<compile_context>
chip_gen: v7x
topology: tpu7x:2x2x1
jax: 0.10.0
libtpu: 0.0.40
codegen_flags: <defaults>
</compile_context>

<pallas_src>
import functools

import jax
import jax.numpy as jnp
from jax import lax
from jax.experimental import pallas as pl
from jax.experimental.pallas import tpu as pltpu


def _round_up(a, b):
    return ((a + b - 1) // b) * b


def _make_kernel(H, W, C, d_k, d_p, dd_k, dd_p, dil,
                 OFF0H, OFF0W, PC0, OFFH, OFFW, PC):
    WC = W * C
    Hp = H + 2 * d_p                      # conv0 staged-window rows
    rows_cs = H + (dd_k - 1) * dil        # conv_spatial staged-window rows
    f32 = jnp.float32

    def kernel(xin_ref, w0t_ref, b0_ref, wst_ref, bs_ref, w1_ref, b1_ref,
               fc1_ref, fc2_ref, out_ref, x0pad_ref, spad_ref, stage_ref):
        # ---- halo-only zeroing of the padded scratches (per step; per-core
        #      scratch + "parallel" grid makes a program_id==0 guard unsafe) ----
        if d_p > 0:
            x0pad_ref[OFF0H - d_p:OFF0H, :] = jnp.zeros((d_p, PC0), f32)
            x0pad_ref[OFF0H + H:OFF0H + H + d_p, :] = jnp.zeros((d_p, PC0), f32)
            x0pad_ref[OFF0H:OFF0H + H, (OFF0W - d_p) * C:OFF0W * C] = (
                jnp.zeros((H, d_p * C), f32))
            x0pad_ref[OFF0H:OFF0H + H, OFF0W * C + WC:(OFF0W + W + d_p) * C] = (
                jnp.zeros((H, d_p * C), f32))
        if dd_p > 0:
            spad_ref[OFFH - dd_p:OFFH, :] = jnp.zeros((dd_p, PC), f32)
            spad_ref[OFFH + H:OFFH + H + dd_p, :] = jnp.zeros((dd_p, PC), f32)
            spad_ref[OFFH:OFFH + H, (OFFW - dd_p) * C:OFFW * C] = (
                jnp.zeros((H, dd_p * C), f32))
            spad_ref[OFFH:OFFH + H, OFFW * C + WC:(OFFW + W + dd_p) * C] = (
                jnp.zeros((H, dd_p * C), f32))

        # ---- in-kernel padding of x (replaces the wrapper jnp.pad) ----
        x0pad_ref[OFF0H:OFF0H + H, OFF0W * C:OFF0W * C + WC] = (
            xin_ref[0].astype(f32))

        # ---------------- conv0: depthwise d_k x d_k, pad d_p ----------------
        # Per kw: one lane-shifted window staged into aligned scratch, then
        # every kh tap is a cheap sublane-offset ref load (vld), not an XLU
        # sublane rotate of an in-register value.
        acc = jnp.broadcast_to(b0_ref[...], (H, WC))
        for kw in range(d_k):
            lane0 = (OFF0W - d_p + kw) * C
            stage_ref[0:Hp, :] = x0pad_ref[OFF0H - d_p:OFF0H - d_p + Hp,
                                           lane0:lane0 + WC]
            for kh in range(d_k):
                acc = acc + stage_ref[kh:kh + H, :] * w0t_ref[kh * d_k + kw]

        # ------ conv_spatial: depthwise dd_k x dd_k, dilation dil, pad dd_p ------
        spad_ref[OFFH:OFFH + H, OFFW * C:OFFW * C + WC] = acc
        acc2 = jnp.broadcast_to(bs_ref[...], (H, WC))
        for kw in range(dd_k):
            lane0 = (OFFW - dd_p + kw * dil) * C
            stage_ref[0:rows_cs, :] = spad_ref[OFFH - dd_p:OFFH - dd_p + rows_cs,
                                               lane0:lane0 + WC]
            for kh in range(dd_k):
                acc2 = acc2 + (stage_ref[kh * dil:kh * dil + H, :]
                               * wst_ref[kh * dd_k + kw])

        # ------- conv1 (1x1): bf16 block-diagonal matmul on the MXU -------
        f_x = jnp.dot(acc2.astype(jnp.bfloat16), w1_ref[...],
                      preferred_element_type=jnp.float32) + b1_ref[...]

        # ---------------- SE branch (pool + MLP folded into matmuls) ----------------
        x2d = xin_ref[0].astype(f32)                           # aligned re-load
        m = jnp.dot(x2d, fc1_ref[...], preferred_element_type=jnp.float32)
        hdn = jnp.maximum(jnp.sum(m, axis=0, keepdims=True), 0.0)   # (1, hidden)
        se = jax.nn.sigmoid(
            jnp.dot(hdn, fc2_ref[...], preferred_element_type=jnp.float32))

        # ---------------- combine: se_atten * f_x * u ----------------
        out_ref[0] = (se * f_x * x2d).astype(out_ref.dtype)

    return kernel


def prepare_params(conv0_w, conv0_b, convs_w, convs_b, conv1_w, conv1_b,
                   fc1_w, fc2_w, *, H, W):
    """Preprocess PyTorch-layout parameters once per parameter set / spatial size.
       conv0_w/(C,1,d_k,d_k); convs_w/(C,1,dd_k,dd_k); conv1_w/(C,C,1,1);
       fc1_w/(hidden,C); fc2_w/(C,hidden); biases (C,)."""
    C = conv0_w.shape[0]
    WC = W * C
    f32 = jnp.float32

    def tile_w(w_oihw):                    # per-tap rows tiled across W (lane-dense)
        k = w_oihw.shape[2]
        w = jnp.transpose(w_oihw[:, 0].astype(f32), (1, 2, 0))      # (k, k, C)
        return jnp.tile(w.reshape(k * k, 1, C), (1, W, 1)).reshape(k * k, WC)

    def tile_row(v):
        return jnp.tile(v.astype(f32).reshape(1, 1, C), (1, W, 1)).reshape(1, WC)

    # 1x1 conv as a block-diagonal lane-dense matmul: kron(I_W, W1^T), in bf16.
    w1_big = jnp.kron(jnp.eye(W, dtype=f32),
                      conv1_w[:, :, 0, 0].astype(f32).T).astype(jnp.bfloat16)

    # SE branch folded into lane-dense matmuls (mean pool + Linear, Linear + tile).
    S = jnp.tile(jnp.eye(C, dtype=f32), (W, 1)) / float(H * W)      # (WC, C)
    fc1_eff = S @ fc1_w.astype(f32).T                               # (WC, hidden)
    T = jnp.tile(jnp.eye(C, dtype=f32), (1, W))                     # (C, WC)
    fc2_eff = fc2_w.astype(f32).T @ T                               # (hidden, WC)

    return dict(w0_t=tile_w(conv0_w), b0=tile_row(conv0_b),
                ws_t=tile_w(convs_w), bs=tile_row(convs_b),
                w1=w1_big, b1=tile_row(conv1_b),
                fc1=fc1_eff, fc2=fc2_eff)


@functools.partial(jax.jit, static_argnames=("kernel_size", "dilation"))
def temporal_attention(x_nchw, params, *, kernel_size, dilation):
    B, C, H, W = x_nchw.shape
    d_k = 2 * dilation - 1
    d_p = (d_k - 1) // 2
    dd_k = kernel_size // dilation + (kernel_size // dilation % 2 - 1)
    dd_p = dilation * (dd_k - 1) // 2
    WC = W * C
    hidden = params["fc1"].shape[1]

    # Padded-scratch interiors must be 128-lane aligned (review concern #3).
    assert 128 % C == 0, "TemporalAttention Pallas kernel requires 128 % C == 0"
    g = 128 // C

    # conv0 padded-input scratch geometry (interior at (8,128)-aligned offset).
    OFF0H = _round_up(d_p, 8)
    OFF0W = _round_up(d_p, g)
    PR0 = _round_up(OFF0H + H + d_p, 8)
    PC0 = _round_up((OFF0W + W + d_p) * C, 128)

    # conv_spatial padded scratch geometry.
    OFFH = _round_up(dd_p, 8)
    OFFW = _round_up(dd_p, g)
    PR = _round_up(OFFH + H + dd_p, 8)
    PC = _round_up((OFFW + W + dd_p) * C, 128)

    # Shared per-kw staging scratch (lane-aligned, read per kh at sublane offsets).
    SR = _round_up(max(H + 2 * d_p, H + (dd_k - 1) * dilation), 8)

    # Lane-dense, UNPADDED input: NCHW -> NHWC -> (B, H, W*C).
    x_in = jnp.transpose(x_nchw, (0, 2, 3, 1)).reshape(B, H, WC)

    kernel = _make_kernel(H, W, C, d_k, d_p, dd_k, dd_p, dilation,
                          OFF0H, OFF0W, PC0, OFFH, OFFW, PC)

    taps = d_k * d_k + dd_k * dd_k
    flops = int(B * (2 * H * WC * taps        # depthwise convs
                     + 2 * H * WC * WC        # 1x1 block-diagonal matmul
                     + 2 * H * WC * hidden    # SE fc1
                     + 2 * hidden * WC        # SE fc2
                     + 4 * H * WC))           # combine
    bytes_accessed = int(4 * (x_in.size + B * H * WC)
                         + 2 * params["w1"].size
                         + 4 * (params["w0_t"].size + params["ws_t"].size
                                + params["fc1"].size + params["fc2"].size
                                + 3 * WC))
    cost = pl.CostEstimate(flops=flops, transcendentals=int(B * WC),
                           bytes_accessed=bytes_accessed)

    out = pl.pallas_call(
        kernel,
        out_shape=jax.ShapeDtypeStruct((B, H, WC), x_nchw.dtype),
        grid_spec=pltpu.PrefetchScalarGridSpec(
            num_scalar_prefetch=0,
            grid=(B,),
            in_specs=[
                pl.BlockSpec((1, H, WC), lambda b: (b, 0, 0)),        # x (lane-dense)
                pl.BlockSpec((d_k * d_k, WC), lambda b: (0, 0)),      # conv0 tap weights
                pl.BlockSpec((1, WC), lambda b: (0, 0)),              # conv0 bias
                pl.BlockSpec((dd_k * dd_k, WC), lambda b: (0, 0)),    # conv_spatial taps
                pl.BlockSpec((1, WC), lambda b: (0, 0)),              # conv_spatial bias
                pl.BlockSpec((WC, WC), lambda b: (0, 0)),             # conv1 block-diag (bf16)
                pl.BlockSpec((1, WC), lambda b: (0, 0)),              # conv1 bias
                pl.BlockSpec((WC, hidden), lambda b: (0, 0)),         # SE fc1 (pool folded)
                pl.BlockSpec((hidden, WC), lambda b: (0, 0)),         # SE fc2 (tile folded)
            ],
            out_specs=pl.BlockSpec((1, H, WC), lambda b: (b, 0, 0)),
            scratch_shapes=[
                pltpu.VMEM((PR0, PC0), jnp.float32),                  # padded x (conv0)
                pltpu.VMEM((PR, PC), jnp.float32),                    # padded conv0 output
                pltpu.VMEM((SR, WC), jnp.float32),                    # per-kw staging
            ],
        ),
        compiler_params=pltpu.CompilerParams(
            dimension_semantics=("parallel",)),
        cost_estimate=cost,
    )(x_in, params["w0_t"], params["b0"], params["ws_t"], params["bs"],
      params["w1"], params["b1"], params["fc1"], params["fc2"])

    # (B, H, W*C) -> NCHW
    return jnp.transpose(out.reshape(B, H, W, C), (0, 3, 1, 2))


if __name__ == "__main__":
    # Module hyperparameters (match PyTorch __init__ arithmetic).
    dim, kernel_size, dilation, reduction = 32, 21, 3, 16
    d_k = 2 * dilation - 1                                              # 5
    d_p = (d_k - 1) // 2                                                # 2
    dd_k = kernel_size // dilation + (kernel_size // dilation % 2 - 1)  # 7
    dd_p = dilation * (dd_k - 1) // 2                                   # 9
    red = max(dim // reduction, 4)                                      # 4
    hidden = dim // red                                                 # 8

    B, C, H, W = 2, dim, 16, 16

    key = jax.random.PRNGKey(0)
    ks = jax.random.split(key, 10)
    x = jax.random.normal(ks[0], (B, C, H, W), jnp.float32)             # PyTorch NCHW

    scale = 0.1
    conv0_w = scale * jax.random.normal(ks[1], (C, 1, d_k, d_k), jnp.float32)
    conv0_b = scale * jax.random.normal(ks[2], (C,), jnp.float32)
    convs_w = scale * jax.random.normal(ks[3], (C, 1, dd_k, dd_k), jnp.float32)
    convs_b = scale * jax.random.normal(ks[4], (C,), jnp.float32)
    conv1_w = scale * jax.random.normal(ks[5], (C, C, 1, 1), jnp.float32)
    conv1_b = scale * jax.random.normal(ks[6], (C,), jnp.float32)
    fc1_w = scale * jax.random.normal(ks[7], (hidden, C), jnp.float32)  # Linear(dim, hidden)
    fc2_w = scale * jax.random.normal(ks[8], (C, hidden), jnp.float32)  # Linear(hidden, dim)

    # Parameter preprocessing is hoisted out of the per-call path.
    prep = prepare_params(conv0_w, conv0_b, convs_w, convs_b,
                          conv1_w, conv1_b, fc1_w, fc2_w, H=H, W=W)

    out = temporal_attention(x, prep, kernel_size=kernel_size, dilation=dilation)
    out = jax.block_until_ready(out)

    # Pure-JAX reference with the same semantics as the PyTorch module.
    def reference(x):
        dn = ("NCHW", "OIHW", "NCHW")
        attn = lax.conv_general_dilated(
            x, conv0_w, (1, 1), [(d_p, d_p), (d_p, d_p)],
            dimension_numbers=dn, feature_group_count=C,
            precision=lax.Precision.HIGHEST) + conv0_b.reshape(1, C, 1, 1)
        attn = lax.conv_general_dilated(
            attn, convs_w, (1, 1), [(dd_p, dd_p), (dd_p, dd_p)],
            rhs_dilation=(dilation, dilation),
            dimension_numbers=dn, feature_group_count=C,
            precision=lax.Precision.HIGHEST) + convs_b.reshape(1, C, 1, 1)
        f_x = lax.conv_general_dilated(
            attn, conv1_w, (1, 1), [(0, 0), (0, 0)],
            dimension_numbers=dn,
            precision=lax.Precision.HIGHEST) + conv1_b.reshape(1, C, 1, 1)
        pooled = jnp.mean(x, axis=(2, 3))
        hdn = jnp.maximum(pooled @ fc1_w.T, 0.0)
        se = jax.nn.sigmoid(hdn @ fc2_w.T).reshape(B, C, 1, 1)
        return se * f_x * x

    ref = jax.block_until_ready(reference(x))

    assert out.shape == (B, C, H, W)
    assert bool(jnp.all(jnp.isfinite(out)))
    max_err = float(jnp.max(jnp.abs(out - ref)))
    assert max_err < 2e-2, f"max abs error vs reference: {max_err}"
    print("KERNEL_OK")
</pallas_src>

<mosaic_0001>
module attributes {stable_mosaic.version = 11 : i64} {
  func.func @kernel(%arg0: i32, %arg1: memref<1x16x512xf32, #tpu.memory_space<vmem>>, %arg2: memref<25x512xf32, #tpu.memory_space<vmem>>, %arg3: memref<1x512xf32, #tpu.memory_space<vmem>>, %arg4: memref<49x512xf32, #tpu.memory_space<vmem>>, %arg5: memref<1x512xf32, #tpu.memory_space<vmem>>, %arg6: memref<512x512xbf16, #tpu.memory_space<vmem>>, %arg7: memref<1x512xf32, #tpu.memory_space<vmem>>, %arg8: memref<512x8xf32, #tpu.memory_space<vmem>>, %arg9: memref<8x512xf32, #tpu.memory_space<vmem>>, %arg10: memref<1x16x512xf32, #tpu.memory_space<vmem>>, %arg11: memref<32x768xf32, #tpu.memory_space<vmem>>, %arg12: memref<48x1280xf32, #tpu.memory_space<vmem>>, %arg13: memref<40x512xf32, #tpu.memory_space<vmem>>) attributes {dimension_semantics = [#tpu.dimension_semantics<parallel>], iteration_bounds = array<i64: 2>, scalar_prefetch = 0 : i64, scratch_operands = 3 : i64, tpu.core_type = #tpu.core_type<tc>, window_params = [{transform_indices = @transform_0, window_bounds = array<i64: 1, 16, 512>}, {pipeline_mode = #tpu.pipeline_mode<synchronous>, transform_indices = @transform_1, window_bounds = array<i64: 25, 512>}, {pipeline_mode = #tpu.pipeline_mode<synchronous>, transform_indices = @transform_2, window_bounds = array<i64: 1, 512>}, {pipeline_mode = #tpu.pipeline_mode<synchronous>, transform_indices = @transform_3, window_bounds = array<i64: 49, 512>}, {pipeline_mode = #tpu.pipeline_mode<synchronous>, transform_indices = @transform_4, window_bounds = array<i64: 1, 512>}, {pipeline_mode = #tpu.pipeline_mode<synchronous>, transform_indices = @transform_5, window_bounds = array<i64: 512, 512>}, {pipeline_mode = #tpu.pipeline_mode<synchronous>, transform_indices = @transform_6, window_bounds = array<i64: 1, 512>}, {pipeline_mode = #tpu.pipeline_mode<synchronous>, transform_indices = @transform_7, window_bounds = array<i64: 512, 8>}, {pipeline_mode = #tpu.pipeline_mode<synchronous>, transform_indices = @transform_8, window_bounds = array<i64: 8, 512>}, {transform_indices = @transform_9, window_bounds = array<i64: 1, 16, 512>}]} {
    %cst = arith.constant 0.000000e+00 : f32
    %0 = vector.broadcast %cst : f32 to vector<2x768xf32>
    %c6 = arith.constant 6 : index
    %c0 = arith.constant 0 : index
    %1 = vector.load %arg11[%c6, %c0] : memref<32x768xf32, #tpu.memory_space<vmem>>, vector<2x768xf32>
    tpu.vector_store %arg11[%c6, %c0], %0 {strides = array<i32>} : memref<32x768xf32, #tpu.memory_space<vmem>>, vector<2x768xf32>,
    %cst_0 = arith.constant 0.000000e+00 : f32
    %2 = vector.broadcast %cst_0 : f32 to vector<2x768xf32>
    %c24 = arith.constant 24 : index
    %c0_1 = arith.constant 0 : index
    %3 = vector.load %arg11[%c24, %c0_1] : memref<32x768xf32, #tpu.memory_space<vmem>>, vector<2x768xf32>
    tpu.vector_store %arg11[%c24, %c0_1], %2 {strides = array<i32>} : memref<32x768xf32, #tpu.memory_space<vmem>>, vector<2x768xf32>,
    %cst_2 = arith.constant 0.000000e+00 : f32
    %4 = vector.broadcast %cst_2 : f32 to vector<16x64xf32>
    %c8 = arith.constant 8 : index
    %c64 = arith.constant 64 : index
    %5 = vector.load %arg11[%c8, %c64] : memref<32x768xf32, #tpu.memory_space<vmem>>, vector<16x64xf32>
    tpu.vector_store %arg11[%c8, %c64], %4 {strides = array<i32>} : memref<32x768xf32, #tpu.memory_space<vmem>>, vector<16x64xf32>,
    %cst_3 = arith.constant 0.000000e+00 : f32
    %6 = vector.broadcast %cst_3 : f32 to vector<16x64xf32>
    %c8_4 = arith.constant 8 : index
    %c640 = arith.constant 640 : index
    %7 = vector.load %arg11[%c8_4, %c640] : memref<32x768xf32, #tpu.memory_space<vmem>>, vector<16x64xf32>
    tpu.vector_store %arg11[%c8_4, %c640], %6 {strides = array<i32>} : memref<32x768xf32, #tpu.memory_space<vmem>>, vector<16x64xf32>,
    %cst_5 = arith.constant 0.000000e+00 : f32
    %8 = vector.broadcast %cst_5 : f32 to vector<9x1280xf32>
    %c7 = arith.constant 7 : index
    %c0_6 = arith.constant 0 : index
    %9 = vector.load %arg12[%c7, %c0_6] : memref<48x1280xf32, #tpu.memory_space<vmem>>, vector<9x1280xf32>
    tpu.vector_store %arg12[%c7, %c0_6], %8 {strides = array<i32>} : memref<48x1280xf32, #tpu.memory_space<vmem>>, vector<9x1280xf32>,
    %cst_7 = arith.constant 0.000000e+00 : f32
    %10 = vector.broadcast %cst_7 : f32 to vector<9x1280xf32>
    %c32 = arith.constant 32 : index
    %c0_8 = arith.constant 0 : index
    %11 = vector.load %arg12[%c32, %c0_8] : memref<48x1280xf32, #tpu.memory_space<vmem>>, vector<9x1280xf32>
    tpu.vector_store %arg12[%c32, %c0_8], %10 {strides = array<i32>} : memref<48x1280xf32, #tpu.memory_space<vmem>>, vector<9x1280xf32>,
    %cst_9 = arith.constant 0.000000e+00 : f32
    %12 = vector.broadcast %cst_9 : f32 to vector<16x288xf32>
    %c16 = arith.constant 16 : index
    %c96 = arith.constant 96 : index
    %13 = vector.load %arg12[%c16, %c96] : memref<48x1280xf32, #tpu.memory_space<vmem>>, vector<16x288xf32>
    tpu.vector_store %arg12[%c16, %c96], %12 {strides = array<i32>} : memref<48x1280xf32, #tpu.memory_space<vmem>>, vector<16x288xf32>,
    %cst_10 = arith.constant 0.000000e+00 : f32
    %14 = vector.broadcast %cst_10 : f32 to vector<16x288xf32>
    %c16_11 = arith.constant 16 : index
    %c896 = arith.constant 896 : index
    %15 = vector.load %arg12[%c16_11, %c896] : memref<48x1280xf32, #tpu.memory_space<vmem>>, vector<16x288xf32>
    tpu.vector_store %arg12[%c16_11, %c896], %14 {strides = array<i32>} : memref<48x1280xf32, #tpu.memory_space<vmem>>, vector<16x288xf32>,
    %c0_12 = arith.constant 0 : index
    %c0_13 = arith.constant 0 : index
    %c0_14 = arith.constant 0 : index
    %16 = vector.load %arg1[%c0_12, %c0_13, %c0_14] : memref<1x16x512xf32, #tpu.memory_space<vmem>>, vector<1x16x512xf32>
    %17 = vector.shape_cast %16 : vector<1x16x512xf32> to vector<16x512xf32>
    %c8_15 = arith.constant 8 : index
    %c128 = arith.constant 128 : index
    %18 = vector.load %arg11[%c8_15, %c128] : memref<32x768xf32, #tpu.memory_space<vmem>>, vector<16x512xf32>
    tpu.vector_store %arg11[%c8_15, %c128], %17 {strides = array<i32>} : memref<32x768xf32, #tpu.memory_space<vmem>>, vector<16x512xf32>,
    %c0_16 = arith.constant 0 : index
    %c0_17 = arith.constant 0 : index
    %19 = vector.load %arg3[%c0_16, %c0_17] : memref<1x512xf32, #tpu.memory_space<vmem>>, vector<1x512xf32>
    %20 = vector.shape_cast %19 : vector<1x512xf32> to vector<1x512xf32>
    %21 = vector.broadcast %20 : vector<1x512xf32> to vector<16x512xf32>
    %c6_18 = arith.constant 6 : index
    %c64_19 = arith.constant 64 : index
    %22 = vector.load %arg11[%c6_18, %c64_19] : memref<32x768xf32, #tpu.memory_space<vmem>>, vector<20x512xf32>
    %c0_20 = arith.constant 0 : index
    %c0_21 = arith.constant 0 : index
    %23 = vector.load %arg13[%c0_20, %c0_21] : memref<40x512xf32, #tpu.memory_space<vmem>>, vector<20x512xf32>
    tpu.vector_store %arg13[%c0_20, %c0_21], %22 {strides = array<i32>} : memref<40x512xf32, #tpu.memory_space<vmem>>, vector<20x512xf32>,
    %c0_22 = arith.constant 0 : index
    %c0_23 = arith.constant 0 : index
    %24 = vector.load %arg13[%c0_22, %c0_23] : memref<40x512xf32, #tpu.memory_space<vmem>>, vector<16x512xf32>
    %c0_24 = arith.constant 0 : index
    %c0_25 = arith.constant 0 : index
    %25 = vector.load %arg2[%c0_24, %c0_25] : memref<25x512xf32, #tpu.memory_space<vmem>>, vector<1x512xf32>
    %26 = vector.shape_cast %25 : vector<1x512xf32> to vector<512xf32>
    %27 = vector.shape_cast %26 : vector<512xf32> to vector<1x512xf32>
    %28 = vector.broadcast %27 : vector<1x512xf32> to vector<16x512xf32>
    %29 = arith.mulf %24, %28 : vector<16x512xf32>
    %30 = arith.addf %21, %29 : vector<16x512xf32>
    %c1 = arith.constant 1 : index
    %c0_26 = arith.constant 0 : index
    %31 = vector.load %arg13[%c1, %c0_26] : memref<40x512xf32, #tpu.memory_space<vmem>>, vector<16x512xf32>
    %c5 = arith.constant 5 : index
    %c0_27 = arith.constant 0 : index
    %32 = vector.load %arg2[%c5, %c0_27] : memref<25x512xf32, #tpu.memory_space<vmem>>, vector<1x512xf32>
    %33 = vector.shape_cast %32 : vector<1x512xf32> to vector<512xf32>
    %34 = vector.shape_cast %33 : vector<512xf32> to vector<1x512xf32>
    %35 = vector.broadcast %34 : vector<1x512xf32> to vector<16x512xf32>
    %36 = arith.mulf %31, %35 : vector<16x512xf32>
    %37 = arith.addf %30, %36 : vector<16x512xf32>
    %c2 = arith.constant 2 : index
    %c0_28 = arith.constant 0 : index
    %38 = vector.load %arg13[%c2, %c0_28] : memref<40x512xf32, #tpu.memory_space<vmem>>, vector<16x512xf32>
    %c10 = arith.constant 10 : index
    %c0_29 = arith.constant 0 : index
    %39 = vector.load %arg2[%c10, %c0_29] : memref<25x512xf32, #tpu.memory_space<vmem>>, vector<1x512xf32>
    %40 = vector.shape_cast %39 : vector<1x512xf32> to vector<512xf32>
    %41 = vector.shape_cast %40 : vector<512xf32> to vector<1x512xf32>
    %42 = vector.broadcast %41 : vector<1x512xf32> to vector<16x512xf32>
    %43 = arith.mulf %38, %42 : vector<16x512xf32>
    %44 = arith.addf %37, %43 : vector<16x512xf32>
    %c3 = arith.constant 3 : index
    %c0_30 = arith.constant 0 : index
    %45 = vector.load %arg13[%c3, %c0_30] : memref<40x512xf32, #tpu.memory_space<vmem>>, vector<16x512xf32>
    %c15 = arith.constant 15 : index
    %c0_31 = arith.constant 0 : index
    %46 = vector.load %arg2[%c15, %c0_31] : memref<25x512xf32, #tpu.memory_space<vmem>>, vector<1x512xf32>
    %47 = vector.shape_cast %46 : vector<1x512xf32> to vector<512xf32>
    %48 = vector.shape_cast %47 : vector<512xf32> to vector<1x512xf32>
    %49 = vector.broadcast %48 : vector<1x512xf32> to vector<16x512xf32>
    %50 = arith.mulf %45, %49 : vector<16x512xf32>
    %51 = arith.addf %44, %50 : vector<16x512xf32>
    %c4 = arith.constant 4 : index
    %c0_32 = arith.constant 0 : index
    %52 = vector.load %arg13[%c4, %c0_32] : memref<40x512xf32, #tpu.memory_space<vmem>>, vector<16x512xf32>
    %c20 = arith.constant 20 : index
    %c0_33 = arith.constant 0 : index
    %53 = vector.load %arg2[%c20, %c0_33] : memref<25x512xf32, #tpu.memory_space<vmem>>, vector<1x512xf32>
    %54 = vector.shape_cast %53 : vector<1x512xf32> to vector<512xf32>
    %55 = vector.shape_cast %54 : vector<512xf32> to vector<1x512xf32>
    %56 = vector.broadcast %55 : vector<1x512xf32> to vector<16x512xf32>
    %57 = arith.mulf %52, %56 : vector<16x512xf32>
    %58 = arith.addf %51, %57 : vector<16x512xf32>
    %c6_34 = arith.constant 6 : index
    %c96_35 = arith.constant 96 : index
    %59 = vector.load %arg11[%c6_34, %c96_35] : memref<32x768xf32, #tpu.memory_space<vmem>>, vector<20x512xf32>
    %c0_36 = arith.constant 0 : index
    %c0_37 = arith.constant 0 : index
    %60 = vector.load %arg13[%c0_36, %c0_37] : memref<40x512xf32, #tpu.memory_space<vmem>>, vector<20x512xf32>
    tpu.vector_store %arg13[%c0_36, %c0_37], %59 {strides = array<i32>} : memref<40x512xf32, #tpu.memory_space<vmem>>, vector<20x512xf32>,
    %c0_38 = arith.constant 0 : index
    %c0_39 = arith.constant 0 : index
    %61 = vector.load %arg13[%c0_38, %c0_39] : memref<40x512xf32, #tpu.memory_space<vmem>>, vector<16x512xf32>
    %c1_40 = arith.constant 1 : index
    %c0_41 = arith.constant 0 : index
    %62 = vector.load %arg2[%c1_40, %c0_41] : memref<25x512xf32, #tpu.memory_space<vmem>>, vector<1x512xf32>
    %63 = vector.shape_cast %62 : vector<1x512xf32> to vector<512xf32>
    %64 = vector.shape_cast %63 : vector<512xf32> to vector<1x512xf32>
    %65 = vector.broadcast %64 : vector<1x512xf32> to vector<16x512xf32>
    %66 = arith.mulf %61, %65 : vector<16x512xf32>
    %67 = arith.addf %58, %66 : vector<16x512xf32>
    %c1_42 = arith.constant 1 : index
    %c0_43 = arith.constant 0 : index
    %68 = vector.load %arg13[%c1_42, %c0_43] : memref<40x512xf32, #tpu.memory_space<vmem>>, vector<16x512xf32>
    %c6_44 = arith.constant 6 : index
    %c0_45 = arith.constant 0 : index
    %69 = vector.load %arg2[%c6_44, %c0_45] : memref<25x512xf32, #tpu.memory_space<vmem>>, vector<1x512xf32>
    %70 = vector.shape_cast %69 : vector<1x512xf32> to vector<512xf32>
    %71 = vector.shape_cast %70 : vector<512xf32> to vector<1x512xf32>
    %72 = vector.broadcast %71 : vector<1x512xf32> to vector<16x512xf32>
    %73 = arith.mulf %68, %72 : vector<16x512xf32>
    %74 = arith.addf %67, %73 : vector<16x512xf32>
    %c2_46 = arith.constant 2 : index
    %c0_47 = arith.constant 0 : index
    %75 = vector.load %arg13[%c2_46, %c0_47] : memref<40x512xf32, #tpu.memory_space<vmem>>, vector<16x512xf32>
    %c11 = arith.constant 11 : index
    %c0_48 = arith.constant 0 : index
    %76 = vector.load %arg2[%c11, %c0_48] : memref<25x512xf32, #tpu.memory_space<vmem>>, vector<1x512xf32>
    %77 = vector.shape_cast %76 : vector<1x512xf32> to vector<512xf32>
    %78 = vector.shape_cast %77 : vector<512xf32> to vector<1x512xf32>
    %79 = vector.broadcast %78 : vector<1x512xf32> to vector<16x512xf32>
    %80 = arith.mulf %75, %79 : vector<16x512xf32>
    %81 = arith.addf %74, %80 : vector<16x512xf32>
    %c3_49 = arith.constant 3 : index
    %c0_50 = arith.constant 0 : index
    %82 = vector.load %arg13[%c3_49, %c0_50] : memref<40x512xf32, #tpu.memory_space<vmem>>, vector<16x512xf32>
    %c16_51 = arith.constant 16 : index
    %c0_52 = arith.constant 0 : index
    %83 = vector.load %arg2[%c16_51, %c0_52] : memref<25x512xf32, #tpu.memory_space<vmem>>, vector<1x512xf32>
    %84 = vector.shape_cast %83 : vector<1x512xf32> to vector<512xf32>
    %85 = vector.shape_cast %84 : vector<512xf32> to vector<1x512xf32>
    %86 = vector.broadcast %85 : vector<1x512xf32> to vector<16x512xf32>
    %87 = arith.mulf %82, %86 : vector<16x512xf32>
    %88 = arith.addf %81, %87 : vector<16x512xf32>
    %c4_53 = arith.constant 4 : index
    %c0_54 = arith.constant 0 : index
    %89 = vector.load %arg13[%c4_53, %c0_54] : memref<40x512xf32, #tpu.memory_space<vmem>>, vector<16x512xf32>
    %c21 = arith.constant 21 : index
    %c0_55 = arith.constant 0 : index
    %90 = vector.load %arg2[%c21, %c0_55] : memref<25x512xf32, #tpu.memory_space<vmem>>, vector<1x512xf32>
    %91 = vector.shape_cast %90 : vector<1x512xf32> to vector<512xf32>
    %92 = vector.shape_cast %91 : vector<512xf32> to vector<1x512xf32>
    %93 = vector.broadcast %92 : vector<1x512xf32> to vector<16x512xf32>
    %94 = arith.mulf %89, %93 : vector<16x512xf32>
    %95 = arith.addf %88, %94 : vector<16x512xf32>
    %c6_56 = arith.constant 6 : index
    %c128_57 = arith.constant 128 : index
    %96 = vector.load %arg11[%c6_56, %c128_57] : memref<32x768xf32, #tpu.memory_space<vmem>>, vector<20x512xf32>
    %c0_58 = arith.constant 0 : index
    %c0_59 = arith.constant 0 : index
    %97 = vector.load %arg13[%c0_58, %c0_59] : memref<40x512xf32, #tpu.memory_space<vmem>>, vector<20x512xf32>
    tpu.vector_store %arg13[%c0_58, %c0_59], %96 {strides = array<i32>} : memref<40x512xf32, #tpu.memory_space<vmem>>, vector<20x512xf32>,
    %c0_60 = arith.constant 0 : index
    %c0_61 = arith.constant 0 : index
    %98 = vector.load %arg13[%c0_60, %c0_61] : memref<40x512xf32, #tpu.memory_space<vmem>>, vector<16x512xf32>
    %c2_62 = arith.constant 2 : index
    %c0_63 = arith.constant 0 : index
    %99 = vector.load %arg2[%c2_62, %c0_63] : memref<25x512xf32, #tpu.memory_space<vmem>>, vector<1x512xf32>
    %100 = vector.shape_cast %99 : vector<1x512xf32> to vector<512xf32>
    %101 = vector.shape_cast %100 : vector<512xf32> to vector<1x512xf32>
    %102 = vector.broadcast %101 : vector<1x512xf32> to vector<16x512xf32>
    %103 = arith.mulf %98, %102 : vector<16x512xf32>
    %104 = arith.addf %95, %103 : vector<16x512xf32>
    %c1_64 = arith.constant 1 : index
    %c0_65 = arith.constant 0 : index
    %105 = vector.load %arg13[%c1_64, %c0_65] : memref<40x512xf32, #tpu.memory_space<vmem>>, vector<16x512xf32>
    %c7_66 = arith.constant 7 : index
    %c0_67 = arith.constant 0 : index
    %106 = vector.load %arg2[%c7_66, %c0_67] : memref<25x512xf32, #tpu.memory_space<vmem>>, vector<1x512xf32>
    %107 = vector.shape_cast %106 : vector<1x512xf32> to vector<512xf32>
    %108 = vector.shape_cast %107 : vector<512xf32> to vector<1x512xf32>
    %109 = vector.broadcast %108 : vector<1x512xf32> to vector<16x512xf32>
    %110 = arith.mulf %105, %109 : vector<16x512xf32>
    %111 = arith.addf %104, %110 : vector<16x512xf32>
    %c2_68 = arith.constant 2 : index
    %c0_69 = arith.constant 0 : index
    %112 = vector.load %arg13[%c2_68, %c0_69] : memref<40x512xf32, #tpu.memory_space<vmem>>, vector<16x512xf32>
    %c12 = arith.constant 12 : index
    %c0_70 = arith.constant 0 : index
    %113 = vector.load %arg2[%c12, %c0_70] : memref<25x512xf32, #tpu.memory_space<vmem>>, vector<1x512xf32>
    %114 = vector.shape_cast %113 : vector<1x512xf32> to vector<512xf32>
    %115 = vector.shape_cast %114 : vector<512xf32> to vector<1x512xf32>
    %116 = vector.broadcast %115 : vector<1x512xf32> to vector<16x512xf32>
    %117 = arith.mulf %112, %116 : vector<16x512xf32>
    %118 = arith.addf %111, %117 : vector<16x512xf32>
    %c3_71 = arith.constant 3 : index
    %c0_72 = arith.constant 0 : index
    %119 = vector.load %arg13[%c3_71, %c0_72] : memref<40x512xf32, #tpu.memory_space<vmem>>, vector<16x512xf32>
    %c17 = arith.constant 17 : index
    %c0_73 = arith.constant 0 : index
    %120 = vector.load %arg2[%c17, %c0_73] : memref<25x512xf32, #tpu.memory_space<vmem>>, vector<1x512xf32>
    %121 = vector.shape_cast %120 : vector<1x512xf32> to vector<512xf32>
    %122 = vector.shape_cast %121 : vector<512xf32> to vector<1x512xf32>
    %123 = vector.broadcast %122 : vector<1x512xf32> to vector<16x512xf32>
    %124 = arith.mulf %119, %123 : vector<16x512xf32>
    %125 = arith.addf %118, %124 : vector<16x512xf32>
    %c4_74 = arith.constant 4 : index
    %c0_75 = arith.constant 0 : index
    %126 = vector.load %arg13[%c4_74, %c0_75] : memref<40x512xf32, #tpu.memory_space<vmem>>, vector<16x512xf32>
    %c22 = arith.constant 22 : index
    %c0_76 = arith.constant 0 : index
    %127 = vector.load %arg2[%c22, %c0_76] : memref<25x512xf32, #tpu.memory_space<vmem>>, vector<1x512xf32>
    %128 = vector.shape_cast %127 : vector<1x512xf32> to vector<512xf32>
    %129 = vector.shape_cast %128 : vector<512xf32> to vector<1x512xf32>
    %130 = vector.broadcast %129 : vector<1x512xf32> to vector<16x512xf32>
    %131 = arith.mulf %126, %130 : vector<16x512xf32>
    %132 = arith.addf %125, %131 : vector<16x512xf32>
    %c6_77 = arith.constant 6 : index
    %c160 = arith.constant 160 : index
    %133 = vector.load %arg11[%c6_77, %c160] : memref<32x768xf32, #tpu.memory_space<vmem>>, vector<20x512xf32>
    %c0_78 = arith.constant 0 : index
    %c0_79 = arith.constant 0 : index
    %134 = vector.load %arg13[%c0_78, %c0_79] : memref<40x512xf32, #tpu.memory_space<vmem>>, vector<20x512xf32>
    tpu.vector_store %arg13[%c0_78, %c0_79], %133 {strides = array<i32>} : memref<40x512xf32, #tpu.memory_space<vmem>>, vector<20x512xf32>,
    %c0_80 = arith.constant 0 : index
    %c0_81 = arith.constant 0 : index
    %135 = vector.load %arg13[%c0_80, %c0_81] : memref<40x512xf32, #tpu.memory_space<vmem>>, vector<16x512xf32>
    %c3_82 = arith.constant 3 : index
    %c0_83 = arith.constant 0 : index
    %136 = vector.load %arg2[%c3_82, %c0_83] : memref<25x512xf32, #tpu.memory_space<vmem>>, vector<1x512xf32>
    %137 = vector.shape_cast %136 : vector<1x512xf32> to vector<512xf32>
    %138 = vector.shape_cast %137 : vector<512xf32> to vector<1x512xf32>
    %139 = vector.broadcast %138 : vector<1x512xf32> to vector<16x512xf32>
    %140 = arith.mulf %135, %139 : vector<16x512xf32>
    %141 = arith.addf %132, %140 : vector<16x512xf32>
    %c1_84 = arith.constant 1 : index
    %c0_85 = arith.constant 0 : index
    %142 = vector.load %arg13[%c1_84, %c0_85] : memref<40x512xf32, #tpu.memory_space<vmem>>, vector<16x512xf32>
    %c8_86 = arith.constant 8 : index
    %c0_87 = arith.constant 0 : index
    %143 = vector.load %arg2[%c8_86, %c0_87] : memref<25x512xf32, #tpu.memory_space<vmem>>, vector<1x512xf32>
    %144 = vector.shape_cast %143 : vector<1x512xf32> to vector<512xf32>
    %145 = vector.shape_cast %144 : vector<512xf32> to vector<1x512xf32>
    %146 = vector.broadcast %145 : vector<1x512xf32> to vector<16x512xf32>
    %147 = arith.mulf %142, %146 : vector<16x512xf32>
    %148 = arith.addf %141, %147 : vector<16x512xf32>
    %c2_88 = arith.constant 2 : index
    %c0_89 = arith.constant 0 : index
    %149 = vector.load %arg13[%c2_88, %c0_89] : memref<40x512xf32, #tpu.memory_space<vmem>>, vector<16x512xf32>
    %c13 = arith.constant 13 : index
    %c0_90 = arith.constant 0 : index
    %150 = vector.load %arg2[%c13, %c0_90] : memref<25x512xf32, #tpu.memory_space<vmem>>, vector<1x512xf32>
    %151 = vector.shape_cast %150 : vector<1x512xf32> to vector<512xf32>
    %152 = vector.shape_cast %151 : vector<512xf32> to vector<1x512xf32>
    %153 = vector.broadcast %152 : vector<1x512xf32> to vector<16x512xf32>
    %154 = arith.mulf %149, %153 : vector<16x512xf32>
    %155 = arith.addf %148, %154 : vector<16x512xf32>
    %c3_91 = arith.constant 3 : index
    %c0_92 = arith.constant 0 : index
    %156 = vector.load %arg13[%c3_91, %c0_92] : memref<40x512xf32, #tpu.memory_space<vmem>>, vector<16x512xf32>
    %c18 = arith.constant 18 : index
    %c0_93 = arith.constant 0 : index
    %157 = vector.load %arg2[%c18, %c0_93] : memref<25x512xf32, #tpu.memory_space<vmem>>, vector<1x512xf32>
    %158 = vector.shape_cast %157 : vector<1x512xf32> to vector<512xf32>
    %159 = vector.shape_cast %158 : vector<512xf32> to vector<1x512xf32>
    %160 = vector.broadcast %159 : vector<1x512xf32> to vector<16x512xf32>
    %161 = arith.mulf %156, %160 : vector<16x512xf32>
    %162 = arith.addf %155, %161 : vector<16x512xf32>
    %c4_94 = arith.constant 4 : index
    %c0_95 = arith.constant 0 : index
    %163 = vector.load %arg13[%c4_94, %c0_95] : memref<40x512xf32, #tpu.memory_space<vmem>>, vector<16x512xf32>
    %c23 = arith.constant 23 : index
    %c0_96 = arith.constant 0 : index
    %164 = vector.load %arg2[%c23, %c0_96] : memref<25x512xf32, #tpu.memory_space<vmem>>, vector<1x512xf32>
    %165 = vector.shape_cast %164 : vector<1x512xf32> to vector<512xf32>
    %166 = vector.shape_cast %165 : vector<512xf32> to vector<1x512xf32>
    %167 = vector.broadcast %166 : vector<1x512xf32> to vector<16x512xf32>
    %168 = arith.mulf %163, %167 : vector<16x512xf32>
    %169 = arith.addf %162, %168 : vector<16x512xf32>
    %c6_97 = arith.constant 6 : index
    %c192 = arith.constant 192 : index
    %170 = vector.load %arg11[%c6_97, %c192] : memref<32x768xf32, #tpu.memory_space<vmem>>, vector<20x512xf32>
    %c0_98 = arith.constant 0 : index
    %c0_99 = arith.constant 0 : index
    %171 = vector.load %arg13[%c0_98, %c0_99] : memref<40x512xf32, #tpu.memory_space<vmem>>, vector<20x512xf32>
    tpu.vector_store %arg13[%c0_98, %c0_99], %170 {strides = array<i32>} : memref<40x512xf32, #tpu.memory_space<vmem>>, vector<20x512xf32>,
    %c0_100 = arith.constant 0 : index
    %c0_101 = arith.constant 0 : index
    %172 = vector.load %arg13[%c0_100, %c0_101] : memref<40x512xf32, #tpu.memory_space<vmem>>, vector<16x512xf32>
    %c4_102 = arith.constant 4 : index
    %c0_103 = arith.constant 0 : index
    %173 = vector.load %arg2[%c4_102, %c0_103] : memref<25x512xf32, #tpu.memory_space<vmem>>, vector<1x512xf32>
    %174 = vector.shape_cast %173 : vector<1x512xf32> to vector<512xf32>
    %175 = vector.shape_cast %174 : vector<512xf32> to vector<1x512xf32>
    %176 = vector.broadcast %175 : vector<1x512xf32> to vector<16x512xf32>
    %177 = arith.mulf %172, %176 : vector<16x512xf32>
    %178 = arith.addf %169, %177 : vector<16x512xf32>
    %c1_104 = arith.constant 1 : index
    %c0_105 = arith.constant 0 : index
    %179 = vector.load %arg13[%c1_104, %c0_105] : memref<40x512xf32, #tpu.memory_space<vmem>>, vector<16x512xf32>
    %c9 = arith.constant 9 : index
    %c0_106 = arith.constant 0 : index
    %180 = vector.load %arg2[%c9, %c0_106] : memref<25x512xf32, #tpu.memory_space<vmem>>, vector<1x512xf32>
    %181 = vector.shape_cast %180 : vector<1x512xf32> to vector<512xf32>
    %182 = vector.shape_cast %181 : vector<512xf32> to vector<1x512xf32>
    %183 = vector.broadcast %182 : vector<1x512xf32> to vector<16x512xf32>
    %184 = arith.mulf %179, %183 : vector<16x512xf32>
    %185 = arith.addf %178, %184 : vector<16x512xf32>
    %c2_107 = arith.constant 2 : index
    %c0_108 = arith.constant 0 : index
    %186 = vector.load %arg13[%c2_107, %c0_108] : memref<40x512xf32, #tpu.memory_space<vmem>>, vector<16x512xf32>
    %c14 = arith.constant 14 : index
    %c0_109 = arith.constant 0 : index
    %187 = vector.load %arg2[%c14, %c0_109] : memref<25x512xf32, #tpu.memory_space<vmem>>, vector<1x512xf32>
    %188 = vector.shape_cast %187 : vector<1x512xf32> to vector<512xf32>
    %189 = vector.shape_cast %188 : vector<512xf32> to vector<1x512xf32>
    %190 = vector.broadcast %189 : vector<1x512xf32> to vector<16x512xf32>
    %191 = arith.mulf %186, %190 : vector<16x512xf32>
    %192 = arith.addf %185, %191 : vector<16x512xf32>
    %c3_110 = arith.constant 3 : index
    %c0_111 = arith.constant 0 : index
    %193 = vector.load %arg13[%c3_110, %c0_111] : memref<40x512xf32, #tpu.memory_space<vmem>>, vector<16x512xf32>
    %c19 = arith.constant 19 : index
    %c0_112 = arith.constant 0 : index
    %194 = vector.load %arg2[%c19, %c0_112] : memref<25x512xf32, #tpu.memory_space<vmem>>, vector<1x512xf32>
    %195 = vector.shape_cast %194 : vector<1x512xf32> to vector<512xf32>
    %196 = vector.shape_cast %195 : vector<512xf32> to vector<1x512xf32>
    %197 = vector.broadcast %196 : vector<1x512xf32> to vector<16x512xf32>
    %198 = arith.mulf %193, %197 : vector<16x512xf32>
    %199 = arith.addf %192, %198 : vector<16x512xf32>
    %c4_113 = arith.constant 4 : index
    %c0_114 = arith.constant 0 : index
    %200 = vector.load %arg13[%c4_113, %c0_114] : memref<40x512xf32, #tpu.memory_space<vmem>>, vector<16x512xf32>
    %c24_115 = arith.constant 24 : index
    %c0_116 = arith.constant 0 : index
    %201 = vector.load %arg2[%c24_115, %c0_116] : memref<25x512xf32, #tpu.memory_space<vmem>>, vector<1x512xf32>
    %202 = vector.shape_cast %201 : vector<1x512xf32> to vector<512xf32>
    %203 = vector.shape_cast %202 : vector<512xf32> to vector<1x512xf32>
    %204 = vector.broadcast %203 : vector<1x512xf32> to vector<16x512xf32>
    %205 = arith.mulf %200, %204 : vector<16x512xf32>
    %206 = arith.addf %199, %205 : vector<16x512xf32>
    %c16_117 = arith.constant 16 : index
    %c384 = arith.constant 384 : index
    %207 = vector.load %arg12[%c16_117, %c384] : memref<48x1280xf32, #tpu.memory_space<vmem>>, vector<16x512xf32>
    tpu.vector_store %arg12[%c16_117, %c384], %206 {strides = array<i32>} : memref<48x1280xf32, #tpu.memory_space<vmem>>, vector<16x512xf32>,
    %c0_118 = arith.constant 0 : index
    %c0_119 = arith.constant 0 : index
    %208 = vector.load %arg5[%c0_118, %c0_119] : memref<1x512xf32, #tpu.memory_space<vmem>>, vector<1x512xf32>
    %209 = vector.shape_cast %208 : vector<1x512xf32> to vector<1x512xf32>
    %210 = vector.broadcast %209 : vector<1x512xf32> to vector<16x512xf32>
    %c7_120 = arith.constant 7 : index
    %c96_121 = arith.constant 96 : index
    %211 = vector.load %arg12[%c7_120, %c96_121] : memref<48x1280xf32, #tpu.memory_space<vmem>>, vector<34x512xf32>
    %c0_122 = arith.constant 0 : index
    %c0_123 = arith.constant 0 : index
    %212 = vector.load %arg13[%c0_122, %c0_123] : memref<40x512xf32, #tpu.memory_space<vmem>>, vector<34x512xf32>
    tpu.vector_store %arg13[%c0_122, %c0_123], %211 {strides = array<i32>} : memref<40x512xf32, #tpu.memory_space<vmem>>, vector<34x512xf32>,
    %c0_124 = arith.constant 0 : index
    %c0_125 = arith.constant 0 : index
    %213 = vector.load %arg13[%c0_124, %c0_125] : memref<40x512xf32, #tpu.memory_space<vmem>>, vector<16x512xf32>
    %c0_126 = arith.constant 0 : index
    %c0_127 = arith.constant 0 : index
    %214 = vector.load %arg4[%c0_126, %c0_127] : memref<49x512xf32, #tpu.memory_space<vmem>>, vector<1x512xf32>
    %215 = vector.shape_cast %214 : vector<1x512xf32> to vector<512xf32>
    %216 = vector.shape_cast %215 : vector<512xf32> to vector<1x512xf32>
    %217 = vector.broadcast %216 : vector<1x512xf32> to vector<16x512xf32>
    %218 = arith.mulf %213, %217 : vector<16x512xf32>
    %219 = arith.addf %210, %218 : vector<16x512xf32>
    %c3_128 = arith.constant 3 : index
    %c0_129 = arith.constant 0 : index
    %220 = vector.load %arg13[%c3_128, %c0_129] : memref<40x512xf32, #tpu.memory_space<vmem>>, vector<16x512xf32>
    %c7_130 = arith.constant 7 : index
    %c0_131 = arith.constant 0 : index
    %221 = vector.load %arg4[%c7_130, %c0_131] : memref<49x512xf32, #tpu.memory_space<vmem>>, vector<1x512xf32>
    %222 = vector.shape_cast %221 : vector<1x512xf32> to vector<512xf32>
    %223 = vector.shape_cast %222 : vector<512xf32> to vector<1x512xf32>
    %224 = vector.broadcast %223 : vector<1x512xf32> to vector<16x512xf32>
    %225 = arith.mulf %220, %224 : vector<16x512xf32>
    %226 = arith.addf %219, %225 : vector<16x512xf32>
    %c6_132 = arith.constant 6 : index
    %c0_133 = arith.constant 0 : index
    %227 = vector.load %arg13[%c6_132, %c0_133] : memref<40x512xf32, #tpu.memory_space<vmem>>, vector<16x512xf32>
    %c14_134 = arith.constant 14 : index
    %c0_135 = arith.constant 0 : index
    %228 = vector.load %arg4[%c14_134, %c0_135] : memref<49x512xf32, #tpu.memory_space<vmem>>, vector<1x512xf32>
    %229 = vector.shape_cast %228 : vector<1x512xf32> to vector<512xf32>
    %230 = vector.shape_cast %229 : vector<512xf32> to vector<1x512xf32>
    %231 = vector.broadcast %230 : vector<1x512xf32> to vector<16x512xf32>
    %232 = arith.mulf %227, %231 : vector<16x512xf32>
    %233 = arith.addf %226, %232 : vector<16x512xf32>
    %c9_136 = arith.constant 9 : index
    %c0_137 = arith.constant 0 : index
    %234 = vector.load %arg13[%c9_136, %c0_137] : memref<40x512xf32, #tpu.memory_space<vmem>>, vector<16x512xf32>
    %c21_138 = arith.constant 21 : index
    %c0_139 = arith.constant 0 : index
    %235 = vector.load %arg4[%c21_138, %c0_139] : memref<49x512xf32, #tpu.memory_space<vmem>>, vector<1x512xf32>
    %236 = vector.shape_cast %235 : vector<1x512xf32> to vector<512xf32>
    %237 = vector.shape_cast %236 : vector<512xf32> to vector<1x512xf32>
    %238 = vector.broadcast %237 : vector<1x512xf32> to vector<16x512xf32>
    %239 = arith.mulf %234, %238 : vector<16x512xf32>
    %240 = arith.addf %233, %239 : vector<16x512xf32>
    %c12_140 = arith.constant 12 : index
    %c0_141 = arith.constant 0 : index
    %241 = vector.load %arg13[%c12_140, %c0_141] : memref<40x512xf32, #tpu.memory_space<vmem>>, vector<16x512xf32>
    %c28 = arith.constant 28 : index
    %c0_142 = arith.constant 0 : index
    %242 = vector.load %arg4[%c28, %c0_142] : memref<49x512xf32, #tpu.memory_space<vmem>>, vector<1x512xf32>
    %243 = vector.shape_cast %242 : vector<1x512xf32> to vector<512xf32>
    %244 = vector.shape_cast %243 : vector<512xf32> to vector<1x512xf32>
    %245 = vector.broadcast %244 : vector<1x512xf32> to vector<16x512xf32>
    %246 = arith.mulf %241, %245 : vector<16x512xf32>
    %247 = arith.addf %240, %246 : vector<16x512xf32>
    %c15_143 = arith.constant 15 : index
    %c0_144 = arith.constant 0 : index
    %248 = vector.load %arg13[%c15_143, %c0_144] : memref<40x512xf32, #tpu.memory_space<vmem>>, vector<16x512xf32>
    %c35 = arith.constant 35 : index
    %c0_145 = arith.constant 0 : index
    %249 = vector.load %arg4[%c35, %c0_145] : memref<49x512xf32, #tpu.memory_space<vmem>>, vector<1x512xf32>
    %250 = vector.shape_cast %249 : vector<1x512xf32> to vector<512xf32>
    %251 = vector.shape_cast %250 : vector<512xf32> to vector<1x512xf32>
    %252 = vector.broadcast %251 : vector<1x512xf32> to vector<16x512xf32>
    %253 = arith.mulf %248, %252 : vector<16x512xf32>
    %254 = arith.addf %247, %253 : vector<16x512xf32>
    %c18_146 = arith.constant 18 : index
    %c0_147 = arith.constant 0 : index
    %255 = vector.load %arg13[%c18_146, %c0_147] : memref<40x512xf32, #tpu.memory_space<vmem>>, vector<16x512xf32>
    %c42 = arith.constant 42 : index
    %c0_148 = arith.constant 0 : index
    %256 = vector.load %arg4[%c42, %c0_148] : memref<49x512xf32, #tpu.memory_space<vmem>>, vector<1x512xf32>
    %257 = vector.shape_cast %256 : vector<1x512xf32> to vector<512xf32>
    %258 = vector.shape_cast %257 : vector<512xf32> to vector<1x512xf32>
    %259 = vector.broadcast %258 : vector<1x512xf32> to vector<16x512xf32>
    %260 = arith.mulf %255, %259 : vector<16x512xf32>
    %261 = arith.addf %254, %260 : vector<16x512xf32>
    %c7_149 = arith.constant 7 : index
    %c192_150 = arith.constant 192 : index
    %262 = vector.load %arg12[%c7_149, %c192_150] : memref<48x1280xf32, #tpu.memory_space<vmem>>, vector<34x512xf32>
    %c0_151 = arith.constant 0 : index
    %c0_152 = arith.constant 0 : index
    %263 = vector.load %arg13[%c0_151, %c0_152] : memref<40x512xf32, #tpu.memory_space<vmem>>, vector<34x512xf32>
    tpu.vector_store %arg13[%c0_151, %c0_152], %262 {strides = array<i32>} : memref<40x512xf32, #tpu.memory_space<vmem>>, vector<34x512xf32>,
    %c0_153 = arith.constant 0 : index
    %c0_154 = arith.constant 0 : index
    %264 = vector.load %arg13[%c0_153, %c0_154] : memref<40x512xf32, #tpu.memory_space<vmem>>, vector<16x512xf32>
    %c1_155 = arith.constant 1 : index
    %c0_156 = arith.constant 0 : index
    %265 = vector.load %arg4[%c1_155, %c0_156] : memref<49x512xf32, #tpu.memory_space<vmem>>, vector<1x512xf32>
    %266 = vector.shape_cast %265 : vector<1x512xf32> to vector<512xf32>
    %267 = vector.shape_cast %266 : vector<512xf32> to vector<1x512xf32>
    %268 = vector.broadcast %267 : vector<1x512xf32> to vector<16x512xf32>
    %269 = arith.mulf %264, %268 : vector<16x512xf32>
    %270 = arith.addf %261, %269 : vector<16x512xf32>
    %c3_157 = arith.constant 3 : index
    %c0_158 = arith.constant 0 : index
    %271 = vector.load %arg13[%c3_157, %c0_158] : memref<40x512xf32, #tpu.memory_space<vmem>>, vector<16x512xf32>
    %c8_159 = arith.constant 8 : index
    %c0_160 = arith.constant 0 : index
    %272 = vector.load %arg4[%c8_159, %c0_160] : memref<49x512xf32, #tpu.memory_space<vmem>>, vector<1x512xf32>
    %273 = vector.shape_cast %272 : vector<1x512xf32> to vector<512xf32>
    %274 = vector.shape_cast %273 : vector<512xf32> to vector<1x512xf32>
    %275 = vector.broadcast %274 : vector<1x512xf32> to vector<16x512xf32>
    %276 = arith.mulf %271, %275 : vector<16x512xf32>
    %277 = arith.addf %270, %276 : vector<16x512xf32>
    %c6_161 = arith.constant 6 : index
    %c0_162 = arith.constant 0 : index
    %278 = vector.load %arg13[%c6_161, %c0_162] : memref<40x512xf32, #tpu.memory_space<vmem>>, vector<16x512xf32>
    %c15_163 = arith.constant 15 : index
    %c0_164 = arith.constant 0 : index
    %279 = vector.load %arg4[%c15_163, %c0_164] : memref<49x512xf32, #tpu.memory_space<vmem>>, vector<1x512xf32>
    %280 = vector.shape_cast %279 : vector<1x512xf32> to vector<512xf32>
    %281 = vector.shape_cast %280 : vector<512xf32> to vector<1x512xf32>
    %282 = vector.broadcast %281 : vector<1x512xf32> to vector<16x512xf32>
    %283 = arith.mulf %278, %282 : vector<16x512xf32>
    %284 = arith.addf %277, %283 : vector<16x512xf32>
    %c9_165 = arith.constant 9 : index
    %c0_166 = arith.constant 0 : index
    %285 = vector.load %arg13[%c9_165, %c0_166] : memref<40x512xf32, #tpu.memory_space<vmem>>, vector<16x512xf32>
    %c22_167 = arith.constant 22 : index
    %c0_168 = arith.constant 0 : index
    %286 = vector.load %arg4[%c22_167, %c0_168] : memref<49x512xf32, #tpu.memory_space<vmem>>, vector<1x512xf32>
    %287 = vector.shape_cast %286 : vector<1x512xf32> to vector<512xf32>
    %288 = vector.shape_cast %287 : vector<512xf32> to vector<1x512xf32>
    %289 = vector.broadcast %288 : vector<1x512xf32> to vector<16x512xf32>
    %290 = arith.mulf %285, %289 : vector<16x512xf32>
    %291 = arith.addf %284, %290 : vector<16x512xf32>
    %c12_169 = arith.constant 12 : index
    %c0_170 = arith.constant 0 : index
    %292 = vector.load %arg13[%c12_169, %c0_170] : memref<40x512xf32, #tpu.memory_space<vmem>>, vector<16x512xf32>
    %c29 = arith.constant 29 : index
    %c0_171 = arith.constant 0 : index
    %293 = vector.load %arg4[%c29, %c0_171] : memref<49x512xf32, #tpu.memory_space<vmem>>, vector<1x512xf32>
    %294 = vector.shape_cast %293 : vector<1x512xf32> to vector<512xf32>
    %295 = vector.shape_cast %294 : vector<512xf32> to vector<1x512xf32>
    %296 = vector.broadcast %295 : vector<1x512xf32> to vector<16x512xf32>
    %297 = arith.mulf %292, %296 : vector<16x512xf32>
    %298 = arith.addf %291, %297 : vector<16x512xf32>
    %c15_172 = arith.constant 15 : index
    %c0_173 = arith.constant 0 : index
    %299 = vector.load %arg13[%c15_172, %c0_173] : memref<40x512xf32, #tpu.memory_space<vmem>>, vector<16x512xf32>
    %c36 = arith.constant 36 : index
    %c0_174 = arith.constant 0 : index
    %300 = vector.load %arg4[%c36, %c0_174] : memref<49x512xf32, #tpu.memory_space<vmem>>, vector<1x512xf32>
    %301 = vector.shape_cast %300 : vector<1x512xf32> to vector<512xf32>
    %302 = vector.shape_cast %301 : vector<512xf32> to vector<1x512xf32>
    %303 = vector.broadcast %302 : vector<1x512xf32> to vector<16x512xf32>
    %304 = arith.mulf %299, %303 : vector<16x512xf32>
    %305 = arith.addf %298, %304 : vector<16x512xf32>
    %c18_175 = arith.constant 18 : index
    %c0_176 = arith.constant 0 : index
    %306 = vector.load %arg13[%c18_175, %c0_176] : memref<40x512xf32, #tpu.memory_space<vmem>>, vector<16x512xf32>
    %c43 = arith.constant 43 : index
    %c0_177 = arith.constant 0 : index
    %307 = vector.load %arg4[%c43, %c0_177] : memref<49x512xf32, #tpu.memory_space<vmem>>, vector<1x512xf32>
    %308 = vector.shape_cast %307 : vector<1x512xf32> to vector<512xf32>
    %309 = vector.shape_cast %308 : vector<512xf32> to vector<1x512xf32>
    %310 = vector.broadcast %309 : vector<1x512xf32> to vector<16x512xf32>
    %311 = arith.mulf %306, %310 : vector<16x512xf32>
    %312 = arith.addf %305, %311 : vector<16x512xf32>
    %c7_178 = arith.constant 7 : index
    %c288 = arith.constant 288 : index
    %313 = vector.load %arg12[%c7_178, %c288] : memref<48x1280xf32, #tpu.memory_space<vmem>>, vector<34x512xf32>
    %c0_179 = arith.constant 0 : index
    %c0_180 = arith.constant 0 : index
    %314 = vector.load %arg13[%c0_179, %c0_180] : memref<40x512xf32, #tpu.memory_space<vmem>>, vector<34x512xf32>
    tpu.vector_store %arg13[%c0_179, %c0_180], %313 {strides = array<i32>} : memref<40x512xf32, #tpu.memory_space<vmem>>, vector<34x512xf32>,
    %c0_181 = arith.constant 0 : index
    %c0_182 = arith.constant 0 : index
    %315 = vector.load %arg13[%c0_181, %c0_182] : memref<40x512xf32, #tpu.memory_space<vmem>>, vector<16x512xf32>
    %c2_183 = arith.constant 2 : index
    %c0_184 = arith.constant 0 : index
    %316 = vector.load %arg4[%c2_183, %c0_184] : memref<49x512xf32, #tpu.memory_space<vmem>>, vector<1x512xf32>
    %317 = vector.shape_cast %316 : vector<1x512xf32> to vector<512xf32>
    %318 = vector.shape_cast %317 : vector<512xf32> to vector<1x512xf32>
    %319 = vector.broadcast %318 : vector<1x512xf32> to vector<16x512xf32>
    %320 = arith.mulf %315, %319 : vector<16x512xf32>
    %321 = arith.addf %312, %320 : vector<16x512xf32>
    %c3_185 = arith.constant 3 : index
    %c0_186 = arith.constant 0 : index
    %322 = vector.load %arg13[%c3_185, %c0_186] : memref<40x512xf32, #tpu.memory_space<vmem>>, vector<16x512xf32>
    %c9_187 = arith.constant 9 : index
    %c0_188 = arith.constant 0 : index
    %323 = vector.load %arg4[%c9_187, %c0_188] : memref<49x512xf32, #tpu.memory_space<vmem>>, vector<1x512xf32>
    %324 = vector.shape_cast %323 : vector<1x512xf32> to vector<512xf32>
    %325 = vector.shape_cast %324 : vector<512xf32> to vector<1x512xf32>
    %326 = vector.broadcast %325 : vector<1x512xf32> to vector<16x512xf32>
    %327 = arith.mulf %322, %326 : vector<16x512xf32>
    %328 = arith.addf %321, %327 : vector<16x512xf32>
    %c6_189 = arith.constant 6 : index
    %c0_190 = arith.constant 0 : index
    %329 = vector.load %arg13[%c6_189, %c0_190] : memref<40x512xf32, #tpu.memory_space<vmem>>, vector<16x512xf32>
    %c16_191 = arith.constant 16 : index
    %c0_192 = arith.constant 0 : index
    %330 = vector.load %arg4[%c16_191, %c0_192] : memref<49x512xf32, #tpu.memory_space<vmem>>, vector<1x512xf32>
    %331 = vector.shape_cast %330 : vector<1x512xf32> to vector<512xf32>
    %332 = vector.shape_cast %331 : vector<512xf32> to vector<1x512xf32>
    %333 = vector.broadcast %332 : vector<1x512xf32> to vector<16x512xf32>
    %334 = arith.mulf %329, %333 : vector<16x512xf32>
    %335 = arith.addf %328, %334 : vector<16x512xf32>
    %c9_193 = arith.constant 9 : index
    %c0_194 = arith.constant 0 : index
    %336 = vector.load %arg13[%c9_193, %c0_194] : memref<40x512xf32, #tpu.memory_space<vmem>>, vector<16x512xf32>
    %c23_195 = arith.constant 23 : index
    %c0_196 = arith.constant 0 : index
    %337 = vector.load %arg4[%c23_195, %c0_196] : memref<49x512xf32, #tpu.memory_space<vmem>>, vector<1x512xf32>
    %338 = vector.shape_cast %337 : vector<1x512xf32> to vector<512xf32>
    %339 = vector.shape_cast %338 : vector<512xf32> to vector<1x512xf32>
    %340 = vector.broadcast %339 : vector<1x512xf32> to vector<16x512xf32>
    %341 = arith.mulf %336, %340 : vector<16x512xf32>
    %342 = arith.addf %335, %341 : vector<16x512xf32>
    %c12_197 = arith.constant 12 : index
    %c0_198 = arith.constant 0 : index
    %343 = vector.load %arg13[%c12_197, %c0_198] : memref<40x512xf32, #tpu.memory_space<vmem>>, vector<16x512xf32>
    %c30 = arith.constant 30 : index
    %c0_199 = arith.constant 0 : index
    %344 = vector.load %arg4[%c30, %c0_199] : memref<49x512xf32, #tpu.memory_space<vmem>>, vector<1x512xf32>
    %345 = vector.shape_cast %344 : vector<1x512xf32> to vector<512xf32>
    %346 = vector.shape_cast %345 : vector<512xf32> to vector<1x512xf32>
    %347 = vector.broadcast %346 : vector<1x512xf32> to vector<16x512xf32>
    %348 = arith.mulf %343, %347 : vector<16x512xf32>
    %349 = arith.addf %342, %348 : vector<16x512xf32>
    %c15_200 = arith.constant 15 : index
    %c0_201 = arith.constant 0 : index
    %350 = vector.load %arg13[%c15_200, %c0_201] : memref<40x512xf32, #tpu.memory_space<vmem>>, vector<16x512xf32>
    %c37 = arith.constant 37 : index
    %c0_202 = arith.constant 0 : index
    %351 = vector.load %arg4[%c37, %c0_202] : memref<49x512xf32, #tpu.memory_space<vmem>>, vector<1x512xf32>
    %352 = vector.shape_cast %351 : vector<1x512xf32> to vector<512xf32>
    %353 = vector.shape_cast %352 : vector<512xf32> to vector<1x512xf32>
    %354 = vector.broadcast %353 : vector<1x512xf32> to vector<16x512xf32>
    %355 = arith.mulf %350, %354 : vector<16x512xf32>
    %356 = arith.addf %349, %355 : vector<16x512xf32>
    %c18_203 = arith.constant 18 : index
    %c0_204 = arith.constant 0 : index
    %357 = vector.load %arg13[%c18_203, %c0_204] : memref<40x512xf32, #tpu.memory_space<vmem>>, vector<16x512xf32>
    %c44 = arith.constant 44 : index
    %c0_205 = arith.constant 0 : index
    %358 = vector.load %arg4[%c44, %c0_205] : memref<49x512xf32, #tpu.memory_space<vmem>>, vector<1x512xf32>
    %359 = vector.shape_cast %358 : vector<1x512xf32> to vector<512xf32>
    %360 = vector.shape_cast %359 : vector<512xf32> to vector<1x512xf32>
    %361 = vector.broadcast %360 : vector<1x512xf32> to vector<16x512xf32>
    %362 = arith.mulf %357, %361 : vector<16x512xf32>
    %363 = arith.addf %356, %362 : vector<16x512xf32>
    %c7_206 = arith.constant 7 : index
    %c384_207 = arith.constant 384 : index
    %364 = vector.load %arg12[%c7_206, %c384_207] : memref<48x1280xf32, #tpu.memory_space<vmem>>, vector<34x512xf32>
    %c0_208 = arith.constant 0 : index
    %c0_209 = arith.constant 0 : index
    %365 = vector.load %arg13[%c0_208, %c0_209] : memref<40x512xf32, #tpu.memory_space<vmem>>, vector<34x512xf32>
    tpu.vector_store %arg13[%c0_208, %c0_209], %364 {strides = array<i32>} : memref<40x512xf32, #tpu.memory_space<vmem>>, vector<34x512xf32>,
    %c0_210 = arith.constant 0 : index
    %c0_211 = arith.constant 0 : index
    %366 = vector.load %arg13[%c0_210, %c0_211] : memref<40x512xf32, #tpu.memory_space<vmem>>, vector<16x512xf32>
    %c3_212 = arith.constant 3 : index
    %c0_213 = arith.constant 0 : index
    %367 = vector.load %arg4[%c3_212, %c0_213] : memref<49x512xf32, #tpu.memory_space<vmem>>, vector<1x512xf32>
    %368 = vector.shape_cast %367 : vector<1x512xf32> to vector<512xf32>
    %369 = vector.shape_cast %368 : vector<512xf32> to vector<1x512xf32>
    %370 = vector.broadcast %369 : vector<1x512xf32> to vector<16x512xf32>
    %371 = arith.mulf %366, %370 : vector<16x512xf32>
    %372 = arith.addf %363, %371 : vector<16x512xf32>
    %c3_214 = arith.constant 3 : index
    %c0_215 = arith.constant 0 : index
    %373 = vector.load %arg13[%c3_214, %c0_215] : memref<40x512xf32, #tpu.memory_space<vmem>>, vector<16x512xf32>
    %c10_216 = arith.constant 10 : index
    %c0_217 = arith.constant 0 : index
    %374 = vector.load %arg4[%c10_216, %c0_217] : memref<49x512xf32, #tpu.memory_space<vmem>>, vector<1x512xf32>
    %375 = vector.shape_cast %374 : vector<1x512xf32> to vector<512xf32>
    %376 = vector.shape_cast %375 : vector<512xf32> to vector<1x512xf32>
    %377 = vector.broadcast %376 : vector<1x512xf32> to vector<16x512xf32>
    %378 = arith.mulf %373, %377 : vector<16x512xf32>
    %379 = arith.addf %372, %378 : vector<16x512xf32>
    %c6_218 = arith.constant 6 : index
    %c0_219 = arith.constant 0 : index
    %380 = vector.load %arg13[%c6_218, %c0_219] : memref<40x512xf32, #tpu.memory_space<vmem>>, vector<16x512xf32>
    %c17_220 = arith.constant 17 : index
    %c0_221 = arith.constant 0 : index
    %381 = vector.load %arg4[%c17_220, %c0_221] : memref<49x512xf32, #tpu.memory_space<vmem>>, vector<1x512xf32>
    %382 = vector.shape_cast %381 : vector<1x512xf32> to vector<512xf32>
    %383 = vector.shape_cast %382 : vector<512xf32> to vector<1x512xf32>
    %384 = vector.broadcast %383 : vector<1x512xf32> to vector<16x512xf32>
    %385 = arith.mulf %380, %384 : vector<16x512xf32>
    %386 = arith.addf %379, %385 : vector<16x512xf32>
    %c9_222 = arith.constant 9 : index
    %c0_223 = arith.constant 0 : index
    %387 = vector.load %arg13[%c9_222, %c0_223] : memref<40x512xf32, #tpu.memory_space<vmem>>, vector<16x512xf32>
    %c24_224 = arith.constant 24 : index
    %c0_225 = arith.constant 0 : index
    %388 = vector.load %arg4[%c24_224, %c0_225] : memref<49x512xf32, #tpu.memory_space<vmem>>, vector<1x512xf32>
    %389 = vector.shape_cast %388 : vector<1x512xf32> to vector<512xf32>
    %390 = vector.shape_cast %389 : vector<512xf32> to vector<1x512xf32>
    %391 = vector.broadcast %390 : vector<1x512xf32> to vector<16x512xf32>
    %392 = arith.mulf %387, %391 : vector<16x512xf32>
    %393 = arith.addf %386, %392 : vector<16x512xf32>
    %c12_226 = arith.constant 12 : index
    %c0_227 = arith.constant 0 : index
    %394 = vector.load %arg13[%c12_226, %c0_227] : memref<40x512xf32, #tpu.memory_space<vmem>>, vector<16x512xf32>
    %c31 = arith.constant 31 : index
    %c0_228 = arith.constant 0 : index
    %395 = vector.load %arg4[%c31, %c0_228] : memref<49x512xf32, #tpu.memory_space<vmem>>, vector<1x512xf32>
    %396 = vector.shape_cast %395 : vector<1x512xf32> to vector<512xf32>
    %397 = vector.shape_cast %396 : vector<512xf32> to vector<1x512xf32>
    %398 = vector.broadcast %397 : vector<1x512xf32> to vector<16x512xf32>
    %399 = arith.mulf %394, %398 : vector<16x512xf32>
    %400 = arith.addf %393, %399 : vector<16x512xf32>
    %c15_229 = arith.constant 15 : index
    %c0_230 = arith.constant 0 : index
    %401 = vector.load %arg13[%c15_229, %c0_230] : memref<40x512xf32, #tpu.memory_space<vmem>>, vector<16x512xf32>
    %c38 = arith.constant 38 : index
    %c0_231 = arith.constant 0 : index
    %402 = vector.load %arg4[%c38, %c0_231] : memref<49x512xf32, #tpu.memory_space<vmem>>, vector<1x512xf32>
    %403 = vector.shape_cast %402 : vector<1x512xf32> to vector<512xf32>
    %404 = vector.shape_cast %403 : vector<512xf32> to vector<1x512xf32>
    %405 = vector.broadcast %404 : vector<1x512xf32> to vector<16x512xf32>
    %406 = arith.mulf %401, %405 : vector<16x512xf32>
    %407 = arith.addf %400, %406 : vector<16x512xf32>
    %c18_232 = arith.constant 18 : index
    %c0_233 = arith.constant 0 : index
    %408 = vector.load %arg13[%c18_232, %c0_233] : memref<40x512xf32, #tpu.memory_space<vmem>>, vector<16x512xf32>
    %c45 = arith.constant 45 : index
    %c0_234 = arith.constant 0 : index
    %409 = vector.load %arg4[%c45, %c0_234] : memref<49x512xf32, #tpu.memory_space<vmem>>, vector<1x512xf32>
    %410 = vector.shape_cast %409 : vector<1x512xf32> to vector<512xf32>
    %411 = vector.shape_cast %410 : vector<512xf32> to vector<1x512xf32>
    %412 = vector.broadcast %411 : vector<1x512xf32> to vector<16x512xf32>
    %413 = arith.mulf %408, %412 : vector<16x512xf32>
    %414 = arith.addf %407, %413 : vector<16x512xf32>
    %c7_235 = arith.constant 7 : index
    %c480 = arith.constant 480 : index
    %415 = vector.load %arg12[%c7_235, %c480] : memref<48x1280xf32, #tpu.memory_space<vmem>>, vector<34x512xf32>
    %c0_236 = arith.constant 0 : index
    %c0_237 = arith.constant 0 : index
    %416 = vector.load %arg13[%c0_236, %c0_237] : memref<40x512xf32, #tpu.memory_space<vmem>>, vector<34x512xf32>
    tpu.vector_store %arg13[%c0_236, %c0_237], %415 {strides = array<i32>} : memref<40x512xf32, #tpu.memory_space<vmem>>, vector<34x512xf32>,
    %c0_238 = arith.constant 0 : index
    %c0_239 = arith.constant 0 : index
    %417 = vector.load %arg13[%c0_238, %c0_239] : memref<40x512xf32, #tpu.memory_space<vmem>>, vector<16x512xf32>
    %c4_240 = arith.constant 4 : index
    %c0_241 = arith.constant 0 : index
    %418 = vector.load %arg4[%c4_240, %c0_241] : memref<49x512xf32, #tpu.memory_space<vmem>>, vector<1x512xf32>
    %419 = vector.shape_cast %418 : vector<1x512xf32> to vector<512xf32>
    %420 = vector.shape_cast %419 : vector<512xf32> to vector<1x512xf32>
    %421 = vector.broadcast %420 : vector<1x512xf32> to vector<16x512xf32>
    %422 = arith.mulf %417, %421 : vector<16x512xf32>
    %423 = arith.addf %414, %422 : vector<16x512xf32>
    %c3_242 = arith.constant 3 : index
    %c0_243 = arith.constant 0 : index
    %424 = vector.load %arg13[%c3_242, %c0_243] : memref<40x512xf32, #tpu.memory_space<vmem>>, vector<16x512xf32>
    %c11_244 = arith.constant 11 : index
    %c0_245 = arith.constant 0 : index
    %425 = vector.load %arg4[%c11_244, %c0_245] : memref<49x512xf32, #tpu.memory_space<vmem>>, vector<1x512xf32>
    %426 = vector.shape_cast %425 : vector<1x512xf32> to vector<512xf32>
    %427 = vector.shape_cast %426 : vector<512xf32> to vector<1x512xf32>
    %428 = vector.broadcast %427 : vector<1x512xf32> to vector<16x512xf32>
    %429 = arith.mulf %424, %428 : vector<16x512xf32>
    %430 = arith.addf %423, %429 : vector<16x512xf32>
    %c6_246 = arith.constant 6 : index
    %c0_247 = arith.constant 0 : index
    %431 = vector.load %arg13[%c6_246, %c0_247] : memref<40x512xf32, #tpu.memory_space<vmem>>, vector<16x512xf32>
    %c18_248 = arith.constant 18 : index
    %c0_249 = arith.constant 0 : index
    %432 = vector.load %arg4[%c18_248, %c0_249] : memref<49x512xf32, #tpu.memory_space<vmem>>, vector<1x512xf32>
    %433 = vector.shape_cast %432 : vector<1x512xf32> to vector<512xf32>
    %434 = vector.shape_cast %433 : vector<512xf32> to vector<1x512xf32>
    %435 = vector.broadcast %434 : vector<1x512xf32> to vector<16x512xf32>
    %436 = arith.mulf %431, %435 : vector<16x512xf32>
    %437 = arith.addf %430, %436 : vector<16x512xf32>
    %c9_250 = arith.constant 9 : index
    %c0_251 = arith.constant 0 : index
    %438 = vector.load %arg13[%c9_250, %c0_251] : memref<40x512xf32, #tpu.memory_space<vmem>>, vector<16x512xf32>
    %c25 = arith.constant 25 : index
    %c0_252 = arith.constant 0 : index
    %439 = vector.load %arg4[%c25, %c0_252] : memref<49x512xf32, #tpu.memory_space<vmem>>, vector<1x512xf32>
    %440 = vector.shape_cast %439 : vector<1x512xf32> to vector<512xf32>
    %441 = vector.shape_cast %440 : vector<512xf32> to vector<1x512xf32>
    %442 = vector.broadcast %441 : vector<1x512xf32> to vector<16x512xf32>
    %443 = arith.mulf %438, %442 : vector<16x512xf32>
    %444 = arith.addf %437, %443 : vector<16x512xf32>
    %c12_253 = arith.constant 12 : index
    %c0_254 = arith.constant 0 : index
    %445 = vector.load %arg13[%c12_253, %c0_254] : memref<40x512xf32, #tpu.memory_space<vmem>>, vector<16x512xf32>
    %c32_255 = arith.constant 32 : index
    %c0_256 = arith.constant 0 : index
    %446 = vector.load %arg4[%c32_255, %c0_256] : memref<49x512xf32, #tpu.memory_space<vmem>>, vector<1x512xf32>
    %447 = vector.shape_cast %446 : vector<1x512xf32> to vector<512xf32>
    %448 = vector.shape_cast %447 : vector<512xf32> to vector<1x512xf32>
    %449 = vector.broadcast %448 : vector<1x512xf32> to vector<16x512xf32>
    %450 = arith.mulf %445, %449 : vector<16x512xf32>
    %451 = arith.addf %444, %450 : vector<16x512xf32>
    %c15_257 = arith.constant 15 : index
    %c0_258 = arith.constant 0 : index
    %452 = vector.load %arg13[%c15_257, %c0_258] : memref<40x512xf32, #tpu.memory_space<vmem>>, vector<16x512xf32>
    %c39 = arith.constant 39 : index
    %c0_259 = arith.constant 0 : index
    %453 = vector.load %arg4[%c39, %c0_259] : memref<49x512xf32, #tpu.memory_space<vmem>>, vector<1x512xf32>
    %454 = vector.shape_cast %453 : vector<1x512xf32> to vector<512xf32>
    %455 = vector.shape_cast %454 : vector<512xf32> to vector<1x512xf32>
    %456 = vector.broadcast %455 : vector<1x512xf32> to vector<16x512xf32>
    %457 = arith.mulf %452, %456 : vector<16x512xf32>
    %458 = arith.addf %451, %457 : vector<16x512xf32>
    %c18_260 = arith.constant 18 : index
    %c0_261 = arith.constant 0 : index
    %459 = vector.load %arg13[%c18_260, %c0_261] : memref<40x512xf32, #tpu.memory_space<vmem>>, vector<16x512xf32>
    %c46 = arith.constant 46 : index
    %c0_262 = arith.constant 0 : index
    %460 = vector.load %arg4[%c46, %c0_262] : memref<49x512xf32, #tpu.memory_space<vmem>>, vector<1x512xf32>
    %461 = vector.shape_cast %460 : vector<1x512xf32> to vector<512xf32>
    %462 = vector.shape_cast %461 : vector<512xf32> to vector<1x512xf32>
    %463 = vector.broadcast %462 : vector<1x512xf32> to vector<16x512xf32>
    %464 = arith.mulf %459, %463 : vector<16x512xf32>
    %465 = arith.addf %458, %464 : vector<16x512xf32>
    %c7_263 = arith.constant 7 : index
    %c576 = arith.constant 576 : index
    %466 = vector.load %arg12[%c7_263, %c576] : memref<48x1280xf32, #tpu.memory_space<vmem>>, vector<34x512xf32>
    %c0_264 = arith.constant 0 : index
    %c0_265 = arith.constant 0 : index
    %467 = vector.load %arg13[%c0_264, %c0_265] : memref<40x512xf32, #tpu.memory_space<vmem>>, vector<34x512xf32>
    tpu.vector_store %arg13[%c0_264, %c0_265], %466 {strides = array<i32>} : memref<40x512xf32, #tpu.memory_space<vmem>>, vector<34x512xf32>,
    %c0_266 = arith.constant 0 : index
    %c0_267 = arith.constant 0 : index
    %468 = vector.load %arg13[%c0_266, %c0_267] : memref<40x512xf32, #tpu.memory_space<vmem>>, vector<16x512xf32>
    %c5_268 = arith.constant 5 : index
    %c0_269 = arith.constant 0 : index
    %469 = vector.load %arg4[%c5_268, %c0_269] : memref<49x512xf32, #tpu.memory_space<vmem>>, vector<1x512xf32>
    %470 = vector.shape_cast %469 : vector<1x512xf32> to vector<512xf32>
    %471 = vector.shape_cast %470 : vector<512xf32> to vector<1x512xf32>
    %472 = vector.broadcast %471 : vector<1x512xf32> to vector<16x512xf32>
    %473 = arith.mulf %468, %472 : vector<16x512xf32>
    %474 = arith.addf %465, %473 : vector<16x512xf32>
    %c3_270 = arith.constant 3 : index
    %c0_271 = arith.constant 0 : index
    %475 = vector.load %arg13[%c3_270, %c0_271] : memref<40x512xf32, #tpu.memory_space<vmem>>, vector<16x512xf32>
    %c12_272 = arith.constant 12 : index
    %c0_273 = arith.constant 0 : index
    %476 = vector.load %arg4[%c12_272, %c0_273] : memref<49x512xf32, #tpu.memory_space<vmem>>, vector<1x512xf32>
    %477 = vector.shape_cast %476 : vector<1x512xf32> to vector<512xf32>
    %478 = vector.shape_cast %477 : vector<512xf32> to vector<1x512xf32>
    %479 = vector.broadcast %478 : vector<1x512xf32> to vector<16x512xf32>
    %480 = arith.mulf %475, %479 : vector<16x512xf32>
    %481 = arith.addf %474, %480 : vector<16x512xf32>
    %c6_274 = arith.constant 6 : index
    %c0_275 = arith.constant 0 : index
    %482 = vector.load %arg13[%c6_274, %c0_275] : memref<40x512xf32, #tpu.memory_space<vmem>>, vector<16x512xf32>
    %c19_276 = arith.constant 19 : index
    %c0_277 = arith.constant 0 : index
    %483 = vector.load %arg4[%c19_276, %c0_277] : memref<49x512xf32, #tpu.memory_space<vmem>>, vector<1x512xf32>
    %484 = vector.shape_cast %483 : vector<1x512xf32> to vector<512xf32>
    %485 = vector.shape_cast %484 : vector<512xf32> to vector<1x512xf32>
    %486 = vector.broadcast %485 : vector<1x512xf32> to vector<16x512xf32>
    %487 = arith.mulf %482, %486 : vector<16x512xf32>
    %488 = arith.addf %481, %487 : vector<16x512xf32>
    %c9_278 = arith.constant 9 : index
    %c0_279 = arith.constant 0 : index
    %489 = vector.load %arg13[%c9_278, %c0_279] : memref<40x512xf32, #tpu.memory_space<vmem>>, vector<16x512xf32>
    %c26 = arith.constant 26 : index
    %c0_280 = arith.constant 0 : index
    %490 = vector.load %arg4[%c26, %c0_280] : memref<49x512xf32, #tpu.memory_space<vmem>>, vector<1x512xf32>
    %491 = vector.shape_cast %490 : vector<1x512xf32> to vector<512xf32>
    %492 = vector.shape_cast %491 : vector<512xf32> to vector<1x512xf32>
    %493 = vector.broadcast %492 : vector<1x512xf32> to vector<16x512xf32>
    %494 = arith.mulf %489, %493 : vector<16x512xf32>
    %495 = arith.addf %488, %494 : vector<16x512xf32>
    %c12_281 = arith.constant 12 : index
    %c0_282 = arith.constant 0 : index
    %496 = vector.load %arg13[%c12_281, %c0_282] : memref<40x512xf32, #tpu.memory_space<vmem>>, vector<16x512xf32>
    %c33 = arith.constant 33 : index
    %c0_283 = arith.constant 0 : index
    %497 = vector.load %arg4[%c33, %c0_283] : memref<49x512xf32, #tpu.memory_space<vmem>>, vector<1x512xf32>
    %498 = vector.shape_cast %497 : vector<1x512xf32> to vector<512xf32>
    %499 = vector.shape_cast %498 : vector<512xf32> to vector<1x512xf32>
    %500 = vector.broadcast %499 : vector<1x512xf32> to vector<16x512xf32>
    %501 = arith.mulf %496, %500 : vector<16x512xf32>
    %502 = arith.addf %495, %501 : vector<16x512xf32>
    %c15_284 = arith.constant 15 : index
    %c0_285 = arith.constant 0 : index
    %503 = vector.load %arg13[%c15_284, %c0_285] : memref<40x512xf32, #tpu.memory_space<vmem>>, vector<16x512xf32>
    %c40 = arith.constant 40 : index
    %c0_286 = arith.constant 0 : index
    %504 = vector.load %arg4[%c40, %c0_286] : memref<49x512xf32, #tpu.memory_space<vmem>>, vector<1x512xf32>
    %505 = vector.shape_cast %504 : vector<1x512xf32> to vector<512xf32>
    %506 = vector.shape_cast %505 : vector<512xf32> to vector<1x512xf32>
    %507 = vector.broadcast %506 : vector<1x512xf32> to vector<16x512xf32>
    %508 = arith.mulf %503, %507 : vector<16x512xf32>
    %509 = arith.addf %502, %508 : vector<16x512xf32>
    %c18_287 = arith.constant 18 : index
    %c0_288 = arith.constant 0 : index
    %510 = vector.load %arg13[%c18_287, %c0_288] : memref<40x512xf32, #tpu.memory_space<vmem>>, vector<16x512xf32>
    %c47 = arith.constant 47 : index
    %c0_289 = arith.constant 0 : index
    %511 = vector.load %arg4[%c47, %c0_289] : memref<49x512xf32, #tpu.memory_space<vmem>>, vector<1x512xf32>
    %512 = vector.shape_cast %511 : vector<1x512xf32> to vector<512xf32>
    %513 = vector.shape_cast %512 : vector<512xf32> to vector<1x512xf32>
    %514 = vector.broadcast %513 : vector<1x512xf32> to vector<16x512xf32>
    %515 = arith.mulf %510, %514 : vector<16x512xf32>
    %516 = arith.addf %509, %515 : vector<16x512xf32>
    %c7_290 = arith.constant 7 : index
    %c672 = arith.constant 672 : index
    %517 = vector.load %arg12[%c7_290, %c672] : memref<48x1280xf32, #tpu.memory_space<vmem>>, vector<34x512xf32>
    %c0_291 = arith.constant 0 : index
    %c0_292 = arith.constant 0 : index
    %518 = vector.load %arg13[%c0_291, %c0_292] : memref<40x512xf32, #tpu.memory_space<vmem>>, vector<34x512xf32>
    tpu.vector_store %arg13[%c0_291, %c0_292], %517 {strides = array<i32>} : memref<40x512xf32, #tpu.memory_space<vmem>>, vector<34x512xf32>,
    %c0_293 = arith.constant 0 : index
    %c0_294 = arith.constant 0 : index
    %519 = vector.load %arg13[%c0_293, %c0_294] : memref<40x512xf32, #tpu.memory_space<vmem>>, vector<16x512xf32>
    %c6_295 = arith.constant 6 : index
    %c0_296 = arith.constant 0 : index
    %520 = vector.load %arg4[%c6_295, %c0_296] : memref<49x512xf32, #tpu.memory_space<vmem>>, vector<1x512xf32>
    %521 = vector.shape_cast %520 : vector<1x512xf32> to vector<512xf32>
    %522 = vector.shape_cast %521 : vector<512xf32> to vector<1x512xf32>
    %523 = vector.broadcast %522 : vector<1x512xf32> to vector<16x512xf32>
    %524 = arith.mulf %519, %523 : vector<16x512xf32>
    %525 = arith.addf %516, %524 : vector<16x512xf32>
    %c3_297 = arith.constant 3 : index
    %c0_298 = arith.constant 0 : index
    %526 = vector.load %arg13[%c3_297, %c0_298] : memref<40x512xf32, #tpu.memory_space<vmem>>, vector<16x512xf32>
    %c13_299 = arith.constant 13 : index
    %c0_300 = arith.constant 0 : index
    %527 = vector.load %arg4[%c13_299, %c0_300] : memref<49x512xf32, #tpu.memory_space<vmem>>, vector<1x512xf32>
    %528 = vector.shape_cast %527 : vector<1x512xf32> to vector<512xf32>
    %529 = vector.shape_cast %528 : vector<512xf32> to vector<1x512xf32>
    %530 = vector.broadcast %529 : vector<1x512xf32> to vector<16x512xf32>
    %531 = arith.mulf %526, %530 : vector<16x512xf32>
    %532 = arith.addf %525, %531 : vector<16x512xf32>
    %c6_301 = arith.constant 6 : index
    %c0_302 = arith.constant 0 : index
    %533 = vector.load %arg13[%c6_301, %c0_302] : memref<40x512xf32, #tpu.memory_space<vmem>>, vector<16x512xf32>
    %c20_303 = arith.constant 20 : index
    %c0_304 = arith.constant 0 : index
    %534 = vector.load %arg4[%c20_303, %c0_304] : memref<49x512xf32, #tpu.memory_space<vmem>>, vector<1x512xf32>
    %535 = vector.shape_cast %534 : vector<1x512xf32> to vector<512xf32>
    %536 = vector.shape_cast %535 : vector<512xf32> to vector<1x512xf32>
    %537 = vector.broadcast %536 : vector<1x512xf32> to vector<16x512xf32>
    %538 = arith.mulf %533, %537 : vector<16x512xf32>
    %539 = arith.addf %532, %538 : vector<16x512xf32>
    %c9_305 = arith.constant 9 : index
    %c0_306 = arith.constant 0 : index
    %540 = vector.load %arg13[%c9_305, %c0_306] : memref<40x512xf32, #tpu.memory_space<vmem>>, vector<16x512xf32>
    %c27 = arith.constant 27 : index
    %c0_307 = arith.constant 0 : index
    %541 = vector.load %arg4[%c27, %c0_307] : memref<49x512xf32, #tpu.memory_space<vmem>>, vector<1x512xf32>
    %542 = vector.shape_cast %541 : vector<1x512xf32> to vector<512xf32>
    %543 = vector.shape_cast %542 : vector<512xf32> to vector<1x512xf32>
    %544 = vector.broadcast %543 : vector<1x512xf32> to vector<16x512xf32>
    %545 = arith.mulf %540, %544 : vector<16x512xf32>
    %546 = arith.addf %539, %545 : vector<16x512xf32>
    %c12_308 = arith.constant 12 : index
    %c0_309 = arith.constant 0 : index
    %547 = vector.load %arg13[%c12_308, %c0_309] : memref<40x512xf32, #tpu.memory_space<vmem>>, vector<16x512xf32>
    %c34 = arith.constant 34 : index
    %c0_310 = arith.constant 0 : index
    %548 = vector.load %arg4[%c34, %c0_310] : memref<49x512xf32, #tpu.memory_space<vmem>>, vector<1x512xf32>
    %549 = vector.shape_cast %548 : vector<1x512xf32> to vector<512xf32>
    %550 = vector.shape_cast %549 : vector<512xf32> to vector<1x512xf32>
    %551 = vector.broadcast %550 : vector<1x512xf32> to vector<16x512xf32>
    %552 = arith.mulf %547, %551 : vector<16x512xf32>
    %553 = arith.addf %546, %552 : vector<16x512xf32>
    %c15_311 = arith.constant 15 : index
    %c0_312 = arith.constant 0 : index
    %554 = vector.load %arg13[%c15_311, %c0_312] : memref<40x512xf32, #tpu.memory_space<vmem>>, vector<16x512xf32>
    %c41 = arith.constant 41 : index
    %c0_313 = arith.constant 0 : index
    %555 = vector.load %arg4[%c41, %c0_313] : memref<49x512xf32, #tpu.memory_space<vmem>>, vector<1x512xf32>
    %556 = vector.shape_cast %555 : vector<1x512xf32> to vector<512xf32>
    %557 = vector.shape_cast %556 : vector<512xf32> to vector<1x512xf32>
    %558 = vector.broadcast %557 : vector<1x512xf32> to vector<16x512xf32>
    %559 = arith.mulf %554, %558 : vector<16x512xf32>
    %560 = arith.addf %553, %559 : vector<16x512xf32>
    %c18_314 = arith.constant 18 : index
    %c0_315 = arith.constant 0 : index
    %561 = vector.load %arg13[%c18_314, %c0_315] : memref<40x512xf32, #tpu.memory_space<vmem>>, vector<16x512xf32>
    %c48 = arith.constant 48 : index
    %c0_316 = arith.constant 0 : index
    %562 = vector.load %arg4[%c48, %c0_316] : memref<49x512xf32, #tpu.memory_space<vmem>>, vector<1x512xf32>
    %563 = vector.shape_cast %562 : vector<1x512xf32> to vector<512xf32>
    %564 = vector.shape_cast %563 : vector<512xf32> to vector<1x512xf32>
    %565 = vector.broadcast %564 : vector<1x512xf32> to vector<16x512xf32>
    %566 = arith.mulf %561, %565 : vector<16x512xf32>
    %567 = arith.addf %560, %566 : vector<16x512xf32>
    %568 = arith.truncf %567 : vector<16x512xf32> to vector<16x512xbf16>
    %c0_317 = arith.constant 0 : index
    %c0_318 = arith.constant 0 : index
    %569 = vector.load %arg6[%c0_317, %c0_318] : memref<512x512xbf16, #tpu.memory_space<vmem>>, vector<512x512xbf16>
    %cst_319 = arith.constant dense<0.000000e+00> : vector<16x512xf32>
    %570 = tpu.matmul %568, %569, %cst_319 {dimension_numbers = #tpu.dot_dimension_numbers<[1], [0], [0], [1], [0, 0, 1, 1], [], []>} : vector<16x512xbf16>, vector<512x512xbf16>, vector<16x512xf32> -> vector<16x512xf32>
    %c0_320 = arith.constant 0 : index
    %c0_321 = arith.constant 0 : index
    %571 = vector.load %arg7[%c0_320, %c0_321] : memref<1x512xf32, #tpu.memory_space<vmem>>, vector<1x512xf32>
    %572 = vector.broadcast %571 : vector<1x512xf32> to vector<16x512xf32>
    %573 = arith.addf %570, %572 : vector<16x512xf32>
    %c0_322 = arith.constant 0 : index
    %c0_323 = arith.constant 0 : index
    %c0_324 = arith.constant 0 : index
    %574 = vector.load %arg1[%c0_322, %c0_323, %c0_324] : memref<1x16x512xf32, #tpu.memory_space<vmem>>, vector<1x16x512xf32>
    %575 = vector.shape_cast %574 : vector<1x16x512xf32> to vector<16x512xf32>
    %c0_325 = arith.constant 0 : index
    %c0_326 = arith.constant 0 : index
    %576 = vector.load %arg8[%c0_325, %c0_326] : memref<512x8xf32, #tpu.memory_space<vmem>>, vector<512x8xf32>
    %cst_327 = arith.constant dense<0.000000e+00> : vector<16x8xf32>
    %577 = tpu.matmul %575, %576, %cst_327 {dimension_numbers = #tpu.dot_dimension_numbers<[1], [0], [0], [1], [0, 0, 1, 1], [], []>} : vector<16x512xf32>, vector<512x8xf32>, vector<16x8xf32> -> vector<16x8xf32>
    %cst_328 = arith.constant dense<0.000000e+00> : vector<8xf32>
    %578 = vector.multi_reduction <add>, %577, %cst_328 [0] : vector<16x8xf32> to vector<8xf32>
    %579 = vector.shape_cast %578 : vector<8xf32> to vector<1x8xf32>
    %cst_329 = arith.constant 0.000000e+00 : f32
    %580 = vector.broadcast %cst_329 : f32 to vector<1x8xf32>
    %581 = arith.maximumf %579, %580 : vector<1x8xf32>
    %c0_330 = arith.constant 0 : index
    %c0_331 = arith.constant 0 : index
    %582 = vector.load %arg9[%c0_330, %c0_331] : memref<8x512xf32, #tpu.memory_space<vmem>>, vector<8x512xf32>
    %cst_332 = arith.constant dense<0.000000e+00> : vector<1x512xf32>
    %583 = tpu.matmul %581, %582, %cst_332 {dimension_numbers = #tpu.dot_dimension_numbers<[1], [0], [0], [1], [0, 0, 1, 1], [], []>} : vector<1x8xf32>, vector<8x512xf32>, vector<1x512xf32> -> vector<1x512xf32>
    %584 = arith.negf %583 : vector<1x512xf32>
    %585 = math.exp %584 : vector<1x512xf32>
    %cst_333 = arith.constant 1.000000e+00 : f32
    %586 = vector.broadcast %cst_333 : f32 to vector<1x512xf32>
    %587 = arith.addf %586, %585 : vector<1x512xf32>
    %588 = arith.divf %586, %587 : vector<1x512xf32>
    %589 = vector.broadcast %588 : vector<1x512xf32> to vector<16x512xf32>
    %590 = arith.mulf %589, %573 : vector<16x512xf32>
    %591 = arith.mulf %590, %575 : vector<16x512xf32>
    %c0_334 = arith.constant 0 : index
    %c0_335 = arith.constant 0 : index
    %c0_336 = arith.constant 0 : index
    %592 = vector.load %arg10[%c0_334, %c0_335, %c0_336] : memref<1x16x512xf32, #tpu.memory_space<vmem>>, vector<1x16x512xf32>
    %593 = vector.shape_cast %592 : vector<1x16x512xf32> to vector<16x512xf32>
    %594 = vector.shape_cast %591 : vector<16x512xf32> to vector<1x16x512xf32>
    tpu.vector_store %arg10[%c0_334, %c0_335, %c0_336], %594 {strides = array<i32>} : memref<1x16x512xf32, #tpu.memory_space<vmem>>, vector<1x16x512xf32>,
    return
  }
  func.func @transform_0(%arg0: i32) -> (i32, i32, i32) {
    %c0_i32 = arith.constant 0 : i32
    %c0_i32_0 = arith.constant 0 : i32
    %c0_i32_1 = arith.constant 0 : i32
    return %arg0, %c0_i32, %c0_i32_0 : i32, i32, i32
  }
  func.func @transform_1(%arg0: i32) -> (i32, i32) {
    %c0_i32 = arith.constant 0 : i32
    %c0_i32_0 = arith.constant 0 : i32
    %c0_i32_1 = arith.constant 0 : i32
    return %c0_i32, %c0_i32_0 : i32, i32
  }
  func.func @transform_2(%arg0: i32) -> (i32, i32) {
    %c0_i32 = arith.constant 0 : i32
    %c0_i32_0 = arith.constant 0 : i32
    %c0_i32_1 = arith.constant 0 : i32
    return %c0_i32, %c0_i32_0 : i32, i32
  }
  func.func @transform_3(%arg0: i32) -> (i32, i32) {
    %c0_i32 = arith.constant 0 : i32
    %c0_i32_0 = arith.constant 0 : i32
    %c0_i32_1 = arith.constant 0 : i32
    return %c0_i32, %c0_i32_0 : i32, i32
  }
  func.func @transform_4(%arg0: i32) -> (i32, i32) {
    %c0_i32 = arith.constant 0 : i32
    %c0_i32_0 = arith.constant 0 : i32
    %c0_i32_1 = arith.constant 0 : i32
    return %c0_i32, %c0_i32_0 : i32, i32
  }
  func.func @transform_5(%arg0: i32) -> (i32, i32) {
    %c0_i32 = arith.constant 0 : i32
    %c0_i32_0 = arith.constant 0 : i32
    %c0_i32_1 = arith.constant 0 : i32
    return %c0_i32, %c0_i32_0 : i32, i32
  }
  func.func @transform_6(%arg0: i32) -> (i32, i32) {
    %c0_i32 = arith.constant 0 : i32
    %c0_i32_0 = arith.constant 0 : i32
    %c0_i32_1 = arith.constant 0 : i32
    return %c0_i32, %c0_i32_0 : i32, i32
  }
  func.func @transform_7(%arg0: i32) -> (i32, i32) {
    %c0_i32 = arith.constant 0 : i32
    %c0_i32_0 = arith.constant 0 : i32
    %c0_i32_1 = arith.constant 0 : i32
    return %c0_i32, %c0_i32_0 : i32, i32
  }
  func.func @transform_8(%arg0: i32) -> (i32, i32) {
    %c0_i32 = arith.constant 0 : i32
    %c0_i32_0 = arith.constant 0 : i32
    %c0_i32_1 = arith.constant 0 : i32
    return %c0_i32, %c0_i32_0 : i32, i32
  }
  func.func @transform_9(%arg0: i32) -> (i32, i32, i32) {
    %c0_i32 = arith.constant 0 : i32
    %c0_i32_0 = arith.constant 0 : i32
    %c0_i32_1 = arith.constant 0 : i32
    return %arg0, %c0_i32, %c0_i32_0 : i32, i32, i32
  }
}

</mosaic_0001>

<bundles_post_ra>
// kernel: temporal_attention.1
= control target key start
LH: loop header
LB: loop body
LE: loop exit
PB: predicated region body
PF: predicated region fallthrough
CT: control target
= control target key end

     0   :  { %14 = vsyncpa [#allocation6], 0  ;;  %s11109_s30 = smov 0   ;;  %s17889_s0 = inlined_call_operand.vmem [shape: f32[2,16,512], index: 0, kind: input, shape index: {}]   ;;  %s17890_s1 = inlined_call_operand.vmem [shape: f32[25,512], index: 1, kind: input, shape index: {}]   ;;  %s17891_s2 = inlined_call_operand.vmem [shape: f32[1,512], index: 2, kind: input, shape index: {}]   ;;  %s17892_s3 = inlined_call_operand.hbm [shape: f32[49,512], index: 3, kind: input, shape index: {}]   ;;  %s17893_s4 = inlined_call_operand.vmem [shape: f32[1,512], index: 4, kind: input, shape index: {}]   ;;  %s17894_s5 = inlined_call_operand.vmem [shape: bf16[512,512], index: 5, kind: input, shape index: {}]   ;;  %s17895_s6 = inlined_call_operand.vmem [shape: f32[1,512], index: 6, kind: input, shape index: {}]   ;;  %s17896_s7 = inlined_call_operand.vmem [shape: f32[512,8], index: 7, kind: input, shape index: {}]   ;;  %s17897_s8 = inlined_call_operand.vmem [shape: f32[8,512], index: 8, kind: input, shape index: {}]   ;;  %s17898_s9 = inlined_call_operand.vmem [shape: f32[2,16,512], index: 9, kind: output, shape index: {}]  }
   0x1 LB: > { %s11115_s10 = sadd.s32 4294967295, %s11050_s30   ;;  %p10366_p0 = scmp.ge.s32.totalorder %s11050_s30, 1  ;;  %s11050_s30 = sphi %s11109_s30, %s20_s30  }
   0x2   : > { %p245_p1 = scmp.lt.s32.totalorder %s11050_s30, 3  ;;  %s11052_s11 = smov [#allocation5]  }
   0x3   : > { %s263_s12 = sshll.u32 %s11052_s11, 4  ;;  %p17899_p3 = scmp.eq.s32.totalorder %s11115_s10, 0  ;;  %s264_s12 = int_to_ptr.vmem [resolvable:$true] %s263_s12 }
   0x4   : > { %p11119_p2 = pnand %p10366_p0, %p245_p1  ;;  %s11012_s17 = scalar_lea.hbm %s17892_s3, 3584 }
   0x5   : > { %p11013_p6 = scmp.ne.s32.totalorder %s17892_s3, %s11012_s17  ;;  %p11019_p10 = scmp.lt.u32.totalorder %s11012_s17, %s17892_s3 }
   0x6   : > { %s18229_s13 = scalar_select %p11119_p2, 1, 0 }
   0x7   : > { %p10697_p4 = pneg %p11119_p2 }
   0x9   : > { %p11128_p5 = pnand %p17899_p3, %p10697_p4 }
   0xb   : > { %p11014_p7 = pneg %p11128_p5 }
   0xd   : > { %p11015_p8 = pnand %p11014_p7, %p11013_p6 }
   0xf   : > { %p11016_p9 = pneg %p11015_p8 }
  0x11   : > { %p11021_p11 = pnand %p11019_p10, %p11016_p9 }
  0x13   : > { %11024 = shalt.err (!%p11021_p11)
}
  0x14   : > { %s11025_s22 = scalar_lea.vmem %s264_s12, 3584  ;;  %p11033_p1 = scmp.lt.s32.totalorder %s264_s12, %s264_s12 }
  0x15   : > { %p11026_p12 = scmp.ne.s32.totalorder %s264_s12, %s11025_s22  ;;  %p11034_p4 = scmp.lt.s32.totalorder %s11025_s22, %s11025_s22 }
  0x17   : > { %p11028_p13 = pnand %p11026_p12, %p11014_p7  ;;  %p11035_p3 = por %p11034_p4, %p11033_p1 }
  0x19   : > { %p11029_p0 = pneg %p11028_p13 }
  0x1b   : > { %p11036_p2 = pnand %p11035_p3, %p11029_p0 }
  0x1d   : > { %11039 = shalt.err (!%p11036_p2)
}
  0x1e   : > { %s11053_s23 = smov 512   ;;  %s11054_s24 = smov 32  }
  0x1f   : > { %10700 = dma.hbm_to_vmem [thread:$0]  (!%p11128_p5), %s17892_s3, 3584, %s264_s12, [#allocation6], %s11053_s23, %s11053_s23, %s11054_s24  }
  0x20   : > { %p18231_p6 = scmp.ne.s32.totalorder %s18229_s13, 0 }
  0x22   : > { %302 = sbr.rel (%p18231_p6) target bundleno = 1596 (0x63c), region = 56 }
  0x29   : > { %p18232_p8 = scmp.eq.s32.totalorder %s11115_s10, 0 }
  0x2b   : > { %11045 = dma.done.wait (%p18232_p8), [#allocation6], 3584   ;;  %p18233_p7 = pmov %p18232_p8 }
  0x2c   : > { %vm360_vm0 = vcmask 1048064   ;;  %v11055_v0 = vmov 0.0   ;;  %p338_p2 = scmp.lt.s32.totalorder %s11115_s10, 1  ;;  %vm363_vm1 = vcmask 523264   ;;  %vm406_vm2 = vcmask 1048320   ;;  %s11056_s12 = smov 64  }
  0x2d   : > { %11047 = vsyncadd (%p18233_p7), [#allocation6], 4294963712  ;;  %348 = vst [vmem:[#allocation2] sm:$0xc0] %v11055_v0  ;;  %vm498_vm3 = vcmask 1041408   ;;  %s11057_s13 = smov 32  }
  0x2e   : > { %361 = vst.msk [vmem:[#allocation2 + $0x30] sm:$0xff] %vm360_vm0, %v11055_v0  ;;  %349 = vst [vmem:[#allocation2 + $0x8] sm:$0xc0] %v11055_v0  ;;  %s18990_s10 = smov (!%p338_p2, %s11115_s10), 1  ;;  %vm415_vm4 = vcmask 261120   ;;  %s11058_s14 = smov 96  }
  0x2f   : > { %350 = vst [vmem:[#allocation2 + $0x10] sm:$0xc0] %v11055_v0  ;;  %351 = vst [vmem:[#allocation2 + $0x18] sm:$0xc0] %v11055_v0  ;;  %s10535_s27 = sshll.u32 %s18990_s10, 6  ;;  %vm3256_vm5 = vcmask 1040384  }
  0x30   : > { %352 = vst [vmem:[#allocation2 + $0x20] sm:$0xc0] %v11055_v0  ;;  %353 = vst [vmem:[#allocation2 + $0x28] sm:$0xc0] %v11055_v0  ;;  %s11203_s11 = scalar_lea.vmem %s17889_s0, %s10535_s27  ;;  %vm701_vm6 = vcmask 1046528   ;;  %vm793_vm7 = vcmask 1045504   ;;  %s347_s21 = scalar_lea.vmem %s17898_s9, %s10535_s27 }
  0x31   : > { %354 = vst [vmem:[#allocation2 + $0x90] sm:$0x3] %v11055_v0  ;;  %355 = vst [vmem:[#allocation2 + $0x98] sm:$0x3] %v11055_v0  ;;  %v420_v1 = vld [vmem:[%s11203_s11] sm:$0xff]  ;;  %v421_v3 = vld [vmem:[%s11203_s11 + $0x8] sm:$0xff] }
  0x32   : > { %356 = vst [vmem:[#allocation2 + $0xa0] sm:$0x3] %v11055_v0  ;;  %357 = vst [vmem:[#allocation2 + $0xa8] sm:$0x3] %v11055_v0  ;;  %v424_v2 = vld [vmem:[%s11203_s11 + $0x20] sm:$0xff]  ;;  %v11210_v7 = vrot.slane %v420_v1, 6 }
  0x33   : > { %358 = vst [vmem:[#allocation2 + $0xb0] sm:$0x3] %v11055_v0  ;;  %359 = vst [vmem:[#allocation2 + $0xb8] sm:$0x3] %v11055_v0  ;;  %v11212_v12 = vrot.slane %v424_v2, 6  ;;  %v425_v16 = vld [vmem:[%s11203_s11 + $0x28] sm:$0xff] }
  0x34   : > { %362 = vst.msk [vmem:[#allocation2 + $0x60] sm:$0xff] %vm360_vm0, %v11055_v0  ;;  %366 = vst [vmem:[#allocation3] sm:$0x80] %v11055_v0  ;;  %v458_v4 = vld [vmem:[#allocation2] sm:$0xc0]  ;;  %v11232_v28 = vld [vmem:[%s11203_s11 + $0x10] sm:$0xff] }
  0x35   : > { %367 = vst [vmem:[#allocation3 + $0x8] sm:$0x80] %v11055_v0  ;;  %368 = vst [vmem:[#allocation3 + $0x10] sm:$0x80] %v11055_v0  ;;  %v463_v5 = vld [vmem:[#allocation2 + $0x30] sm:$0xff]  ;;  %v499_v8 = vrot.slane %v458_v4, 6  ;;  %v11223_v20 = vsel %vm498_vm3, %v11210_v7, %v11212_v12 }
  0x36   : > { %369 = vst [vmem:[#allocation3 + $0x18] sm:$0x80] %v11055_v0  ;;  %370 = vst [vmem:[#allocation3 + $0x20] sm:$0x80] %v11055_v0  ;;  %v500_v9 = vrot.slane %v463_v5, 6  ;;  %v11235_v29 = vld [vmem:[%s11203_s11 + $0x30] sm:$0xff] }
  0x37   : > { %371 = vst [vmem:[#allocation3 + $0x28] sm:$0x80] %v11055_v0  ;;  %372 = vst [vmem:[#allocation3 + $0x30] sm:$0x80] %v11055_v0  ;;  %v1014_v14 = vld [vmem:[#allocation2] sm:$0xc0] }
  0x38   : > { %373 = vst [vmem:[#allocation3 + $0x38] sm:$0x80] %v11055_v0  ;;  %374 = vst [vmem:[#allocation3 + $0x40] sm:$0x80] %v11055_v0  ;;  %v473_v11 = vld [vmem:[#allocation2 + $0x90] sm:$0x3]  ;;  %v501_v17 = vsel %vm498_vm3, %v499_v8, %v500_v9 }
  0x39   : > { %375 = vst [vmem:[#allocation3 + $0x48] sm:$0x80] %v11055_v0  ;;  %376 = vst [vmem:[#allocation3 + $0x50] sm:$0xff] %v11055_v0  ;;  %v524_v13 = vrot.slane %v473_v11, 6  ;;  %v474_v15 = vld [vmem:[#allocation2 + $0x98] sm:$0x3]  ;;  %534 = vrot.lane.b32.xlu0 %v501_v17, %s11056_s12 }
  0x3a   : > { %396 = vst [vmem:[#allocation3 + $0x190] sm:$0x1] %v11055_v0  ;;  %397 = vst [vmem:[#allocation3 + $0x198] sm:$0x1] %v11055_v0  ;;  %v1054_v21 = vrot.slane %v1014_v14, 6  ;;  %v526_v22 = vrot.slane %v474_v15, 6 }
  0x3b   : > { %398 = vst [vmem:[#allocation3 + $0x1a0] sm:$0x1] %v11055_v0  ;;  %399 = vst [vmem:[#allocation3 + $0x1a8] sm:$0x1] %v11055_v0  ;;  %v468_v6 = vld [vmem:[#allocation2 + $0x60] sm:$0xff]  ;;  %v423_v34 = vld [vmem:[%s11203_s11 + $0x18] sm:$0xff] }
  0x3c   : > { %400 = vst [vmem:[#allocation3 + $0x1b0] sm:$0x1] %v11055_v0  ;;  %401 = vst [vmem:[#allocation3 + $0x1b8] sm:$0x1] %v11055_v0  ;;  %v514_v10 = vrot.slane %v468_v6, 6  ;;  %v1056_v24 = vsel %vm498_vm3, %v1054_v21, %v500_v9  ;;  %v527_v25 = vsel %vm498_vm3, %v11212_v12, %v526_v22  ;;  %v427_v35 = vld [vmem:[%s11203_s11 + $0x38] sm:$0xff] }
  0x3d   : > { %402 = vst [vmem:[#allocation3 + $0x1c0] sm:$0x1] %v11055_v0  ;;  %403 = vst [vmem:[#allocation3 + $0x1c8] sm:$0x1] %v11055_v0  ;;  %v1015_v23 = vld [vmem:[#allocation2 + $0x8] sm:$0xc0] }
  0x3e   : > { %404 = vst [vmem:[#allocation3 + $0x1d0] sm:$0x1] %v11055_v0  ;;  %405 = vst [vmem:[#allocation3 + $0x1d8] sm:$0x1] %v11055_v0  ;;  %v515_v18 = vsel %vm498_vm3, %v500_v9, %v514_v10  ;;  %v525_v19 = vsel %vm498_vm3, %v514_v10, %v524_v13  ;;  %v1057_v26 = vrot.slane %v1015_v23, 6  ;;  %v11249_v40 = vrot.slane %v423_v34, 6 }
  0x3f   : > { %364 = vst.msk [vmem:[#allocation2 + $0x58] sm:$0xff] %vm363_vm1, %v11055_v0  ;;  %365 = vst.msk [vmem:[#allocation2 + $0x88] sm:$0xff] %vm363_vm1, %v11055_v0  ;;  %544 = vrot.lane.b32.xlu1 %v515_v18, %s11056_s12  ;;  %554 = vrot.lane.b32.xlu0 %v525_v19, %s11056_s12  ;;  %v459_v27 = vld [vmem:[#allocation2 + $0x8] sm:$0xc0]  ;;  %v1029_v32 = vld [vmem:[#allocation2 + $0x90] sm:$0x3] }
  0x40   : > { %407 = vst.msk [vmem:[#allocation3 + $0xa0] sm:$0xff] %vm406_vm2, %v11055_v0  ;;  %410 = vst.msk [vmem:[#allocation3 + $0xf0] sm:$0xff] %vm406_vm2, %v11055_v0  ;;  %v1059_v30 = vsel %vm498_vm3, %v1057_v26, %v11210_v7  ;;  %v502_v31 = vrot.slane %v459_v27, 6  ;;  %v1030_v33 = vld [vmem:[#allocation2 + $0x98] sm:$0x3]  ;;  %v1079_v37 = vrot.slane %v1029_v32, 6 }
  0x41   : > { %428 = vst [vmem:[#allocation2 + $0x38] sm:$0xff] %v420_v1  ;;  %432 = vst [vmem:[#allocation2 + $0x68] sm:$0xff] %v424_v2  ;;  %v1081_v38 = vrot.slane %v1030_v33, 6  ;;  %v460_v39 = vld [vmem:[#allocation2 + $0x10] sm:$0xc0]  ;;  %v11251_v41 = vrot.slane %v427_v35, 6 }
  0x42   : > { %429 = vst [vmem:[#allocation2 + $0x40] sm:$0xff] %v421_v3  ;;  %433 = vst [vmem:[#allocation2 + $0x70] sm:$0xff] %v425_v16  ;;  %v504_v36 = vsel %vm498_vm3, %v502_v31, %v11210_v7  ;;  %v506_v42 = vrot.slane %v421_v3, 6  ;;  %v1080_v44 = vsel %vm498_vm3, %v514_v10, %v1079_v37  ;;  %v505_v46 = vrot.slane %v460_v39, 6  ;;  %v475_v48 = vld [vmem:[#allocation2 + $0xa0] sm:$0x3] }
  0x43   : > { %546 = vrot.lane.b32.xlu1 %v11223_v20, %s11056_s12  ;;  %1089 = vrot.lane.b32.xlu0 %v1056_v24, %s11057_s13  ;;  %430 = vst [vmem:[#allocation2 + $0x48] sm:$0xff] %v11232_v28  ;;  %434 = vst [vmem:[#allocation2 + $0x78] sm:$0xff] %v11235_v29  ;;  %v11259_v43 = vsel %vm498_vm3, %v11249_v40, %v11251_v41  ;;  %v1082_v45 = vsel %vm498_vm3, %v11212_v12, %v1081_v38  ;;  %v11264_v47 = vrot.slane %v425_v16, 6  ;;  %v1016_v49 = vld [vmem:[#allocation2 + $0x10] sm:$0xc0]  ;;  %vm885_vm8 = vcmask 1044480  }
  0x44   : > { %431 = vst [vmem:[#allocation2 + $0x50] sm:$0xff] %v423_v34  ;;  %435 = vst [vmem:[#allocation2 + $0x80] sm:$0xff] %v427_v35  ;;  %v507_v50 = vsel %vm498_vm3, %v505_v46, %v506_v42  ;;  %v528_v52 = vrot.slane %v475_v48, 6  ;;  %v1060_v53 = vrot.slane %v1016_v49, 6  ;;  %v1031_v54 = vld [vmem:[#allocation2 + $0xa0] sm:$0x3] }
  0x45   : > { %v519_v51 = vsel %vm498_vm3, %v506_v42, %v11264_v47  ;;  %416 = vst.msk [vmem:[#allocation3 + $0xe8] sm:$0xff] %vm415_vm4, %v11055_v0  ;;  %419 = vst.msk [vmem:[#allocation3 + $0x138] sm:$0xff] %vm415_vm4, %v11055_v0  ;;  %v1083_v57 = vrot.slane %v1031_v54, 6  ;;  %v2061_v58 = vld [vmem:[#allocation2 + $0x8] sm:$0xc0]  ;;  %v509_v33 = vrot.slane %v11232_v28, 6 }
  0x46   : > { %v529_v55 = vsel %vm498_vm3, %v11264_v47, %v528_v52  ;;  %v1062_v56 = vsel %vm498_vm3, %v1060_v53, %v506_v42  ;;  %v2062_v59 = vld [vmem:[#allocation2 + $0x10] sm:$0xc0]  ;;  %v2101_v61 = vrot.slane %v2061_v58, 6  ;;  %v2076_v6 = vld [vmem:[#allocation2 + $0x98] sm:$0x3]  ;;  %v520_v34 = vrot.slane %v11235_v29, 6 }
  0x47   : > { %556 = vrot.lane.b32.xlu1 %v527_v25, %s11056_s12  ;;  %1099 = vrot.lane.b32.xlu0 %v515_v18, %s11057_s13  ;;  %v1084_v60 = vsel %vm498_vm3, %v11264_v47, %v1083_v57  ;;  %v2104_v62 = vrot.slane %v2062_v59, 6  ;;  %v2077_v8 = vld [vmem:[#allocation2 + $0xa0] sm:$0x3]  ;;  %v2614_v10 = vld [vmem:[#allocation2 + $0x8] sm:$0xc0]  ;;  %v2126_v13 = vrot.slane %v2076_v6, 6 }
  0x48   : > { %v11284_v63 = vld [vmem:[#allocation2 + $0x38] sm:$0xff]  ;;  %v11286_v1 = vld [vmem:[#allocation2 + $0x68] sm:$0xff]  ;;  %v2103_v4 = vsel %vm498_vm3, %v2101_v61, %v11210_v7  ;;  %v2615_v11 = vld [vmem:[#allocation2 + $0x10] sm:$0xc0]  ;;  %v2128_v14 = vrot.slane %v2077_v8, 6  ;;  %v2654_v17 = vrot.slane %v2614_v10, 6 }
  0x49   : > { %v17904_v2 = vrot.slane %v11284_v63, 6  ;;  %v17903_v3 = vrot.slane %v11286_v1, 6  ;;  %v2106_v5 = vsel %vm498_vm3, %v2104_v62, %v506_v42  ;;  %v2127_v15 = vsel %vm498_vm3, %v11212_v12, %v2126_v13  ;;  %v2629_v19 = vld [vmem:[#allocation2 + $0x98] sm:$0x3]  ;;  %v2630_v21 = vld [vmem:[#allocation2 + $0xa0] sm:$0x3] }
  0x4a   : > { %v2129_v16 = vsel %vm498_vm3, %v11264_v47, %v2128_v14  ;;  %v2657_v18 = vrot.slane %v2615_v11, 6  ;;  %v2656_v22 = vsel %vm498_vm3, %v2654_v17, %v11210_v7  ;;  %v2679_v24 = vrot.slane %v2629_v19, 6  ;;  %v461_v26 = vld [vmem:[#allocation2 + $0x18] sm:$0xc0]  ;;  %v462_v52 = vld [vmem:[#allocation2 + $0x20] sm:$0xc0] }
  0x4b   : > { %1091 = vrot.lane.b32.xlu1 %v1059_v30, %s11057_s13  ;;  %536 = vrot.lane.b32.xlu0 %v504_v36, %s11056_s12  ;;  %v11300_v9 = vsel %vm498_vm3, %v17904_v2, %v17903_v3  ;;  %v2681_v25 = vrot.slane %v2630_v21, 6  ;;  %v508_v27 = vrot.slane %v461_v26, 6  ;;  %v476_v30 = vld [vmem:[#allocation2 + $0xa8] sm:$0x3]  ;;  %v2063_v31 = vld [vmem:[#allocation2 + $0x18] sm:$0xc0]  ;;  %v521_v36 = vsel %vm498_vm3, %v509_v33, %v520_v34 }
  0x4c   : > { %v2659_v23 = vsel %vm498_vm3, %v2657_v18, %v506_v42  ;;  %v2680_v7 = vsel %vm498_vm3, %v11212_v12, %v2679_v24  ;;  %v530_v37 = vrot.slane %v476_v30, 6  ;;  %v2107_v38 = vrot.slane %v2063_v31, 6  ;;  %v1017_v12 = vld [vmem:[#allocation2 + $0x18] sm:$0xc0]  ;;  %v1032_v42 = vld [vmem:[#allocation2 + $0xa8] sm:$0x3] }
  0x4d   : > { %v2682_v32 = vsel %vm498_vm3, %v11264_v47, %v2681_v25  ;;  %v510_v35 = vsel %vm498_vm3, %v508_v27, %v509_v33  ;;  %v1063_v46 = vrot.slane %v1017_v12, 6  ;;  %v2631_v47 = vld [vmem:[#allocation2 + $0xa8] sm:$0x3]  ;;  %v1085_v49 = vrot.slane %v1032_v42, 6  ;;  %v477_v57 = vld [vmem:[#allocation2 + $0xb0] sm:$0x3] }
  0x4e   : > { %v531_v28 = vsel %vm498_vm3, %v520_v34, %v530_v37  ;;  %v2109_v29 = vsel %vm498_vm3, %v2107_v38, %v509_v33  ;;  %v511_v59 = vrot.slane %v462_v52, 6  ;;  %v11353_v62 = vld [vmem:[#allocation2 + $0x40] sm:$0xff]  ;;  %v1033_v11 = vld [vmem:[#allocation2 + $0xb0] sm:$0x3]  ;;  %v2065_v24 = vld [vmem:[#allocation2 + $0x28] sm:$0xc0] }
  0x4f   : > { %1101 = vrot.lane.b32.xlu1 %v11223_v20, %s11057_s13  ;;  %1109 = vrot.lane.b32.xlu0 %v1080_v44, %s11057_s13  ;;  %v2616_v44 = vld [vmem:[#allocation2 + $0x18] sm:$0xc0]  ;;  %v1065_v48 = vsel %vm498_vm3, %v1063_v46, %v509_v33  ;;  %v1086_v53 = vsel %vm498_vm3, %v520_v34, %v1085_v49  ;;  %v17902_v6 = vrot.slane %v11353_v62, 6  ;;  %v2064_v17 = vld [vmem:[#allocation2 + $0x20] sm:$0xc0]  ;;  %v2075_v26 = vld [vmem:[#allocation2 + $0x88] sm:$0xff] }
  0x50   : > { %v513_v14 = vsel %vm498_vm3, %v511_v59, %v11249_v40  ;;  %v2079_v19 = vld [vmem:[#allocation2 + $0xb0] sm:$0x3]  ;;  %v2617_v21 = vld [vmem:[#allocation2 + $0x20] sm:$0xc0]  ;;  %v2070_v25 = vld [vmem:[#allocation2 + $0x58] sm:$0xff]  ;;  %vm977_vm9 = vcmask 1043456  }
  0x51   : > { %v2080_v27 = vld [vmem:[#allocation2 + $0xb8] sm:$0x3]  ;;  %v2132_v37 = vrot.slane %v2079_v19, 6  ;;  %v2663_v38 = vrot.slane %v2617_v21, 6  ;;  %v3211_v49 = vld [vmem:[#allocation3 + $0xf0] sm:$0xff]  ;;  %vm2166_vm10 = vcmask 785408  }
  0x52   : > { %v2134_v42 = vrot.slane %v2080_v27, 6  ;;  %v3196_v52 = vld [vmem:[#allocation3] sm:$0x80]  ;;  %v11469_v21 = vld [vmem:[%s17890_s1 + $0x44] ss:$8 sm:$0xf] }
  0x53   : > { %1111 = vrot.lane.b32.xlu1 %v1082_v45, %s11057_s13  ;;  %538 = vrot.lane.b32.xlu0 %v507_v50, %s11056_s12  ;;  %v2660_v50 = vrot.slane %v2616_v44, 6  ;;  %v3206_v44 = vld [vmem:[#allocation3 + $0xa0] sm:$0xff]  ;;  %v4023_v2 = vld [vmem:[#allocation3 + $0x10] sm:$0x80]  ;;  %vm10073_vm11 = vcmask 64512  }
  0x54   : > { %v11432_v59 = vld [vmem:[%s17890_s1 + $0x7] ss:$8 sm:$0xf] }
  0x55   : > { %v2662_v54 = vsel %vm498_vm3, %v2660_v50, %v509_v33 }
  0x57   : > { %548 = vrot.lane.b32.xlu1 %v519_v51, %s11056_s12  ;;  %558 = vrot.lane.b32.xlu0 %v529_v55, %s11056_s12  ;;  %v2683_v55 = vrot.slane %v2631_v47, 6 }
  0x59   : > { %v2684_v58 = vsel %vm498_vm3, %v520_v34, %v2683_v55  ;;  %v2665_v55 = vsel %vm498_vm3, %v2663_v38, %v11249_v40 }
  0x5b   : > { %1093 = vrot.lane.b32.xlu1 %v1062_v56, %s11057_s13  ;;  %1103 = vrot.lane.b32.xlu0 %v519_v51, %s11057_s13 }
  0x5f   : > { %1113 = vrot.lane.b32.xlu1 %v1084_v60, %s11057_s13  ;;  %2136 = vrot.lane.b32.xlu0 %v2103_v4, %s11058_s14  ;;  %v1018_v60 = vld [vmem:[#allocation2 + $0x20] sm:$0xc0]  ;;  %v11355_v4 = vld [vmem:[#allocation2 + $0x70] sm:$0xff] }
  0x60   : > { %v17901_v8 = vrot.slane %v11355_v4, 6 }
  0x62   : > { %v11375_v13 = vsel %vm498_vm3, %v17902_v6, %v17901_v8 }
  0x63   : > { %2138 = vrot.lane.b32.xlu1 %v2106_v5, %s11058_s14  ;;  %2146 = vrot.lane.b32.xlu0 %v11223_v20, %s11058_s14  ;;  %v11360_v5 = vld [vmem:[%s17890_s1 + $0x2] ss:$8 sm:$0xf] }
  0x67   : > { %2148 = vrot.lane.b32.xlu1 %v519_v51, %s11058_s14  ;;  %2156 = vrot.lane.b32.xlu0 %v2127_v15, %s11058_s14  ;;  %v532_v15 = vrot.slane %v477_v57, 6  ;;  %v11422_v57 = vld [vmem:[%s17890_s1 + $0x5] ss:$8 sm:$0xf] }
  0x69   : > { %v533_v30 = vsel %vm498_vm3, %v11251_v41, %v532_v15 }
  0x6b   : > { %2158 = vrot.lane.b32.xlu1 %v2129_v16, %s11058_s14  ;;  %2689 = vrot.lane.b32.xlu0 %v2656_v22, %s11056_s12  ;;  %v1066_v16 = vrot.slane %v1018_v60, 6  ;;  %v2632_v22 = vld [vmem:[#allocation2 + $0xb0] sm:$0x3]  ;;  %v11437_v60 = vld [vmem:[%s17890_s1 + $0x24] ss:$8 sm:$0xf] }
  0x6c   : > { %v2685_v12 = vrot.slane %v2632_v22, 6  ;;  %v3257_v22 = vrot.slane %v3196_v52, 7 }
  0x6d   : > { %v1068_v31 = vsel %vm498_vm3, %v1066_v16, %v11249_v40  ;;  %v11453_v16 = vld [vmem:[%s17890_s1 + $0x27] ss:$8 sm:$0xf] }
  0x6f   : > { %2691 = vrot.lane.b32.xlu1 %v2659_v23, %s11056_s12  ;;  %2699 = vrot.lane.b32.xlu0 %v11223_v20, %s11056_s12  ;;  %v2078_v20 = vld [vmem:[#allocation2 + $0xa8] sm:$0x3]  ;;  %v1087_v23 = vrot.slane %v1033_v11, 6 }
  0x70   : > { %v2130_v39 = vrot.slane %v2078_v20, 6  ;;  %v2633_v20 = vld [vmem:[#allocation2 + $0xb8] sm:$0x3] }
  0x71   : > { %v2687_v46 = vrot.slane %v2633_v20, 6 }
  0x72   : > { %v2131_v45 = vsel %vm498_vm3, %v520_v34, %v2130_v39  ;;  %v2618_v34 = vld [vmem:[#allocation2 + $0x28] sm:$0xc0]  ;;  %v2124_v39 = vrot.slane %v2075_v26, 6 }
  0x73   : > { %2701 = vrot.lane.b32.xlu1 %v519_v51, %s11056_s12  ;;  %2709 = vrot.lane.b32.xlu0 %v2680_v7, %s11056_s12  ;;  %v438_v51 = vlaneseq  ;;  %v11391_v7 = vrot.slane %v11055_v0, 7  ;;  %v3198_v0 = vld [vmem:[#allocation3 + $0x10] sm:$0x80] }
  0x74   : > { %v3263_v50 = vrot.slane %v3198_v0, 7  ;;  %v11448_v15 = vsel %vm498_vm3, %v2124_v39, %v2134_v42  ;;  %v11464_v19 = vsel %vm498_vm3, %v2124_v39, %v2687_v46  ;;  %v1578_v46 = vld [vmem:[#allocation2 + $0x98] sm:$0x3] }
  0x75   : > { %v11345_v56 = vshrl.u32 %v438_v51, 7  ;;  %v11408_v51 = vld [vmem:[%s17890_s1] ss:$8 sm:$0xf] }
  0x76   : > { %v11505_v20 = vsel %vm3256_vm5, %v3263_v50, %v11391_v7 }
  0x77   : > { %2711 = vrot.lane.b32.xlu1 %v2682_v32, %s11056_s12  ;;  %540 = vrot.lane.b32.xlu0 %v510_v35, %s11056_s12  ;;  %v11351_v61 = vsub.s32 1, %v11345_v56  ;;  %v2110_v32 = vrot.slane %v2064_v17, 6  ;;  %v11394_v33 = vsub.s32 0, %v11345_v56  ;;  %v3197_v35 = vld [vmem:[#allocation3 + $0x8] sm:$0x80] }
  0x78   : > { %v3260_v47 = vrot.slane %v3197_v35, 7  ;;  %v11458_v17 = vld [vmem:[%s17890_s1 + $0x41] ss:$8 sm:$0xf] }
  0x79   : > { %18234 = vst [vmem:[#allocation8_spill] sm:$0xff] %v11351_v61  ;;  %v11366_v10 = vrot.slane %v11360_v5, %v11351_v61  ;;  %18236 = vst [vmem:[#allocation10_spill] sm:$0xff] %v11394_v33  ;;  %v11477_v26 = vrot.slane %v11432_v59, %v11394_v33  ;;  %v11481_v27 = vrot.slane %v11437_v60, %v11394_v33 }
  0x7a   : > { %v11509_v35 = vrot.slane %v11422_v57, %v11394_v33  ;;  %v11521_v38 = vrot.slane %v11469_v21, %v11394_v33  ;;  %v11558_v52 = vrot.slane %v11408_v51, %v11351_v61  ;;  %v11589_v6 = vrot.slane %v11453_v16, %v11351_v61 }
  0x7b   : > { %550 = vrot.lane.b32.xlu1 %v521_v36, %s11056_s12  ;;  %560 = vrot.lane.b32.xlu0 %v531_v28, %s11056_s12  ;;  %v11381_v18 = vmul.f32 %v11366_v10, %v11375_v13  ;;  %v2113_v28 = vrot.slane %v2065_v24, 6  ;;  %18237 = vst [vmem:[#allocation11_spill] sm:$0xff] %v11477_v26  ;;  %18238 = vst [vmem:[#allocation12_spill] sm:$0xff] %v11481_v27 }
  0x7c   : > { %18246 = vst [vmem:[#allocation20_spill] sm:$0xff] %v11558_v52  ;;  %18251 = vst [vmem:[#allocation25_spill] sm:$0xff] %v11589_v6 }
  0x7d   : > { %18235 = vst [vmem:[#allocation9_spill] sm:$0xff] %v11381_v18  ;;  %v4024_v18 = vld [vmem:[#allocation3 + $0x18] sm:$0x80] }
  0x7e   : > { %v4088_v52 = vrot.slane %v4024_v18, 7  ;;  %v11641_v18 = vld [vmem:[%s17890_s1 + $0x20] ss:$8 sm:$0xf] }
  0x7f   : > { %2140 = vrot.lane.b32.xlu1 %v2109_v29, %s11058_s14  ;;  %2150 = vrot.lane.b32.xlu0 %v521_v36, %s11058_s14  ;;  %v2114_v29 = vrot.slane %v2070_v25, 6  ;;  %v3282_v25 = vrot.slane %v3211_v49, 7  ;;  %v11548_v49 = vmul.f32 %v11481_v27, %v11300_v9 }
  0x81   : > { %v11442_v11 = vsel %vm498_vm3, %v2113_v28, %v2114_v29  ;;  %v3222_v28 = vld [vmem:[#allocation3 + $0x198] sm:$0x1]  ;;  %v11540_v42 = vsel %vm3256_vm5, %v3282_v25, %v11391_v7  ;;  %18244 = vst [vmem:[#allocation18_spill] sm:$0xff] %v11548_v49 }
  0x82   : > { %18242 = vst [vmem:[#allocation16_spill] sm:$0xff] %v11540_v42  ;;  %v3304_v3 = vrot.slane %v3222_v28, 7  ;;  %v1664_v28 = vrot.slane %v11360_v5, %v11394_v33  ;;  %v11620_v5 = vld [vmem:[%s17890_s1 + $0x3] ss:$8 sm:$0xf] }
  0x83   : > { %2160 = vrot.lane.b32.xlu1 %v2131_v45, %s11058_s14  ;;  %1095 = vrot.lane.b32.xlu0 %v1065_v48, %s11057_s13  ;;  %v2666_v45 = vrot.slane %v2618_v34, 6  ;;  %v11403_v48 = vld [vmem:[%s17891_s2] sm:$0xf]  ;;  %v11501_v34 = vrot.slane %v11458_v17, %v11394_v33 }
  0x84   : > { %v11473_v24 = vrot.slane %v11403_v48, %v11394_v33  ;;  %v11554_v50 = vrot.slane %v11403_v48, %v11351_v61 }
  0x85   : > { %18239 = vst [vmem:[#allocation13_spill] sm:$0xff] %v11501_v34 }
  0x86   : > { %18245 = vst [vmem:[#allocation19_spill] sm:$0xff] %v11554_v50  ;;  %v1618_v50 = vrot.slane %v1578_v46, 6  ;;  %v11651_v46 = vld [vmem:[%s17890_s1 + $0x42] ss:$8 sm:$0xf] }
  0x87   : > { %1105 = vrot.lane.b32.xlu1 %v521_v36, %s11057_s13  ;;  %1115 = vrot.lane.b32.xlu0 %v1086_v53, %s11057_s13  ;;  %v2112_v53 = vsel %vm498_vm3, %v2110_v32, %v11249_v40  ;;  %v2686_v40 = vsel %vm498_vm3, %v11251_v41, %v2685_v12  ;;  %v11497_v32 = vrot.slane %v11408_v51, %v11394_v33 }
  0x88   : > { %v11525_v12 = vsel %vm3256_vm5, %v3257_v22, %v11391_v7  ;;  %v11568_v22 = vld [vmem:[%s17890_s1 + $0x6] ss:$8 sm:$0xf] }
  0x8b   : > { %2693 = vrot.lane.b32.xlu1 %v2662_v54, %s11056_s12  ;;  %2703 = vrot.lane.b32.xlu0 %v521_v36, %s11056_s12  ;;  %v1088_v36 = vsel %vm498_vm3, %v11251_v41, %v1087_v23  ;;  %v2133_v54 = vsel %vm498_vm3, %v11251_v41, %v2132_v37  ;;  %v11461_v41 = vsel %vm498_vm3, %v2666_v45, %v2114_v29  ;;  %v3272_v23 = vrot.slane %v3206_v44, 7  ;;  %v3223_v44 = vld [vmem:[#allocation3 + $0x1a0] sm:$0x1]  ;;  %v1566_v45 = vld [vmem:[#allocation2 + $0x8] sm:$0xc0] }
  0x8c   : > { %v11517_v37 = vrot.slane %v11453_v16, %v11394_v33  ;;  %v3306_v27 = vrot.slane %v3223_v44, 7 }
  0x8d   : > { %v11529_v0 = vsel %vm3256_vm5, %v11391_v7, %v3272_v23 }
  0x8f   : > { %2713 = vrot.lane.b32.xlu1 %v2684_v58, %s11056_s12  ;;  %542 = vrot.lane.b32.xlu0 %v513_v14, %s11056_s12  ;;  %v11427_v58 = vld [vmem:[%s17890_s1 + $0x22] ss:$8 sm:$0xf]  ;;  %v11445_v14 = vsel %vm498_vm3, %v2114_v29, %v2124_v39  ;;  %v11536_v39 = vsel %vm3256_vm5, %v3272_v23, %v3282_v25  ;;  %v3221_v23 = vld [vmem:[#allocation3 + $0x190] sm:$0x1]  ;;  %v11581_v25 = vrot.slane %v11422_v57, %v11351_v61 }
  0x90   : > { %18241 = vst [vmem:[#allocation15_spill] sm:$0xff] %v11536_v39  ;;  %v11585_v8 = vrot.slane %v11427_v58, %v11351_v61  ;;  %v18260_v39 = vrot.slane %v11286_v1, 6 }
  0x91   : > { %18249 = vst [vmem:[#allocation23_spill] sm:$0xff] %v11581_v25  ;;  %v3302_v25 = vrot.slane %v3221_v23, 7  ;;  %v11624_v23 = vsel %vm3256_vm5, %v11391_v7, %v3304_v3  ;;  %v11646_v3 = vld [vmem:[%s17890_s1 + $0x25] ss:$8 sm:$0xf] }
  0x92   : > { %18250 = vst [vmem:[#allocation24_spill] sm:$0xff] %v11585_v8  ;;  %v11603_v8 = vld [vmem:[%s17890_s1 + $0x45] ss:$8 sm:$0xf]  ;;  %18254 = vst [vmem:[#allocation28_spill] sm:$0xff] %v11624_v23 }
  0x93   : > { %552 = vrot.lane.b32.xlu1 %v11259_v43, %s11056_s12  ;;  %562 = vrot.lane.b32.xlu0 %v533_v30, %s11056_s12  ;;  %v11486_v30 = vld [vmem:[%s17890_s1 + $0x46] ss:$8 sm:$0xf]  ;;  %v11659_v44 = vrot.slane %v11603_v8, %v11394_v33  ;;  %v4022_v23 = vld [vmem:[#allocation3 + $0x8] sm:$0x80]  ;;  %v11703_v1 = vsel %vm3256_vm5, %v11391_v7, %v3302_v25  ;;  %v11725_v25 = vsel %vm3256_vm5, %v4088_v52, %v11391_v7 }
  0x94   : > { %v11533_v29 = vrot.slane %v11486_v30, %v11394_v33  ;;  %18264 = vst [vmem:[#allocation36_spill] sm:$0xff] %v11703_v1  ;;  %18267 = vst [vmem:[#allocation39_spill] sm:$0xff] %v11725_v25  ;;  %v11743_v52 = vrot.slane %v11651_v46, %v11394_v33  ;;  %v1567_v25 = vld [vmem:[#allocation2 + $0x10] sm:$0xc0]  ;;  %v4047_v1 = vld [vmem:[#allocation3 + $0x198] sm:$0x1] }
  0x95   : > { %18256 = vst [vmem:[#allocation30_spill] sm:$0xff] %v11659_v44  ;;  %v11679_v44 = vsel %vm498_vm3, %v18260_v39, %v1618_v50  ;;  %v11711_v39 = vrot.slane %v11620_v5, %v11394_v33  ;;  %v11716_v50 = vld [vmem:[%s17890_s1 + $0x26] ss:$8 sm:$0xf] }
  0x96   : > { %18240 = vst [vmem:[#allocation14_spill] sm:$0xff] %v11533_v29  ;;  %v11598_v42 = vmul.f32 %v11533_v29, %v11300_v9  ;;  %v4085_v29 = vrot.slane %v4023_v2, 7  ;;  %18261 = vst [vmem:[#allocation33_spill] sm:$0xff] %v11679_v44  ;;  %v4848_v44 = vld [vmem:[#allocation3 + $0x10] sm:$0x80] }
  0x97   : > { %1097 = vrot.lane.b32.xlu1 %v1068_v31, %s11057_s13  ;;  %1107 = vrot.lane.b32.xlu0 %v11259_v43, %s11057_s13  ;;  %v11493_v31 = vsel %vm3256_vm5, %v3260_v47, %v11391_v7  ;;  %v11544_v47 = vmul.f32 %v11477_v26, %v11300_v9  ;;  %v1598_v26 = vrot.slane %v1566_v45, 6  ;;  %v11614_v45 = vrot.slane %v11469_v21, %v11351_v61 }
  0x98   : > { %18252 = vst [vmem:[#allocation26_spill] sm:$0xff] %v11598_v42  ;;  %18266 = vst [vmem:[#allocation38_spill] sm:$0xff] %v11711_v39  ;;  %v4049_v42 = vld [vmem:[#allocation3 + $0x1a8] sm:$0x1] }
  0x99   : > { %18243 = vst [vmem:[#allocation17_spill] sm:$0xff] %v11544_v47  ;;  %18253 = vst [vmem:[#allocation27_spill] sm:$0xff] %v11614_v45  ;;  %v11670_v45 = vld [vmem:[%s17890_s1 + $0x47] ss:$8 sm:$0xf]  ;;  %v4082_v47 = vrot.slane %v4022_v23, 7 }
  0x9a   : > { %18272 = vst [vmem:[#allocation44_spill] sm:$0xff] %v11743_v52  ;;  %v11747_v23 = vrot.slane %v11670_v45, %v11394_v33  ;;  %v11763_v52 = vrot.slane %v11437_v60, %v11351_v61 }
  0x9b   : > { %1117 = vrot.lane.b32.xlu1 %v1088_v36, %s11057_s13  ;;  %2142 = vrot.lane.b32.xlu0 %v2112_v53, %s11058_s14  ;;  %v11513_v36 = vrot.slane %v11427_v58, %v11394_v33  ;;  %v11563_v53 = vld [vmem:[%s17890_s1 + $0x1] ss:$8 sm:$0xf] }
  0x9c   : > { %18247 = vst [vmem:[#allocation21_spill] sm:$0xff] %v11563_v53  ;;  %v11731_v39 = vrot.slane %v11563_v53, %v11351_v61  ;;  %18273 = vst [vmem:[#allocation45_spill] sm:$0xff] %v11747_v23  ;;  %v11779_v23 = vrot.slane %v11458_v17, %v11351_v61  ;;  %v11794_v17 = vrot.slane %v11568_v22, %v11351_v61 }
  0x9d   : > { %18277 = vst [vmem:[#allocation49_spill] sm:$0xff] %v11763_v52 }
  0x9e   : > { %18269 = vst [vmem:[#allocation41_spill] sm:$0xff] %v11731_v39  ;;  %18280 = vst [vmem:[#allocation52_spill] sm:$0xff] %v11779_v23 }
  0x9f   : > { %2152 = vrot.lane.b32.xlu1 %v11259_v43, %s11058_s14  ;;  %2162 = vrot.lane.b32.xlu0 %v2133_v54, %s11058_s14  ;;  %v11573_v54 = vld [vmem:[%s17890_s1 + $0x23] ss:$8 sm:$0xf]  ;;  %18282 = vst [vmem:[#allocation54_spill] sm:$0xff] %v11794_v17 }
  0xa0   : > { %v11636_v2 = vrot.slane %v11573_v54, %v11394_v33 }
  0xa3   : > { %2695 = vrot.lane.b32.xlu1 %v2665_v55, %s11056_s12  ;;  %v11577_v55 = vmul.f32 %v11501_v34, %v11300_v9  ;;  %v11594_v34 = vld [vmem:[%s17890_s1 + $0x40] ss:$8 sm:$0xf]  ;;  %2705 = vrot.lane.b32.xlu0 %v11259_v43, %s11056_s12  ;;  %v11628_v43 = vrot.slane %v11563_v53, %v11394_v33 }
  0xa4   : > { %v11655_v6 = vrot.slane %v11594_v34, %v11394_v33 }
  0xa5   : > { %18248 = vst [vmem:[#allocation22_spill] sm:$0xff] %v11577_v55  ;;  %v18257_v55 = vrot.slane %v11284_v63, 6 }
  0xa6   : > { %18255 = vst [vmem:[#allocation29_spill] sm:$0xff] %v11655_v6  ;;  %v11674_v6 = vsel %vm3256_vm5, %v11391_v7, %v3306_v27  ;;  %v11695_v27 = vld [vmem:[%s17890_s1 + $0x21] ss:$8 sm:$0xf] }
  0xa7   : > { %2715 = vrot.lane.b32.xlu1 %v2686_v40, %s11056_s12  ;;  %v11632_v40 = vrot.slane %v11568_v22, %v11394_v33  ;;  %v11664_v49 = vsel %vm498_vm3, %v1598_v26, %v18257_v55  ;;  %18259 = vst [vmem:[#allocation32_spill] sm:$0xff] %v11674_v6  ;;  %v11685_v26 = vmul.f32 %v1664_v28, %v11300_v9  ;;  %v11690_v55 = vld [vmem:[%s17890_s1 + $0x4] ss:$8 sm:$0xf] }
  0xa8   : > { %18258 = vst [vmem:[#allocation31_spill] sm:$0xff] %v11664_v49  ;;  %v11682_v63 = vmul.f32 %v1664_v28, %v11664_v49  ;;  %2144 = vrot.lane.b32.xlu0 %v11442_v11, %s11058_s14  ;;  %v11707_v9 = vsel %vm3256_vm5, %v4085_v29, %v11391_v7  ;;  %v11721_v11 = vld [vmem:[%s17890_s1 + $0x43] ss:$8 sm:$0xf]  ;;  %v11751_v39 = vrot.slane %v11690_v55, %v11394_v33  ;;  %v4849_v49 = vld [vmem:[#allocation3 + $0x18] sm:$0x80] }
  0xa9   : > { %18263 = vst [vmem:[#allocation35_spill] sm:$0xff] %v11685_v26  ;;  %18265 = vst [vmem:[#allocation37_spill] sm:$0xff] %v11707_v9  ;;  %v10926_v29 = vld [vmem:[#allocation3 + $0x50] sm:$0xff]  ;;  %v11735_v26 = vrot.slane %v11641_v18, %v11394_v33  ;;  %v11759_v9 = vrot.slane %v11432_v59, %v11351_v61  ;;  %v4131_v59 = vrot.slane %v4049_v42, 7  ;;  %v11818_v22 = vrot.slane %v11594_v34, %v11351_v61 }
  0xaa   : > { %18262 = vst [vmem:[#allocation34_spill] sm:$0xff] %v11682_v63  ;;  %v11727_v28 = vrot.slane %v10926_v29, 7  ;;  %v11739_v63 = vrot.slane %v11646_v3, %v11394_v33  ;;  %v4048_v29 = vld [vmem:[#allocation3 + $0x1a0] sm:$0x1]  ;;  %18274 = vst [vmem:[#allocation46_spill] sm:$0xff] %v11751_v39  ;;  %v11771_v39 = vrot.slane %v11716_v50, %v11394_v33 }
  0xab   : > { %2154 = vrot.lane.b32.xlu1 %v11445_v14, %s11058_s14  ;;  %18270 = vst [vmem:[#allocation42_spill] sm:$0xff] %v11735_v26  ;;  %v11755_v26 = vrot.slane %v11695_v27, %v11394_v33  ;;  %18276 = vst [vmem:[#allocation48_spill] sm:$0xff] %v11759_v9  ;;  %v11790_v6 = vpop.permute.xlu0 %534 }
  0xac   : > { %18268 = vst [vmem:[#allocation40_spill] sm:$0xff] %v11727_v28  ;;  %18271 = vst [vmem:[#allocation43_spill] sm:$0xff] %v11739_v63  ;;  %v1579_v63 = vld [vmem:[#allocation2 + $0xa0] sm:$0x3]  ;;  %2164 = vrot.lane.b32.xlu0 %v11448_v15, %s11058_s14  ;;  %v11784_v60 = vsel %vm3256_vm5, %v11391_v7, %v11727_v28  ;;  %v11788_v15 = vsel %vm3256_vm5, %v4082_v47, %v11391_v7  ;;  %v11802_v47 = vmul.f32 %v11759_v9, %v11375_v13 }
  0xad   : > { %18275 = vst [vmem:[#allocation47_spill] sm:$0xff] %v11755_v26  ;;  %18278 = vst [vmem:[#allocation50_spill] sm:$0xff] %v11771_v39  ;;  %v11775_v26 = vrot.slane %v11721_v11, %v11394_v33  ;;  %v1601_v39 = vrot.slane %v1567_v25, 6  ;;  %v1620_v53 = vrot.slane %v1579_v63, 6  ;;  %v11806_v25 = vmul.f32 %v11763_v52, %v11375_v13  ;;  %v4850_v52 = vld [vmem:[#allocation3 + $0x20] sm:$0x80] }
  0xae   : > { %18281 = vst [vmem:[#allocation53_spill] sm:$0xff] %v11784_v60  ;;  %v11798_v60 = vrot.slane %v11573_v54, %v11351_v61  ;;  %18284 = vst [vmem:[#allocation56_spill] sm:$0xff] %v11802_v47  ;;  %v11822_v54 = vmul.f32 %v11779_v23, %v11375_v13  ;;  %v4127_v63 = vrot.slane %v4047_v1, 7  ;;  %v11838_v9 = vsub.s32 2, %v11345_v56 }
  0xaf   : > { %2697 = vrot.lane.b32.xlu1 %v11461_v41, %s11056_s12  ;;  %18279 = vst [vmem:[#allocation51_spill] sm:$0xff] %v11775_v26  ;;  %v4129_v41 = vrot.slane %v4048_v29, 7  ;;  %v4911_v26 = vrot.slane %v4849_v49, 7  ;;  %18285 = vst [vmem:[#allocation57_spill] sm:$0xff] %v11806_v25  ;;  %v11810_v49 = vrot.slane %v11486_v30, %v11351_v61  ;;  %v4908_v29 = vrot.slane %v4848_v44, 7 }
  0xb0   : > { %18283 = vst [vmem:[#allocation55_spill] sm:$0xff] %v11798_v60  ;;  %2707 = vrot.lane.b32.xlu0 %v11445_v14, %s11056_s12  ;;  %18287 = vst [vmem:[#allocation59_spill] sm:$0xff] %v11818_v22  ;;  %v11826_v30 = vsel %vm3256_vm5, %v11727_v28, %v4131_v59  ;;  %v10398_v44 = vld [vmem:[%s17890_s1 + $0x60] ss:$8 sm:$0xf]  ;;  %v4914_v17 = vrot.slane %v4850_v52, 7  ;;  %v11898_v52 = vrot.slane %v11427_v58, %v11838_v9 }
  0xb1   : > { %v545_v42 = vpop.permute.xlu1 %544  ;;  %18286 = vst [vmem:[#allocation58_spill] sm:$0xff] %v11810_v49  ;;  %18288 = vst [vmem:[#allocation60_spill] sm:$0xff] %v11822_v54  ;;  %v11830_v14 = vsel %vm3256_vm5, %v11727_v28, %v4129_v41  ;;  %v555_v1 = vpop.permute.xlu0 %554  ;;  %v11847_v59 = vsel %vm3256_vm5, %v4911_v26, %v11727_v28  ;;  %v11866_v26 = vmul.f32 %v11810_v49, %v11375_v13 }
  0xb2   : > { %18290 = vst [vmem:[#allocation61_spill] sm:$0xff] %v11838_v9  ;;  %v11882_v13 = vrot.slane %v10398_v44, %v11394_v33  ;;  %18299 = vst [vmem:[#allocation69_spill] sm:$0xff] %v11898_v52  ;;  %v11906_v60 = vrot.slane %v11453_v16, %v11838_v9  ;;  %v11910_v22 = vrot.slane %v11469_v21, %v11838_v9 }
  0xb3   : > { %2717 = vrot.lane.b32.xlu1 %v11464_v19, %s11056_s12  ;;  %v18289_v19 = vrot.slane %v11353_v62, 6  ;;  %v11851_v62 = vrot.slane %v11603_v8, %v11351_v61  ;;  %18294 = vst [vmem:[#allocation64_spill] sm:$0xff] %v11866_v26  ;;  %v11875_v8 = vsel %vm3256_vm5, %v11727_v28, %v4127_v63  ;;  %v4874_v63 = vld [vmem:[#allocation3 + $0x1a8] sm:$0x1]  ;;  %v11914_v33 = vrot.slane %v11620_v5, %v11351_v61 }
  0xb4   : > { %3314 = vrot.lane.b32.xlu0 %v11493_v31, %s11057_s13  ;;  %18295 = vst [vmem:[#allocation65_spill] sm:$0xff] %v11882_v13  ;;  %v11890_v31 = vrot.slane %v11408_v51, %v11838_v9  ;;  %18300 = vst [vmem:[#allocation70_spill] sm:$0xff] %v11906_v60  ;;  %v4875_v13 = vld [vmem:[#allocation3 + $0x1b0] sm:$0x1]  ;;  %v11928_v60 = vrot.slane %v11646_v3, %v11351_v61  ;;  %v11936_v5 = vrot.slane %v11651_v46, %v11351_v61 }
  0xb5   : > { %v11835_v34 = vsel %vm498_vm3, %v1601_v39, %v18289_v19  ;;  %v11843_v23 = vpop.permute.xlu1 %546  ;;  %18291 = vst [vmem:[#allocation62_spill] sm:$0xff] %v11851_v62  ;;  %v18292_v39 = vrot.slane %v11355_v4, 6  ;;  %18301 = vst [vmem:[#allocation71_spill] sm:$0xff] %v11910_v22 }
  0xb6   : > { %v11860_v19 = vmul.f32 %v11366_v10, %v11835_v34  ;;  %v11879_v10 = vsel %vm3256_vm5, %v4908_v29, %v11727_v28  ;;  %18297 = vst [vmem:[#allocation67_spill] sm:$0xff] %v11890_v31  ;;  %v568_v29 = vsel %vm363_vm1, %v545_v42, %v11843_v23  ;;  %18302 = vst [vmem:[#allocation72_spill] sm:$0xff] %v11914_v33 }
  0xb7   : > { %v11856_v41 = vsel %vm498_vm3, %v18292_v39, %v1620_v53  ;;  %3316 = vrot.lane.b32.xlu1 %v11505_v20, %s11057_s13  ;;  %v11886_v53 = vrot.slane %v11403_v48, %v11838_v9  ;;  %v11894_v20 = vrot.slane %v11422_v57, %v11838_v9  ;;  %v1090_v39 = vpop.permute.xlu0 %1089  ;;  %v11920_v42 = vsel %vm3256_vm5, %v4914_v17, %v11727_v28 }
  0xb8   : > { %18293 = vst [vmem:[#allocation63_spill] sm:$0xff] %v11860_v19  ;;  %18304 = vst [vmem:[#allocation74_spill] sm:$0xff] %v11928_v60  ;;  %3324 = vrot.lane.b32.xlu0 %v11391_v7, %s11057_s13  ;;  %v11940_v17 = vrot.slane %v11670_v45, %v11351_v61  ;;  %v11944_v3 = vmul.f32 %v11509_v35, %v568_v29  ;;  %v11949_v46 = vmul.f32 %v11513_v36, %v568_v29 }
  0xb9   : > { %18296 = vst [vmem:[#allocation66_spill] sm:$0xff] %v11886_v53  ;;  %18298 = vst [vmem:[#allocation68_spill] sm:$0xff] %v11894_v20  ;;  %v11902_v4 = vpop.permute.xlu1 %556  ;;  %v11924_v53 = vrot.slane %v11641_v18, %v11351_v61  ;;  %v4955_v18 = vrot.slane %v4874_v63, 7  ;;  %v11955_v45 = vmul.f32 %v11521_v38, %v568_v29  ;;  %v11971_v33 = vrot.slane %v11716_v50, %v11351_v61 }
  0xba   : > { %v572_v52 = vsel %vm363_vm1, %v555_v1, %v11902_v4  ;;  %18305 = vst [vmem:[#allocation75_spill] sm:$0xff] %v11936_v5  ;;  %18306 = vst [vmem:[#allocation76_spill] sm:$0xff] %v11940_v17  ;;  %v634_v1 = vmul.f32 %v11497_v32, %v568_v29  ;;  %v11952_v5 = vmul.f32 %v11517_v37, %v568_v29  ;;  %v11996_v29 = vsub.s32 3, %v11345_v56 }
  0xbb   : > { %18303 = vst [vmem:[#allocation73_spill] sm:$0xff] %v11924_v53  ;;  %596 = vst [vmem:[#allocation4 + $0x40] sm:$0xf] %v572_v52  ;;  %3326 = vrot.lane.b32.xlu1 %v11391_v7, %s11057_s13  ;;  %v4957_v52 = vrot.slane %v4875_v13, 7  ;;  %v1100_v60 = vpop.permute.xlu0 %1099  ;;  %v11963_v13 = vrot.slane %v11690_v55, %v11351_v61  ;;  %v11967_v17 = vrot.slane %v11695_v27, %v11351_v61  ;;  %v18316_v31 = vrot.slane %v11944_v3, 1 }
  0xbc   : > { %18309 = vst [vmem:[#allocation79_spill] sm:$0xff] %v11971_v33  ;;  %3334 = vrot.lane.b32.xlu0 %v11391_v7, %s11057_s13  ;;  %v11980_v55 = vrot.slane %v11721_v11, %v11351_v61  ;;  %v11987_v27 = vsel %vm3256_vm5, %v11727_v28, %v4955_v18  ;;  %v642_v50 = vadd.f32 %v634_v1, %v11473_v24  ;;  %18313 = vst [vmem:[#allocation83_spill] sm:$0xff] %v11996_v29 }
  0xbd   : > { %v11946_v53 = vpop.permute.xlu1 %1091  ;;  %18307 = vst [vmem:[#allocation77_spill] sm:$0xff] %v11963_v13  ;;  %18308 = vst [vmem:[#allocation78_spill] sm:$0xff] %v11967_v17  ;;  %v11993_v17 = vsel %vm3256_vm5, %v11727_v28, %v4957_v52 }
  0xbe   : > { %v11959_v63 = vsel %vm415_vm4, %v1090_v39, %v11946_v53  ;;  %18310 = vst [vmem:[#allocation80_spill] sm:$0xff] %v11980_v55  ;;  %v11983_v39 = vrot.slane %v10398_v44, %v11351_v61  ;;  %18312 = vst [vmem:[#allocation82_spill] sm:$0xff] %v11993_v17  ;;  %v12013_v44 = vrot.slane %v11403_v48, %v11996_v29 }
  0xbf   : > { %3336 = vrot.lane.b32.xlu1 %v11391_v7, %s11057_s13  ;;  %v537_v11 = vpop.permute.xlu0 %536  ;;  %v12005_v1 = vmul.f32 %v11628_v43, %v11959_v63  ;;  %v12017_v61 = vrot.slane %v11408_v51, %v11996_v29 }
  0xc0   : > { %18311 = vst [vmem:[#allocation81_spill] sm:$0xff] %v11983_v39  ;;  %v564_v52 = vsel %vm363_vm1, %v11790_v6, %v537_v11  ;;  %18314 = vst [vmem:[#allocation84_spill] sm:$0xff] %v12013_v44  ;;  %3312 = vrot.lane.b32.xlu0 %v11525_v12, %s11057_s13 }
  0xc1   : > { %v12001_v18 = vpop.permute.xlu1 %1101  ;;  %18315 = vst [vmem:[#allocation85_spill] sm:$0xff] %v12017_v61  ;;  %588 = vst [vmem:[#allocation4] sm:$0xff] %v564_v52  ;;  %v630_v55 = vmul.f32 %v11497_v32, %v564_v52 }
  0xc2   : > { %v1123_v56 = vsel %vm415_vm4, %v1100_v60, %v12001_v18  ;;  %v650_v33 = vld [vmem:[#allocation4 + $0x40] sm:$0x1] }
  0xc3   : > { %v742_v39 = vld [vmem:[#allocation4 + $0x40] sm:$0x3]  ;;  %v685_v22 = vmul.f32 %v11509_v35, %v650_v33  ;;  %3322 = vrot.lane.b32.xlu1 %v11529_v0, %s11057_s13  ;;  %v12029_v51 = vmul.f32 %v11628_v43, %v1123_v56  ;;  %v12032_v32 = vmul.f32 %v11632_v40, %v1123_v56  ;;  %v12035_v33 = vmul.f32 %v11636_v2, %v1123_v56 }
  0xc4   : > { %v834_v13 = vld [vmem:[#allocation4 + $0x40] sm:$0x7]  ;;  %v777_v6 = vmul.f32 %v11513_v36, %v742_v39  ;;  %v1110_v39 = vpop.permute.xlu0 %1109 }
  0xc5   : > { %v869_v60 = vmul.f32 %v11517_v37, %v834_v13  ;;  %v926_v20 = vld [vmem:[#allocation4 + $0x40] sm:$0xf]  ;;  %v12038_v13 = vadd.f32 %v630_v55, %v11473_v24  ;;  %v12040_v52 = vpop.permute.xlu1 %1111  ;;  %v714_v12 = vrot.slane %v685_v22, 1  ;;  %v18317_v24 = vrot.slane %v11949_v46, 2 }
  0xc6   : > { %v961_v48 = vmul.f32 %v11521_v38, %v926_v20  ;;  %v806_v20 = vrot.slane %v777_v6, 2  ;;  %v1127_v0 = vsel %vm415_vm4, %v1110_v39, %v12040_v52  ;;  %v18318_v22 = vrot.slane %v11952_v5, 3 }
  0xc7   : > { %v898_v44 = vrot.slane %v869_v60, 3  ;;  %v715_v54 = vsel %vm701_vm6, %v18316_v31, %v714_v12  ;;  %1151 = vst [vmem:[#allocation4 + $0x40] sm:$0xf] %v1127_v0  ;;  %v18319_v60 = vld [vmem:[#allocation15_spill] sm:$0xff]  ;;  %3344 = vrot.lane.b32.xlu1 %v11391_v7, %s11057_s13  ;;  %v18321_v31 = vrot.slane %v11955_v45, 4 }
  0xc8   : > { %v990_v61 = vrot.slane %v961_v48, 4  ;;  %v807_v55 = vsel %vm793_vm7, %v18317_v24, %v806_v20  ;;  %3332 = vrot.lane.b32.xlu0 %v18319_v60, %s11057_s13  ;;  %v18320_v48 = vld [vmem:[#allocation29_spill] sm:$0xff]  ;;  %v734_v26 = vadd.f32 %v715_v54, %v642_v50  ;;  %v18322_v20 = vld [vmem:[#allocation30_spill] sm:$0xff]  ;;  %v12076_v0 = vpop.permute.xlu0 %538  ;;  %v12083_v50 = vrot.slane %v11427_v58, %v11996_v29  ;;  %v738_v60 = vld [vmem:[#allocation4] sm:$0xfc] }
  0xc9   : > { %v12055_v6 = vsel %vm885_vm8, %v18318_v22, %v898_v44  ;;  %v12060_v39 = vmul.f32 %v18320_v48, %v1123_v56  ;;  %v12070_v24 = vmul.f32 %v18322_v20, %v1123_v56  ;;  %v12074_v44 = vrot.slane %v11422_v57, %v11996_v29  ;;  %v12078_v22 = vpop.permute.xlu1 %548  ;;  %v646_v57 = vld [vmem:[#allocation4] sm:$0xfe] }
  0xca   : > { %v12067_v12 = vsel %vm977_vm9, %v18321_v31, %v990_v61  ;;  %18324 = vst [vmem:[#allocation29_spill] sm:$0xff] %v12083_v50  ;;  %v12087_v61 = vrot.slane %v11453_v16, %v11996_v29  ;;  %v12091_v56 = vrot.slane %v11469_v21, %v11996_v29  ;;  %v830_v31 = vld [vmem:[#allocation4] sm:$0xf8]  ;;  %v565_v43 = vsel %vm363_vm1, %v537_v11, %v12076_v0  ;;  %v18327_v50 = vld [vmem:[#allocation21_spill] sm:$0xff]  ;;  %v18330_v11 = vld [vmem:[#allocation23_spill] sm:$0xff] }
  0xcb   : > { %18323 = vst [vmem:[#allocation15_spill] sm:$0xff] %v12074_v44  ;;  %v569_v54 = vsel %vm363_vm1, %v11843_v23, %v12078_v22  ;;  %v826_v58 = vadd.f32 %v807_v55, %v734_v26  ;;  %v12100_v44 = vrot.slane %v18327_v50, %v11838_v9  ;;  %v922_v16 = vld [vmem:[#allocation4] sm:$0xf0]  ;;  %v769_v21 = vmul.f32 %v11513_v36, %v738_v60 }
  0xcc   : > { %18325 = vst [vmem:[#allocation30_spill] sm:$0xff] %v12087_v61  ;;  %18326 = vst [vmem:[#allocation86_spill] sm:$0xff] %v12091_v56  ;;  %v677_v61 = vmul.f32 %v11509_v35, %v646_v57  ;;  %v861_v29 = vmul.f32 %v11517_v37, %v830_v31  ;;  %v18329_v56 = vld [vmem:[#allocation20_spill] sm:$0xff]  ;;  %3346 = vrot.lane.b32.xlu0 %v11391_v7, %s11057_s13  ;;  %v953_v23 = vmul.f32 %v11521_v38, %v922_v16  ;;  %v12119_v60 = vpop.permute.xlu0 %558 }
  0xcd   : > { %18328 = vst [vmem:[#allocation21_spill] sm:$0xff] %v12100_v44  ;;  %589 = vst [vmem:[#allocation4 + $0x8] sm:$0xff] %v565_v43  ;;  %v631_v49 = vmul.f32 %v18329_v56, %v565_v43  ;;  %v635_v26 = vmul.f32 %v18329_v56, %v569_v54  ;;  %v12112_v55 = vmul.f32 %v18330_v11, %v569_v54  ;;  %v18331_v35 = vld [vmem:[#allocation24_spill] sm:$0xff]  ;;  %v794_v50 = vrot.slane %v769_v21, 2  ;;  %v12121_v31 = vpop.permute.xlu1 %1093 }
  0xce   : > { %1143 = vst [vmem:[#allocation4] sm:$0xff] %v11959_v63  ;;  %v12115_v36 = vmul.f32 %v18331_v35, %v569_v54  ;;  %v18332_v37 = vld [vmem:[#allocation16_spill] sm:$0xff]  ;;  %v702_v43 = vrot.slane %v677_v61, 1  ;;  %v886_v57 = vrot.slane %v861_v29, 3  ;;  %18333 = vst [vmem:[#allocation20_spill] sm:$0xff] %v12119_v60  ;;  %v18335_v63 = vld [vmem:[#allocation19_spill] sm:$0xff]  ;;  %v573_v16 = vsel %vm363_vm1, %v11902_v4, %v12119_v60 }
  0xcf   : > { %3342 = vrot.lane.b32.xlu1 %v18332_v37, %s11057_s13  ;;  %18334 = vst [vmem:[#allocation23_spill] sm:$0xff] %v12121_v31  ;;  %v12124_v38 = vadd.f32 %v631_v49, %v18335_v63  ;;  %v978_v56 = vrot.slane %v953_v23, 4  ;;  %v12132_v44 = vsel %vm415_vm4, %v11946_v53, %v12121_v31  ;;  %v12135_v61 = vadd.f32 %v635_v26, %v18335_v63  ;;  %v1206_v29 = vld [vmem:[#allocation4 + $0x40] sm:$0x1] }
  0xd0   : > { %18336 = vst [vmem:[#allocation24_spill] sm:$0xff] %v12132_v44  ;;  %v1297_v21 = vld [vmem:[#allocation4 + $0x40] sm:$0x3]  ;;  %v18337_v37 = vrot.slane %v11944_v3, 1  ;;  %v18338_v23 = vrot.slane %v11949_v46, 2  ;;  %v18339_v4 = vrot.slane %v11952_v5, 3 }
  0xd1   : > { %597 = vst [vmem:[#allocation4 + $0x48] sm:$0xf] %v573_v16  ;;  %v18340_v26 = vld [vmem:[#allocation28_spill] sm:$0xff]  ;;  %v18342_v5 = vld [vmem:[#allocation25_spill] sm:$0xff] }
  0xd2   : > { %v704_v49 = vsel %vm701_vm6, %v702_v43, %v18337_v37  ;;  %v796_v9 = vsel %vm793_vm7, %v794_v50, %v18338_v23  ;;  %v888_v25 = vsel %vm885_vm8, %v886_v57, %v18339_v4  ;;  %3354 = vrot.lane.b32.xlu0 %v18340_v26, %s11057_s13  ;;  %v1388_v63 = vld [vmem:[#allocation4 + $0x40] sm:$0x7]  ;;  %v18341_v43 = vrot.slane %v11955_v45, 4  ;;  %v18344_v16 = vld [vmem:[#allocation33_spill] sm:$0xff]  ;;  %v18345_v23 = vld [vmem:[#allocation27_spill] sm:$0xff]  ;;  %v12165_v26 = vpop.permute.xlu0 %1103 }
  0xd3   : > { %v12149_v31 = vld [vmem:[#allocation4 + $0x40] sm:$0xf]  ;;  %v730_v3 = vadd.f32 %v704_v49, %v12038_v13  ;;  %v12157_v37 = vmul.f32 %v18342_v5, %v569_v54  ;;  %v12163_v4 = vmul.f32 %v18345_v23, %v569_v54  ;;  %18346 = vst [vmem:[#allocation16_spill] sm:$0xff] %v12165_v26  ;;  %v12167_v13 = vpop.permute.xlu1 %1113  ;;  %v918_v45 = vadd.f32 %v12055_v6, %v826_v58 }
  0xd4   : > { %v980_v46 = vsel %vm977_vm9, %v978_v56, %v18341_v43  ;;  %v18343_v57 = vld [vmem:[#allocation32_spill] sm:$0xff]  ;;  %1646 = vst [vmem:[#allocation4 + $0x40] sm:$0xf] %v18344_v16  ;;  %18347 = vst [vmem:[#allocation19_spill] sm:$0xff] %v12167_v13  ;;  %v12171_v56 = vmul.f32 %v11632_v40, %v1206_v29  ;;  %v12174_v49 = vmul.f32 %v11636_v2, %v1297_v21  ;;  %v647_v50 = vld [vmem:[#allocation4 + $0x8] sm:$0xfe] }
  0xd5   : > { %3356 = vrot.lane.b32.xlu1 %v18343_v57, %s11057_s13  ;;  %v822_v43 = vadd.f32 %v796_v9, %v730_v3  ;;  %v739_v57 = vld [vmem:[#allocation4 + $0x8] sm:$0xfc]  ;;  %v12179_v54 = vsel %vm415_vm4, %v12001_v18, %v12165_v26  ;;  %v1128_v16 = vsel %vm415_vm4, %v12040_v52, %v12167_v13  ;;  %v12185_v6 = vmul.f32 %v18320_v48, %v1388_v63  ;;  %v1202_v58 = vld [vmem:[#allocation4] sm:$0xfe] }
  0xd6   : > { %v831_v53 = vld [vmem:[#allocation4 + $0x8] sm:$0xf8]  ;;  %18348 = vst [vmem:[#allocation28_spill] sm:$0xff] %v12179_v54  ;;  %v1293_v29 = vld [vmem:[#allocation4] sm:$0xfc]  ;;  %v678_v9 = vmul.f32 %v18330_v11, %v647_v50  ;;  %v770_v3 = vmul.f32 %v18331_v35, %v739_v57  ;;  %v1010_v18 = vadd.f32 %v12067_v12, %v918_v45  ;;  %v890_v13 = vrot.slane %v12157_v37, 3  ;;  %v2137_v57 = vpop.permute.xlu0 %2136 }
  0xd7   : > { %v12187_v21 = vld [vmem:[#allocation4] sm:$0xf8]  ;;  %v862_v19 = vmul.f32 %v18342_v5, %v831_v53  ;;  %v914_v52 = vadd.f32 %v888_v25, %v822_v43  ;;  %v923_v63 = vld [vmem:[#allocation4 + $0x8] sm:$0xf0]  ;;  %v1233_v54 = vmul.f32 %v11632_v40, %v1202_v58  ;;  %v12204_v17 = vpop.permute.xlu1 %2138  ;;  %v18351_v25 = vld [vmem:[#allocation31_spill] sm:$0xff] }
  0xd8   : > { %v18349_v26 = vld [vmem:[#allocation36_spill] sm:$0xff]  ;;  %v18350_v50 = vld [vmem:[#allocation37_spill] sm:$0xff]  ;;  %1144 = vst [vmem:[#allocation4 + $0x8] sm:$0xff] %v12132_v44  ;;  %v705_v53 = vrot.slane %v678_v9, 1  ;;  %v797_v12 = vrot.slane %v770_v3, 2  ;;  %v12209_v40 = vsel %vm2166_vm10, %v2137_v57, %v12204_v17  ;;  %v1198_v58 = vadd.f32 %v12029_v51, %v1010_v18  ;;  %v18354_v44 = vld [vmem:[#allocation39_spill] sm:$0xff] }
  0xd9   : > { %3352 = vrot.lane.b32.xlu0 %v18349_v26, %s11057_s13  ;;  %v12195_v47 = vld [vmem:[#allocation4] sm:$0xf0]  ;;  %4139 = vrot.lane.b32.xlu1 %v18350_v50, %s11056_s12  ;;  %v889_v45 = vrot.slane %v862_v19, 3  ;;  %v954_v26 = vmul.f32 %v18345_v23, %v923_v63  ;;  %v1006_v37 = vadd.f32 %v980_v46, %v914_v52  ;;  %v651_v43 = vld [vmem:[#allocation4 + $0x48] sm:$0x1]  ;;  %v1324_v9 = vmul.f32 %v11636_v2, %v1293_v29 }
  0xda   : > { %1638 = vst [vmem:[#allocation4] sm:$0xff] %v18351_v25  ;;  %v743_v62 = vld [vmem:[#allocation4 + $0x48] sm:$0x3]  ;;  %v18352_v19 = vrot.slane %v12112_v55, 1  ;;  %v18353_v63 = vrot.slane %v12115_v36, 2  ;;  %v686_v51 = vmul.f32 %v18330_v11, %v651_v43  ;;  %v18355_v18 = vrot.slane %v12163_v4, 4 }
  0xdb   : > { %v835_v60 = vld [vmem:[#allocation4 + $0x48] sm:$0x7]  ;;  %v891_v46 = vsel %vm885_vm8, %v889_v45, %v890_v13  ;;  %v981_v52 = vrot.slane %v954_v26, 4  ;;  %v778_v2 = vmul.f32 %v18331_v35, %v743_v62  ;;  %v1194_v11 = vadd.f32 %v12005_v1, %v1006_v37 }
  0xdc   : > { %v707_v3 = vsel %vm701_vm6, %v705_v53, %v18352_v19  ;;  %v799_v50 = vsel %vm793_vm7, %v797_v12, %v18353_v63  ;;  %v927_v25 = vld [vmem:[#allocation4 + $0x48] sm:$0xf]  ;;  %v870_v29 = vmul.f32 %v18342_v5, %v835_v60  ;;  %v1257_v62 = vrot.slane %v1233_v54, 1 }
  0xdd   : > { %4141 = vrot.lane.b32.xlu0 %v18354_v44, %s11056_s12  ;;  %v731_v57 = vadd.f32 %v707_v3, %v12124_v38  ;;  %1152 = vst [vmem:[#allocation4 + $0x48] sm:$0xf] %v1128_v16  ;;  %4149 = vrot.lane.b32.xlu1 %v11391_v7, %s11056_s12  ;;  %v983_v53 = vsel %vm977_vm9, %v981_v52, %v18355_v18  ;;  %v12234_v44 = vpop.permute.xlu0 %2146  ;;  %v12236_v38 = vpop.permute.xlu1 %2148  ;;  %v716_v60 = vrot.slane %v686_v51, 1  ;;  %v808_v5 = vrot.slane %v778_v2, 2 }
  0xde   : > { %v12232_v12 = vmul.f32 %v18345_v23, %v927_v25  ;;  %v900_v16 = vrot.slane %v870_v29, 3  ;;  %v18356_v26 = vrot.slane %v12032_v32, 1  ;;  %v1269_v23 = vrot.slane %v12171_v56, 1 }
  0xdf   : > { %v823_v35 = vadd.f32 %v799_v50, %v731_v57  ;;  %v1348_v19 = vrot.slane %v1324_v9, 2  ;;  %v12246_v3 = vld [vmem:[#allocation4 + $0x8] sm:$0xfe]  ;;  %v18357_v63 = vrot.slane %v12112_v55, 1  ;;  %v18358_v52 = vrot.slane %v12115_v36, 2 }
  0xe0   : > { %v992_v45 = vrot.slane %v12232_v12, 4  ;;  %v1259_v43 = vsel %vm701_vm6, %v1257_v62, %v18356_v26  ;;  %v12248_v1 = vld [vmem:[#allocation4 + $0x8] sm:$0xfc]  ;;  %v12261_v56 = vsel %vm885_vm8, %v890_v13, %v900_v16  ;;  %v18359_v55 = vmov %v18356_v26  ;;  %v1701_v13 = vld [vmem:[#allocation4 + $0x40] sm:$0x1] }
  0xe1   : > { %4147 = vrot.lane.b32.xlu0 %v11391_v7, %s11056_s12  ;;  %v12250_v54 = vld [vmem:[#allocation4 + $0x8] sm:$0xf8]  ;;  %v915_v37 = vadd.f32 %v891_v46, %v823_v35  ;;  %v717_v50 = vsel %vm701_vm6, %v18357_v63, %v716_v60  ;;  %v12258_v25 = vsel %vm793_vm7, %v18358_v52, %v808_v5  ;;  %4159 = vrot.lane.b32.xlu1 %v11391_v7, %s11056_s12  ;;  %v18360_v36 = vrot.slane %v12035_v33, 2  ;;  %v1697_v29 = vld [vmem:[#allocation4] sm:$0xfe]  ;;  %v12276_v62 = vpop.permute.xlu0 %2156  ;;  %v12278_v35 = vpop.permute.xlu1 %2158 }
  0xe2   : > { %v12265_v9 = vld [vmem:[#allocation4 + $0x8] sm:$0xf0]  ;;  %v12268_v57 = vadd.f32 %v717_v50, %v12135_v61  ;;  %v1270_v46 = vsel %vm701_vm6, %v18359_v55, %v1269_v23  ;;  %v1285_v51 = vadd.f32 %v1259_v43, %v1194_v11  ;;  %v1788_v18 = vld [vmem:[#allocation4] sm:$0xfc]  ;;  %v1360_v5 = vrot.slane %v12174_v49, 2 }
  0xe3   : > { %v1350_v2 = vsel %vm793_vm7, %v1348_v19, %v18360_v36  ;;  %v12280_v60 = vadd.f32 %v983_v53, %v915_v37  ;;  %v1289_v61 = vadd.f32 %v1270_v46, %v1198_v58  ;;  %v1415_v32 = vmul.f32 %v18320_v48, %v12187_v21  ;;  %v1879_v11 = vld [vmem:[#allocation4] sm:$0xf8]  ;;  %1639 = vst [vmem:[#allocation4 + $0x8] sm:$0xff] %v11835_v34  ;;  %v18361_v49 = vld [vmem:[#allocation53_spill] sm:$0xff]  ;;  %v1792_v46 = vld [vmem:[#allocation4 + $0x40] sm:$0x3] }
  0xe4   : > { %v1970_v16 = vld [vmem:[#allocation4] sm:$0xf0]  ;;  %v1376_v26 = vadd.f32 %v1350_v2, %v1285_v51  ;;  %v1451_v43 = vrot.slane %v12185_v6, 3  ;;  %v1506_v23 = vmul.f32 %v18322_v20, %v12195_v47  ;;  %v1514_v53 = vmul.f32 %v18322_v20, %v12149_v31  ;;  %v12294_v58 = vld [vmem:[#allocation4 + $0x48] sm:$0x1]  ;;  %v18363_v47 = vld [vmem:[#allocation11_spill] sm:$0xff] }
  0xe5   : > { %2191 = vst [vmem:[#allocation4] sm:$0xff] %v12209_v40  ;;  %4169 = vrot.lane.b32.xlu0 %v18361_v49, %s11056_s12  ;;  %v12296_v48 = vld [vmem:[#allocation4 + $0x48] sm:$0x3]  ;;  %v18362_v34 = vmov %v18360_v36  ;;  %v1439_v6 = vrot.slane %v1415_v32, 3  ;;  %v1531_v19 = vrot.slane %v12070_v24, 4  ;;  %v1728_v37 = vmul.f32 %v18363_v47, %v1697_v29  ;;  %4137 = vrot.lane.b32.xlu1 %v11788_v15, %s11056_s12  ;;  %v2690_v51 = vpop.permute.xlu0 %2689  ;;  %v12312_v36 = vpop.permute.xlu1 %2691 }
  0xe6   : > { %v1361_v21 = vsel %vm793_vm7, %v18362_v34, %v1360_v5  ;;  %v12305_v20 = vld [vmem:[#allocation4 + $0x48] sm:$0x7]  ;;  %v18364_v50 = vrot.slane %v12060_v39, 3  ;;  %v1530_v33 = vrot.slane %v1506_v23, 4  ;;  %v1542_v55 = vrot.slane %v1514_v53, 4 }
  0xe7   : > { %v12307_v31 = vld [vmem:[#allocation4 + $0x48] sm:$0xf]  ;;  %v1380_v63 = vadd.f32 %v1361_v21, %v1289_v61  ;;  %v1736_v2 = vmul.f32 %v18363_v47, %v1701_v13  ;;  %v1752_v29 = vrot.slane %v1728_v37, 1  ;;  %v18366_v61 = vld [vmem:[#allocation12_spill] sm:$0xff] }
  0xe8   : > { %v1452_v52 = vsel %vm885_vm8, %v18364_v50, %v1451_v43  ;;  %1647 = vst [vmem:[#allocation4 + $0x48] sm:$0xf] %v11856_v41  ;;  %v18365_v24 = vmov %v18364_v50  ;;  %v1819_v5 = vmul.f32 %v18366_v61, %v1788_v18  ;;  %v1883_v32 = vld [vmem:[#allocation4 + $0x40] sm:$0x7]  ;;  %v1532_v23 = vsel %vm977_vm9, %v1530_v33, %v1531_v19  ;;  %v18367_v41 = vld [vmem:[#allocation17_spill] sm:$0xff] }
  0xe9   : > { %v1441_v15 = vsel %vm885_vm8, %v1439_v6, %v18365_v24  ;;  %v1471_v43 = vadd.f32 %v1452_v52, %v1380_v63  ;;  %v1543_v53 = vsel %vm977_vm9, %v1531_v19, %v1542_v55  ;;  %4167 = vrot.lane.b32.xlu0 %v11727_v28, %s11056_s12  ;;  %v18368_v21 = vrot.slane %v18367_v41, 1  ;;  %4157 = vrot.lane.b32.xlu1 %v18361_v49, %s11056_s12  ;;  %v18369_v37 = vld [vmem:[#allocation13_spill] sm:$0xff]  ;;  %v1974_v50 = vld [vmem:[#allocation4 + $0x40] sm:$0xf]  ;;  %v18371_v55 = vld [vmem:[#allocation18_spill] sm:$0xff] }
  0xea   : > { %v1467_v34 = vadd.f32 %v1441_v15, %v1376_v26  ;;  %v1764_v6 = vrot.slane %v1736_v2, 1  ;;  %v1827_v13 = vmul.f32 %v18366_v61, %v1792_v46  ;;  %v1843_v47 = vrot.slane %v1819_v5, 2  ;;  %v18373_v2 = vld [vmem:[#allocation14_spill] sm:$0xff]  ;;  %v18375_v5 = vld [vmem:[#allocation35_spill] sm:$0xff] }
  0xeb   : > { %v1754_v39 = vsel %vm701_vm6, %v1752_v29, %v18368_v21  ;;  %v1562_v26 = vadd.f32 %v1543_v53, %v1471_v43  ;;  %v1910_v63 = vmul.f32 %v18369_v37, %v1879_v11  ;;  %v1918_v19 = vmul.f32 %v18369_v37, %v1883_v32  ;;  %v18374_v61 = vld [vmem:[#allocation34_spill] sm:$0xff]  ;;  %v12341_v32 = vpop.permute.xlu1 %2701 }
  0xec   : > { %v1558_v18 = vadd.f32 %v1532_v23, %v1467_v34  ;;  %v18370_v52 = vmov %v18368_v21  ;;  %v18372_v24 = vrot.slane %v18371_v55, 2  ;;  %v1855_v46 = vrot.slane %v1827_v13, 2  ;;  %v2700_v23 = vpop.permute.xlu0 %2699  ;;  %v2250_v53 = vld [vmem:[#allocation4] sm:$0xfe] }
  0xed   : > { %v1765_v33 = vsel %vm701_vm6, %v18370_v52, %v1764_v6  ;;  %v2001_v29 = vmul.f32 %v18373_v2, %v1970_v16  ;;  %v1693_v34 = vadd.f32 %v18375_v5, %v1562_v26  ;;  %v1934_v43 = vrot.slane %v1910_v63, 3  ;;  %v2341_v41 = vld [vmem:[#allocation4] sm:$0xfc]  ;;  %4181 = vrot.lane.b32.xlu0 %v11826_v30, %s11056_s12  ;;  %4179 = vrot.lane.b32.xlu1 %v11830_v14, %s11056_s12 }
  0xee   : > { %v1845_v15 = vsel %vm793_vm7, %v1843_v47, %v18372_v24  ;;  %v1689_v49 = vadd.f32 %v18374_v61, %v1558_v18  ;;  %v1946_v11 = vrot.slane %v1918_v19, 3  ;;  %v18376_v21 = vmov %v18372_v24  ;;  %v2432_v18 = vld [vmem:[#allocation4] sm:$0xf8]  ;;  %v18377_v19 = vld [vmem:[#allocation22_spill] sm:$0xff] }
  0xef   : > { %v1856_v6 = vsel %vm793_vm7, %v18376_v21, %v1855_v46  ;;  %v2009_v16 = vmul.f32 %v18373_v2, %v1974_v50  ;;  %v2025_v13 = vrot.slane %v2001_v29, 4  ;;  %v2171_v47 = vsel %vm2166_vm10, %v12234_v44, %v12236_v38  ;;  %v2523_v26 = vld [vmem:[#allocation4] sm:$0xf0]  ;;  %v18380_v24 = vld [vmem:[#allocation26_spill] sm:$0xff] }
  0xf0   : > { %v1780_v37 = vadd.f32 %v1754_v39, %v1689_v49  ;;  %v1784_v63 = vadd.f32 %v1765_v33, %v1693_v34  ;;  %v18378_v30 = vrot.slane %v18377_v19, 3  ;;  %v18381_v46 = vrot.slane %v18380_v24, 4  ;;  %v18382_v61 = vld [vmem:[#allocation38_spill] sm:$0xff] }
  0xf1   : > { %v2175_v44 = vsel %vm2166_vm10, %v12276_v62, %v12278_v35  ;;  %v2719_v14 = vsel %vm363_vm1, %v2690_v51, %v12312_v36  ;;  %v2037_v39 = vrot.slane %v2009_v16, 4  ;;  %v2234_v49 = vmul.f32 %v18382_v61, %v12209_v40  ;;  %4965 = vrot.lane.b32.xlu0 %v11847_v59, %s11058_s14  ;;  %4177 = vrot.lane.b32.xlu1 %v11875_v8, %s11056_s12  ;;  %v12383_v59 = vpop.permute.xlu0 %2709 }
  0xf2   : > { %v1936_v52 = vsel %vm885_vm8, %v1934_v43, %v18378_v30  ;;  %v18379_v55 = vmov %v18378_v30  ;;  %v2027_v2 = vsel %vm977_vm9, %v2025_v13, %v18381_v46  ;;  %v1871_v33 = vadd.f32 %v1845_v15, %v1780_v37  ;;  %2199 = vst [vmem:[#allocation4 + $0x40] sm:$0xf] %v2175_v44  ;;  %2743 = vst [vmem:[#allocation4] sm:$0xff] %v2719_v14  ;;  %v18384_v43 = vld [vmem:[#allocation42_spill] sm:$0xff]  ;;  %v18385_v15 = vld [vmem:[#allocation43_spill] sm:$0xff] }
  0xf3   : > { %v1947_v50 = vsel %vm885_vm8, %v18379_v55, %v1946_v11  ;;  %v1875_v29 = vadd.f32 %v1856_v6, %v1784_v63  ;;  %v2238_v5 = vmul.f32 %v18382_v61, %v2171_v47  ;;  %v18383_v34 = vmov %v18381_v46  ;;  %v18386_v13 = vld [vmem:[#allocation44_spill] sm:$0xff]  ;;  %v12385_v63 = vpop.permute.xlu1 %2711 }
  0xf4   : > { %v2038_v62 = vsel %vm977_vm9, %v18383_v34, %v2037_v39  ;;  %v2281_v11 = vmul.f32 %v18384_v43, %v2250_v53  ;;  %v2285_v51 = vmul.f32 %v18384_v43, %v2171_v47  ;;  %v2372_v21 = vmul.f32 %v18385_v15, %v2341_v41 }
  0xf5   : > { %v1962_v40 = vadd.f32 %v1936_v52, %v1871_v33  ;;  %v1966_v6 = vadd.f32 %v1947_v50, %v1875_v29  ;;  %v2376_v16 = vmul.f32 %v18385_v15, %v2171_v47  ;;  %v2463_v37 = vmul.f32 %v18386_v13, %v2432_v18  ;;  %4963 = vrot.lane.b32.xlu0 %v11879_v10, %s11058_s14  ;;  %v18387_v18 = vld [vmem:[#allocation45_spill] sm:$0xff] }
  0xf6   : > { %v2305_v19 = vrot.slane %v2281_v11, 1  ;;  %v2306_v30 = vrot.slane %v2285_v51, 1  ;;  %v2396_v53 = vrot.slane %v2372_v21, 2  ;;  %v2467_v55 = vmul.f32 %v18386_v13, %v2171_v47  ;;  %4967 = vrot.lane.b32.xlu1 %v11920_v42, %s11058_s14  ;;  %v18388_v51 = vld [vmem:[#allocation46_spill] sm:$0xff]  ;;  %v18389_v42 = vld [vmem:[#allocation47_spill] sm:$0xff] }
  0xf7   : > { %v2053_v24 = vadd.f32 %v2027_v2, %v1962_v40  ;;  %v2057_v41 = vadd.f32 %v2038_v62, %v1966_v6  ;;  %v2397_v46 = vrot.slane %v2376_v16, 2  ;;  %v2487_v44 = vrot.slane %v2463_v37, 3  ;;  %v12413_v37 = vpop.permute.xlu0 %540 }
  0xf8   : > { %v2307_v8 = vsel %vm701_vm6, %v2305_v19, %v2306_v30  ;;  %v2488_v52 = vrot.slane %v2467_v55, 3  ;;  %v2554_v50 = vmul.f32 %v18387_v18, %v2523_v26  ;;  %v2558_v39 = vmul.f32 %v18387_v18, %v2171_v47 }
  0xf9   : > { %v2242_v33 = vadd.f32 %v2234_v49, %v2053_v24  ;;  %v2246_v29 = vadd.f32 %v2238_v5, %v2057_v41  ;;  %v2398_v2 = vsel %vm793_vm7, %v2396_v53, %v2397_v46  ;;  %v12398_v61 = vsel %vm363_vm1, %v2700_v23, %v12341_v32  ;;  %v2254_v34 = vld [vmem:[#allocation4 + $0x40] sm:$0x1]  ;;  %v2802_v16 = vld [vmem:[#allocation4] sm:$0xfe]  ;;  %4983 = vrot.lane.b32.xlu0 %v11727_v28, %s11058_s14 }
  0xfa   : > { %v2345_v10 = vld [vmem:[#allocation4 + $0x40] sm:$0x3]  ;;  %v2489_v11 = vsel %vm885_vm8, %v2487_v44, %v2488_v52  ;;  %v2786_v26 = vmul.f32 %v18388_v51, %v2719_v14  ;;  %v12404_v47 = vmul.f32 %v18388_v51, %v12398_v61  ;;  %v12408_v49 = vmul.f32 %v18389_v42, %v12398_v61  ;;  %v12415_v14 = vpop.permute.xlu1 %550  ;;  %4973 = vrot.lane.b32.xlu1 %v11727_v28, %s11058_s14  ;;  %v2893_v44 = vld [vmem:[#allocation4] sm:$0xfc] }
  0xfb   : > { %v2436_v62 = vld [vmem:[#allocation4 + $0x40] sm:$0x7]  ;;  %v2289_v5 = vmul.f32 %v18384_v43, %v2254_v34  ;;  %v2333_v21 = vadd.f32 %v2307_v8, %v2242_v33  ;;  %v2380_v23 = vmul.f32 %v18385_v15, %v2345_v10  ;;  %v2578_v53 = vrot.slane %v2554_v50, 4 }
  0xfc   : > { %v2471_v40 = vmul.f32 %v18386_v13, %v2436_v62  ;;  %v2527_v6 = vld [vmem:[#allocation4 + $0x40] sm:$0xf]  ;;  %v2579_v55 = vrot.slane %v2558_v39, 4  ;;  %v2833_v43 = vmul.f32 %v18389_v42, %v2802_v16  ;;  %v18003_v10 = vrot.slane %v12408_v49, 1 }
  0xfd   : > { %v2562_v19 = vmul.f32 %v18387_v18, %v2527_v6  ;;  %v2317_v15 = vrot.slane %v2289_v5, 1  ;;  %v2408_v13 = vrot.slane %v2380_v23, 2  ;;  %v2424_v24 = vadd.f32 %v2398_v2, %v2333_v21  ;;  %v2984_v62 = vld [vmem:[#allocation4] sm:$0xf8]  ;;  %5005 = vrot.lane.b32.xlu0 %v11987_v27, %s11058_s14  ;;  %v18390_v23 = vld [vmem:[#allocation50_spill] sm:$0xff] }
  0xfe   : > { %v2499_v41 = vrot.slane %v2471_v40, 3  ;;  %v2580_v8 = vsel %vm977_vm9, %v2578_v53, %v2579_v55  ;;  %v2857_v34 = vrot.slane %v2833_v43, 1  ;;  %v2924_v40 = vmul.f32 %v18390_v23, %v2893_v44  ;;  %4993 = vrot.lane.b32.xlu1 %v11727_v28, %s11058_s14  ;;  %v12448_v6 = vpop.permute.xlu1 %2140 }
  0xff   : > { %v2590_v33 = vrot.slane %v2562_v19, 4  ;;  %v2318_v18 = vsel %vm701_vm6, %v2306_v30, %v2317_v15  ;;  %v2409_v50 = vsel %vm793_vm7, %v2397_v46, %v2408_v13  ;;  %v2515_v51 = vadd.f32 %v2489_v11, %v2424_v24 }
 0x100   : > { %v2500_v39 = vsel %vm885_vm8, %v2488_v52, %v2499_v41  ;;  %v2337_v2 = vadd.f32 %v2318_v18, %v2246_v29  ;;  %v2859_v21 = vsel %vm701_vm6, %v2857_v34, %v18003_v10  ;;  %v12439_v46 = vmul.f32 %v18390_v23, %v12398_v61  ;;  %v18391_v52 = vld [vmem:[#allocation51_spill] sm:$0xff]  ;;  %v12446_v29 = vpop.permute.xlu0 %560  ;;  %v1698_v41 = vld [vmem:[#allocation4 + $0x8] sm:$0xfe]  ;;  %v18393_v18 = vld [vmem:[#allocation82_spill] sm:$0xff] }
 0x101   : > { %v2591_v5 = vsel %vm977_vm9, %v2579_v55, %v2590_v33  ;;  %v2606_v30 = vadd.f32 %v2580_v8, %v2515_v51  ;;  %v3015_v11 = vmul.f32 %v18391_v52, %v2984_v62  ;;  %v12444_v27 = vmul.f32 %v18391_v52, %v12398_v61  ;;  %v18392_v8 = vld [vmem:[#allocation20_spill] sm:$0xff]  ;;  %v12474_v33 = vld [vmem:[#allocation4 + $0x8] sm:$0xfc] }
 0x102   : > { %v2428_v16 = vadd.f32 %v2409_v50, %v2337_v2  ;;  %v2948_v19 = vrot.slane %v2924_v40, 2  ;;  %v2727_v53 = vsel %vm363_vm1, %v12383_v59, %v12385_v63  ;;  %v12456_v55 = vsel %vm363_vm1, %v12076_v0, %v12413_v37  ;;  %v12476_v34 = vld [vmem:[#allocation4 + $0x8] sm:$0xf8]  ;;  %5007 = vrot.lane.b32.xlu1 %v18393_v18, %s11058_s14  ;;  %v18395_v40 = vld [vmem:[#allocation24_spill] sm:$0xff] }
 0x103   : > { %v2794_v43 = vadd.f32 %v2786_v26, %v2606_v30  ;;  %v18002_v15 = vrot.slane %v12439_v46, 2  ;;  %v3039_v13 = vrot.slane %v3015_v11, 3  ;;  %v18000_v24 = vrot.slane %v12444_v27, 3  ;;  %2751 = vst [vmem:[#allocation4 + $0x40] sm:$0xf] %v2727_v53  ;;  %590 = vst [vmem:[#allocation4 + $0x10] sm:$0xff] %v12456_v55 }
 0x104   : > { %v2519_v44 = vadd.f32 %v2500_v39, %v2428_v16  ;;  %v12464_v59 = vsel %vm363_vm1, %v12078_v22, %v12415_v14  ;;  %v574_v0 = vsel %vm363_vm1, %v18392_v8, %v12446_v29  ;;  %v12472_v26 = vsel %vm2166_vm10, %v12204_v17, %v12448_v6  ;;  %v12478_v62 = vld [vmem:[#allocation4 + $0x8] sm:$0xf0]  ;;  %v18397_v16 = vld [vmem:[#allocation28_spill] sm:$0xff] }
 0x105   : > { %v2885_v22 = vadd.f32 %v2859_v21, %v2794_v43  ;;  %v2950_v50 = vsel %vm793_vm7, %v2948_v19, %v18002_v15  ;;  %v3041_v39 = vsel %vm885_vm8, %v3039_v13, %v18000_v24  ;;  %598 = vst [vmem:[#allocation4 + $0x50] sm:$0xf] %v574_v0  ;;  %v827_v17 = vadd.f32 %v12258_v25, %v12268_v57  ;;  %v18396_v30 = vld [vmem:[#allocation41_spill] sm:$0xff]  ;;  %v18398_v25 = vld [vmem:[#allocation54_spill] sm:$0xff]  ;;  %v18399_v13 = vld [vmem:[#allocation55_spill] sm:$0xff] }
 0x106   : > { %2192 = vst [vmem:[#allocation4 + $0x8] sm:$0xff] %v12472_v26  ;;  %v2610_v51 = vadd.f32 %v2591_v5, %v2519_v44  ;;  %v18394_v2 = vrot.slane %v12163_v4, 4  ;;  %v1187_v11 = vmul.f32 %v18396_v30, %v18395_v40  ;;  %v1191_v19 = vmul.f32 %v18396_v30, %v18397_v16 }
 0x107   : > { %v2976_v53 = vadd.f32 %v2950_v50, %v2885_v22  ;;  %v919_v43 = vadd.f32 %v12261_v56, %v827_v17  ;;  %v1234_v57 = vmul.f32 %v18398_v25, %v12246_v3  ;;  %v1238_v5 = vmul.f32 %v18398_v25, %v18397_v16  ;;  %v18400_v22 = vld [vmem:[#allocation59_spill] sm:$0xff] }
 0x108   : > { %v993_v21 = vsel %vm977_vm9, %v18394_v2, %v992_v45  ;;  %v12506_v12 = vadd.f32 %v12404_v47, %v2610_v51  ;;  %v1195_v4 = vadd.f32 %v1187_v11, %v12280_v60  ;;  %v1242_v45 = vmul.f32 %v18398_v25, %v12294_v58 }
 0x109   : > { %v1325_v44 = vmul.f32 %v18399_v13, %v12248_v1  ;;  %v12513_v8 = vadd.f32 %v3041_v39, %v2976_v53  ;;  %v1011_v56 = vadd.f32 %v993_v21, %v919_v43  ;;  %v1260_v0 = vrot.slane %v1234_v57, 1 }
 0x10a   : > { %v1261_v18 = vrot.slane %v1238_v5, 1  ;;  %v1329_v3 = vmul.f32 %v18399_v13, %v18397_v16  ;;  %v1333_v47 = vmul.f32 %v18399_v13, %v12296_v48  ;;  %v1416_v60 = vmul.f32 %v18400_v22, %v12250_v54  ;;  %v18401_v54 = vld [vmem:[#allocation62_spill] sm:$0xff]  ;;  %v1702_v5 = vld [vmem:[#allocation4 + $0x48] sm:$0x1] }
 0x10b   : > { %v1420_v58 = vmul.f32 %v18400_v22, %v18397_v16  ;;  %v1199_v50 = vadd.f32 %v1191_v19, %v1011_v56  ;;  %v1271_v39 = vrot.slane %v1242_v45, 1  ;;  %v1351_v17 = vrot.slane %v1325_v44, 2  ;;  %v1793_v44 = vld [vmem:[#allocation4 + $0x48] sm:$0x3] }
 0x10c   : > { %v1262_v1 = vsel %vm701_vm6, %v1260_v0, %v1261_v18  ;;  %v1352_v2 = vrot.slane %v1329_v3, 2  ;;  %v1362_v21 = vrot.slane %v1333_v47, 2  ;;  %v1424_v40 = vmul.f32 %v18400_v22, %v12305_v20  ;;  %v12538_v47 = vpop.permute.xlu0 %2150 }
 0x10d   : > { %v1286_v51 = vadd.f32 %v1262_v1, %v1195_v4  ;;  %v1272_v30 = vsel %vm701_vm6, %v1261_v18, %v1271_v39  ;;  %v1442_v48 = vrot.slane %v1416_v60, 3  ;;  %v1443_v11 = vrot.slane %v1420_v58, 3  ;;  %v18402_v18 = vld [vmem:[#allocation48_spill] sm:$0xff]  ;;  %18403 = vst [vmem:[#allocation25_spill] sm:$0xff] %v12538_v47 }
 0x10e   : > { %v1507_v53 = vmul.f32 %v18401_v54, %v12265_v9  ;;  %v1290_v43 = vadd.f32 %v1272_v30, %v1199_v50  ;;  %v1353_v19 = vsel %vm793_vm7, %v1351_v17, %v1352_v2  ;;  %v1363_v25 = vsel %vm793_vm7, %v1352_v2, %v1362_v21 }
 0x10f   : > { %v1453_v57 = vrot.slane %v1424_v40, 3  ;;  %v1377_v4 = vadd.f32 %v1353_v19, %v1286_v51  ;;  %v1444_v45 = vsel %vm885_vm8, %v1442_v48, %v1443_v11  ;;  %v1511_v20 = vmul.f32 %v18401_v54, %v18397_v16  ;;  %v18404_v16 = vld [vmem:[#allocation49_spill] sm:$0xff]  ;;  %v18405_v40 = vld [vmem:[#allocation52_spill] sm:$0xff] }
 0x110   : > { %v1515_v13 = vmul.f32 %v18401_v54, %v12307_v31  ;;  %v1381_v56 = vadd.f32 %v1363_v25, %v1290_v43  ;;  %v1533_v0 = vrot.slane %v1507_v53, 4  ;;  %v1729_v3 = vmul.f32 %v18402_v18, %v1698_v41  ;;  %v1884_v51 = vld [vmem:[#allocation4 + $0x48] sm:$0x7]  ;;  %v18406_v54 = vld [vmem:[#allocation56_spill] sm:$0xff] }
 0x111   : > { %v1454_v9 = vsel %vm885_vm8, %v1443_v11, %v1453_v57  ;;  %v1468_v22 = vadd.f32 %v1444_v45, %v1377_v4  ;;  %v1534_v60 = vrot.slane %v1511_v20, 4  ;;  %v1737_v50 = vmul.f32 %v18402_v18, %v1702_v5  ;;  %v1975_v25 = vld [vmem:[#allocation4 + $0x48] sm:$0xf] }
 0x112   : > { %v1544_v58 = vrot.slane %v1515_v13, 4  ;;  %v1472_v1 = vadd.f32 %v1454_v9, %v1381_v56  ;;  %v1755_v39 = vrot.slane %v1729_v3, 1  ;;  %v1820_v17 = vmul.f32 %v18404_v16, %v12474_v33  ;;  %v12551_v33 = vpop.permute.xlu1 %2160  ;;  %v18410_v13 = vld [vmem:[#allocation63_spill] sm:$0xff]  ;;  %v18412_v9 = vld [vmem:[#allocation57_spill] sm:$0xff]  ;;  %v18414_v3 = vld [vmem:[#allocation58_spill] sm:$0xff] }
 0x113   : > { %v1828_v31 = vmul.f32 %v18404_v16, %v1793_v44  ;;  %v1535_v2 = vsel %vm977_vm9, %v1533_v0, %v1534_v60  ;;  %v1766_v41 = vrot.slane %v1737_v50, 1  ;;  %v1911_v30 = vmul.f32 %v18405_v40, %v12476_v34  ;;  %18408 = vst [vmem:[#allocation32_spill] sm:$0xff] %v12551_v33  ;;  %v18411_v44 = vld [vmem:[#allocation9_spill] sm:$0xff] }
 0x114   : > { %v1545_v21 = vsel %vm977_vm9, %v1534_v60, %v1544_v58  ;;  %v1559_v48 = vadd.f32 %v1535_v2, %v1468_v22  ;;  %v18407_v53 = vrot.slane %v18406_v54, 1  ;;  %v1846_v19 = vrot.slane %v1820_v17, 2  ;;  %v12564_v60 = vpop.permute.xlu0 %1095 }
 0x115   : > { %v1563_v11 = vadd.f32 %v1545_v21, %v1472_v1  ;;  %v1857_v4 = vrot.slane %v1828_v31, 2  ;;  %v1919_v45 = vmul.f32 %v18405_v40, %v1884_v51  ;;  %v1937_v20 = vrot.slane %v1911_v30, 3  ;;  %v18416_v1 = vld [vmem:[#allocation60_spill] sm:$0xff]  ;;  %v648_v51 = vld [vmem:[#allocation4 + $0x10] sm:$0xfe] }
 0x116   : > { %v1757_v43 = vsel %vm701_vm6, %v1755_v39, %v18407_v53  ;;  %v18409_v57 = vmov %v18407_v53  ;;  %v1690_v34 = vadd.f32 %v18410_v13, %v1559_v48  ;;  %v18413_v0 = vrot.slane %v18412_v9, 2  ;;  %v740_v40 = vld [vmem:[#allocation4 + $0x10] sm:$0xfc]  ;;  %v18423_v13 = vld [vmem:[#allocation68_spill] sm:$0xff]  ;;  %v18425_v9 = vld [vmem:[#allocation69_spill] sm:$0xff] }
 0x117   : > { %v1767_v5 = vsel %vm701_vm6, %v18409_v57, %v1766_v41  ;;  %v1694_v56 = vadd.f32 %v18411_v44, %v1563_v11  ;;  %v2002_v22 = vmul.f32 %v18414_v3, %v12478_v62  ;;  %v18417_v39 = vrot.slane %v18416_v1, 3  ;;  %v832_v30 = vld [vmem:[#allocation4 + $0x10] sm:$0xf8] }
 0x118   : > { %v1848_v18 = vsel %vm793_vm7, %v1846_v19, %v18413_v0  ;;  %v18415_v58 = vmov %v18413_v0  ;;  %v1948_v17 = vrot.slane %v1919_v45, 3  ;;  %v12573_v31 = vmul.f32 %v18414_v3, %v1975_v25  ;;  %v924_v48 = vld [vmem:[#allocation4 + $0x10] sm:$0xf0]  ;;  %v18420_v25 = vld [vmem:[#allocation67_spill] sm:$0xff] }
 0x119   : > { %v1858_v50 = vsel %vm793_vm7, %v18415_v58, %v1857_v4  ;;  %v1939_v16 = vsel %vm885_vm8, %v1937_v20, %v18417_v39  ;;  %v1781_v2 = vadd.f32 %v1757_v43, %v1690_v34  ;;  %v1785_v21 = vadd.f32 %v1767_v5, %v1694_v56  ;;  %v18419_v43 = vld [vmem:[#allocation23_spill] sm:$0xff]  ;;  %v18421_v4 = vld [vmem:[#allocation64_spill] sm:$0xff]  ;;  %v12599_v34 = vpop.permute.xlu1 %1105  ;;  %v18424_v44 = vld [vmem:[#allocation66_spill] sm:$0xff] }
 0x11a   : > { %v2028_v41 = vrot.slane %v2002_v22, 4  ;;  %v12578_v62 = vsel %vm2166_vm10, %v12236_v38, %v12538_v47  ;;  %v18418_v11 = vmov %v18417_v39  ;;  %v2176_v53 = vsel %vm2166_vm10, %v12278_v35, %v12551_v33  ;;  %v18427_v22 = vld [vmem:[#allocation71_spill] sm:$0xff] }
 0x11b   : > { %v1949_v54 = vsel %vm885_vm8, %v18418_v11, %v1948_v17  ;;  %v12589_v19 = vsel %vm415_vm4, %v18419_v43, %v12564_v60  ;;  %v636_v38 = vmul.f32 %v18420_v25, %v12464_v59  ;;  %v1872_v57 = vadd.f32 %v1848_v18, %v1781_v2  ;;  %2200 = vst [vmem:[#allocation4 + $0x48] sm:$0xf] %v2176_v53  ;;  %v18426_v18 = vld [vmem:[#allocation70_spill] sm:$0xff] }
 0x11c   : > { %v1876_v5 = vadd.f32 %v1858_v50, %v1785_v21  ;;  %v18422_v45 = vrot.slane %v18421_v4, 4  ;;  %1145 = vst [vmem:[#allocation4 + $0x10] sm:$0xff] %v12589_v19  ;;  %v683_v35 = vmul.f32 %v18423_v13, %v12464_v59  ;;  %v775_v0 = vmul.f32 %v18425_v9, %v12464_v59  ;;  %v652_v2 = vld [vmem:[#allocation4 + $0x50] sm:$0x1] }
 0x11d   : > { %v644_v56 = vadd.f32 %v636_v38, %v18424_v44  ;;  %v867_v3 = vmul.f32 %v18426_v18, %v12464_v59  ;;  %v12608_v58 = vmul.f32 %v18427_v22, %v12464_v59  ;;  %v1963_v50 = vadd.f32 %v1939_v16, %v1872_v57  ;;  %v744_v21 = vld [vmem:[#allocation4 + $0x50] sm:$0x3] }
 0x11e   : > { %v2030_v20 = vsel %vm977_vm9, %v2028_v41, %v18422_v45  ;;  %v709_v1 = vrot.slane %v683_v35, 1  ;;  %v632_v39 = vmul.f32 %v18420_v25, %v12456_v55  ;;  %v679_v17 = vmul.f32 %v18423_v13, %v648_v51  ;;  %v836_v38 = vld [vmem:[#allocation4 + $0x50] sm:$0x7]  ;;  %v12617_v35 = vpop.permute.xlu0 %1115  ;;  %v18428_v25 = vld [vmem:[#allocation16_spill] sm:$0xff] }
 0x11f   : > { %v801_v41 = vrot.slane %v775_v0, 2  ;;  %v893_v11 = vrot.slane %v867_v3, 3  ;;  %v18001_v53 = vrot.slane %v12608_v58, 4  ;;  %v771_v43 = vmul.f32 %v18425_v9, %v740_v40  ;;  %v928_v57 = vld [vmem:[#allocation4 + $0x50] sm:$0xf] }
 0x120   : > { %v2054_v45 = vadd.f32 %v2030_v20, %v1963_v50  ;;  %v640_v59 = vadd.f32 %v632_v39, %v18424_v44  ;;  %v708_v24 = vrot.slane %v679_v17, 1  ;;  %v863_v16 = vmul.f32 %v18426_v18, %v832_v30  ;;  %v12629_v50 = vpop.permute.xlu1 %2693 }
 0x121   : > { %v800_v55 = vrot.slane %v771_v43, 2  ;;  %v955_v51 = vmul.f32 %v18427_v22, %v924_v48  ;;  %v12623_v0 = vsel %vm415_vm4, %v18428_v25, %v12599_v34  ;;  %v687_v40 = vmul.f32 %v18423_v13, %v652_v2  ;;  %18429 = vst [vmem:[#allocation33_spill] sm:$0xff] %v12629_v50  ;;  %v18430_v43 = vld [vmem:[#allocation19_spill] sm:$0xff]  ;;  %v2251_v13 = vld [vmem:[#allocation4 + $0x8] sm:$0xfe] }
 0x122   : > { %v710_v20 = vsel %vm701_vm6, %v708_v24, %v709_v1  ;;  %v892_v3 = vrot.slane %v863_v16, 3  ;;  %v779_v44 = vmul.f32 %v18425_v9, %v744_v21  ;;  %v871_v30 = vmul.f32 %v18426_v18, %v836_v38  ;;  %v2342_v18 = vld [vmem:[#allocation4 + $0x8] sm:$0xfc] }
 0x123   : > { %v732_v39 = vadd.f32 %v710_v20, %v640_v59  ;;  %v802_v17 = vsel %vm793_vm7, %v800_v55, %v801_v41  ;;  %v12633_v48 = vmul.f32 %v18427_v22, %v928_v57  ;;  %v1129_v25 = vsel %vm415_vm4, %v18430_v43, %v12617_v35  ;;  %v2433_v57 = vld [vmem:[#allocation4 + $0x8] sm:$0xf8]  ;;  %v18431_v43 = vld [vmem:[#allocation72_spill] sm:$0xff] }
 0x124   : > { %v894_v24 = vsel %vm885_vm8, %v892_v3, %v893_v11  ;;  %v984_v2 = vrot.slane %v955_v51, 4  ;;  %v718_v16 = vrot.slane %v687_v40, 1  ;;  %v810_v9 = vrot.slane %v779_v44, 2  ;;  %1153 = vst [vmem:[#allocation4 + $0x50] sm:$0xf] %v1129_v25  ;;  %v12675_v59 = vpop.permute.xlu1 %2713 }
 0x125   : > { %v824_v21 = vadd.f32 %v802_v17, %v732_v39  ;;  %v902_v38 = vrot.slane %v871_v30, 3  ;;  %v2720_v22 = vsel %vm363_vm1, %v12312_v36, %v12629_v50  ;;  %v2524_v55 = vld [vmem:[#allocation4 + $0x8] sm:$0xf0]  ;;  %v1967_v3 = vadd.f32 %v1949_v54, %v1876_v5  ;;  %v2255_v44 = vld [vmem:[#allocation4 + $0x48] sm:$0x1]  ;;  %v18439_v50 = vld [vmem:[#allocation79_spill] sm:$0xff] }
 0x126   : > { %v986_v20 = vsel %vm977_vm9, %v984_v2, %v18001_v53  ;;  %v719_v51 = vsel %vm701_vm6, %v709_v1, %v718_v16  ;;  %v12648_v40 = vsel %vm793_vm7, %v801_v41, %v810_v9  ;;  %2744 = vst [vmem:[#allocation4 + $0x8] sm:$0xff] %v2720_v22  ;;  %v2039_v36 = vrot.slane %v12573_v31, 4  ;;  %v18432_v2 = vld [vmem:[#allocation73_spill] sm:$0xff]  ;;  %v18434_v16 = vld [vmem:[#allocation74_spill] sm:$0xff] }
 0x127   : > { %v916_v30 = vadd.f32 %v894_v24, %v824_v21  ;;  %v12650_v39 = vadd.f32 %v719_v51, %v644_v56  ;;  %v12653_v17 = vsel %vm885_vm8, %v893_v11, %v902_v38  ;;  %v2235_v25 = vmul.f32 %v18431_v43, %v12472_v26  ;;  %v2346_v5 = vld [vmem:[#allocation4 + $0x48] sm:$0x3]  ;;  %v12670_v26 = vpop.permute.xlu0 %2703 }
 0x128   : > { %v2239_v1 = vmul.f32 %v18431_v43, %v12578_v62  ;;  %v2282_v41 = vmul.f32 %v18432_v2, %v2251_v13  ;;  %v2286_v54 = vmul.f32 %v18432_v2, %v12578_v62  ;;  %v18433_v56 = vrot.slane %v18421_v4, 4  ;;  %v2437_v4 = vld [vmem:[#allocation4 + $0x48] sm:$0x7] }
 0x129   : > { %v12663_v24 = vadd.f32 %v986_v20, %v916_v30  ;;  %v2290_v31 = vmul.f32 %v18432_v2, %v2255_v44  ;;  %v2373_v9 = vmul.f32 %v18434_v16, %v2342_v18  ;;  %v2243_v38 = vadd.f32 %v2235_v25, %v2054_v45  ;;  %v18435_v18 = vld [vmem:[#allocation75_spill] sm:$0xff] }
 0x12a   : > { %v2040_v11 = vsel %vm977_vm9, %v18433_v56, %v2039_v36  ;;  %v2308_v51 = vrot.slane %v2282_v41, 1  ;;  %v2309_v13 = vrot.slane %v2286_v54, 1  ;;  %v2377_v53 = vmul.f32 %v18434_v16, %v12578_v62 }
 0x12b   : > { %v2058_v21 = vadd.f32 %v2040_v11, %v1967_v3  ;;  %v2319_v43 = vrot.slane %v2290_v31, 1  ;;  %v2381_v20 = vmul.f32 %v18434_v16, %v2346_v5  ;;  %v2399_v30 = vrot.slane %v2373_v9, 2  ;;  %v2528_v16 = vld [vmem:[#allocation4 + $0x48] sm:$0xf] }
 0x12c   : > { %v2310_v44 = vsel %vm701_vm6, %v2308_v51, %v2309_v13  ;;  %v2464_v2 = vmul.f32 %v18435_v18, %v2433_v57  ;;  %v2468_v45 = vmul.f32 %v18435_v18, %v12578_v62  ;;  %v2400_v41 = vrot.slane %v2377_v53, 2 }
 0x12d   : > { %v2247_v36 = vadd.f32 %v2239_v1, %v2058_v21  ;;  %v2320_v3 = vsel %vm701_vm6, %v2309_v13, %v2319_v43  ;;  %v2334_v25 = vadd.f32 %v2310_v44, %v2243_v38  ;;  %v2410_v54 = vrot.slane %v2381_v20, 2  ;;  %v18436_v21 = vld [vmem:[#allocation76_spill] sm:$0xff]  ;;  %v2803_v15 = vld [vmem:[#allocation4 + $0x8] sm:$0xfe]  ;;  %v543_v38 = vpop.permute.xlu0 %542 }
 0x12e   : > { %v2472_v5 = vmul.f32 %v18435_v18, %v2437_v4  ;;  %v2490_v11 = vrot.slane %v2464_v2, 3  ;;  %v2491_v31 = vrot.slane %v2468_v45, 3  ;;  %v2401_v1 = vsel %vm793_vm7, %v2399_v30, %v2400_v41  ;;  %v2894_v13 = vld [vmem:[#allocation4 + $0x8] sm:$0xfc] }
 0x12f   : > { %v2338_v56 = vadd.f32 %v2320_v3, %v2247_v36  ;;  %v2411_v9 = vsel %vm793_vm7, %v2400_v41, %v2410_v54  ;;  %v2555_v57 = vmul.f32 %v18436_v21, %v2524_v55  ;;  %v2559_v51 = vmul.f32 %v18436_v21, %v12578_v62  ;;  %v2985_v36 = vld [vmem:[#allocation4 + $0x8] sm:$0xf8]  ;;  %v553_v55 = vpop.permute.xlu1 %552  ;;  %v18438_v54 = vld [vmem:[#allocation78_spill] sm:$0xff] }
 0x130   : > { %v2425_v53 = vadd.f32 %v2401_v1, %v2334_v25  ;;  %v2492_v20 = vsel %vm885_vm8, %v2490_v11, %v2491_v31  ;;  %v2501_v4 = vrot.slane %v2472_v5, 3  ;;  %v2563_v44 = vmul.f32 %v18436_v21, %v2528_v16  ;;  %v18437_v2 = vld [vmem:[#allocation77_spill] sm:$0xff]  ;;  %v18440_v1 = vld [vmem:[#allocation80_spill] sm:$0xff] }
 0x131   : > { %v2429_v43 = vadd.f32 %v2411_v9, %v2338_v56  ;;  %v2581_v18 = vrot.slane %v2555_v57, 4  ;;  %v2582_v30 = vrot.slane %v2559_v51, 4  ;;  %v2787_v45 = vmul.f32 %v18437_v2, %v2720_v22  ;;  %v3076_v3 = vld [vmem:[#allocation4 + $0x8] sm:$0xf0] }
 0x132   : > { %v2502_v41 = vsel %vm885_vm8, %v2491_v31, %v2501_v4  ;;  %v2516_v62 = vadd.f32 %v2492_v20, %v2425_v53  ;;  %v2834_v10 = vmul.f32 %v18438_v54, %v2803_v15  ;;  %v2925_v25 = vmul.f32 %v18439_v50, %v2894_v13  ;;  %v18441_v51 = vld [vmem:[#allocation81_spill] sm:$0xff]  ;;  %v563_v13 = vpop.permute.xlu0 %562 }
 0x133   : > { %v2520_v56 = vadd.f32 %v2502_v41, %v2429_v43  ;;  %v2583_v11 = vsel %vm977_vm9, %v2581_v18, %v2582_v30  ;;  %v2592_v5 = vrot.slane %v2563_v44, 4  ;;  %v3016_v9 = vmul.f32 %v18440_v1, %v2985_v36  ;;  %v1098_v18 = vpop.permute.xlu1 %1097 }
 0x134   : > { %v2607_v16 = vadd.f32 %v2583_v11, %v2516_v62  ;;  %v2860_v21 = vrot.slane %v2834_v10, 1  ;;  %v2951_v57 = vrot.slane %v2925_v25, 2  ;;  %v3107_v22 = vmul.f32 %v18441_v51, %v3076_v3 }
 0x135   : > { %v2593_v33 = vsel %vm977_vm9, %v2582_v30, %v2592_v5  ;;  %v3042_v47 = vrot.slane %v3016_v9, 3  ;;  %v2724_v15 = vsel %vm363_vm1, %v12341_v32, %v12670_v26  ;;  %v2728_v31 = vsel %vm363_vm1, %v12385_v63, %v12675_v59  ;;  %v3075_v63 = vld [vmem:[#allocation4] sm:$0xf0] }
 0x136   : > { %v2611_v53 = vadd.f32 %v2593_v33, %v2520_v56  ;;  %v2795_v43 = vadd.f32 %v2787_v45, %v2607_v16  ;;  %v3133_v20 = vrot.slane %v3107_v22, 4  ;;  %v2791_v10 = vmul.f32 %v18437_v2, %v2724_v15  ;;  %2752 = vst [vmem:[#allocation4 + $0x48] sm:$0xf] %v2728_v31  ;;  %v18447_v56 = vld [vmem:[#allocation65_spill] sm:$0xff]  ;;  %v18449_v31 = vld [vmem:[#allocation84_spill] sm:$0xff] }
 0x137   : > { %v12706_v4 = vmul.f32 %v18438_v54, %v2724_v15  ;;  %v12709_v36 = vmul.f32 %v18439_v50, %v2724_v15  ;;  %v12712_v44 = vmul.f32 %v18440_v1, %v2724_v15  ;;  %v12715_v32 = vmul.f32 %v18441_v51, %v2724_v15  ;;  %v1481_v51 = vld [vmem:[#allocation4 + $0x50] sm:$0xf] }
 0x138   : > { %v12717_v33 = vadd.f32 %v2791_v10, %v2611_v53  ;;  %v567_v30 = vsel %vm363_vm1, %v12413_v37, %v543_v38  ;;  %v571_v2 = vsel %vm363_vm1, %v12415_v14, %v553_v55  ;;  %v575_v45 = vsel %vm363_vm1, %v12446_v29, %v563_v13  ;;  %v18448_v29 = vld [vmem:[#allocation85_spill] sm:$0xff]  ;;  %v18450_v13 = vld [vmem:[#allocation15_spill] sm:$0xff] }
 0x139   : > { %18442 = vst [vmem:[#allocation27_spill] sm:$0xff] %v12706_v4  ;;  %18443 = vst [vmem:[#allocation36_spill] sm:$0xff] %v12709_v36  ;;  %v18010_v3 = vrot.slane %v12706_v4, 1  ;;  %v18009_v41 = vrot.slane %v12709_v36, 2  ;;  %v18008_v62 = vrot.slane %v12712_v44, 3  ;;  %v18007_v25 = vrot.slane %v12715_v32, 4 }
 0x13a   : > { %18444 = vst [vmem:[#allocation37_spill] sm:$0xff] %v12712_v44  ;;  %18445 = vst [vmem:[#allocation31_spill] sm:$0xff] %v12715_v32  ;;  %v3106_v11 = vmul.f32 %v18447_v56, %v3075_v63  ;;  %v12732_v37 = vmul.f32 %v18447_v56, %v12398_v61  ;;  %v12736_v14 = vsel %vm415_vm4, %v12564_v60, %v1098_v18  ;;  %v18452_v63 = vld [vmem:[#allocation30_spill] sm:$0xff]  ;;  %v1108_v18 = vpop.permute.xlu0 %1107 }
 0x13b   : > { %18446 = vst [vmem:[#allocation39_spill] sm:$0xff] %v12717_v33  ;;  %591 = vst [vmem:[#allocation4 + $0x18] sm:$0xff] %v567_v30  ;;  %v633_v38 = vmul.f32 %v18448_v29, %v567_v30  ;;  %v2862_v55 = vsel %vm701_vm6, %v2860_v21, %v18010_v3  ;;  %v2953_v5 = vsel %vm793_vm7, %v2951_v57, %v18009_v41  ;;  %v18451_v57 = vld [vmem:[#allocation29_spill] sm:$0xff]  ;;  %v2806_v30 = vld [vmem:[#allocation4 + $0x40] sm:$0x1] }
 0x13c   : > { %599 = vst [vmem:[#allocation4 + $0x58] sm:$0xf] %v575_v45  ;;  %v3044_v9 = vsel %vm885_vm8, %v3042_v47, %v18008_v62  ;;  %v3135_v61 = vsel %vm977_vm9, %v3133_v20, %v18007_v25  ;;  %v2886_v60 = vadd.f32 %v2862_v55, %v2795_v43  ;;  %v3130_v16 = vrot.slane %v3106_v11, 4  ;;  %v2897_v20 = vld [vmem:[#allocation4 + $0x40] sm:$0x3]  ;;  %v18466_v33 = vld [vmem:[#allocation21_spill] sm:$0xff] }
 0x13d   : > { %v18012_v22 = vrot.slane %v12732_v37, 4  ;;  %v637_v15 = vmul.f32 %v18448_v29, %v571_v2  ;;  %v641_v21 = vadd.f32 %v633_v38, %v18449_v31  ;;  %v12755_v53 = vmul.f32 %v18450_v13, %v571_v2  ;;  %v18453_v29 = vld [vmem:[#allocation86_spill] sm:$0xff] }
 0x13e   : > { %v12758_v10 = vmul.f32 %v18451_v57, %v571_v2  ;;  %v12761_v47 = vmul.f32 %v18452_v63, %v571_v2  ;;  %v2977_v43 = vadd.f32 %v2953_v5, %v2886_v60  ;;  %v12770_v38 = vmul.f32 %v18453_v29, %v571_v2  ;;  %v1299_v44 = vld [vmem:[#allocation4 + $0x50] sm:$0x3] }
 0x13f   : > { %v3132_v45 = vsel %vm977_vm9, %v3130_v16, %v18012_v22  ;;  %v12767_v11 = vadd.f32 %v637_v15, %v18449_v31  ;;  %v712_v25 = vrot.slane %v12755_v53, 1  ;;  %v12778_v16 = vsel %vm415_vm4, %v12599_v34, %v1108_v18  ;;  %v12879_v53 = vld [vmem:[%s17890_s1 + $0x40] ss:$8 sm:$0xf] }
 0x140   : > { %v3158_v55 = vadd.f32 %v3132_v45, %v12513_v8  ;;  %v18013_v62 = vrot.slane %v12758_v10, 2  ;;  %v3068_v3 = vadd.f32 %v3044_v9, %v2977_v43  ;;  %v2841_v15 = vmul.f32 %v18389_v42, %v2806_v30  ;;  %v2988_v43 = vld [vmem:[#allocation4 + $0x40] sm:$0x7]  ;;  %v1390_v36 = vld [vmem:[#allocation4 + $0x50] sm:$0x7] }
 0x141   : > { %v2932_v2 = vmul.f32 %v18390_v23, %v2897_v20  ;;  %v1188_v4 = vmul.f32 %v18466_v33, %v12589_v19 }
 0x142   : > { %v649_v5 = vld [vmem:[#allocation4 + $0x18] sm:$0xfe]  ;;  %3166 = vst [vmem:[#allocation3 + $0xb8] sm:$0xff] %v3158_v55  ;;  %v12782_v8 = vrot.slane %v3158_v55, 7  ;;  %v3159_v41 = vadd.f32 %v3135_v61, %v3068_v3  ;;  %v2869_v18 = vrot.slane %v2841_v15, 1  ;;  %v18454_v3 = vrot.slane %v12408_v49, 1 }
 0x143   : > { %v741_v60 = vld [vmem:[#allocation4 + $0x18] sm:$0xfc]  ;;  %v680_v45 = vmul.f32 %v18450_v13, %v649_v5  ;;  %v3079_v5 = vld [vmem:[#allocation4 + $0x40] sm:$0xf]  ;;  %v653_v15 = vld [vmem:[#allocation4 + $0x58] sm:$0x1] }
 0x144   : > { %v833_v32 = vld [vmem:[#allocation4 + $0x18] sm:$0xf8]  ;;  %v772_v22 = vmul.f32 %v18451_v57, %v741_v60  ;;  %v4102_v23 = vsel %vm3256_vm5, %v11391_v7, %v12782_v8  ;;  %3167 = vst [vmem:[#allocation3 + $0xc0] sm:$0xff] %v3159_v41  ;;  %v2870_v61 = vsel %vm701_vm6, %v18454_v3, %v2869_v18  ;;  %v2960_v60 = vrot.slane %v2932_v2, 2  ;;  %v745_v42 = vld [vmem:[#allocation4 + $0x58] sm:$0x3]  ;;  %v1118_v3 = vpop.permute.xlu1 %1117 }
 0x145   : > { %v925_v31 = vld [vmem:[#allocation4 + $0x18] sm:$0xf0]  ;;  %v864_v9 = vmul.f32 %v18452_v63, %v833_v32  ;;  %v711_v30 = vrot.slane %v680_v45, 1  ;;  %4151 = vrot.lane.b32.xlu0 %v4102_v23, %s11056_s12  ;;  %v2889_v49 = vadd.f32 %v2870_v61, %v12506_v12  ;;  %v929_v2 = vld [vmem:[#allocation4 + $0x58] sm:$0xf]  ;;  %v18457_v18 = vrot.slane %v12439_v46, 2 }
 0x146   : > { %1146 = vst [vmem:[#allocation4 + $0x18] sm:$0xff] %v12736_v14  ;;  %v956_v34 = vmul.f32 %v18453_v29, %v925_v31  ;;  %v803_v20 = vrot.slane %v772_v22, 2  ;;  %v3023_v31 = vmul.f32 %v18391_v52, %v2988_v43  ;;  %v18455_v22 = vrot.slane %v12761_v47, 3 }
 0x147   : > { %v895_v55 = vrot.slane %v864_v9, 3  ;;  %v713_v7 = vsel %vm701_vm6, %v711_v30, %v712_v25  ;;  %v837_v9 = vld [vmem:[#allocation4 + $0x58] sm:$0x7]  ;;  %v18456_v52 = vrot.slane %v12770_v38, 4  ;;  %v2961_v23 = vsel %vm793_vm7, %v18457_v18, %v2960_v60 }
 0x148   : > { %v987_v32 = vrot.slane %v956_v34, 4  ;;  %v805_v41 = vsel %vm793_vm7, %v803_v20, %v18013_v62  ;;  %v733_v34 = vadd.f32 %v713_v7, %v641_v21  ;;  %v3051_v30 = vrot.slane %v3023_v31, 3  ;;  %v12814_v20 = vpop.permute.xlu0 %2142 }
 0x149   : > { %v897_v45 = vsel %vm885_vm8, %v895_v55, %v18455_v22  ;;  %v2980_v62 = vadd.f32 %v2961_v23, %v2889_v49  ;;  %v3114_v55 = vmul.f32 %v18447_v56, %v3079_v5  ;;  %v688_v12 = vmul.f32 %v18450_v13, %v653_v15  ;;  %v12849_v15 = vld [vmem:[%s17890_s1 + $0x23] ss:$8 sm:$0xf] }
 0x14a   : > { %v989_v43 = vsel %vm977_vm9, %v987_v32, %v18456_v52  ;;  %v780_v61 = vmul.f32 %v18451_v57, %v745_v42  ;;  %v825_v21 = vadd.f32 %v805_v41, %v733_v34  ;;  %v18458_v7 = vrot.slane %v12444_v27, 3  ;;  %v1572_v49 = vld [vmem:[#allocation2 + $0x48] sm:$0xff] }
 0x14b   : > { %v872_v46 = vmul.f32 %v18452_v63, %v837_v9  ;;  %v12824_v60 = vmul.f32 %v18453_v29, %v929_v2  ;;  %v1130_v22 = vsel %vm415_vm4, %v12617_v35, %v1118_v3  ;;  %v12831_v56 = vsel %vm2166_vm10, %v12448_v6, %v12814_v20  ;;  %v12842_v35 = vld [vmem:[%s17890_s1 + $0x6] ss:$8 sm:$0xf]  ;;  %v1580_v3 = vld [vmem:[#allocation2 + $0xa8] sm:$0x3] }
 0x14c   : > { %v3052_v32 = vsel %vm885_vm8, %v18458_v7, %v3051_v30  ;;  %v12836_v27 = vsel %vm3256_vm5, %v11727_v28, %v12782_v8  ;;  %v917_v13 = vadd.f32 %v897_v45, %v825_v21  ;;  %v3142_v57 = vrot.slane %v3114_v55, 4  ;;  %1154 = vst [vmem:[#allocation4 + $0x58] sm:$0xf] %v1130_v22  ;;  %v18459_v6 = vld [vmem:[#allocation61_spill] sm:$0xff]  ;;  %v1568_v45 = vld [vmem:[#allocation2 + $0x18] sm:$0xc0] }
 0x14d   : > { %v3071_v31 = vadd.f32 %v3052_v32, %v2980_v62  ;;  %v720_v63 = vrot.slane %v688_v12, 1  ;;  %v812_v42 = vrot.slane %v780_v61, 2  ;;  %v904_v29 = vrot.slane %v872_v46, 3  ;;  %v1576_v9 = vld [vmem:[#allocation2 + $0x78] sm:$0xff]  ;;  %v12894_v7 = vld [vmem:[#allocation2 + $0x20] sm:$0xc0] }
 0x14e   : > { %v1224_v5 = vrot.slane %v12842_v35, %v18459_v6  ;;  %v12853_v41 = vrot.slane %v12849_v15, %v18459_v6  ;;  %v12855_v2 = vadd.f32 %v989_v43, %v917_v13  ;;  %v18460_v34 = vrot.slane %v12732_v37, 4  ;;  %v1204_v32 = vld [vmem:[#allocation4 + $0x10] sm:$0xfe] }
 0x14f   : > { %v721_v18 = vsel %vm701_vm6, %v712_v25, %v720_v63  ;;  %v18461_v23 = vrot.slane %v12758_v10, 2  ;;  %v18462_v43 = vrot.slane %v12761_v47, 3  ;;  %v12883_v25 = vrot.slane %v12879_v53, %v18459_v6  ;;  %v12888_v10 = vld [vmem:[%s17890_s1 + $0x45] ss:$8 sm:$0xf] }
 0x150   : > { %v3143_v52 = vsel %vm977_vm9, %v18460_v34, %v3142_v57  ;;  %v12869_v12 = vadd.f32 %v721_v18, %v12767_v11  ;;  %v12892_v47 = vrot.slane %v12888_v10, %v18459_v6  ;;  %v1604_v11 = vrot.slane %v1568_v45, 6  ;;  %v1295_v46 = vld [vmem:[#allocation4 + $0x10] sm:$0xfc]  ;;  %v12932_v18 = vld [vmem:[%s17890_s1 + $0x41] ss:$8 sm:$0xf] }
 0x151   : > { %v12866_v30 = vsel %vm793_vm7, %v18461_v23, %v812_v42  ;;  %v3162_v55 = vadd.f32 %v3143_v52, %v3071_v31  ;;  %v12874_v37 = vsel %vm885_vm8, %v18462_v43, %v904_v29  ;;  %v1605_v61 = vrot.slane %v1572_v49, 6  ;;  %v12899_v13 = vld [vmem:[%s17890_s1 + $0x2] ss:$8 sm:$0xf]  ;;  %v1386_v29 = vld [vmem:[#allocation4 + $0x10] sm:$0xf8] }
 0x152   : > { %v1614_v21 = vrot.slane %v1576_v9, 6  ;;  %v1622_v22 = vrot.slane %v1580_v3, 6  ;;  %v12903_v57 = vrot.slane %v12899_v13, %v18459_v6  ;;  %v12908_v63 = vld [vmem:[%s17890_s1 + $0x7] ss:$8 sm:$0xf]  ;;  %v12936_v23 = vrot.slane %v12932_v18, %v18459_v6 }
 0x153   : > { %3170 = vst [vmem:[#allocation3 + $0x108] sm:$0xff] %v3162_v55  ;;  %v4111_v31 = vrot.slane %v3162_v55, 7  ;;  %v12912_v42 = vrot.slane %v12908_v63, %v18459_v6  ;;  %v1477_v45 = vld [vmem:[#allocation4 + $0x10] sm:$0xf0]  ;;  %v12915_v49 = vsel %vm498_vm3, %v1604_v11, %v1605_v61  ;;  %v1208_v3 = vld [vmem:[#allocation4 + $0x50] sm:$0x1]  ;;  %v1235_v50 = vmul.f32 %v1224_v5, %v1204_v32 }
 0x154   : > { %v12918_v9 = vsel %vm498_vm3, %v1605_v61, %v1614_v21  ;;  %v12923_v34 = vld [vmem:[%s17890_s1 + $0x24] ss:$8 sm:$0xf]  ;;  %v1623_v11 = vsel %vm498_vm3, %v1614_v21, %v1622_v22  ;;  %v12948_v61 = vld [vmem:[%s17890_s1 + $0x46] ss:$8 sm:$0xf]  ;;  %v1239_v54 = vmul.f32 %v1224_v5, %v12623_v0 }
 0x155   : > { %v12927_v52 = vrot.slane %v12923_v34, %v18459_v6  ;;  %v12940_v55 = vsel %vm3256_vm5, %v4111_v31, %v11727_v28  ;;  %v4112_v43 = vsel %vm3256_vm5, %v12782_v8, %v4111_v31  ;;  %v12952_v62 = vrot.slane %v12948_v61, %v18459_v6  ;;  %1640 = vst [vmem:[#allocation4 + $0x10] sm:$0xff] %v12915_v49 }
 0x156   : > { %18463 = vst [vmem:[#allocation53_spill] sm:$0xff] %v12940_v55  ;;  %4171 = vrot.lane.b32.xlu1 %v12940_v55, %s11056_s12  ;;  %4161 = vrot.lane.b32.xlu0 %v4112_v43, %s11056_s12  ;;  %v828_v8 = vadd.f32 %v12648_v40, %v12650_v39  ;;  %v18464_v21 = vrot.slane %v12633_v48, 4  ;;  %v18465_v31 = vrot.slane %v12608_v58, 4  ;;  %1648 = vst [vmem:[#allocation4 + $0x50] sm:$0xf] %v1623_v11  ;;  %v1263_v19 = vrot.slane %v1235_v50, 1 }
 0x157   : > { %v1192_v55 = vmul.f32 %v18466_v33, %v12623_v0  ;;  %v1243_v28 = vmul.f32 %v1224_v5, %v1208_v3  ;;  %v1196_v48 = vadd.f32 %v1188_v4, %v12663_v24  ;;  %v1326_v58 = vmul.f32 %v12853_v41, %v1295_v46 }
 0x158   : > { %v995_v22 = vsel %vm977_vm9, %v18465_v31, %v18464_v21  ;;  %v920_v40 = vadd.f32 %v12653_v17, %v828_v8  ;;  %v1330_v39 = vmul.f32 %v12853_v41, %v12623_v0  ;;  %v1264_v11 = vrot.slane %v1239_v54, 1 }
 0x159   : > { %v1273_v21 = vrot.slane %v1243_v28, 1  ;;  %v1334_v31 = vmul.f32 %v12853_v41, %v1299_v44  ;;  %v1354_v32 = vrot.slane %v1326_v58, 2  ;;  %v1417_v17 = vmul.f32 %v12883_v25, %v1386_v29 }
 0x15a   : > { %4975 = vrot.lane.b32.xlu0 %v12836_v27, %s11058_s14  ;;  %v1012_v33 = vadd.f32 %v995_v22, %v920_v40  ;;  %v1355_v5 = vrot.slane %v1330_v39, 2  ;;  %v1265_v24 = vsel %vm701_vm6, %v1263_v19, %v1264_v11  ;;  %v1421_v50 = vmul.f32 %v12883_v25, %v12623_v0  ;;  %v12986_v27 = vpop.permute.xlu1 %2152 }
 0x15b   : > { %v1274_v4 = vsel %vm701_vm6, %v1264_v11, %v1273_v21  ;;  %v1364_v46 = vrot.slane %v1334_v31, 2  ;;  %v1287_v28 = vadd.f32 %v1265_v24, %v1196_v48  ;;  %v1425_v41 = vmul.f32 %v12883_v25, %v1390_v36 }
 0x15c   : > { %v1200_v54 = vadd.f32 %v1192_v55, %v1012_v33  ;;  %v1356_v44 = vsel %vm793_vm7, %v1354_v32, %v1355_v5  ;;  %v1445_v8 = vrot.slane %v1417_v17, 3  ;;  %v1446_v29 = vrot.slane %v1421_v50, 3  ;;  %v1699_v40 = vld [vmem:[#allocation4 + $0x10] sm:$0xfe] }
 0x15d   : > { %v1365_v3 = vsel %vm793_vm7, %v1355_v5, %v1364_v46  ;;  %v1508_v22 = vmul.f32 %v12892_v47, %v1477_v45  ;;  %v1790_v58 = vld [vmem:[#allocation4 + $0x10] sm:$0xfc]  ;;  %v1378_v19 = vadd.f32 %v1356_v44, %v1287_v28  ;;  %v1455_v11 = vrot.slane %v1425_v41, 3  ;;  %v1703_v33 = vld [vmem:[#allocation4 + $0x50] sm:$0x1] }
 0x15e   : > { %v1291_v39 = vadd.f32 %v1274_v4, %v1200_v54  ;;  %v1512_v55 = vmul.f32 %v12892_v47, %v12623_v0  ;;  %v1881_v48 = vld [vmem:[#allocation4 + $0x10] sm:$0xf8]  ;;  %4985 = vrot.lane.b32.xlu0 %v4112_v43, %s11058_s14  ;;  %v1447_v36 = vsel %vm885_vm8, %v1445_v8, %v1446_v29  ;;  %v1516_v25 = vmul.f32 %v12892_v47, %v1481_v51  ;;  %v1794_v47 = vld [vmem:[#allocation4 + $0x50] sm:$0x3]  ;;  %v13008_v8 = vpop.permute.xlu1 %2695 }
 0x15f   : > { %v1972_v21 = vld [vmem:[#allocation4 + $0x10] sm:$0xf0]  ;;  %v1536_v31 = vrot.slane %v1508_v22, 4  ;;  %v1683_v45 = vmul.f32 %v12903_v57, %v12915_v49  ;;  %v1456_v5 = vsel %vm885_vm8, %v1446_v29, %v1455_v11  ;;  %v1469_v17 = vadd.f32 %v1447_v36, %v1378_v19 }
 0x160   : > { %2193 = vst [vmem:[#allocation4 + $0x10] sm:$0xff] %v12831_v56  ;;  %v1382_v32 = vadd.f32 %v1365_v3, %v1291_v39  ;;  %v1537_v0 = vrot.slane %v1512_v55, 4  ;;  %v1546_v24 = vrot.slane %v1516_v25, 4  ;;  %v1687_v43 = vmul.f32 %v12903_v57, %v12918_v9  ;;  %v1885_v39 = vld [vmem:[#allocation4 + $0x50] sm:$0x7] }
 0x161   : > { %v1730_v4 = vmul.f32 %v12912_v42, %v1699_v40  ;;  %v1734_v51 = vmul.f32 %v12912_v42, %v12918_v9  ;;  %v1738_v50 = vmul.f32 %v12912_v42, %v1703_v33  ;;  %v1821_v54 = vmul.f32 %v12927_v52, %v1790_v58 }
 0x162   : > { %v1473_v46 = vadd.f32 %v1456_v5, %v1382_v32  ;;  %v1538_v49 = vsel %vm977_vm9, %v1536_v31, %v1537_v0  ;;  %v1547_v28 = vsel %vm977_vm9, %v1537_v0, %v1546_v24  ;;  %v1825_v22 = vmul.f32 %v12927_v52, %v12918_v9 }
 0x163   : > { %v1560_v44 = vadd.f32 %v1538_v49, %v1469_v17  ;;  %v1758_v41 = vrot.slane %v1730_v4, 1  ;;  %v1759_v3 = vrot.slane %v1734_v51, 1  ;;  %v1768_v29 = vrot.slane %v1738_v50, 1 }
 0x164   : > { %v1564_v57 = vadd.f32 %v1547_v28, %v1473_v46  ;;  %v1829_v40 = vmul.f32 %v12927_v52, %v1794_v47  ;;  %v1849_v11 = vrot.slane %v1821_v54, 2  ;;  %v1912_v58 = vmul.f32 %v12936_v23, %v1881_v48  ;;  %v1976_v52 = vld [vmem:[#allocation4 + $0x50] sm:$0xf] }
 0x165   : > { %v1691_v19 = vadd.f32 %v1683_v45, %v1560_v44  ;;  %v1760_v42 = vsel %vm701_vm6, %v1758_v41, %v1759_v3  ;;  %v1769_v36 = vsel %vm701_vm6, %v1759_v3, %v1768_v29  ;;  %v1850_v25 = vrot.slane %v1825_v22, 2  ;;  %v18467_v41 = vld [vmem:[#allocation25_spill] sm:$0xff] }
 0x166   : > { %v1695_v55 = vadd.f32 %v1687_v43, %v1564_v57  ;;  %v1859_v31 = vrot.slane %v1829_v40, 2  ;;  %v1916_v32 = vmul.f32 %v12936_v23, %v12918_v9  ;;  %v1920_v5 = vmul.f32 %v12936_v23, %v1885_v39  ;;  %v13022_v43 = vpop.permute.xlu0 %2162  ;;  %v13026_v23 = vpop.permute.xlu1 %2715 }
 0x167   : > { %v1782_v33 = vadd.f32 %v1760_v42, %v1691_v19  ;;  %v1940_v17 = vrot.slane %v1912_v58, 3  ;;  %v1851_v45 = vsel %vm793_vm7, %v1849_v11, %v1850_v25  ;;  %v2003_v48 = vmul.f32 %v12952_v62, %v1972_v21  ;;  %v2252_v49 = vld [vmem:[#allocation4 + $0x10] sm:$0xfe] }
 0x168   : > { %v1786_v0 = vadd.f32 %v1769_v36, %v1695_v55  ;;  %v1860_v24 = vsel %vm793_vm7, %v1850_v25, %v1859_v31  ;;  %v1941_v51 = vrot.slane %v1916_v32, 3  ;;  %v1950_v47 = vrot.slane %v1920_v5, 3  ;;  %v2343_v50 = vld [vmem:[#allocation4 + $0x10] sm:$0xfc] }
 0x169   : > { %v1873_v4 = vadd.f32 %v1851_v45, %v1782_v33  ;;  %v2007_v46 = vmul.f32 %v12952_v62, %v12918_v9  ;;  %v2011_v28 = vmul.f32 %v12952_v62, %v1976_v52  ;;  %v2031_v44 = vrot.slane %v2003_v48, 4  ;;  %v2434_v3 = vld [vmem:[#allocation4 + $0x10] sm:$0xf8]  ;;  %v18468_v9 = vld [vmem:[#allocation32_spill] sm:$0xff]  ;;  %v18469_v62 = vld [vmem:[#allocation33_spill] sm:$0xff] }
 0x16a   : > { %v1877_v54 = vadd.f32 %v1860_v24, %v1786_v0  ;;  %v2173_v21 = vsel %vm2166_vm10, %v18467_v41, %v12986_v27  ;;  %v2525_v57 = vld [vmem:[#allocation4 + $0x10] sm:$0xf0]  ;;  %v1942_v29 = vsel %vm885_vm8, %v1940_v17, %v1941_v51  ;;  %v1951_v22 = vsel %vm885_vm8, %v1941_v51, %v1950_v47  ;;  %v13046_v36 = vld [vmem:[%s17890_s1 + $0x3] ss:$8 sm:$0xf] }
 0x16b   : > { %v2032_v40 = vrot.slane %v2007_v46, 4  ;;  %v2177_v39 = vsel %vm2166_vm10, %v18468_v9, %v13022_v43  ;;  %v1964_v19 = vadd.f32 %v1942_v29, %v1873_v4  ;;  %v13040_v42 = vsel %vm363_vm1, %v18469_v62, %v13008_v8  ;;  %18470 = vst [vmem:[#allocation11_spill] sm:$0xff] %v13046_v36  ;;  %v13053_v31 = vld [vmem:[%s17890_s1 + $0x20] ss:$8 sm:$0xf] }
 0x16c   : > { %2201 = vst [vmem:[#allocation4 + $0x50] sm:$0xf] %v2177_v39  ;;  %v1968_v11 = vadd.f32 %v1951_v22, %v1877_v54  ;;  %v2041_v58 = vrot.slane %v2011_v28, 4  ;;  %v2225_v25 = vrot.slane %v13046_v36, %v18459_v6  ;;  %18471 = vst [vmem:[#allocation12_spill] sm:$0xff] %v13053_v31  ;;  %v2272_v33 = vrot.slane %v13053_v31, %v18459_v6  ;;  %v13081_v54 = vpop.permute.xlu1 %2154 }
 0x16d   : > { %v2033_v55 = vsel %vm977_vm9, %v2031_v44, %v2032_v40  ;;  %v13060_v32 = vld [vmem:[%s17890_s1 + $0x25] ss:$8 sm:$0xf]  ;;  %2745 = vst [vmem:[#allocation4 + $0x10] sm:$0xff] %v13040_v42 }
 0x16e   : > { %18472 = vst [vmem:[#allocation17_spill] sm:$0xff] %v13060_v32  ;;  %v2363_v5 = vrot.slane %v13060_v32, %v18459_v6  ;;  %v2055_v17 = vadd.f32 %v2033_v55, %v1964_v19  ;;  %v2042_v52 = vsel %vm977_vm9, %v2032_v40, %v2041_v58  ;;  %v13069_v0 = vld [vmem:[%s17890_s1 + $0x42] ss:$8 sm:$0xf]  ;;  %v2236_v51 = vmul.f32 %v2225_v25, %v12831_v56  ;;  %v13083_v19 = vpop.permute.xlu0 %2705 }
 0x16f   : > { %18473 = vst [vmem:[#allocation13_spill] sm:$0xff] %v13069_v0  ;;  %v2454_v45 = vrot.slane %v13069_v0, %v18459_v6  ;;  %v13076_v24 = vld [vmem:[%s17890_s1 + $0x47] ss:$8 sm:$0xf]  ;;  %v2059_v4 = vadd.f32 %v2042_v52, %v1968_v11  ;;  %v2240_v47 = vmul.f32 %v2225_v25, %v2173_v21  ;;  %v2283_v46 = vmul.f32 %v2272_v33, %v2252_v49 }
 0x170   : > { %18474 = vst [vmem:[#allocation18_spill] sm:$0xff] %v13076_v24  ;;  %v2545_v48 = vrot.slane %v13076_v24, %v18459_v6  ;;  %v2287_v28 = vmul.f32 %v2272_v33, %v2173_v21  ;;  %v2374_v44 = vmul.f32 %v2363_v5, %v2343_v50  ;;  %v2378_v41 = vmul.f32 %v2363_v5, %v2173_v21  ;;  %v13088_v50 = vld [vmem:[%s17890_s1 + $0x4] ss:$8 sm:$0xf] }
 0x171   : > { %v2465_v29 = vmul.f32 %v2454_v45, %v2434_v3  ;;  %v2244_v22 = vadd.f32 %v2236_v51, %v2055_v17  ;;  %v2248_v40 = vadd.f32 %v2240_v47, %v2059_v4  ;;  %v2311_v9 = vrot.slane %v2283_v46, 1  ;;  %18475 = vst [vmem:[#allocation14_spill] sm:$0xff] %v13088_v50  ;;  %v13095_v17 = vld [vmem:[%s17890_s1 + $0x21] ss:$8 sm:$0xf] }
 0x172   : > { %v2469_v39 = vmul.f32 %v2454_v45, %v2173_v21  ;;  %v2312_v62 = vrot.slane %v2287_v28, 1  ;;  %v2402_v58 = vrot.slane %v2374_v44, 2  ;;  %v2403_v55 = vrot.slane %v2378_v41, 2  ;;  %18476 = vst [vmem:[#allocation34_spill] sm:$0xff] %v13095_v17 }
 0x173   : > { %v2493_v11 = vrot.slane %v2465_v29, 3  ;;  %v2256_v52 = vld [vmem:[#allocation4 + $0x50] sm:$0x1]  ;;  %v2556_v49 = vmul.f32 %v2545_v48, %v2525_v57  ;;  %v2560_v1 = vmul.f32 %v2545_v48, %v2173_v21  ;;  %v2777_v3 = vrot.slane %v13088_v50, %v18459_v6  ;;  %v13103_v50 = vpop.permute.xlu1 %2697 }
 0x174   : > { %v2347_v56 = vld [vmem:[#allocation4 + $0x50] sm:$0x3]  ;;  %v13099_v4 = vrot.slane %v13095_v17, %v18459_v6  ;;  %v2291_v51 = vmul.f32 %v2272_v33, %v2256_v52  ;;  %v2313_v21 = vsel %vm701_vm6, %v2311_v9, %v2312_v62  ;;  %v2404_v47 = vsel %vm793_vm7, %v2402_v58, %v2403_v55 }
 0x175   : > { %v2438_v25 = vld [vmem:[#allocation4 + $0x50] sm:$0x7]  ;;  %v2382_v57 = vmul.f32 %v2363_v5, %v2347_v56  ;;  %v2335_v28 = vadd.f32 %v2313_v21, %v2244_v22  ;;  %v2494_v41 = vrot.slane %v2469_v39, 3  ;;  %v2584_v32 = vrot.slane %v2556_v49, 4  ;;  %v2145_v5 = vpop.permute.xlu0 %2144 }
 0x176   : > { %v2529_v46 = vld [vmem:[#allocation4 + $0x50] sm:$0xf]  ;;  %v2473_v44 = vmul.f32 %v2454_v45, %v2438_v25  ;;  %v2321_v24 = vrot.slane %v2291_v51, 1  ;;  %v2585_v31 = vrot.slane %v2560_v1, 4  ;;  %v3077_v51 = vld [vmem:[#allocation4 + $0x10] sm:$0xf0] }
 0x177   : > { %v2564_v29 = vmul.f32 %v2545_v48, %v2529_v46  ;;  %v2412_v0 = vrot.slane %v2382_v57, 2  ;;  %v2426_v36 = vadd.f32 %v2404_v47, %v2335_v28  ;;  %v2495_v17 = vsel %vm885_vm8, %v2493_v11, %v2494_v41  ;;  %v2804_v9 = vld [vmem:[#allocation4 + $0x10] sm:$0xfe]  ;;  %v13146_v57 = vpop.permute.xlu1 %2717 }
 0x178   : > { %v2503_v33 = vrot.slane %v2473_v44, 3  ;;  %v2322_v58 = vsel %vm701_vm6, %v2312_v62, %v2321_v24  ;;  %v2586_v45 = vsel %vm977_vm9, %v2584_v32, %v2585_v31  ;;  %v2788_v48 = vmul.f32 %v2777_v3, %v13040_v42  ;;  %v2895_v49 = vld [vmem:[#allocation4 + $0x10] sm:$0xfc] }
 0x179   : > { %v2594_v52 = vrot.slane %v2564_v29, 4  ;;  %v2413_v22 = vsel %vm793_vm7, %v2403_v55, %v2412_v0  ;;  %v2339_v39 = vadd.f32 %v2322_v58, %v2248_v40  ;;  %v2517_v25 = vadd.f32 %v2495_v17, %v2426_v36  ;;  %v2986_v11 = vld [vmem:[#allocation4 + $0x10] sm:$0xf8] }
 0x17a   : > { %v2504_v56 = vsel %vm885_vm8, %v2494_v41, %v2503_v33  ;;  %v2835_v21 = vmul.f32 %v13099_v4, %v2804_v9  ;;  %v13116_v24 = vld [vmem:[%s17890_s1 + $0x26] ss:$8 sm:$0xf]  ;;  %v13125_v42 = vld [vmem:[%s17890_s1 + $0x43] ss:$8 sm:$0xf]  ;;  %v2725_v55 = vsel %vm363_vm1, %v12670_v26, %v13083_v19  ;;  %v2729_v17 = vsel %vm363_vm1, %v12675_v59, %v13026_v23  ;;  %v13154_v26 = vpop.permute.xlu0 %2164 }
 0x17b   : > { %v2595_v1 = vsel %vm977_vm9, %v2585_v31, %v2594_v52  ;;  %v13120_v32 = vrot.slane %v13116_v24, %v18459_v6  ;;  %v13129_v36 = vrot.slane %v13125_v42, %v18459_v6  ;;  %v13134_v31 = vld [vmem:[%s17890_s1 + $0x60] ss:$8 sm:$0xf]  ;;  %v2430_v40 = vadd.f32 %v2413_v22, %v2339_v39  ;;  %2753 = vst [vmem:[#allocation4 + $0x50] sm:$0xf] %v2729_v17 }
 0x17c   : > { %v13138_v0 = vrot.slane %v13134_v31, %v18459_v6  ;;  %v2608_v62 = vadd.f32 %v2586_v45, %v2517_v25  ;;  %v2863_v47 = vrot.slane %v2835_v21, 1  ;;  %v2792_v33 = vmul.f32 %v2777_v3, %v2725_v55  ;;  %v1573_v21 = vld [vmem:[#allocation2 + $0x50] sm:$0xff] }
 0x17d   : > { %v2926_v46 = vmul.f32 %v13120_v32, %v2895_v49  ;;  %v3017_v28 = vmul.f32 %v13129_v36, %v2986_v11  ;;  %v2521_v41 = vadd.f32 %v2504_v56, %v2430_v40  ;;  %v13152_v52 = vmul.f32 %v13099_v4, %v2725_v55  ;;  %v10946_v49 = vld [vmem:[%s17890_s1 + $0x1] ss:$8 sm:$0xf] }
 0x17e   : > { %v3108_v44 = vmul.f32 %v13138_v0, %v3077_v51  ;;  %v2796_v29 = vadd.f32 %v2788_v48, %v2608_v62  ;;  %v13157_v22 = vmul.f32 %v13120_v32, %v2725_v55  ;;  %v13161_v25 = vmul.f32 %v13129_v36, %v2725_v55  ;;  %v18481_v11 = vld [vmem:[#allocation83_spill] sm:$0xff]  ;;  %v1577_v40 = vld [vmem:[#allocation2 + $0x80] sm:$0xff] }
 0x17f   : > { %18477 = vst [vmem:[#allocation35_spill] sm:$0xff] %v13152_v52  ;;  %v2954_v9 = vrot.slane %v2926_v46, 2  ;;  %v3045_v59 = vrot.slane %v3017_v28, 3  ;;  %v2612_v45 = vadd.f32 %v2595_v1, %v2521_v41  ;;  %v18031_v39 = vrot.slane %v13152_v52, 1  ;;  %v1205_v62 = vld [vmem:[#allocation4 + $0x18] sm:$0xfe]  ;;  %v13184_v28 = vpop.permute.xlu1 %3316 }
 0x180   : > { %v3136_v58 = vrot.slane %v3108_v44, 4  ;;  %18478 = vst [vmem:[#allocation22_spill] sm:$0xff] %v13157_v22  ;;  %18479 = vst [vmem:[#allocation26_spill] sm:$0xff] %v13161_v25  ;;  %v13164_v48 = vmul.f32 %v13138_v0, %v2725_v55  ;;  %v18033_v3 = vrot.slane %v13157_v22, 2  ;;  %v13169_v56 = vsel %vm2166_vm10, %v12814_v20, %v2145_v5  ;;  %v1581_v46 = vld [vmem:[#allocation2 + $0xb0] sm:$0x3]  ;;  %v13205_v22 = vpop.permute.xlu0 %2707 }
 0x181   : > { %v1181_v1 = vrot.slane %v10946_v49, %v18481_v11  ;;  %v1228_v51 = vrot.slane %v12842_v35, %v18481_v11  ;;  %v13177_v55 = vadd.f32 %v2792_v33, %v2612_v45  ;;  %v2865_v17 = vsel %vm701_vm6, %v2863_v47, %v18031_v39  ;;  %18483 = vst [vmem:[#allocation43_spill] sm:$0xff] %v13184_v28  ;;  %v1296_v44 = vld [vmem:[#allocation4 + $0x18] sm:$0xfc] }
 0x182   : > { %18480 = vst [vmem:[#allocation38_spill] sm:$0xff] %v13164_v48  ;;  %v18036_v20 = vrot.slane %v13161_v25, 3  ;;  %v18037_v5 = vrot.slane %v13164_v48, 4  ;;  %v1387_v41 = vld [vmem:[#allocation4 + $0x18] sm:$0xf8]  ;;  %v2887_v35 = vadd.f32 %v2865_v17, %v2796_v29  ;;  %v2956_v33 = vsel %vm793_vm7, %v2954_v9, %v18033_v3 }
 0x183   : > { %18482 = vst [vmem:[#allocation42_spill] sm:$0xff] %v13177_v55  ;;  %v13186_v49 = vld [vmem:[#allocation4 + $0x18] sm:$0xf0]  ;;  %v1319_v45 = vrot.slane %v12849_v15, %v18481_v11  ;;  %v1410_v47 = vrot.slane %v12879_v53, %v18481_v11  ;;  %v13203_v29 = vrot.slane %v12888_v10, %v18481_v11  ;;  %v1608_v17 = vrot.slane %v1573_v21, 6  ;;  %v1209_v9 = vld [vmem:[#allocation4 + $0x58] sm:$0x1] }
 0x184   : > { %v3047_v39 = vsel %vm885_vm8, %v3045_v59, %v18036_v20  ;;  %v3138_v6 = vsel %vm977_vm9, %v3136_v58, %v18037_v5  ;;  %v1300_v3 = vld [vmem:[#allocation4 + $0x58] sm:$0x3]  ;;  %v2978_v15 = vadd.f32 %v2956_v33, %v2887_v35  ;;  %v1616_v55 = vrot.slane %v1577_v40, 6 }
 0x185   : > { %v1624_v53 = vrot.slane %v1581_v46, 6  ;;  %v13209_v25 = vrot.slane %v12899_v13, %v18481_v11  ;;  %v1391_v59 = vld [vmem:[#allocation4 + $0x58] sm:$0x7]  ;;  %v18484_v58 = vrot.slane %v12894_v7, 6  ;;  %v13216_v10 = vrot.slane %v12908_v63, %v18481_v11 }
 0x186   : > { %v1482_v20 = vld [vmem:[#allocation4 + $0x58] sm:$0xf]  ;;  %v13220_v21 = vrot.slane %v12923_v34, %v18481_v11  ;;  %v13224_v40 = vrot.slane %v12932_v18, %v18481_v11  ;;  %v3069_v13 = vadd.f32 %v3047_v39, %v2978_v15  ;;  %v13227_v46 = vsel %vm498_vm3, %v1608_v17, %v1616_v55 }
 0x187   : > { %v1609_v5 = vsel %vm498_vm3, %v18484_v58, %v1608_v17  ;;  %v1625_v7 = vsel %vm498_vm3, %v1616_v55, %v1624_v53  ;;  %v13232_v35 = vrot.slane %v12948_v61, %v18481_v11  ;;  %v829_v63 = vadd.f32 %v12866_v30, %v12869_v12  ;;  %v13243_v55 = vpop.permute.xlu1 %3326 }
 0x188   : > { %1641 = vst [vmem:[#allocation4 + $0x18] sm:$0xff] %v1609_v5  ;;  %v18485_v34 = vrot.slane %v12824_v60, 4  ;;  %v18486_v33 = vrot.slane %v12770_v38, 4  ;;  %v1189_v39 = vmul.f32 %v1181_v1, %v12736_v14  ;;  %v1193_v17 = vmul.f32 %v1181_v1, %v12778_v16  ;;  %1649 = vst [vmem:[#allocation4 + $0x58] sm:$0xf] %v1625_v7 }
 0x189   : > { %18487 = vst [vmem:[#allocation44_spill] sm:$0xff] %v13243_v55  ;;  %v13245_v15 = vadd.f32 %v3138_v6, %v3069_v13  ;;  %v1236_v61 = vmul.f32 %v1228_v51, %v1205_v62  ;;  %v1240_v53 = vmul.f32 %v1228_v51, %v12778_v16  ;;  %v1244_v58 = vmul.f32 %v1228_v51, %v1209_v9 }
 0x18a   : > { %v997_v18 = vsel %vm977_vm9, %v18486_v33, %v18485_v34  ;;  %v921_v30 = vadd.f32 %v12874_v37, %v829_v63  ;;  %v1197_v60 = vadd.f32 %v1189_v39, %v12855_v2  ;;  %v1327_v38 = vmul.f32 %v1319_v45, %v1296_v44  ;;  %v13251_v34 = vpop.permute.xlu0 %3314 }
 0x18b   : > { %v1331_v12 = vmul.f32 %v1319_v45, %v12778_v16  ;;  %3168 = vst [vmem:[#allocation3 + $0xc8] sm:$0xff] %v13245_v15  ;;  %v1266_v14 = vrot.slane %v1236_v61, 1  ;;  %v1267_v1 = vrot.slane %v1240_v53, 1  ;;  %v1275_v7 = vrot.slane %v1244_v58, 1 }
 0x18c   : > { %v1335_v6 = vmul.f32 %v1319_v45, %v1300_v3  ;;  %v1013_v13 = vadd.f32 %v997_v18, %v921_v30  ;;  %v1357_v62 = vrot.slane %v1327_v38, 2  ;;  %v1418_v48 = vmul.f32 %v1410_v47, %v1387_v41  ;;  %v13258_v3 = vpop.permute.xlu1 %3336 }
 0x18d   : > { %v1358_v33 = vrot.slane %v1331_v12, 2  ;;  %v1268_v51 = vsel %vm701_vm6, %v1266_v14, %v1267_v1  ;;  %v1276_v37 = vsel %vm701_vm6, %v1267_v1, %v1275_v7  ;;  %v1422_v44 = vmul.f32 %v1410_v47, %v12778_v16  ;;  %18488 = vst [vmem:[#allocation45_spill] sm:$0xff] %v13258_v3 }
 0x18e   : > { %v1366_v2 = vrot.slane %v1335_v6, 2  ;;  %v1201_v9 = vadd.f32 %v1193_v17, %v1013_v13  ;;  %v1288_v63 = vadd.f32 %v1268_v51, %v1197_v60  ;;  %v1426_v52 = vmul.f32 %v1410_v47, %v1391_v59  ;;  %v13265_v47 = vpop.permute.xlu0 %3324 }
 0x18f   : > { %v1359_v39 = vsel %vm793_vm7, %v1357_v62, %v1358_v33  ;;  %v1700_v61 = vld [vmem:[#allocation4 + $0x18] sm:$0xfe]  ;;  %v1448_v41 = vrot.slane %v1418_v48, 3  ;;  %v1449_v18 = vrot.slane %v1422_v44, 3  ;;  %v1509_v30 = vmul.f32 %v13203_v29, %v13186_v49 }
 0x190   : > { %v1791_v53 = vld [vmem:[#allocation4 + $0x18] sm:$0xfc]  ;;  %v1367_v45 = vsel %vm793_vm7, %v1358_v33, %v1366_v2  ;;  %v1292_v38 = vadd.f32 %v1276_v37, %v1201_v9  ;;  %v1379_v12 = vadd.f32 %v1359_v39, %v1288_v63  ;;  %v1457_v14 = vrot.slane %v1426_v52, 3  ;;  %v1704_v33 = vld [vmem:[#allocation4 + $0x58] sm:$0x1]  ;;  %v13280_v44 = vpop.permute.xlu1 %3322 }
 0x191   : > { %v1882_v58 = vld [vmem:[#allocation4 + $0x18] sm:$0xf8]  ;;  %v1513_v17 = vmul.f32 %v13203_v29, %v12778_v16  ;;  %v1450_v59 = vsel %vm885_vm8, %v1448_v41, %v1449_v18  ;;  %v1517_v1 = vmul.f32 %v13203_v29, %v1482_v20  ;;  %v1539_v7 = vrot.slane %v1509_v30, 4 }
 0x192   : > { %v1973_v60 = vld [vmem:[#allocation4 + $0x18] sm:$0xf0]  ;;  %v1684_v48 = vmul.f32 %v13209_v25, %v1609_v5  ;;  %v1383_v6 = vadd.f32 %v1367_v45, %v1292_v38  ;;  %v1458_v49 = vsel %vm885_vm8, %v1449_v18, %v1457_v14  ;;  %v1470_v13 = vadd.f32 %v1450_v59, %v1379_v12  ;;  %v1795_v45 = vld [vmem:[#allocation4 + $0x58] sm:$0x3]  ;;  %v13286_v38 = vpop.permute.xlu0 %3334 }
 0x193   : > { %2194 = vst [vmem:[#allocation4 + $0x18] sm:$0xff] %v13169_v56  ;;  %v1540_v52 = vrot.slane %v1513_v17, 4  ;;  %v1548_v62 = vrot.slane %v1517_v1, 4  ;;  %v1688_v16 = vmul.f32 %v13209_v25, %v13227_v46  ;;  %v1731_v51 = vmul.f32 %v13216_v10, %v1700_v61 }
 0x194   : > { %v1735_v20 = vmul.f32 %v13216_v10, %v13227_v46  ;;  %v1474_v29 = vadd.f32 %v1458_v49, %v1383_v6  ;;  %v1739_v37 = vmul.f32 %v13216_v10, %v1704_v33  ;;  %v1822_v2 = vmul.f32 %v13220_v21, %v1791_v53  ;;  %v1886_v6 = vld [vmem:[#allocation4 + $0x58] sm:$0x7] }
 0x195   : > { %v1541_v5 = vsel %vm977_vm9, %v1539_v7, %v1540_v52  ;;  %v1549_v9 = vsel %vm977_vm9, %v1540_v52, %v1548_v62  ;;  %v1761_v39 = vrot.slane %v1731_v51, 1  ;;  %v1826_v18 = vmul.f32 %v13220_v21, %v13227_v46  ;;  %v1977_v51 = vld [vmem:[#allocation4 + $0x58] sm:$0xf] }
 0x196   : > { %v1561_v63 = vadd.f32 %v1541_v5, %v1470_v13  ;;  %v1762_v25 = vrot.slane %v1735_v20, 1  ;;  %v1565_v41 = vadd.f32 %v1549_v9, %v1474_v29  ;;  %v1770_v61 = vrot.slane %v1739_v37, 1  ;;  %v13297_v20 = vpop.permute.xlu1 %3344 }
 0x197   : > { %v1830_v30 = vmul.f32 %v13220_v21, %v1795_v45  ;;  %v1852_v12 = vrot.slane %v1822_v2, 2  ;;  %v1913_v14 = vmul.f32 %v13224_v40, %v1882_v58  ;;  %v1853_v1 = vrot.slane %v1826_v18, 2 }
 0x198   : > { %v1692_v10 = vadd.f32 %v1684_v48, %v1561_v63  ;;  %v1763_v53 = vsel %vm701_vm6, %v1761_v39, %v1762_v25  ;;  %v1696_v17 = vadd.f32 %v1688_v16, %v1565_v41  ;;  %v1771_v59 = vsel %vm701_vm6, %v1762_v25, %v1770_v61  ;;  %v4860_v16 = vld [vmem:[#allocation3 + $0xc0] sm:$0xff]  ;;  %v13305_v61 = vpop.permute.xlu0 %3312 }
 0x199   : > { %v1861_v7 = vrot.slane %v1830_v30, 2  ;;  %v1917_v13 = vmul.f32 %v13224_v40, %v13227_v46  ;;  %v1921_v21 = vmul.f32 %v13224_v40, %v1886_v6  ;;  %v1943_v52 = vrot.slane %v1913_v14, 3 }
 0x19a   : > { %v1783_v49 = vadd.f32 %v1763_v53, %v1692_v10  ;;  %v1787_v62 = vadd.f32 %v1771_v59, %v1696_v17  ;;  %v1854_v48 = vsel %vm793_vm7, %v1852_v12, %v1853_v1  ;;  %v2004_v58 = vmul.f32 %v13232_v35, %v1973_v60  ;;  %v2253_v9 = vld [vmem:[#allocation4 + $0x18] sm:$0xfe] }
 0x19b   : > { %v1862_v33 = vsel %vm793_vm7, %v1853_v1, %v1861_v7  ;;  %v1944_v5 = vrot.slane %v1917_v13, 3  ;;  %v1952_v37 = vrot.slane %v1921_v21, 3  ;;  %v2008_v2 = vmul.f32 %v13232_v35, %v13227_v46  ;;  %v2344_v40 = vld [vmem:[#allocation4 + $0x18] sm:$0xfc]  ;;  %v18490_v1 = vld [vmem:[#allocation12_spill] sm:$0xff]  ;;  %v13332_v21 = vpop.permute.xlu1 %3342 }
 0x19c   : > { %v1874_v29 = vadd.f32 %v1854_v48, %v1783_v49  ;;  %v1878_v63 = vadd.f32 %v1862_v33, %v1787_v62  ;;  %v2012_v39 = vmul.f32 %v13232_v35, %v1977_v51  ;;  %v2034_v25 = vrot.slane %v2004_v58, 4  ;;  %v2435_v60 = vld [vmem:[#allocation4 + $0x18] sm:$0xf8]  ;;  %v18493_v49 = vld [vmem:[#allocation13_spill] sm:$0xff] }
 0x19d   : > { %v2174_v45 = vsel %vm2166_vm10, %v12986_v27, %v13081_v54  ;;  %v2526_v41 = vld [vmem:[#allocation4 + $0x18] sm:$0xf0]  ;;  %v1945_v18 = vsel %vm885_vm8, %v1943_v52, %v1944_v5  ;;  %v1953_v30 = vsel %vm885_vm8, %v1944_v5, %v1952_v37  ;;  %v2035_v10 = vrot.slane %v2008_v2, 4  ;;  %v13337_v5 = vpop.permute.xlu0 %3332 }
 0x19e   : > { %v2178_v46 = vsel %vm2166_vm10, %v13022_v43, %v13154_v26  ;;  %v1965_v53 = vadd.f32 %v1945_v18, %v1874_v29  ;;  %v13312_v35 = vrot.slane %v4860_v16, 7  ;;  %v13317_v27 = vsel %vm363_vm1, %v13008_v8, %v13103_v50  ;;  %v18489_v17 = vld [vmem:[#allocation11_spill] sm:$0xff]  ;;  %v18491_v26 = vld [vmem:[#allocation40_spill] sm:$0xff]  ;;  %v18492_v8 = vld [vmem:[#allocation17_spill] sm:$0xff] }
 0x19f   : > { %2202 = vst [vmem:[#allocation4 + $0x58] sm:$0xf] %v2178_v46  ;;  %v1969_v54 = vadd.f32 %v1953_v30, %v1878_v63  ;;  %v2036_v12 = vsel %vm977_vm9, %v2034_v25, %v2035_v10  ;;  %v2043_v14 = vrot.slane %v2012_v39, 4  ;;  %v2229_v59 = vrot.slane %v18489_v17, %v18481_v11  ;;  %2746 = vst [vmem:[#allocation4 + $0x18] sm:$0xff] %v13317_v27 }
 0x1a0   : > { %v2276_v7 = vrot.slane %v18490_v1, %v18481_v11  ;;  %v2056_v43 = vadd.f32 %v2036_v12, %v1965_v53  ;;  %v4928_v6 = vsel %vm3256_vm5, %v18491_v26, %v13312_v35  ;;  %v2367_v50 = vrot.slane %v18492_v8, %v18481_v11 }
 0x1a1   : > { %v2458_v13 = vrot.slane %v18493_v49, %v18481_v11  ;;  %4977 = vrot.lane.b32.xlu1 %v4928_v6, %s11058_s14  ;;  %v2044_v52 = vsel %vm977_vm9, %v2035_v10, %v2043_v14  ;;  %v2237_v62 = vmul.f32 %v2229_v59, %v13169_v56  ;;  %v2241_v48 = vmul.f32 %v2229_v59, %v2174_v45  ;;  %v18494_v56 = vld [vmem:[#allocation18_spill] sm:$0xff]  ;;  %v13353_v49 = vpop.permute.xlu1 %3356 }
 0x1a2   : > { %v2284_v33 = vmul.f32 %v2276_v7, %v2253_v9  ;;  %v2060_v51 = vadd.f32 %v2044_v52, %v1969_v54  ;;  %v2288_v58 = vmul.f32 %v2276_v7, %v2174_v45  ;;  %v2375_v16 = vmul.f32 %v2367_v50, %v2344_v40  ;;  %v18495_v54 = vld [vmem:[#allocation14_spill] sm:$0xff]  ;;  %18497 = vst [vmem:[#allocation46_spill] sm:$0xff] %v13353_v49 }
 0x1a3   : > { %v2379_v29 = vmul.f32 %v2367_v50, %v2174_v45  ;;  %v2245_v37 = vadd.f32 %v2237_v62, %v2056_v43  ;;  %v2466_v63 = vmul.f32 %v2458_v13, %v2435_v60  ;;  %v2470_v39 = vmul.f32 %v2458_v13, %v2174_v45  ;;  %v18496_v14 = vld [vmem:[#allocation34_spill] sm:$0xff] }
 0x1a4   : > { %v2314_v2 = vrot.slane %v2284_v33, 1  ;;  %v2249_v25 = vadd.f32 %v2241_v48, %v2060_v51  ;;  %v2315_v18 = vrot.slane %v2288_v58, 1  ;;  %v2405_v30 = vrot.slane %v2375_v16, 2 }
 0x1a5   : > { %v2406_v46 = vrot.slane %v2379_v29, 2  ;;  %v2549_v9 = vrot.slane %v18494_v56, %v18481_v11  ;;  %v2781_v40 = vrot.slane %v18495_v54, %v18481_v11  ;;  %v13345_v17 = vrot.slane %v18496_v14, %v18481_v11  ;;  %v13355_v56 = vpop.permute.xlu0 %3346 }
 0x1a6   : > { %v2257_v53 = vld [vmem:[#allocation4 + $0x58] sm:$0x1]  ;;  %v13349_v60 = vrot.slane %v13116_v24, %v18481_v11  ;;  %v2316_v1 = vsel %vm701_vm6, %v2314_v2, %v2315_v18  ;;  %v2496_v48 = vrot.slane %v2466_v63, 3  ;;  %v2497_v33 = vrot.slane %v2470_v39, 3  ;;  %18498 = vst [vmem:[#allocation47_spill] sm:$0xff] %v13355_v56 }
 0x1a7   : > { %v2348_v10 = vld [vmem:[#allocation4 + $0x58] sm:$0x3]  ;;  %v2292_v59 = vmul.f32 %v2276_v7, %v2257_v53  ;;  %v2407_v6 = vsel %vm793_vm7, %v2405_v30, %v2406_v46  ;;  %v2336_v52 = vadd.f32 %v2316_v1, %v2245_v37  ;;  %v2557_v16 = vmul.f32 %v2549_v9, %v2526_v41  ;;  %v2896_v30 = vld [vmem:[#allocation4 + $0x18] sm:$0xfc] }
 0x1a8   : > { %v2439_v12 = vld [vmem:[#allocation4 + $0x58] sm:$0x7]  ;;  %v2383_v43 = vmul.f32 %v2367_v50, %v2348_v10  ;;  %v2561_v29 = vmul.f32 %v2549_v9, %v2174_v45  ;;  %v2498_v7 = vsel %vm885_vm8, %v2496_v48, %v2497_v33  ;;  %v2789_v14 = vmul.f32 %v2781_v40, %v13317_v27  ;;  %v2987_v1 = vld [vmem:[#allocation4 + $0x18] sm:$0xf8] }
 0x1a9   : > { %v2530_v8 = vld [vmem:[#allocation4 + $0x58] sm:$0xf]  ;;  %v2474_v62 = vmul.f32 %v2458_v13, %v2439_v12  ;;  %v2323_v51 = vrot.slane %v2292_v59, 1  ;;  %v2427_v24 = vadd.f32 %v2407_v6, %v2336_v52  ;;  %v2587_v13 = vrot.slane %v2557_v16, 4 }
 0x1aa   : > { %v2414_v58 = vrot.slane %v2383_v43, 2  ;;  %v2565_v50 = vmul.f32 %v2549_v9, %v2530_v8  ;;  %v2805_v53 = vld [vmem:[#allocation4 + $0x18] sm:$0xfe]  ;;  %v2588_v63 = vrot.slane %v2561_v29, 4  ;;  %v2927_v9 = vmul.f32 %v13349_v60, %v2896_v30  ;;  %v13365_v43 = vpop.permute.xlu1 %4139  ;;  %v18500_v30 = vld [vmem:[#allocation78_spill] sm:$0xff] }
 0x1ab   : > { %v2505_v2 = vrot.slane %v2474_v62, 3  ;;  %v2324_v10 = vsel %vm701_vm6, %v2315_v18, %v2323_v51  ;;  %v2518_v41 = vadd.f32 %v2498_v7, %v2427_v24  ;;  %v2836_v59 = vmul.f32 %v13345_v17, %v2805_v53  ;;  %v3078_v8 = vld [vmem:[#allocation4 + $0x18] sm:$0xf0]  ;;  %v13379_v51 = vpop.permute.xlu0 %3354 }
 0x1ac   : > { %v2415_v37 = vsel %vm793_vm7, %v2406_v46, %v2414_v58  ;;  %v2340_v39 = vadd.f32 %v2324_v10, %v2249_v25  ;;  %v2596_v45 = vrot.slane %v2565_v50, 4  ;;  %v2589_v54 = vsel %vm977_vm9, %v2587_v13, %v2588_v63 }
 0x1ad   : > { %v2506_v12 = vsel %vm885_vm8, %v2497_v33, %v2505_v2  ;;  %v2609_v6 = vadd.f32 %v2589_v54, %v2518_v41  ;;  %v13370_v25 = vrot.slane %v13125_v42, %v18481_v11  ;;  %v2866_v52 = vrot.slane %v2836_v59, 1  ;;  %v2807_v33 = vld [vmem:[#allocation4 + $0x48] sm:$0x1] }
 0x1ae   : > { %v2431_v18 = vadd.f32 %v2415_v37, %v2340_v39  ;;  %v2597_v46 = vsel %vm977_vm9, %v2588_v63, %v2596_v45  ;;  %v2957_v62 = vrot.slane %v2927_v9, 2  ;;  %v13374_v27 = vrot.slane %v13134_v31, %v18481_v11  ;;  %v3080_v9 = vld [vmem:[#allocation4 + $0x48] sm:$0xf]  ;;  %v13604_v11 = vld [vmem:[#allocation5 + $0x26] ss:$8 sm:$0xf] }
 0x1af   : > { %v2726_v48 = vsel %vm363_vm1, %v13083_v19, %v13205_v22  ;;  %v2797_v16 = vadd.f32 %v2789_v14, %v2609_v6  ;;  %v3018_v29 = vmul.f32 %v13370_v25, %v2987_v1  ;;  %v2898_v19 = vld [vmem:[#allocation4 + $0x48] sm:$0x3]  ;;  %v2842_v10 = vmul.f32 %v18500_v30, %v2807_v33  ;;  %v18503_v14 = vld [vmem:[#allocation79_spill] sm:$0xff]  ;;  %v18504_v6 = vld [vmem:[#allocation80_spill] sm:$0xff]  ;;  %v13415_v33 = vpop.permute.xlu0 %3352  ;;  %18538 = vst [vmem:[#allocation9_spill] sm:$0xff] %v13604_v11 }
 0x1b0   : > { %v2522_v58 = vadd.f32 %v2506_v12, %v2431_v18  ;;  %v2793_v42 = vmul.f32 %v2781_v40, %v2726_v48  ;;  %v3109_v24 = vmul.f32 %v13374_v27, %v3078_v8  ;;  %v13384_v7 = vmul.f32 %v13345_v17, %v2726_v48  ;;  %v2989_v40 = vld [vmem:[#allocation4 + $0x48] sm:$0x7]  ;;  %v13399_v12 = vpop.permute.xlu1 %4149 }
 0x1b1   : > { %v13387_v31 = vmul.f32 %v13349_v60, %v2726_v48  ;;  %v13390_v2 = vmul.f32 %v13370_v25, %v2726_v48  ;;  %v3048_v50 = vrot.slane %v3018_v29, 3  ;;  %v13393_v53 = vmul.f32 %v13374_v27, %v2726_v48  ;;  %18501 = vst [vmem:[#allocation51_spill] sm:$0xff] %v13399_v12  ;;  %v4873_v48 = vld [vmem:[#allocation3 + $0x1a0] sm:$0x1] }
 0x1b2   : > { %v2613_v22 = vadd.f32 %v2597_v46, %v2522_v58  ;;  %v3139_v37 = vrot.slane %v3109_v24, 4  ;;  %v18043_v13 = vrot.slane %v13384_v7, 1  ;;  %v2871_v54 = vrot.slane %v2842_v10, 1 }
 0x1b3   : > { %18499 = vst [vmem:[#allocation50_spill] sm:$0xff] %v13393_v53  ;;  %v18042_v63 = vrot.slane %v13387_v31, 2  ;;  %v18041_v39 = vrot.slane %v13390_v2, 3  ;;  %v18040_v45 = vrot.slane %v13393_v53, 4  ;;  %v2933_v59 = vmul.f32 %v18503_v14, %v2898_v19 }
 0x1b4   : > { %v13401_v41 = vadd.f32 %v2793_v42, %v2613_v22  ;;  %v2868_v1 = vsel %vm701_vm6, %v2866_v52, %v18043_v13  ;;  %v3024_v8 = vmul.f32 %v18504_v6, %v2989_v40  ;;  %v18505_v42 = vld [vmem:[#allocation27_spill] sm:$0xff]  ;;  %v2730_v40 = vsel %vm363_vm1, %v13026_v23, %v13146_v57  ;;  %v18531_v13 = vld [vmem:[#allocation38_spill] sm:$0xff] }
 0x1b5   : > { %v2959_v18 = vsel %vm793_vm7, %v2957_v62, %v18042_v63  ;;  %v3050_v46 = vsel %vm885_vm8, %v3048_v50, %v18041_v39  ;;  %v2888_v58 = vadd.f32 %v2868_v1, %v2797_v16  ;;  %v3141_v29 = vsel %vm977_vm9, %v3139_v37, %v18040_v45  ;;  %v6408_v62 = vld [vmem:[#allocation3 + $0x20] sm:$0x80]  ;;  %v18507_v22 = vld [vmem:[#allocation39_spill] sm:$0xff]  ;;  %v18508_v50 = vld [vmem:[#allocation81_spill] sm:$0xff]  ;;  %2754 = vst [vmem:[#allocation4 + $0x58] sm:$0xf] %v2730_v40 }
 0x1b6   : > { %18502 = vst [vmem:[#allocation20_spill] sm:$0xff] %v13401_v41  ;;  %v18506_v52 = vrot.slane %v18505_v42, 1  ;;  %v2962_v19 = vrot.slane %v2933_v59, 2  ;;  %v3053_v10 = vrot.slane %v3024_v8, 3  ;;  %v3115_v14 = vmul.f32 %v18508_v50, %v3080_v9  ;;  %v18509_v1 = vld [vmem:[#allocation36_spill] sm:$0xff]  ;;  %v18512_v59 = vld [vmem:[#allocation37_spill] sm:$0xff]  ;;  %v13436_v50 = vpop.permute.xlu1 %4159 }
 0x1b7   : > { %v2979_v16 = vadd.f32 %v2959_v18, %v2888_v58  ;;  %v18510_v6 = vrot.slane %v18509_v1, 2  ;;  %v4953_v42 = vrot.slane %v4873_v48, 7  ;;  %v13431_v45 = vld [vmem:[#allocation3 + $0x28] sm:$0x80]  ;;  %v6470_v9 = vrot.slane %v6408_v62, 7  ;;  %v10947_v18 = vld [vmem:[#allocation3 + $0x50] sm:$0xff] }
 0x1b8   : > { %v2872_v24 = vsel %vm701_vm6, %v18506_v52, %v2871_v54  ;;  %18511 = vst [vmem:[#allocation82_spill] sm:$0xff] %v13431_v45  ;;  %v18513_v52 = vrot.slane %v18512_v59, 3  ;;  %v13442_v58 = vrot.slane %v10947_v18, 7  ;;  %v13447_v48 = vsel %vm415_vm4, %v13251_v34, %v13184_v28  ;;  %v13461_v1 = vld [vmem:[#allocation3 + $0x108] sm:$0xff] }
 0x1b9   : > { %v2890_v30 = vadd.f32 %v2872_v24, %v18507_v22  ;;  %v2963_v37 = vsel %vm793_vm7, %v18510_v6, %v2962_v19  ;;  %v3144_v24 = vrot.slane %v3115_v14, 4  ;;  %v6409_v22 = vld [vmem:[#allocation3 + $0x28] sm:$0x80]  ;;  %v3070_v23 = vadd.f32 %v3050_v46, %v2979_v16  ;;  %18515 = vst [vmem:[#allocation41_spill] sm:$0xff] %v13447_v48  ;;  %v6407_v19 = vld [vmem:[#allocation3 + $0x18] sm:$0x80]  ;;  %v13463_v6 = vpop.permute.xlu0 %4141 }
 0x1ba   : > { %v3054_v8 = vsel %vm885_vm8, %v18513_v52, %v3053_v10  ;;  %v13440_v57 = vsel %vm3256_vm5, %v18491_v26, %v4953_v42  ;;  %18514 = vst [vmem:[#allocation24_spill] sm:$0xff] %v13442_v58  ;;  %v18516_v10 = vld [vmem:[#allocation31_spill] sm:$0xff]  ;;  %3403 = vst [vmem:[#allocation4 + $0x8] sm:$0xff] %v13447_v48  ;;  %v13458_v40 = vsel %vm415_vm4, %v13265_v47, %v13243_v55  ;;  %v6473_v59 = vrot.slane %v6409_v22, 7  ;;  %v2808_v52 = vld [vmem:[#allocation4 + $0x50] sm:$0x1] }
 0x1bb   : > { %v2981_v54 = vadd.f32 %v2963_v37, %v2890_v30  ;;  %v13449_v30 = vld [vmem:[#allocation3 + $0xb8] sm:$0xff]  ;;  %v18517_v14 = vrot.slane %v18516_v10, 4  ;;  %18518 = vst [vmem:[#allocation28_spill] sm:$0xff] %v13458_v40  ;;  %18519 = vst [vmem:[#allocation54_spill] sm:$0xff] %v13463_v6  ;;  %v13465_v37 = vadd.f32 %v3141_v29, %v3070_v23  ;;  %v13469_v42 = vsel %vm3256_vm5, %v6470_v9, %v13442_v58  ;;  %v2990_v23 = vld [vmem:[#allocation4 + $0x50] sm:$0x7] }
 0x1bc   : > { %3407 = vst [vmem:[#allocation4 + $0x28] sm:$0xff] %v13458_v40  ;;  %v6467_v18 = vrot.slane %v6407_v19, 7  ;;  %v13480_v29 = vsel %vm415_vm4, %v13286_v38, %v13258_v3  ;;  %v6482_v9 = vrot.slane %v13449_v30, 7  ;;  %v3081_v10 = vld [vmem:[#allocation4 + $0x50] sm:$0xf]  ;;  %v6492_v22 = vrot.slane %v13461_v1, 7 }
 0x1bd   : > { %v3072_v62 = vadd.f32 %v3054_v8, %v2981_v54  ;;  %v3145_v46 = vsel %vm977_vm9, %v18517_v14, %v3144_v24  ;;  %v13474_v54 = vsel %vm3256_vm5, %v13442_v58, %v13312_v35  ;;  %v2899_v8 = vld [vmem:[#allocation4 + $0x50] sm:$0x3]  ;;  %18521 = vst [vmem:[#allocation59_spill] sm:$0xff] %v13480_v29  ;;  %3169 = vst [vmem:[#allocation3 + $0xd0] sm:$0xff] %v13465_v37  ;;  %v18044_v1 = vrot.slane %v13245_v15, 7 }
 0x1be   : > { %18520 = vst [vmem:[#allocation55_spill] sm:$0xff] %v13474_v54  ;;  %v13486_v14 = vsel %vm3256_vm5, %v6473_v59, %v13442_v58  ;;  %3411 = vst [vmem:[#allocation4 + $0x48] sm:$0xff] %v13480_v29  ;;  %v13493_v19 = vsel %vm415_vm4, %v13305_v61, %v13251_v34  ;;  %v13498_v30 = vsel %vm415_vm4, %v13280_v44, %v13265_v47  ;;  %v13510_v61 = vpop.permute.xlu1 %4137 }
 0x1bf   : > { %v3163_v24 = vadd.f32 %v3145_v46, %v3072_v62  ;;  %v13504_v46 = vsel %vm3256_vm5, %v6467_v18, %v13442_v58  ;;  %3402 = vst [vmem:[#allocation4] sm:$0xff] %v13493_v19  ;;  %3406 = vst [vmem:[#allocation4 + $0x20] sm:$0xff] %v13498_v30  ;;  %v2843_v34 = vmul.f32 %v13099_v4, %v2808_v52  ;;  %v3199_v18 = vld [vmem:[#allocation3 + $0x18] sm:$0x80] }
 0x1c0   : > { %v13513_v47 = vsel %vm3256_vm5, %v6482_v9, %v6492_v22  ;;  %v2934_v44 = vmul.f32 %v13120_v32, %v2899_v8  ;;  %v3025_v59 = vmul.f32 %v13129_v36, %v2990_v23  ;;  %v13530_v52 = vsel %vm3256_vm5, %v13442_v58, %v18044_v1  ;;  %v4148_v36 = vpop.permute.xlu0 %4147  ;;  %v18524_v23 = vld [vmem:[#allocation35_spill] sm:$0xff] }
 0x1c1   : > { %3171 = vst [vmem:[#allocation3 + $0x110] sm:$0xff] %v3163_v24  ;;  %v13500_v62 = vrot.slane %v3163_v24, 7  ;;  %v3116_v24 = vmul.f32 %v13138_v0, %v3081_v10  ;;  %v2873_v32 = vrot.slane %v2843_v34, 1  ;;  %v18525_v10 = vrot.slane %v18524_v23, 1 }
 0x1c2   : > { %v2964_v0 = vrot.slane %v2934_v44, 2  ;;  %v3266_v34 = vrot.slane %v3199_v18, 7  ;;  %v13552_v44 = vsel %vm415_vm4, %v13332_v21, %v13297_v20  ;;  %v18532_v1 = vrot.slane %v18531_v13, 4  ;;  %v6432_v21 = vld [vmem:[#allocation3 + $0x1a8] sm:$0x1] }
 0x1c3   : > { %18522 = vst [vmem:[#allocation62_spill] sm:$0xff] %v13500_v62  ;;  %v4948_v16 = vsel %vm3256_vm5, %v13500_v62, %v18491_v26  ;;  %v13524_v4 = vsel %vm3256_vm5, %v13312_v35, %v13500_v62  ;;  %v3055_v26 = vrot.slane %v3025_v59, 3  ;;  %v3146_v8 = vrot.slane %v3116_v24, 4  ;;  %v6433_v59 = vld [vmem:[#allocation3 + $0x1b0] sm:$0x1]  ;;  %3414 = vst [vmem:[#allocation4 + $0x60] sm:$0xff] %v13552_v44 }
 0x1c4   : > { %18523 = vst [vmem:[#allocation48_spill] sm:$0xff] %v13524_v4  ;;  %4997 = vrot.lane.b32.xlu0 %v4948_v16, %s11058_s14  ;;  %4987 = vrot.lane.b32.xlu1 %v13524_v4, %s11058_s14  ;;  %v13538_v35 = vsel %vm415_vm4, %v13337_v5, %v13286_v38  ;;  %v2874_v39 = vsel %vm701_vm6, %v18525_v10, %v2873_v32  ;;  %v18526_v38 = vld [vmem:[#allocation42_spill] sm:$0xff] }
 0x1c5   : > { %3410 = vst [vmem:[#allocation4 + $0x40] sm:$0xff] %v13538_v35  ;;  %v13547_v16 = vsel %vm415_vm4, %v13297_v20, %v13355_v56  ;;  %v2891_v5 = vadd.f32 %v2874_v39, %v18526_v38  ;;  %v18527_v24 = vld [vmem:[#allocation22_spill] sm:$0xff]  ;;  %v3147_v45 = vsel %vm977_vm9, %v18532_v1, %v3146_v8  ;;  %v3200_v20 = vld [vmem:[#allocation3 + $0x20] sm:$0x80]  ;;  %v13569_v39 = vld [vmem:[%s17893_s4] sm:$0xf]  ;;  %v13577_v13 = vsel %vm3256_vm5, %v13442_v58, %v6482_v9  ;;  %v13591_v38 = vpop.permute.xlu1 %4157 }
 0x1c6   : > { %v18528_v23 = vrot.slane %v18527_v24, 2  ;;  %v18529_v10 = vld [vmem:[#allocation26_spill] sm:$0xff]  ;;  %3415 = vst [vmem:[#allocation4 + $0x68] sm:$0xff] %v13547_v16  ;;  %18533 = vst [vmem:[#allocation49_spill] sm:$0xff] %v13569_v39  ;;  %v13585_v1 = vsel %vm3256_vm5, %v13500_v62, %v13442_v58  ;;  %v18537_v9 = vld [vmem:[#allocation53_spill] sm:$0xff]  ;;  %v3378_v24 = vsel %vm415_vm4, %v13415_v33, %v13379_v51  ;;  %v13615_v33 = vpop.permute.xlu0 %4169  ;;  %v13646_v29 = vsel %vm363_vm1, %v4148_v36, %v13399_v12 }
 0x1c7   : > { %v18530_v63 = vrot.slane %v18529_v10, 3  ;;  %18534 = vst [vmem:[#allocation52_spill] sm:$0xff] %v13585_v1  ;;  %v13589_v8 = vld [vmem:[#allocation5 + $0x7] ss:$8 sm:$0xf]  ;;  %v6514_v10 = vrot.slane %v6433_v59, 7 }
 0x1c8   : > { %v2965_v32 = vsel %vm793_vm7, %v18528_v23, %v2964_v0  ;;  %v13573_v0 = vsel %vm3256_vm5, %v3266_v34, %v13442_v58  ;;  %18536 = vst [vmem:[#allocation63_spill] sm:$0xff] %v13589_v8  ;;  %5003 = vrot.lane.b32.xlu0 %v13440_v57, %s11058_s14  ;;  %4995 = vrot.lane.b32.xlu1 %v18537_v9, %s11058_s14  ;;  %3418 = vst [vmem:[#allocation4 + $0x80] sm:$0x3] %v3378_v24  ;;  %v13619_v59 = vld [vmem:[#allocation4 + $0x8] sm:$0xc0] }
 0x1c9   : > { %v3056_v18 = vsel %vm885_vm8, %v18530_v63, %v3055_v26  ;;  %v3379_v63 = vsel %vm415_vm4, %v13379_v51, %v13353_v49  ;;  %v13587_v26 = vld [vmem:[#allocation5] ss:$8 sm:$0xf]  ;;  %v2982_v34 = vadd.f32 %v2965_v32, %v2891_v5  ;;  %v13602_v23 = vsel %vm3256_vm5, %v6492_v22, %v13442_v58  ;;  %v13606_v49 = vld [vmem:[#allocation3 + $0x30] sm:$0x80]  ;;  %18543 = vst [vmem:[#allocation23_spill] sm:$0xff] %v13619_v59 }
 0x1ca   : > { %18535 = vst [vmem:[#allocation56_spill] sm:$0xff] %v13587_v26  ;;  %3419 = vst [vmem:[#allocation4 + $0x88] sm:$0x3] %v3379_v63  ;;  %v13611_v57 = vsel %vm363_vm1, %v13365_v43, %v13463_v6  ;;  %v3269_v5 = vrot.slane %v3200_v20, 7  ;;  %v6512_v32 = vrot.slane %v6432_v21, 7  ;;  %v18541_v63 = vld [vmem:[#allocation10_spill] sm:$0xff]  ;;  %v13623_v24 = vsel %vm3256_vm5, %v13442_v58, %v6514_v10  ;;  %v4168_v48 = vpop.permute.xlu0 %4167 }
 0x1cb   : > { %18539 = vst [vmem:[#allocation57_spill] sm:$0xff] %v13606_v49  ;;  %18540 = vst [vmem:[#allocation58_spill] sm:$0xff] %v13611_v57  ;;  %v3179_v51 = vrot.slane %v13569_v39, %v18541_v63  ;;  %v13617_v22 = vld [vmem:[#allocation4 + $0x8] sm:$0xf8]  ;;  %v3073_v9 = vadd.f32 %v3056_v18, %v2982_v34  ;;  %v3435_v6 = vrot.slane %v13587_v26, %v18541_v63  ;;  %v3468_v56 = vld [vmem:[#allocation4] sm:$0xf8] }
 0x1cc   : > { %18542 = vst [vmem:[#allocation60_spill] sm:$0xff] %v13617_v22  ;;  %18544 = vst [vmem:[#allocation67_spill] sm:$0xff] %v13623_v24  ;;  %v13629_v20 = vrot.slane %v13589_v8, %v18541_v63  ;;  %v3559_v21 = vld [vmem:[#allocation4] sm:$0xc0]  ;;  %v13634_v3 = vsel %vm3256_vm5, %v3269_v5, %v13442_v58  ;;  %v13638_v18 = vsel %vm3256_vm5, %v13442_v58, %v6512_v32  ;;  %6524 = vrot.lane.b32.xlu1 %v13469_v42, %s11057_s13 }
 0x1cd   : > { %4228 = vst [vmem:[#allocation4 + $0x8] sm:$0xff] %v13611_v57  ;;  %18545 = vst [vmem:[#allocation64_spill] sm:$0xff] %v13638_v18  ;;  %v13642_v34 = vrot.slane %v13604_v11, %v18541_v63  ;;  %v3650_v10 = vld [vmem:[#allocation4 + $0x20] sm:$0xfe]  ;;  %6526 = vrot.lane.b32.xlu0 %v13486_v14, %s11057_s13  ;;  %v3164_v5 = vadd.f32 %v3147_v45, %v3073_v9  ;;  %v3452_v32 = vmul.f32 %v3435_v6, %v13493_v19  ;;  %v7235_v18 = vld [vmem:[#allocation3 + $0x30] sm:$0x80]  ;;  %v13672_v9 = vpop.permute.xlu1 %4179 }
 0x1ce   : > { %v3745_v55 = vld [vmem:[#allocation4 + $0x20] sm:$0xf0]  ;;  %18546 = vst [vmem:[#allocation68_spill] sm:$0xff] %v13646_v29  ;;  %v3456_v57 = vmul.f32 %v3435_v6, %v13498_v30  ;;  %v3499_v36 = vmul.f32 %v13629_v20, %v3468_v56  ;;  %v13661_v42 = vmul.f32 %v13629_v20, %v13498_v30  ;;  %v13670_v19 = vld [vmem:[#allocation5 + $0x83] ss:$8 sm:$0xf] }
 0x1cf   : > { %v3836_v28 = vld [vmem:[#allocation4 + $0x20] sm:$0x80]  ;;  %v13656_v22 = vld [vmem:[#allocation5 + $0x45] ss:$8 sm:$0xf]  ;;  %v3590_v14 = vmul.f32 %v13642_v34, %v3559_v21  ;;  %v13666_v45 = vmul.f32 %v13642_v34, %v13498_v30  ;;  %18549 = vst [vmem:[#allocation70_spill] sm:$0xff] %v13670_v19  ;;  %v3460_v56 = vadd.f32 %v3452_v32, %v3179_v51  ;;  %v4187_v32 = vsel %vm363_vm1, %v13510_v61, %v13365_v43 }
 0x1d0   : > { %4231 = vst [vmem:[#allocation4 + $0x20] sm:$0xff] %v13646_v29  ;;  %18547 = vst [vmem:[#allocation66_spill] sm:$0xff] %v13656_v22  ;;  %v13668_v6 = vld [vmem:[#allocation5 + $0x64] ss:$8 sm:$0xf]  ;;  %v13674_v59 = vrot.slane %v3164_v5, 7  ;;  %v13676_v49 = vadd.f32 %v3456_v57, %v3179_v51  ;;  %6534 = vrot.lane.b32.xlu1 %v13474_v54, %s11057_s13  ;;  %v13730_v54 = vpop.permute.xlu0 %4181 }
 0x1d1   : > { %18548 = vst [vmem:[#allocation69_spill] sm:$0xff] %v13668_v6  ;;  %3172 = vst [vmem:[#allocation3 + $0x118] sm:$0xff] %v3164_v5  ;;  %v13678_v12 = vld [vmem:[#allocation5 + $0xa2] ss:$8 sm:$0xf]  ;;  %v3523_v11 = vrot.slane %v3499_v36, 3  ;;  %6536 = vrot.lane.b32.xlu0 %v13530_v52, %s11057_s13 }
 0x1d2   : > { %18550 = vst [vmem:[#allocation71_spill] sm:$0xff] %v13674_v59  ;;  %v18065_v21 = vrot.slane %v13661_v42, 3  ;;  %v3614_v40 = vrot.slane %v3590_v14, 6  ;;  %v13689_v57 = vsel %vm3256_vm5, %v13674_v59, %v13442_v58  ;;  %v18551_v51 = vrot.slane %v13245_v15, 7  ;;  %v3658_v14 = vld [vmem:[#allocation4 + $0x60] sm:$0x1] }
 0x1d3   : > { %v7299_v36 = vrot.slane %v7235_v18, 7  ;;  %v3749_v30 = vld [vmem:[#allocation4 + $0x60] sm:$0xf]  ;;  %v18552_v8 = vrot.slane %v13666_v45, 6  ;;  %4227 = vst [vmem:[#allocation4] sm:$0xff] %v4187_v32  ;;  %v3668_v15 = vrot.slane %v13656_v22, %v18541_v63  ;;  %18555 = vst [vmem:[#allocation72_spill] sm:$0xff] %v13730_v54 }
 0x1d4   : > { %v6497_v5 = vsel %vm3256_vm5, %v18551_v51, %v13674_v59  ;;  %v3525_v52 = vsel %vm885_vm8, %v3523_v11, %v18065_v21  ;;  %v3759_v51 = vrot.slane %v13668_v6, %v18541_v63  ;;  %v3840_v26 = vld [vmem:[#allocation4 + $0x60] sm:$0x7f]  ;;  %v13708_v43 = vld [vmem:[#allocation3 + $0x1b8] sm:$0x1]  ;;  %v3850_v11 = vrot.slane %v13670_v19, %v18541_v63  ;;  %6544 = vrot.lane.b32.xlu1 %v13524_v4, %s11057_s13 }
 0x1d5   : > { %v3616_v62 = vsel %vm498_vm3, %v3614_v40, %v18552_v8  ;;  %v3551_v61 = vadd.f32 %v3525_v52, %v3460_v56  ;;  %v13712_v18 = vsel %vm3256_vm5, %v7299_v36, %v13442_v58  ;;  %v13718_v40 = vrot.slane %v13678_v12, %v18541_v63  ;;  %v13720_v6 = vld [vmem:[#allocation5 + $0x1] ss:$8 sm:$0xf]  ;;  %v13722_v24 = vld [vmem:[#allocation5 + $0x20] ss:$8 sm:$0xf]  ;;  %v13724_v56 = vpop.permute.xlu1 %4177  ;;  %6546 = vrot.lane.b32.xlu0 %v6497_v5, %s11057_s13 }
 0x1d6   : > { %18553 = vst [vmem:[#allocation16_spill] sm:$0xff] %v13712_v18  ;;  %v3685_v8 = vmul.f32 %v3668_v15, %v3650_v10  ;;  %v3693_v21 = vmul.f32 %v3668_v15, %v3658_v14  ;;  %v3776_v22 = vmul.f32 %v3759_v51, %v3745_v55  ;;  %v3784_v39 = vmul.f32 %v3759_v51, %v3749_v30  ;;  %v3472_v18 = vld [vmem:[#allocation4 + $0x40] sm:$0x7] }
 0x1d7   : > { %18554 = vst [vmem:[#allocation19_spill] sm:$0xff] %v13724_v56  ;;  %v3642_v36 = vadd.f32 %v3616_v62, %v3551_v61  ;;  %v3867_v52 = vmul.f32 %v3850_v11, %v3836_v28  ;;  %v3875_v19 = vmul.f32 %v3850_v11, %v3840_v26  ;;  %v3563_v59 = vld [vmem:[#allocation4 + $0x40] sm:$0x3f]  ;;  %v6516_v10 = vrot.slane %v13708_v43, 7 }
 0x1d8   : > { %v3709_v55 = vrot.slane %v3685_v8, 1  ;;  %v3721_v30 = vrot.slane %v3693_v21, 1  ;;  %v3800_v14 = vrot.slane %v3776_v22, 4  ;;  %v3812_v53 = vrot.slane %v3784_v39, 4  ;;  %v3927_v62 = vld [vmem:[#allocation4 + $0x40] sm:$0xfc]  ;;  %6522 = vrot.lane.b32.xlu1 %v13504_v46, %s11057_s13 }
 0x1d9   : > { %v3891_v41 = vrot.slane %v3867_v52, 7  ;;  %v3903_v56 = vrot.slane %v3875_v19, 7  ;;  %v13734_v4 = vmul.f32 %v13718_v40, %v13552_v44  ;;  %v4199_v28 = vsel %vm363_vm1, %v4168_v48, %v13615_v33  ;;  %6532 = vrot.lane.b32.xlu0 %v13577_v13, %s11057_s13 }
 0x1da   : > { %4239 = vst [vmem:[#allocation4 + $0x60] sm:$0xff] %v4199_v28  ;;  %v13740_v26 = vrot.slane %v13720_v6, %v18541_v63  ;;  %v13744_v39 = vrot.slane %v13722_v24, %v18541_v63  ;;  %v3507_v22 = vmul.f32 %v13629_v20, %v3472_v18  ;;  %v3598_v19 = vmul.f32 %v13642_v34, %v3563_v59  ;;  %v4294_v43 = vld [vmem:[#allocation4] sm:$0xf8]  ;;  %v13762_v59 = vpop.permute.xlu1 %4967 }
 0x1db   : > { %v3987_v48 = vrot.slane %v13734_v4, 2  ;;  %v3689_v44 = vmul.f32 %v3668_v15, %v13538_v35  ;;  %v3780_v21 = vmul.f32 %v3759_v51, %v13538_v35  ;;  %v3871_v5 = vmul.f32 %v3850_v11, %v13538_v35  ;;  %18557 = vst [vmem:[#allocation74_spill] sm:$0xff] %v13762_v59 }
 0x1dc   : > { %v3535_v61 = vrot.slane %v3507_v22, 3  ;;  %v3626_v8 = vrot.slane %v3598_v19, 6  ;;  %v3962_v20 = vmul.f32 %v13718_v40, %v3927_v62  ;;  %v13760_v46 = vsel %vm363_vm1, %v13591_v38, %v13436_v50  ;;  %v13773_v22 = vpop.permute.xlu0 %4965  ;;  %6542 = vrot.lane.b32.xlu1 %v13513_v47, %s11057_s13 }
 0x1dd   : > { %18556 = vst [vmem:[#allocation73_spill] sm:$0xff] %v13760_v46  ;;  %v3710_v34 = vrot.slane %v3689_v44, 1  ;;  %v3801_v18 = vrot.slane %v3780_v21, 4  ;;  %v3892_v52 = vrot.slane %v3871_v5, 7  ;;  %4235 = vst [vmem:[#allocation4 + $0x40] sm:$0xff] %v13760_v46  ;;  %v4278_v15 = vmul.f32 %v13740_v26, %v4187_v32  ;;  %6554 = vrot.lane.b32.xlu0 %v13585_v1, %s11057_s13 }
 0x1de   : > { %v18558_v35 = vrot.slane %v13661_v42, 3  ;;  %v18559_v11 = vrot.slane %v13666_v45, 6  ;;  %v3986_v62 = vrot.slane %v3962_v20, 2  ;;  %v4325_v38 = vmul.f32 %v13744_v39, %v4294_v43  ;;  %v2900_v20 = vld [vmem:[#allocation4 + $0x58] sm:$0x3] }
 0x1df   : > { %v3711_v42 = vsel %vm701_vm6, %v3709_v55, %v3710_v34  ;;  %v3722_v19 = vsel %vm701_vm6, %v3710_v34, %v3721_v30  ;;  %v7312_v45 = vrot.slane %v13465_v37, 7  ;;  %v3802_v21 = vsel %vm977_vm9, %v3800_v14, %v3801_v18  ;;  %v2809_v30 = vld [vmem:[#allocation4 + $0x58] sm:$0x1]  ;;  %v13998_v46 = vld [vmem:[#allocation4 + $0x68] sm:$0x7f] }
 0x1e0   : > { %v3536_v51 = vsel %vm885_vm8, %v18558_v35, %v3535_v61  ;;  %v3627_v28 = vsel %vm498_vm3, %v18559_v11, %v3626_v8  ;;  %v3737_v44 = vadd.f32 %v3711_v42, %v3642_v36  ;;  %v3813_v5 = vsel %vm977_vm9, %v3801_v18, %v3812_v53  ;;  %v2991_v36 = vld [vmem:[#allocation4 + $0x58] sm:$0x7]  ;;  %v13804_v18 = vpop.permute.xlu1 %4973  ;;  %6556 = vrot.lane.b32.xlu1 %v13689_v57, %s11057_s13 }
 0x1e1   : > { %v3555_v32 = vadd.f32 %v3536_v51, %v13676_v49  ;;  %v3893_v43 = vsel %vm3256_vm5, %v3891_v41, %v3892_v52  ;;  %v3904_v8 = vsel %vm3256_vm5, %v3892_v52, %v3903_v56  ;;  %v3988_v49 = vsel %vm793_vm7, %v3986_v62, %v3987_v48  ;;  %v3936_v56 = vld [vmem:[#allocation4 + $0x88] sm:$0x3]  ;;  %6552 = vrot.lane.b32.xlu0 %v13602_v23, %s11057_s13  ;;  %v3082_v42 = vld [vmem:[#allocation4 + $0x58] sm:$0xf] }
 0x1e2   : > { %v13792_v55 = vmul.f32 %v13744_v39, %v13646_v29  ;;  %v3828_v34 = vadd.f32 %v3802_v21, %v3737_v44  ;;  %v4349_v14 = vrot.slane %v4325_v38, 3  ;;  %v13796_v53 = vsel %vm3256_vm5, %v13442_v58, %v6516_v10  ;;  %v18561_v10 = vld [vmem:[#allocation8_spill] sm:$0xff] }
 0x1e3   : > { %v3646_v61 = vadd.f32 %v3627_v28, %v3555_v32  ;;  %v13802_v41 = vsel %vm3256_vm5, %v13442_v58, %v7312_v45  ;;  %v13813_v51 = vrot.slane %v13678_v12, %v18561_v10  ;;  %v4204_v11 = vsel %vm363_vm1, %v13672_v9, %v13730_v54 }
 0x1e4   : > { %18560 = vst [vmem:[#allocation75_spill] sm:$0xff] %v13792_v55  ;;  %v18076_v35 = vrot.slane %v13792_v55, 3  ;;  %v3919_v28 = vadd.f32 %v3893_v43, %v3828_v34  ;;  %4244 = vst [vmem:[#allocation4 + $0x88] sm:$0x3] %v4204_v11  ;;  %v2844_v62 = vmul.f32 %v13345_v17, %v2809_v30  ;;  %v2935_v38 = vmul.f32 %v13349_v60, %v2900_v20  ;;  %v7234_v60 = vld [vmem:[#allocation3 + $0x28] sm:$0x80] }
 0x1e5   : > { %v3741_v52 = vadd.f32 %v3722_v19, %v3646_v61  ;;  %v3026_v32 = vmul.f32 %v13370_v25, %v2991_v36  ;;  %v4964_v19 = vpop.permute.xlu0 %4963  ;;  %v13826_v21 = vmul.f32 %v13813_v51, %v13547_v16  ;;  %v3971_v43 = vmul.f32 %v13813_v51, %v3936_v56  ;;  %3318 = vrot.lane.b32.xlu1 %v13573_v0, %s11057_s13  ;;  %v3935_v36 = vld [vmem:[#allocation4 + $0x80] sm:$0x3] }
 0x1e6   : > { %v4351_v12 = vsel %vm885_vm8, %v4349_v14, %v18076_v35  ;;  %v4014_v61 = vadd.f32 %v3988_v49, %v3919_v28  ;;  %v2875_v34 = vrot.slane %v2844_v62, 1  ;;  %v2966_v17 = vrot.slane %v2935_v38, 2  ;;  %3320 = vrot.lane.b32.xlu0 %v13634_v3, %s11057_s13  ;;  %v13846_v62 = vpop.permute.xlu1 %4993  ;;  %v3651_v35 = vld [vmem:[#allocation4 + $0x28] sm:$0xfe] }
 0x1e7   : > { %v3832_v44 = vadd.f32 %v3813_v5, %v3741_v52  ;;  %v3057_v30 = vrot.slane %v3026_v32, 3  ;;  %v18077_v5 = vrot.slane %v13826_v21, 2  ;;  %v4000_v20 = vrot.slane %v3971_v43, 2  ;;  %18565 = vst [vmem:[#allocation76_spill] sm:$0xff] %v13846_v62  ;;  %v3224_v32 = vld [vmem:[#allocation3 + $0x1a8] sm:$0x1] }
 0x1e8   : > { %v3117_v16 = vmul.f32 %v13374_v27, %v3082_v42  ;;  %v4286_v14 = vadd.f32 %v4278_v15, %v4014_v61  ;;  %v18562_v49 = vrot.slane %v13384_v7, 1  ;;  %v18563_v52 = vrot.slane %v13387_v31, 2  ;;  %v18566_v7 = vld [vmem:[#allocation20_spill] sm:$0xff] }
 0x1e9   : > { %v3923_v25 = vadd.f32 %v3904_v8, %v3832_v44  ;;  %v18564_v0 = vrot.slane %v13390_v2, 3  ;;  %v7244_v8 = vld [vmem:[#allocation3 + $0xc8] sm:$0xff]  ;;  %v13844_v28 = vpop.permute.xlu0 %4983  ;;  %v13851_v27 = vsel %vm793_vm7, %v18077_v5, %v4000_v20  ;;  %v7296_v31 = vrot.slane %v7234_v60, 7  ;;  %v18568_v44 = vld [vmem:[#allocation19_spill] sm:$0xff]  ;;  %3328 = vrot.lane.b32.xlu1 %v13577_v13, %s11057_s13 }
 0x1ea   : > { %v2876_v56 = vsel %vm701_vm6, %v18562_v49, %v2875_v34  ;;  %v2967_v11 = vsel %vm793_vm7, %v18563_v52, %v2966_v17  ;;  %v3148_v38 = vrot.slane %v3117_v16, 4  ;;  %v13854_v42 = vadd.f32 %v4351_v12, %v4286_v14  ;;  %v7233_v34 = vld [vmem:[#allocation3 + $0x20] sm:$0x80]  ;;  %v13862_v17 = vld [vmem:[#allocation4 + $0x8] sm:$0xf8]  ;;  %v18569_v12 = vld [vmem:[#allocation55_spill] sm:$0xff] }
 0x1eb   : > { %v3058_v3 = vsel %vm885_vm8, %v18564_v0, %v3057_v30  ;;  %v2892_v15 = vadd.f32 %v2876_v56, %v18566_v7  ;;  %v3970_v2 = vmul.f32 %v13718_v40, %v3935_v36  ;;  %v4203_v43 = vsel %vm363_vm1, %v18568_v44, %v13672_v9  ;;  %v13864_v30 = vld [vmem:[#allocation4 + $0x8] sm:$0xc0]  ;;  %3330 = vrot.lane.b32.xlu0 %v18569_v12, %s11057_s13  ;;  %v18570_v40 = vld [vmem:[#allocation50_spill] sm:$0xff]  ;;  %v5675_v52 = vld [vmem:[#allocation3 + $0x20] sm:$0x80]  ;;  %v13909_v44 = vpop.permute.xlu1 %5007 }
 0x1ec   : > { %18567 = vst [vmem:[#allocation77_spill] sm:$0xff] %v13854_v42  ;;  %v4282_v61 = vmul.f32 %v13740_v26, %v13646_v29  ;;  %v18571_v20 = vrot.slane %v18570_v40, 4  ;;  %v13875_v9 = vsel %vm3256_vm5, %v7296_v31, %v13442_v58  ;;  %4243 = vst [vmem:[#allocation4 + $0x80] sm:$0x3] %v4203_v43  ;;  %v7310_v26 = vrot.slane %v7244_v8, 7  ;;  %v18574_v8 = vld [vmem:[#allocation71_spill] sm:$0xff] }
 0x1ed   : > { %v2983_v60 = vadd.f32 %v2967_v11, %v2892_v15  ;;  %v4026_v36 = vld [vmem:[#allocation3 + $0x28] sm:$0x80]  ;;  %v3998_v14 = vrot.slane %v3970_v2, 2  ;;  %v13879_v49 = vsel %vm2166_vm10, %v4964_v19, %v13773_v22  ;;  %v3308_v13 = vrot.slane %v3224_v32, 7  ;;  %v13886_v11 = vld [vmem:[#allocation4] sm:$0xc0]  ;;  %v13905_v31 = vpop.permute.xlu0 %5005  ;;  %3338 = vrot.lane.b32.xlu1 %v13513_v47, %s11057_s13 }
 0x1ee   : > { %v3149_v16 = vsel %vm977_vm9, %v18571_v20, %v3148_v38  ;;  %18572 = vst [vmem:[#allocation65_spill] sm:$0xff] %v13879_v49  ;;  %v13884_v56 = vsel %vm2166_vm10, %v13773_v22, %v13762_v59  ;;  %v13890_v7 = vsel %vm3256_vm5, %v13442_v58, %v7310_v26  ;;  %v13894_v15 = vsel %vm3256_vm5, %v7310_v26, %v18574_v8  ;;  %v5695_v38 = vld [vmem:[#allocation3 + $0x1b0] sm:$0x1]  ;;  %v13907_v2 = vld [vmem:[#allocation5 + $0xa3] ss:$8 sm:$0xf] }
 0x1ef   : > { %18573 = vst [vmem:[#allocation85_spill] sm:$0xff] %v13884_v56  ;;  %v3074_v0 = vadd.f32 %v3058_v3, %v2983_v60  ;;  %v7293_v19 = vrot.slane %v7233_v34, 7  ;;  %5053 = vst [vmem:[#allocation4] sm:$0xff] %v13879_v49  ;;  %v3999_v22 = vsel %vm793_vm7, %v3987_v48, %v3998_v14  ;;  %v13903_v3 = vsel %vm3256_vm5, %v13442_v58, %v3308_v13  ;;  %v5683_v43 = vld [vmem:[#allocation3 + $0xc0] sm:$0xff]  ;;  %v4762_v26 = vld [vmem:[#allocation4 + $0x88] sm:$0x3] }
 0x1f0   : > { %5054 = vst [vmem:[#allocation4 + $0x8] sm:$0xff] %v13884_v56  ;;  %18575 = vst [vmem:[#allocation84_spill] sm:$0xff] %v13905_v31  ;;  %v4094_v32 = vrot.slane %v4026_v36, 7  ;;  %v18577_v34 = vld [vmem:[#allocation48_spill] sm:$0xff]  ;;  %v4018_v48 = vadd.f32 %v3999_v22, %v3923_v25  ;;  %v5725_v20 = vrot.slane %v5675_v52, 7  ;;  %v13927_v47 = vrot.slane %v13907_v2, %v18561_v10  ;;  %v18594_v59 = vld [vmem:[#allocation41_spill] sm:$0xff] }
 0x1f1   : > { %18576 = vst [vmem:[#allocation15_spill] sm:$0xff] %v13909_v44  ;;  %3340 = vrot.lane.b32.xlu0 %v18577_v34, %s11057_s13  ;;  %v3165_v4 = vadd.f32 %v3149_v16, %v3074_v0  ;;  %v13917_v60 = vsel %vm3256_vm5, %v7293_v19, %v13442_v58  ;;  %v13919_v40 = vld [vmem:[#allocation5 + $0xa4] ss:$8 sm:$0xf]  ;;  %v5760_v25 = vrot.slane %v5695_v38, 7  ;;  %v5030_v8 = vsel %vm2166_vm10, %v13905_v31, %v13909_v44 }
 0x1f2   : > { %v13923_v36 = vsel %vm3256_vm5, %v4094_v32, %v13442_v58  ;;  %18579 = vst [vmem:[#allocation30_spill] sm:$0xff] %v13927_v47  ;;  %v13931_v16 = vrot.slane %v13919_v40, %v18561_v10  ;;  %v3225_v14 = vld [vmem:[#allocation3 + $0x1b0] sm:$0x1]  ;;  %v13935_v0 = vadd.f32 %v4282_v61, %v4018_v48  ;;  %v13939_v52 = vsel %vm3256_vm5, %v5725_v20, %v13442_v58  ;;  %v18584_v61 = vld [vmem:[#allocation67_spill] sm:$0xff]  ;;  %v18585_v48 = vld [vmem:[#allocation49_spill] sm:$0xff] }
 0x1f3   : > { %18578 = vst [vmem:[#allocation29_spill] sm:$0xff] %v13923_v36  ;;  %3173 = vst [vmem:[#allocation3 + $0x120] sm:$0xff] %v3165_v4  ;;  %v13933_v13 = vrot.slane %v3165_v4, 7  ;;  %v5761_v19 = vsel %vm3256_vm5, %v13442_v58, %v5760_v25  ;;  %v13947_v22 = vmul.f32 %v13927_v47, %v4762_v26  ;;  %v13949_v38 = vrot.slane %v5683_v43, 7  ;;  %6564 = vrot.lane.b32.xlu1 %v18584_v61, %s11057_s13  ;;  %v18586_v26 = vld [vmem:[#allocation56_spill] sm:$0xff]  ;;  %v13965_v25 = vpop.permute.xlu0 %4151  ;;  %v18603_v36 = vld [vmem:[#allocation23_spill] sm:$0xff] }
 0x1f4   : > { %18580 = vst [vmem:[#allocation86_spill] sm:$0xff] %v13931_v16  ;;  %18581 = vst [vmem:[#allocation21_spill] sm:$0xff] %v13935_v0  ;;  %v3310_v4 = vrot.slane %v3225_v14, 7  ;;  %v3183_v20 = vrot.slane %v18585_v48, %v18561_v10  ;;  %v3439_v43 = vrot.slane %v18586_v26, %v18561_v10  ;;  %v13969_v61 = vld [vmem:[#allocation3 + $0x20] sm:$0x80]  ;;  %v18592_v48 = vld [vmem:[#allocation63_spill] sm:$0xff] }
 0x1f5   : > { %18582 = vst [vmem:[#allocation25_spill] sm:$0xff] %v13939_v52  ;;  %18583 = vst [vmem:[#allocation32_spill] sm:$0xff] %v13947_v22  ;;  %6566 = vrot.lane.b32.xlu0 %v13796_v53, %s11057_s13  ;;  %v13959_v32 = vsel %vm3256_vm5, %v7312_v45, %v13933_v13  ;;  %v13975_v37 = vsel %vm3256_vm5, %v13442_v58, %v13949_v38  ;;  %v18590_v45 = vld [vmem:[#allocation62_spill] sm:$0xff]  ;;  %v3486_v26 = vrot.slane %v18592_v48, %v18561_v10  ;;  %v3746_v5 = vld [vmem:[#allocation4 + $0x28] sm:$0xf0] }
 0x1f6   : > { %5070 = vst [vmem:[#allocation4 + $0x88] sm:$0x3] %v5030_v8  ;;  %18587 = vst [vmem:[#allocation33_spill] sm:$0xff] %v13965_v25  ;;  %v13967_v8 = vpop.permute.xlu1 %4171  ;;  %v13980_v14 = vsel %vm3256_vm5, %v13949_v38, %v18590_v45  ;;  %v13984_v44 = vld [vmem:[#allocation4 + $0x28] sm:$0x80]  ;;  %v13990_v53 = vsel %vm3256_vm5, %v13442_v58, %v3310_v4  ;;  %v3453_v62 = vmul.f32 %v3439_v43, %v18594_v59  ;;  %v18595_v31 = vld [vmem:[#allocation28_spill] sm:$0xff] }
 0x1f7   : > { %18588 = vst [vmem:[#allocation11_spill] sm:$0xff] %v13967_v8  ;;  %18589 = vst [vmem:[#allocation12_spill] sm:$0xff] %v13975_v37  ;;  %v13986_v54 = vld [vmem:[#allocation4 + $0x8] sm:$0xf8]  ;;  %v3457_v22 = vmul.f32 %v3439_v43, %v18595_v31  ;;  %v3473_v56 = vld [vmem:[#allocation4 + $0x48] sm:$0x7]  ;;  %v3504_v4 = vmul.f32 %v3486_v26, %v18595_v31  ;;  %v14010_v43 = vsel %vm363_vm1, %v13615_v33, %v13967_v8  ;;  %v14035_v55 = vpop.permute.xlu0 %4161 }
 0x1f8   : > { %18591 = vst [vmem:[#allocation40_spill] sm:$0xff] %v13980_v14  ;;  %18593 = vst [vmem:[#allocation17_spill] sm:$0xff] %v13986_v54  ;;  %v18596_v45 = vld [vmem:[#allocation9_spill] sm:$0xff]  ;;  %v18598_v54 = vld [vmem:[#allocation60_spill] sm:$0xff] }
 0x1f9   : > { %v3577_v14 = vrot.slane %v18596_v45, %v18561_v10  ;;  %v3564_v49 = vld [vmem:[#allocation4 + $0x48] sm:$0x3f]  ;;  %v13996_v48 = vld [vmem:[#allocation4 + $0x8] sm:$0xc0]  ;;  %v3500_v0 = vmul.f32 %v3486_v26, %v18598_v54  ;;  %v18599_v37 = vld [vmem:[#allocation51_spill] sm:$0xff]  ;;  %18601 = vst [vmem:[#allocation14_spill] sm:$0xff] %v14010_v43  ;;  %3348 = vrot.lane.b32.xlu0 %v13602_v23, %s11057_s13  ;;  %v3461_v54 = vadd.f32 %v3453_v62, %v3183_v20 }
 0x1fa   : > { %18597 = vst [vmem:[#allocation13_spill] sm:$0xff] %v13996_v48  ;;  %v3659_v47 = vld [vmem:[#allocation4 + $0x68] sm:$0x1]  ;;  %v14005_v59 = vsel %vm363_vm1, %v18599_v37, %v13965_v25  ;;  %5787 = vst [vmem:[#allocation4 + $0x8] sm:$0xff] %v13939_v52  ;;  %v18602_v45 = vld [vmem:[#allocation64_spill] sm:$0xff]  ;;  %v3465_v48 = vadd.f32 %v3457_v22, %v3183_v20  ;;  %v3527_v8 = vrot.slane %v3504_v4, 3  ;;  %v3508_v22 = vmul.f32 %v3486_v26, %v3473_v56 }
 0x1fb   : > { %v3750_v42 = vld [vmem:[#allocation4 + $0x68] sm:$0xf]  ;;  %18600 = vst [vmem:[#allocation18_spill] sm:$0xff] %v14005_v59  ;;  %6562 = vrot.lane.b32.xlu1 %v18602_v45, %s11057_s13  ;;  %v3591_v29 = vmul.f32 %v3577_v14, %v18603_v36  ;;  %4232 = vst [vmem:[#allocation4 + $0x28] sm:$0xff] %v14005_v59  ;;  %v3526_v33 = vrot.slane %v3500_v0, 3  ;;  %v3595_v25 = vmul.f32 %v3577_v14, %v18595_v31  ;;  %v18605_v36 = vld [vmem:[#allocation66_spill] sm:$0xff] }
 0x1fc   : > { %4240 = vst [vmem:[#allocation4 + $0x68] sm:$0xff] %v14010_v43  ;;  %v14025_v45 = vsel %vm3256_vm5, %v13933_v13, %v13442_v58  ;;  %v3599_v20 = vmul.f32 %v3577_v14, %v3564_v49  ;;  %v3672_v52 = vrot.slane %v18605_v36, %v18561_v10  ;;  %v18607_v31 = vld [vmem:[#allocation69_spill] sm:$0xff]  ;;  %18608 = vst [vmem:[#allocation79_spill] sm:$0xff] %v14035_v55  ;;  %v3537_v49 = vrot.slane %v3508_v22, 3 }
 0x1fd   : > { %18604 = vst [vmem:[#allocation34_spill] sm:$0xff] %v14025_v45  ;;  %v5588_v23 = vld [vmem:[#allocation4 + $0x88] sm:$0x3]  ;;  %v3617_v62 = vrot.slane %v3591_v29, 6  ;;  %v3528_v0 = vsel %vm885_vm8, %v3526_v33, %v3527_v8  ;;  %v3618_v4 = vrot.slane %v3595_v25, 6  ;;  %v3763_v37 = vrot.slane %v18607_v31, %v18561_v10  ;;  %7350 = vrot.lane.b32.xlu0 %v13875_v9, %s11056_s12  ;;  %v18609_v25 = vld [vmem:[#allocation59_spill] sm:$0xff] }
 0x1fe   : > { %v14030_v43 = vmul.f32 %v13931_v16, %v5588_v23  ;;  %5803 = vst [vmem:[#allocation4 + $0x88] sm:$0x3] %v5761_v19  ;;  %v3552_v29 = vadd.f32 %v3528_v0, %v3461_v54  ;;  %v3628_v56 = vrot.slane %v3599_v20, 6  ;;  %v3686_v14 = vmul.f32 %v3672_v52, %v3651_v35  ;;  %v3928_v36 = vld [vmem:[#allocation4 + $0x48] sm:$0xfc]  ;;  %v18610_v35 = vld [vmem:[#allocation16_spill] sm:$0xff] }
 0x1ff   : > { %3350 = vrot.lane.b32.xlu1 %v13585_v1, %s11057_s13  ;;  %v3619_v26 = vsel %vm498_vm3, %v3617_v62, %v3618_v4  ;;  %v3690_v33 = vmul.f32 %v3672_v52, %v18609_v25  ;;  %v3694_v23 = vmul.f32 %v3672_v52, %v3659_v47  ;;  %v3538_v16 = vsel %vm885_vm8, %v3527_v8, %v3537_v49  ;;  %v18611_v52 = vld [vmem:[#allocation70_spill] sm:$0xff] }
 0x200   : > { %18606 = vst [vmem:[#allocation78_spill] sm:$0xff] %v14030_v43  ;;  %v3643_v31 = vadd.f32 %v3619_v26, %v3552_v29  ;;  %v3629_v59 = vsel %vm498_vm3, %v3618_v4, %v3628_v56  ;;  %v3712_v1 = vrot.slane %v3686_v14, 1  ;;  %v3556_v45 = vadd.f32 %v3538_v16, %v3465_v48  ;;  %v14054_v48 = vpop.permute.xlu0 %4975 }
 0x201   : > { %v3777_v9 = vmul.f32 %v3763_v37, %v3746_v5  ;;  %v3781_v54 = vmul.f32 %v3763_v37, %v18609_v25  ;;  %v3785_v22 = vmul.f32 %v3763_v37, %v3750_v42  ;;  %7360 = vrot.lane.b32.xlu0 %v13890_v7, %s11056_s12  ;;  %v3713_v62 = vrot.slane %v3690_v33, 1 }
 0x202   : > { %v3723_v47 = vrot.slane %v3694_v23, 1  ;;  %v3854_v20 = vrot.slane %v18611_v52, %v18561_v10  ;;  %v3963_v8 = vmul.f32 %v13813_v51, %v3928_v36  ;;  %v3647_v0 = vadd.f32 %v3629_v59, %v3556_v45  ;;  %v14085_v52 = vld [vmem:[#allocation4 + $0x20] sm:$0x80] }
 0x203   : > { %7352 = vrot.lane.b32.xlu1 %v18610_v35, %s11056_s12  ;;  %v3803_v4 = vrot.slane %v3777_v9, 4  ;;  %v3804_v16 = vrot.slane %v3781_v54, 4  ;;  %v3814_v5 = vrot.slane %v3785_v22, 4  ;;  %v3714_v42 = vsel %vm701_vm6, %v3712_v1, %v3713_v62  ;;  %v4040_v9 = vld [vmem:[#allocation3 + $0x110] sm:$0xff]  ;;  %v14076_v54 = vld [vmem:[#allocation4 + $0x20] sm:$0xfe] }
 0x204   : > { %v3724_v37 = vsel %vm701_vm6, %v3713_v62, %v3723_v47  ;;  %v3868_v29 = vmul.f32 %v3854_v20, %v13984_v44  ;;  %v3872_v49 = vmul.f32 %v3854_v20, %v18609_v25  ;;  %v3738_v56 = vadd.f32 %v3714_v42, %v3643_v31  ;;  %v7260_v44 = vld [vmem:[#allocation3 + $0x1c0] sm:$0x1]  ;;  %v14083_v47 = vld [vmem:[#allocation4 + $0x20] sm:$0xf0] }
 0x205   : > { %v3742_v14 = vadd.f32 %v3724_v37, %v3647_v0  ;;  %v3805_v26 = vsel %vm977_vm9, %v3803_v4, %v3804_v16  ;;  %v3815_v51 = vsel %vm977_vm9, %v3804_v16, %v3814_v5  ;;  %7370 = vrot.lane.b32.xlu0 %v13894_v15, %s11056_s12  ;;  %v3876_v1 = vmul.f32 %v3854_v20, %v13998_v46  ;;  %v18613_v20 = vld [vmem:[#allocation58_spill] sm:$0xff] }
 0x206   : > { %v3894_v59 = vrot.slane %v3868_v29, 7  ;;  %v3895_v45 = vrot.slane %v3872_v49, 7  ;;  %v3989_v33 = vrot.slane %v3963_v8, 2  ;;  %v3829_v23 = vadd.f32 %v3805_v26, %v3738_v56  ;;  %v8060_v37 = vld [vmem:[#allocation3 + $0x30] sm:$0x80] }
 0x207   : > { %7362 = vrot.lane.b32.xlu1 %v13802_v41, %s11056_s12  ;;  %v3833_v25 = vadd.f32 %v3815_v51, %v3742_v14  ;;  %v14069_v36 = vrot.slane %v13720_v6, %v18561_v10  ;;  %v14074_v31 = vsel %vm363_vm1, %v13436_v50, %v14035_v55  ;;  %v4394_v41 = vld [vmem:[#allocation5 + $0x27] ss:$8 sm:$0xf]  ;;  %v3905_v22 = vrot.slane %v3876_v1, 7  ;;  %v4298_v6 = vld [vmem:[#allocation4 + $0x40] sm:$0x7] }
 0x208   : > { %v3896_v46 = vsel %vm3256_vm5, %v3894_v59, %v3895_v45  ;;  %v18612_v35 = vrot.slane %v13826_v21, 2  ;;  %4236 = vst [vmem:[#allocation4 + $0x48] sm:$0xff] %v14074_v31  ;;  %v14092_v0 = vsel %vm2166_vm10, %v13804_v18, %v14054_v48  ;;  %v7342_v4 = vrot.slane %v7260_v44, 7  ;;  %v14094_v21 = vpop.permute.xlu0 %4985  ;;  %v4389_v56 = vld [vmem:[#allocation4 + $0x40] sm:$0x3f]  ;;  %v8070_v26 = vld [vmem:[#allocation3 + $0xd0] sm:$0xff] }
 0x209   : > { %v3920_v50 = vadd.f32 %v3896_v46, %v3829_v23  ;;  %v4279_v8 = vmul.f32 %v14069_v36, %v18613_v20  ;;  %18614 = vst [vmem:[#allocation80_spill] sm:$0xff] %v14094_v21  ;;  %7348 = vrot.lane.b32.xlu0 %v13917_v60, %s11056_s12  ;;  %v3906_v16 = vsel %vm3256_vm5, %v3895_v45, %v3905_v22  ;;  %v18615_v5 = vrot.slane %v13969_v61, 7  ;;  %v7259_v14 = vld [vmem:[#allocation3 + $0x1b8] sm:$0x1]  ;;  %v4753_v51 = vld [vmem:[#allocation4 + $0x40] sm:$0xfc] }
 0x20a   : > { %v3991_v62 = vsel %vm793_vm7, %v3989_v33, %v18612_v35  ;;  %5057 = vst [vmem:[#allocation4 + $0x20] sm:$0xff] %v14092_v0  ;;  %v4113_v18 = vrot.slane %v4040_v9, 7  ;;  %v3924_v29 = vadd.f32 %v3906_v16, %v3833_v25  ;;  %v14113_v60 = vmul.f32 %v13744_v39, %v4298_v6  ;;  %v7258_v45 = vld [vmem:[#allocation3 + $0x1b0] sm:$0x1]  ;;  %v8059_v46 = vld [vmem:[#allocation3 + $0x28] sm:$0x80] }
 0x20b   : > { %7372 = vrot.lane.b32.xlu1 %v13959_v32, %s11056_s12  ;;  %v14105_v42 = vsel %vm3256_vm5, %v18615_v5, %v13442_v58  ;;  %v4015_v49 = vadd.f32 %v3991_v62, %v3920_v50  ;;  %v14110_v32 = vsel %vm3256_vm5, %v13442_v58, %v7342_v4  ;;  %v14116_v61 = vrot.slane %v4394_v41, %v18541_v63  ;;  %v8061_v62 = vld [vmem:[#allocation3 + $0x38] sm:$0x80] }
 0x20c   : > { %v14121_v1 = vsel %vm2166_vm10, %v13844_v28, %v14094_v21  ;;  %v14125_v59 = vsel %vm3256_vm5, %v4113_v18, %v13442_v58  ;;  %v14129_v39 = vsel %vm3256_vm5, %v13949_v38, %v4113_v18  ;;  %v14132_v33 = vadd.f32 %v13851_v27, %v3924_v29  ;;  %v5682_v18 = vld [vmem:[#allocation3 + $0xb8] sm:$0xff] }
 0x20d   : > { %18616 = vst [vmem:[#allocation27_spill] sm:$0xff] %v14121_v1  ;;  %v14134_v44 = vadd.f32 %v4279_v8, %v4015_v49  ;;  %5061 = vst [vmem:[#allocation4 + $0x40] sm:$0xff] %v14121_v1  ;;  %v8122_v28 = vrot.slane %v8060_v37, 7  ;;  %7368 = vrot.lane.b32.xlu0 %v18577_v34, %s11056_s12  ;;  %v14144_v38 = vmul.f32 %v14116_v61, %v13886_v11  ;;  %v7340_v25 = vrot.slane %v7259_v14, 7  ;;  %v5686_v37 = vld [vmem:[#allocation3 + $0x108] sm:$0xff] }
 0x20e   : > { %v14147_v27 = vmul.f32 %v14116_v61, %v4389_v56  ;;  %v14149_v9 = vrot.slane %v8070_v26, 7  ;;  %v7338_v35 = vrot.slane %v7258_v45, 7  ;;  %v14180_v16 = vrot.slane %v4394_v41, %v18561_v10  ;;  %v4761_v56 = vld [vmem:[#allocation4 + $0x80] sm:$0x3]  ;;  %v5694_v45 = vld [vmem:[#allocation3 + $0x1a8] sm:$0x1] }
 0x20f   : > { %7358 = vrot.lane.b32.xlu1 %v18569_v12, %s11056_s12  ;;  %v14153_v22 = vsel %vm3256_vm5, %v8122_v28, %v13442_v58  ;;  %v14157_v12 = vrot.slane %v13722_v24, %v18561_v10  ;;  %v4299_v34 = vld [vmem:[#allocation4 + $0x48] sm:$0x7]  ;;  %v14163_v50 = vsel %vm3256_vm5, %v13442_v58, %v7340_v25  ;;  %v8125_v49 = vrot.slane %v8061_v62, 7  ;;  %v4489_v28 = vld [vmem:[#allocation5 + $0x46] ss:$8 sm:$0xf] }
 0x210   : > { %18617 = vst [vmem:[#allocation39_spill] sm:$0xff] %v14149_v9  ;;  %v14168_v20 = vsel %vm3256_vm5, %v13442_v58, %v14149_v9  ;;  %v4390_v8 = vld [vmem:[#allocation4 + $0x48] sm:$0x3f]  ;;  %v14172_v24 = vsel %vm3256_vm5, %v13442_v58, %v7338_v35  ;;  %v14177_v4 = vsel %vm3256_vm5, %v14149_v9, %v13933_v13  ;;  %v8119_v13 = vrot.slane %v8059_v46, 7  ;;  %v14221_v62 = vld [vmem:[#allocation4] sm:$0xf8] }
 0x211   : > { %18618 = vst [vmem:[#allocation81_spill] sm:$0xff] %v14177_v4  ;;  %v14184_v5 = vmul.f32 %v14157_v12, %v13862_v17  ;;  %3360 = vrot.lane.b32.xlu0 %v13990_v53, %s11057_s13  ;;  %v14191_v29 = vmul.f32 %v14157_v12, %v4299_v34  ;;  %v14195_v41 = vrot.slane %v13907_v2, %v18541_v63  ;;  %v5674_v17 = vld [vmem:[#allocation3 + $0x18] sm:$0x80]  ;;  %v4580_v34 = vld [vmem:[#allocation5 + $0x65] ss:$8 sm:$0xf] }
 0x212   : > { %v14200_v26 = vmul.f32 %v14180_v16, %v13864_v30  ;;  %v14207_v53 = vrot.slane %v13919_v40, %v18541_v63  ;;  %v14212_v2 = vsel %vm3256_vm5, %v8119_v13, %v13442_v58  ;;  %v14216_v46 = vsel %vm3256_vm5, %v8125_v49, %v13442_v58  ;;  %v14223_v40 = vld [vmem:[#allocation4] sm:$0xc0]  ;;  %v4671_v11 = vld [vmem:[#allocation5 + $0x84] ss:$8 sm:$0xf] }
 0x213   : > { %3358 = vrot.lane.b32.xlu1 %v13903_v3, %s11057_s13  ;;  %v14203_v3 = vmul.f32 %v14180_v16, %v4390_v8  ;;  %18620 = vst [vmem:[#allocation37_spill] sm:$0xff] %v14212_v2  ;;  %v14219_v30 = vmul.f32 %v14195_v41, %v4753_v51  ;;  %18621 = vst [vmem:[#allocation31_spill] sm:$0xff] %v14223_v40  ;;  %v14225_v8 = vld [vmem:[#allocation4 + $0x20] sm:$0xfe]  ;;  %v14232_v49 = vmul.f32 %v14195_v41, %v4761_v56  ;;  %v14239_v14 = vld [vmem:[#allocation3 + $0xc8] sm:$0xff] }
 0x214   : > { %18619 = vst [vmem:[#allocation36_spill] sm:$0xff] %v14207_v53  ;;  %v5579_v35 = vld [vmem:[#allocation4 + $0x40] sm:$0xfc]  ;;  %18622 = vst [vmem:[#allocation35_spill] sm:$0xff] %v14225_v8  ;;  %v18628_v13 = vld [vmem:[#allocation34_spill] sm:$0xff]  ;;  %v5722_v56 = vrot.slane %v5674_v17, 7  ;;  %v14274_v9 = vrot.slane %v4580_v34, %v18541_v63 }
 0x215   : > { %v14227_v19 = vld [vmem:[#allocation4 + $0x20] sm:$0xf0]  ;;  %v14235_v51 = vmul.f32 %v14207_v53, %v5579_v35  ;;  %v14237_v25 = vld [vmem:[#allocation4 + $0x40] sm:$0x7]  ;;  %18626 = vst [vmem:[#allocation38_spill] sm:$0xff] %v14239_v14  ;;  %7382 = vrot.lane.b32.xlu0 %v18628_v13, %s11056_s12  ;;  %v5734_v55 = vrot.slane %v5682_v18, 7 }
 0x216   : > { %18623 = vst [vmem:[#allocation42_spill] sm:$0xff] %v14227_v19  ;;  %18625 = vst [vmem:[#allocation26_spill] sm:$0xff] %v14237_v25  ;;  %v14241_v23 = vld [vmem:[#allocation4 + $0x20] sm:$0x80]  ;;  %v5742_v19 = vrot.slane %v5686_v37, 7  ;;  %v5758_v53 = vrot.slane %v5694_v45, 7  ;;  %v14255_v8 = vsel %vm3256_vm5, %v5722_v56, %v13442_v58  ;;  %v4498_v56 = vrot.slane %v4489_v28, %v18561_v10 }
 0x217   : > { %18624 = vst [vmem:[#allocation22_spill] sm:$0xff] %v14235_v51  ;;  %18627 = vst [vmem:[#allocation53_spill] sm:$0xff] %v14241_v23  ;;  %7380 = vrot.lane.b32.xlu1 %v13689_v57, %s11056_s12  ;;  %v14248_v35 = vld [vmem:[#allocation4 + $0x40] sm:$0x3f]  ;;  %v4494_v23 = vrot.slane %v4489_v28, %v18541_v63  ;;  %v14259_v6 = vsel %vm3256_vm5, %v13442_v58, %v5734_v55  ;;  %v14277_v51 = vrot.slane %v4580_v34, %v18561_v10  ;;  %v4572_v14 = vld [vmem:[#allocation4 + $0x28] sm:$0xf0] }
 0x218   : > { %18629 = vst [vmem:[#allocation20_spill] sm:$0xff] %v14248_v35  ;;  %v5082_v1 = vld [vmem:[#allocation5 + $0x2] ss:$8 sm:$0xf]  ;;  %18630 = vst [vmem:[#allocation19_spill] sm:$0xff] %v14255_v8  ;;  %v14262_v18 = vsel %vm3256_vm5, %v5734_v55, %v5742_v19  ;;  %v14266_v37 = vsel %vm3256_vm5, %v5742_v19, %v13442_v58  ;;  %v14270_v43 = vsel %vm3256_vm5, %v13442_v58, %v5758_v53 }
 0x219   : > { %18631 = vst [vmem:[#allocation55_spill] sm:$0xff] %v14259_v6  ;;  %18632 = vst [vmem:[#allocation50_spill] sm:$0xff] %v14262_v18  ;;  %v5129_v17 = vld [vmem:[#allocation5 + $0x21] ss:$8 sm:$0xf]  ;;  %4143 = vrot.lane.b32.xlu0 %v14105_v42, %s11056_s12  ;;  %v14287_v53 = vrot.slane %v4671_v11, %v18541_v63  ;;  %v14290_v28 = vrot.slane %v4671_v11, %v18561_v10  ;;  %v14293_v34 = vrot.slane %v5082_v1, %v18541_v63 }
 0x21a   : > { %18633 = vst [vmem:[#allocation71_spill] sm:$0xff] %v14266_v37  ;;  %v5220_v45 = vld [vmem:[#allocation5 + $0x40] ss:$8 sm:$0xf]  ;;  %18634 = vst [vmem:[#allocation48_spill] sm:$0xff] %v14270_v43  ;;  %v14303_v13 = vrot.slane %v5129_v17, %v18561_v10 }
 0x21b   : > { %v5315_v55 = vld [vmem:[#allocation5 + $0x47] ss:$8 sm:$0xf]  ;;  %5786 = vst [vmem:[#allocation4] sm:$0xff] %v14255_v8  ;;  %5794 = vst [vmem:[#allocation4 + $0x40] sm:$0xff] %v14262_v18  ;;  %v14297_v18 = vrot.slane %v5082_v1, %v18561_v10  ;;  %v14306_v42 = vrot.slane %v5220_v45, %v18541_v63  ;;  %v14311_v43 = vrot.slane %v5220_v45, %v18561_v10 }
 0x21c   : > { %5790 = vst [vmem:[#allocation4 + $0x20] sm:$0xff] %v14259_v6  ;;  %v18635_v19 = vld [vmem:[#allocation52_spill] sm:$0xff]  ;;  %v14300_v6 = vrot.slane %v5129_v17, %v18541_v63  ;;  %18637 = vst [vmem:[#allocation49_spill] sm:$0xff] %v14303_v13  ;;  %v8074_v37 = vld [vmem:[#allocation3 + $0x118] sm:$0xff]  ;;  %v14314_v8 = vrot.slane %v5315_v55, %v18541_v63  ;;  %v14317_v1 = vrot.slane %v5315_v55, %v18561_v10  ;;  %v18644_v63 = vrot.slane %v14113_v60, 3 }
 0x21d   : > { %7378 = vrot.lane.b32.xlu1 %v18635_v19, %s11056_s12  ;;  %18638 = vst [vmem:[#allocation56_spill] sm:$0xff] %v14306_v42  ;;  %v4477_v11 = vld [vmem:[#allocation4 + $0x28] sm:$0xfe]  ;;  %v14308_v19 = vpop.permute.xlu1 %4977  ;;  %18640 = vst [vmem:[#allocation63_spill] sm:$0xff] %v14311_v43  ;;  %v18643_v58 = vld [vmem:[#allocation18_spill] sm:$0xff]  ;;  %v4516_v13 = vmul.f32 %v4498_v56, %v14074_v31 }
 0x21e   : > { %18636 = vst [vmem:[#allocation67_spill] sm:$0xff] %v14300_v6  ;;  %18639 = vst [vmem:[#allocation62_spill] sm:$0xff] %v14308_v19  ;;  %v4283_v17 = vmul.f32 %v14069_v36, %v18643_v58  ;;  %v14321_v2 = vld [vmem:[#allocation4 + $0x28] sm:$0x80]  ;;  %v14326_v21 = vsel %vm2166_vm10, %v14054_v48, %v14308_v19  ;;  %v4330_v45 = vmul.f32 %v14157_v12, %v18643_v58  ;;  %v18647_v10 = vld [vmem:[#allocation68_spill] sm:$0xff] }
 0x21f   : > { %18641 = vst [vmem:[#allocation41_spill] sm:$0xff] %v14314_v8  ;;  %18642 = vst [vmem:[#allocation28_spill] sm:$0xff] %v14317_v1  ;;  %v18645_v8 = vld [vmem:[#allocation75_spill] sm:$0xff]  ;;  %v4420_v36 = vmul.f32 %v14116_v61, %v18647_v10  ;;  %v4484_v1 = vld [vmem:[#allocation4 + $0x60] sm:$0x1]  ;;  %v4511_v61 = vmul.f32 %v4494_v23, %v14076_v54  ;;  %v4512_v19 = vmul.f32 %v4498_v56, %v4477_v11  ;;  %v18656_v11 = vrot.slane %v14147_v27, 6 }
 0x220   : > { %v18646_v35 = vrot.slane %v18645_v8, 3  ;;  %v18648_v43 = vld [vmem:[#allocation29_spill] sm:$0xff]  ;;  %v18649_v4 = vld [vmem:[#allocation12_spill] sm:$0xff]  ;;  %5058 = vst [vmem:[#allocation4 + $0x28] sm:$0xff] %v14326_v21  ;;  %v4291_v48 = vadd.f32 %v4283_v17, %v14132_v33  ;;  %v4421_v8 = vmul.f32 %v14180_v16, %v18643_v58  ;;  %v4519_v6 = vmul.f32 %v4494_v23, %v4484_v1 }
 0x221   : > { %4145 = vrot.lane.b32.xlu1 %v18648_v43, %s11056_s12  ;;  %4153 = vrot.lane.b32.xlu0 %v18649_v4, %s11056_s12  ;;  %v18650_v12 = vld [vmem:[#allocation21_spill] sm:$0xff]  ;;  %v4441_v10 = vrot.slane %v4420_v36, 6  ;;  %v18653_v33 = vrot.slane %v14184_v5, 3  ;;  %v18654_v58 = vrot.slane %v14191_v29, 3  ;;  %v18657_v29 = vrot.slane %v14200_v26, 6 }
 0x222   : > { %v4362_v55 = vsel %vm885_vm8, %v18646_v35, %v18644_v63  ;;  %v14346_v63 = vrot.slane %v8074_v37, 7  ;;  %v4353_v35 = vrot.slane %v4330_v45, 3  ;;  %v4444_v43 = vrot.slane %v4421_v8, 6  ;;  %v4485_v42 = vld [vmem:[#allocation4 + $0x68] sm:$0x1] }
 0x223   : > { %v4381_v60 = vadd.f32 %v4362_v55, %v18650_v12  ;;  %v18652_v40 = vld [vmem:[#allocation73_spill] sm:$0xff]  ;;  %v18655_v37 = vrot.slane %v14144_v38, 6  ;;  %v4453_v45 = vsel %vm498_vm3, %v4441_v10, %v18656_v11  ;;  %v4535_v38 = vrot.slane %v4511_v61, 1 }
 0x224   : > { %18651 = vst [vmem:[#allocation9_spill] sm:$0xff] %v14346_v63  ;;  %v4515_v25 = vmul.f32 %v4494_v23, %v18652_v40  ;;  %v4354_v17 = vsel %vm885_vm8, %v18653_v33, %v4353_v35  ;;  %v4364_v16 = vsel %vm885_vm8, %v4353_v35, %v18654_v58  ;;  %v4445_v1 = vsel %vm498_vm3, %v18657_v29, %v4444_v43  ;;  %v18659_v36 = vld [vmem:[#allocation77_spill] sm:$0xff]  ;;  %v4666_v29 = vld [vmem:[#allocation4 + $0x60] sm:$0x7f] }
 0x225   : > { %v4442_v54 = vsel %vm498_vm3, %v18655_v37, %v4441_v10  ;;  %4155 = vrot.lane.b32.xlu1 %v13890_v7, %s11056_s12  ;;  %4163 = vrot.lane.b32.xlu0 %v14129_v39, %s11056_s12  ;;  %v4378_v23 = vadd.f32 %v4354_v17, %v14134_v44  ;;  %v4382_v5 = vadd.f32 %v4364_v16, %v4291_v48  ;;  %v18658_v55 = vrot.slane %v14203_v3, 6  ;;  %v14375_v7 = vld [vmem:[#allocation3 + $0x1b8] sm:$0x1]  ;;  %v4575_v48 = vld [vmem:[#allocation4 + $0x60] sm:$0xf] }
 0x226   : > { %v4468_v12 = vadd.f32 %v4442_v54, %v18659_v36  ;;  %v4472_v8 = vadd.f32 %v4453_v45, %v4381_v60  ;;  %v4520_v35 = vmul.f32 %v4498_v56, %v4485_v42  ;;  %v4536_v33 = vrot.slane %v4515_v25, 1  ;;  %v4576_v17 = vld [vmem:[#allocation4 + $0x68] sm:$0xf] }
 0x227   : > { %v4455_v27 = vsel %vm498_vm3, %v4444_v43, %v18658_v55  ;;  %v4469_v10 = vadd.f32 %v4445_v1, %v4378_v23  ;;  %v4538_v44 = vrot.slane %v4512_v19, 1  ;;  %v4539_v26 = vrot.slane %v4516_v13, 1  ;;  %v14379_v61 = vld [vmem:[#allocation4 + $0x28] sm:$0xfe] }
 0x228   : > { %v4473_v39 = vadd.f32 %v4455_v27, %v4382_v5  ;;  %v4547_v58 = vrot.slane %v4519_v6, 1  ;;  %v4549_v16 = vrot.slane %v4520_v35, 1  ;;  %v4602_v3 = vmul.f32 %v14274_v9, %v14083_v47  ;;  %v14390_v19 = vld [vmem:[#allocation4 + $0x28] sm:$0xf0] }
 0x229   : > { %4165 = vrot.lane.b32.xlu1 %v13894_v15, %s11056_s12  ;;  %7390 = vrot.lane.b32.xlu0 %v14163_v50, %s11056_s12  ;;  %v4537_v56 = vsel %vm701_vm6, %v4535_v38, %v4536_v33  ;;  %v4603_v25 = vmul.f32 %v14277_v51, %v4572_v14  ;;  %v4606_v13 = vmul.f32 %v14274_v9, %v18652_v40  ;;  %v4135_v6 = vrot.slane %v14375_v7, 7  ;;  %v14392_v47 = vld [vmem:[#allocation4 + $0x28] sm:$0x80]  ;;  %v4667_v55 = vld [vmem:[#allocation4 + $0x68] sm:$0x7f] }
 0x22a   : > { %v4540_v42 = vsel %vm701_vm6, %v4538_v44, %v4539_v26  ;;  %v4548_v15 = vsel %vm701_vm6, %v4536_v33, %v4547_v58  ;;  %v4550_v60 = vsel %vm701_vm6, %v4539_v26, %v4549_v16  ;;  %v4563_v50 = vadd.f32 %v4537_v56, %v4468_v12  ;;  %5791 = vst [vmem:[#allocation4 + $0x28] sm:$0xff] %v18649_v4 }
 0x22b   : > { %v4564_v43 = vadd.f32 %v4540_v42, %v4469_v10  ;;  %v4567_v14 = vadd.f32 %v4548_v15, %v4472_v8  ;;  %v4568_v37 = vadd.f32 %v4550_v60, %v4473_v39  ;;  %v4607_v54 = vmul.f32 %v14277_v51, %v14074_v31  ;;  %v4754_v39 = vld [vmem:[#allocation4 + $0x48] sm:$0xfc]  ;;  %v18661_v42 = vld [vmem:[#allocation14_spill] sm:$0xff] }
 0x22c   : > { %v4610_v11 = vmul.f32 %v14274_v9, %v4575_v48  ;;  %v4611_v45 = vmul.f32 %v14277_v51, %v4576_v17  ;;  %v4626_v23 = vrot.slane %v4602_v3, 4  ;;  %v4627_v5 = vrot.slane %v4606_v13, 4  ;;  %v4757_v48 = vld [vmem:[#allocation4 + $0x60] sm:$0xff] }
 0x22d   : > { %7392 = vrot.lane.b32.xlu1 %v14110_v32, %s11056_s12  ;;  %7388 = vrot.lane.b32.xlu0 %v14172_v24, %s11056_s12  ;;  %v4629_v1 = vrot.slane %v4603_v25, 4  ;;  %v4630_v38 = vrot.slane %v4607_v54, 4  ;;  %v4693_v27 = vmul.f32 %v14287_v53, %v14085_v52  ;;  %v4694_v9 = vmul.f32 %v14290_v28, %v14321_v2  ;;  %v18660_v25 = vld [vmem:[#allocation30_spill] sm:$0xff] }
 0x22e   : > { %v4628_v51 = vsel %vm977_vm9, %v4626_v23, %v4627_v5  ;;  %v4638_v36 = vrot.slane %v4610_v11, 4  ;;  %v4640_v12 = vrot.slane %v4611_v45, 4  ;;  %v4697_v8 = vmul.f32 %v14287_v53, %v18652_v40  ;;  %v18662_v45 = vld [vmem:[#allocation65_spill] sm:$0xff] }
 0x22f   : > { %v4631_v32 = vsel %vm977_vm9, %v4629_v1, %v4630_v38  ;;  %v4654_v35 = vadd.f32 %v4628_v51, %v4563_v50  ;;  %v4698_v24 = vmul.f32 %v14290_v28, %v14074_v31  ;;  %v4701_v10 = vmul.f32 %v14287_v53, %v4666_v29  ;;  %v18666_v51 = vld [vmem:[#allocation32_spill] sm:$0xff] }
 0x230   : > { %v4639_v52 = vsel %vm977_vm9, %v4627_v5, %v4638_v36  ;;  %v4641_v2 = vsel %vm977_vm9, %v4630_v38, %v4640_v12  ;;  %v4655_v33 = vadd.f32 %v4631_v32, %v4564_v43  ;;  %v4702_v44 = vmul.f32 %v14290_v28, %v4667_v55  ;;  %v18663_v5 = vld [vmem:[#allocation85_spill] sm:$0xff] }
 0x231   : > { %4173 = vrot.lane.b32.xlu1 %v14125_v59, %s11056_s12  ;;  %4175 = vrot.lane.b32.xlu0 %v13689_v57, %s11056_s12  ;;  %v4658_v40 = vadd.f32 %v4639_v52, %v4567_v14  ;;  %v4659_v17 = vadd.f32 %v4641_v2, %v4568_v37  ;;  %v4717_v31 = vrot.slane %v4693_v27, 7  ;;  %v4718_v26 = vrot.slane %v4697_v8, 7 }
 0x232   : > { %v4720_v53 = vrot.slane %v4694_v9, 7  ;;  %v4721_v58 = vrot.slane %v4698_v24, 7  ;;  %v4729_v16 = vrot.slane %v4701_v10, 7  ;;  %v4731_v3 = vrot.slane %v4702_v44, 7  ;;  %v18670_v10 = vld [vmem:[#allocation49_spill] sm:$0xff] }
 0x233   : > { %v4719_v56 = vsel %vm3256_vm5, %v4717_v31, %v4718_v26  ;;  %v4789_v13 = vmul.f32 %v18660_v25, %v4754_v39  ;;  %v4792_v28 = vmul.f32 %v14195_v41, %v4757_v48  ;;  %v4793_v59 = vmul.f32 %v18660_v25, %v18661_v42 }
 0x234   : > { %v4722_v15 = vsel %vm3256_vm5, %v4720_v53, %v4721_v58  ;;  %v4730_v57 = vsel %vm3256_vm5, %v4718_v26, %v4729_v16  ;;  %v4732_v60 = vsel %vm3256_vm5, %v4721_v58, %v4731_v3  ;;  %v4745_v50 = vadd.f32 %v4719_v56, %v4654_v35  ;;  %v18668_v35 = vld [vmem:[#allocation67_spill] sm:$0xff]  ;;  %v18673_v16 = vld [vmem:[#allocation56_spill] sm:$0xff]  ;;  %v18674_v56 = vld [vmem:[#allocation81_spill] sm:$0xff] }
 0x235   : > { %8176 = vrot.lane.b32.xlu1 %v14153_v22, %s11058_s14  ;;  %8178 = vrot.lane.b32.xlu0 %v14216_v46, %s11058_s14  ;;  %v4746_v43 = vadd.f32 %v4722_v15, %v4655_v33  ;;  %v4749_v14 = vadd.f32 %v4730_v57, %v4658_v40  ;;  %v4750_v37 = vadd.f32 %v4732_v60, %v4659_v17  ;;  %v4813_v41 = vrot.slane %v4792_v28, 2  ;;  %v18671_v40 = vld [vmem:[#allocation26_spill] sm:$0xff]  ;;  %v18672_v58 = vld [vmem:[#allocation31_spill] sm:$0xff] }
 0x236   : > { %v4815_v54 = vrot.slane %v4789_v13, 2  ;;  %v4816_v11 = vrot.slane %v4793_v59, 2  ;;  %v5104_v23 = vmul.f32 %v14293_v34, %v18662_v45  ;;  %v5105_v29 = vmul.f32 %v14297_v18, %v18663_v5  ;;  %v18675_v13 = vld [vmem:[#allocation13_spill] sm:$0xff]  ;;  %v18676_v28 = vld [vmem:[#allocation63_spill] sm:$0xff]  ;;  %v18680_v45 = vld [vmem:[#allocation80_spill] sm:$0xff] }
 0x237   : > { %v18664_v1 = vrot.slane %v14219_v30, 2  ;;  %v18665_v22 = vrot.slane %v14232_v49, 2  ;;  %v5108_v55 = vmul.f32 %v14293_v34, %v14092_v0  ;;  %v5109_v27 = vmul.f32 %v14297_v18, %v14326_v21  ;;  %v18669_v34 = vld [vmem:[#allocation17_spill] sm:$0xff] }
 0x238   : > { %v4817_v9 = vsel %vm793_vm7, %v4815_v54, %v4816_v11  ;;  %v18667_v36 = vrot.slane %v18666_v51, 2  ;;  %v5151_v24 = vmul.f32 %v18668_v35, %v14221_v62  ;;  %v5152_v39 = vmul.f32 %v18670_v10, %v18669_v34  ;;  %v18684_v51 = vld [vmem:[#allocation28_spill] sm:$0xff] }
 0x239   : > { %v4814_v38 = vsel %vm793_vm7, %v18664_v1, %v4813_v41  ;;  %v4825_v46 = vsel %vm793_vm7, %v4813_v41, %v18665_v22  ;;  %8186 = vrot.lane.b32.xlu1 %v14168_v20, %s11058_s14  ;;  %v4841_v49 = vadd.f32 %v4817_v9, %v4746_v43  ;;  %v5155_v2 = vmul.f32 %v18668_v35, %v14092_v0  ;;  %v14491_v41 = vpop.permute.xlu1 %4987 }
 0x23a   : > { %v4827_v12 = vsel %vm793_vm7, %v4816_v11, %v18667_v36  ;;  %v4840_v8 = vadd.f32 %v4814_v38, %v4745_v50  ;;  %v4844_v30 = vadd.f32 %v4825_v46, %v4749_v14  ;;  %v14464_v33 = vmul.f32 %v18670_v10, %v14326_v21  ;;  %v18677_v50 = vld [vmem:[#allocation20_spill] sm:$0xff]  ;;  %18679 = vst [vmem:[#allocation51_spill] sm:$0xff] %v14491_v41  ;;  %v18681_v38 = vld [vmem:[#allocation37_spill] sm:$0xff] }
 0x23b   : > { %v4845_v32 = vadd.f32 %v4827_v12, %v4750_v37  ;;  %v5113_v44 = vadd.f32 %v5105_v29, %v4841_v49  ;;  %v5159_v17 = vmul.f32 %v18668_v35, %v18671_v40  ;;  %v5175_v31 = vrot.slane %v5151_v24, 3  ;;  %v14489_v37 = vpop.permute.xlu0 %4997  ;;  %v18687_v40 = vld [vmem:[#allocation76_spill] sm:$0xff] }
 0x23c   : > { %v5112_v18 = vadd.f32 %v5104_v23, %v4840_v8  ;;  %v5116_v52 = vadd.f32 %v5108_v55, %v4844_v30  ;;  %v5176_v62 = vrot.slane %v5155_v2, 3  ;;  %v5178_v26 = vrot.slane %v5152_v39, 3  ;;  %18678 = vst [vmem:[#allocation60_spill] sm:$0xff] %v14489_v37  ;;  %v18682_v55 = vld [vmem:[#allocation35_spill] sm:$0xff]  ;;  %v18686_v2 = vld [vmem:[#allocation84_spill] sm:$0xff] }
 0x23d   : > { %v14466_v48 = vadd.f32 %v5109_v27, %v4845_v32  ;;  %v5179_v53 = vrot.slane %v14464_v33, 3  ;;  %v5242_v3 = vmul.f32 %v18673_v16, %v18672_v58  ;;  %8196 = vrot.lane.b32.xlu1 %v18674_v56, %s11058_s14  ;;  %v5187_v25 = vrot.slane %v5159_v17, 3  ;;  %v18683_v27 = vld [vmem:[#allocation41_spill] sm:$0xff]  ;;  %v18685_v30 = vld [vmem:[#allocation27_spill] sm:$0xff]  ;;  %v4996_v24 = vpop.permute.xlu1 %4995 }
 0x23e   : > { %v5243_v42 = vmul.f32 %v18676_v28, %v18675_v13  ;;  %v5246_v59 = vmul.f32 %v18673_v16, %v14092_v0  ;;  %v14481_v15 = vmul.f32 %v18676_v28, %v14326_v21  ;;  %v5177_v57 = vsel %vm885_vm8, %v5175_v31, %v5176_v62  ;;  %v8085_v13 = vld [vmem:[#allocation3 + $0x1c0] sm:$0x1] }
 0x23f   : > { %v5180_v60 = vsel %vm885_vm8, %v5178_v26, %v5179_v53  ;;  %v5250_v43 = vmul.f32 %v18673_v16, %v18677_v50  ;;  %v5266_v14 = vrot.slane %v5242_v3, 6  ;;  %v5188_v0 = vsel %vm885_vm8, %v5176_v62, %v5187_v25  ;;  %v5004_v35 = vpop.permute.xlu0 %5003  ;;  %v4050_v26 = vld [vmem:[#allocation3 + $0x1b0] sm:$0x1]  ;;  %v8084_v50 = vld [vmem:[#allocation3 + $0x1b8] sm:$0x1] }
 0x240   : > { %v5203_v54 = vadd.f32 %v5177_v57, %v5112_v18  ;;  %v5204_v11 = vadd.f32 %v5180_v60, %v5113_v44  ;;  %v5267_v21 = vrot.slane %v5246_v59, 6  ;;  %v14497_v23 = vsel %vm2166_vm10, %v18680_v45, %v14491_v41  ;;  %v18688_v3 = vld [vmem:[#allocation38_spill] sm:$0xff]  ;;  %v14568_v45 = vld [vmem:[#allocation4 + $0x8] sm:$0xc0] }
 0x241   : > { %v5207_v5 = vadd.f32 %v5188_v0, %v5116_v52  ;;  %v5269_v29 = vrot.slane %v5243_v42, 6  ;;  %v5270_v1 = vrot.slane %v14481_v15, 6  ;;  %5062 = vst [vmem:[#allocation4 + $0x48] sm:$0xff] %v14497_v23  ;;  %8174 = vrot.lane.b32.xlu1 %v18681_v38, %s11058_s14  ;;  %v5278_v46 = vrot.slane %v5250_v43, 6  ;;  %v4851_v52 = vld [vmem:[#allocation3 + $0x28] sm:$0x80]  ;;  %v14556_v0 = vpop.permute.xlu1 %6524 }
 0x242   : > { %v5268_v22 = vsel %vm498_vm3, %v5266_v14, %v5267_v21  ;;  %v5337_v9 = vmul.f32 %v18683_v27, %v18682_v55  ;;  %v5338_v36 = vmul.f32 %v18684_v51, %v14379_v61  ;;  %v14513_v49 = vmul.f32 %v18683_v27, %v18685_v30  ;;  %v18690_v42 = vld [vmem:[#allocation24_spill] sm:$0xff]  ;;  %v4852_v60 = vld [vmem:[#allocation3 + $0x30] sm:$0x80] }
 0x243   : > { %v5271_v12 = vsel %vm498_vm3, %v5269_v29, %v5270_v1  ;;  %v5294_v8 = vadd.f32 %v5268_v22, %v5203_v54  ;;  %v14517_v32 = vmul.f32 %v18684_v51, %v14497_v23  ;;  %v5279_v34 = vsel %vm498_vm3, %v5267_v21, %v5278_v46  ;;  %8188 = vrot.lane.b32.xlu0 %v18690_v42, %s11058_s14  ;;  %v14566_v21 = vld [vmem:[#allocation4 + $0x8] sm:$0xf8]  ;;  %v18698_v15 = vld [vmem:[#allocation52_spill] sm:$0xff] }
 0x244   : > { %v5295_v39 = vadd.f32 %v5271_v12, %v5204_v11  ;;  %v5361_v18 = vrot.slane %v5337_v9, 1  ;;  %v5364_v61 = vrot.slane %v5338_v36, 1  ;;  %v5029_v44 = vsel %vm2166_vm10, %v5004_v35, %v18686_v2  ;;  %v18693_v36 = vld [vmem:[#allocation40_spill] sm:$0xff] }
 0x245   : > { %v14524_v17 = vsel %vm2166_vm10, %v18687_v40, %v4996_v24  ;;  %v14528_v31 = vsel %vm2166_vm10, %v4996_v24, %v14489_v37  ;;  %v14530_v62 = vadd.f32 %v5279_v34, %v5207_v5  ;;  %5069 = vst [vmem:[#allocation4 + $0x80] sm:$0x3] %v5029_v44  ;;  %v18132_v58 = vrot.slane %v14513_v49, 1  ;;  %v14592_v24 = vld [vmem:[#allocation5 + $0x66] ss:$8 sm:$0xf]  ;;  %v14607_v40 = vpop.permute.xlu1 %6534 }
 0x246   : > { %5065 = vst [vmem:[#allocation4 + $0x60] sm:$0xff] %v14524_v17  ;;  %5066 = vst [vmem:[#allocation4 + $0x68] sm:$0xff] %v14528_v31  ;;  %v18133_v16 = vrot.slane %v14517_v32, 1  ;;  %v18689_v56 = vrot.slane %v18688_v3, 7  ;;  %v4136_v59 = vsel %vm3256_vm5, %v18690_v42, %v4135_v6  ;;  %v4917_v57 = vrot.slane %v4851_v52, 7  ;;  %v14564_v6 = vpop.permute.xlu0 %6526  ;;  %v4867_v52 = vld [vmem:[#allocation3 + $0x120] sm:$0xff] }
 0x247   : > { %v5363_v43 = vsel %vm701_vm6, %v5361_v18, %v18132_v58  ;;  %18692 = vst [vmem:[#allocation64_spill] sm:$0xff] %v14564_v6  ;;  %v4133_v11 = vrot.slane %v4050_v26, 7  ;;  %v14579_v55 = vsel %vm415_vm4, %v14556_v0, %v14564_v6  ;;  %v14594_v34 = vld [vmem:[#allocation5 + $0x85] ss:$8 sm:$0xf]  ;;  %8198 = vrot.lane.b32.xlu0 %v18690_v42, %s11058_s14  ;;  %v8164_v18 = vrot.slane %v8084_v50, 7 }
 0x248   : > { %v14540_v25 = vsel %vm3256_vm5, %v18689_v56, %v14346_v63  ;;  %v5366_v14 = vsel %vm701_vm6, %v5364_v61, %v18133_v16  ;;  %v18691_v54 = vmov %v18689_v56  ;;  %v5125_v5 = vld [vmem:[#allocation4 + $0x48] sm:$0x7]  ;;  %v14572_v22 = vadd.f32 %v5363_v43, %v5294_v8  ;;  %6613 = vst [vmem:[#allocation4 + $0x8] sm:$0xff] %v14579_v55  ;;  %v18695_v3 = vld [vmem:[#allocation8_spill] sm:$0xff]  ;;  %v18700_v6 = vld [vmem:[#allocation71_spill] sm:$0xff] }
 0x249   : > { %8194 = vrot.lane.b32.xlu1 %v14540_v25, %s11058_s14  ;;  %v14562_v7 = vsel %vm3256_vm5, %v18690_v42, %v18691_v54  ;;  %v5216_v29 = vld [vmem:[#allocation4 + $0x48] sm:$0x3f]  ;;  %v14574_v46 = vadd.f32 %v5366_v14, %v5295_v39  ;;  %v14583_v9 = vsel %vm3256_vm5, %v4917_v57, %v18690_v42  ;;  %v5160_v12 = vmul.f32 %v18670_v10, %v5125_v5 }
 0x24a   : > { %v14570_v38 = vld [vmem:[#allocation4 + $0x48] sm:$0xfc]  ;;  %v5251_v35 = vmul.f32 %v18676_v28, %v5216_v29  ;;  %v14590_v8 = vsel %vm3256_vm5, %v18690_v42, %v4133_v11  ;;  %v14603_v10 = vsel %vm3256_vm5, %v14346_v63, %v18690_v42  ;;  %v8166_v28 = vrot.slane %v8085_v13, 7  ;;  %v14609_v26 = vpop.permute.xlu0 %6536  ;;  %v18696_v29 = vld [vmem:[#allocation36_spill] sm:$0xff] }
 0x24b   : > { %5795 = vst [vmem:[#allocation4 + $0x48] sm:$0xff] %v18693_v36  ;;  %v4920_v39 = vrot.slane %v4852_v60, 7  ;;  %v14605_v61 = vld [vmem:[#allocation4 + $0x28] sm:$0xfe]  ;;  %v5189_v2 = vrot.slane %v5160_v12, 3  ;;  %18694 = vst [vmem:[#allocation23_spill] sm:$0xff] %v14609_v26  ;;  %v5415_v56 = vrot.slane %v14592_v24, %v18695_v3  ;;  %v14622_v50 = vsel %vm415_vm4, %v14607_v40, %v14609_v26  ;;  %8184 = vrot.lane.b32.xlu0 %v14562_v7, %s11058_s14 }
 0x24c   : > { %v5280_v44 = vrot.slane %v5251_v35, 6  ;;  %v14615_v57 = vld [vmem:[#allocation4 + $0x28] sm:$0xf0]  ;;  %v5587_v60 = vld [vmem:[#allocation4 + $0x80] sm:$0x3]  ;;  %v14626_v43 = vsel %vm3256_vm5, %v18690_v42, %v8166_v28  ;;  %v14634_v54 = vsel %vm3256_vm5, %v18690_v42, %v8164_v18 }
 0x24d   : > { %4185 = vrot.lane.b32.xlu1 %v4136_v59, %s11056_s12  ;;  %v5506_v59 = vrot.slane %v14594_v34, %v18695_v3  ;;  %v14617_v13 = vld [vmem:[#allocation4 + $0x28] sm:$0x80]  ;;  %v14630_v14 = vsel %vm3256_vm5, %v4920_v39, %v18690_v42  ;;  %v5311_v11 = vld [vmem:[#allocation4 + $0x68] sm:$0x1]  ;;  %v14637_v12 = vmul.f32 %v18696_v29, %v5587_v60  ;;  %v18697_v35 = vld [vmem:[#allocation48_spill] sm:$0xff]  ;;  %v5190_v28 = vsel %vm885_vm8, %v5179_v53, %v5189_v2 }
 0x24e   : > { %v5402_v5 = vld [vmem:[#allocation4 + $0x68] sm:$0xf]  ;;  %5802 = vst [vmem:[#allocation4 + $0x80] sm:$0x3] %v18697_v35  ;;  %v5281_v39 = vsel %vm498_vm3, %v5270_v1, %v5280_v44  ;;  %v5346_v58 = vmul.f32 %v18684_v51, %v5311_v11  ;;  %6617 = vst [vmem:[#allocation4 + $0x28] sm:$0xff] %v14622_v50  ;;  %v5208_v60 = vadd.f32 %v5190_v28, %v14466_v48  ;;  %v14660_v1 = vrot.slane %v4867_v52, 7  ;;  %v14665_v44 = vpop.permute.xlu1 %6544  ;;  %v14667_v48 = vpop.permute.xlu0 %6546 }
 0x24f   : > { %v5493_v16 = vld [vmem:[#allocation4 + $0x68] sm:$0x7f]  ;;  %v14648_v18 = vld [vmem:[#allocation4 + $0x60] sm:$0x1]  ;;  %v5429_v33 = vmul.f32 %v5415_v56, %v14390_v19  ;;  %v5433_v53 = vmul.f32 %v5415_v56, %v14497_v23  ;;  %18699 = vst [vmem:[#allocation66_spill] sm:$0xff] %v14667_v48  ;;  %v5437_v35 = vmul.f32 %v5415_v56, %v5402_v5  ;;  %v5520_v28 = vmul.f32 %v5506_v59, %v14392_v47 }
 0x250   : > { %v14650_v26 = vld [vmem:[#allocation4 + $0x60] sm:$0xf]  ;;  %5799 = vst [vmem:[#allocation4 + $0x68] sm:$0xff] %v18698_v15  ;;  %v5375_v11 = vrot.slane %v5346_v58, 1  ;;  %v5299_v19 = vadd.f32 %v5281_v39, %v5208_v60  ;;  %v14680_v2 = vsel %vm415_vm4, %v14665_v44, %v14667_v48  ;;  %v5524_v63 = vmul.f32 %v5506_v59, %v14497_v23  ;;  %4183 = vrot.lane.b32.xlu0 %v14590_v8, %s11056_s12  ;;  %v14701_v8 = vld [vmem:[#allocation4] sm:$0xc0] }
 0x251   : > { %8208 = vrot.lane.b32.xlu1 %v18690_v42, %s11058_s14  ;;  %v14662_v51 = vld [vmem:[#allocation4 + $0x60] sm:$0x7f]  ;;  %18701 = vst [vmem:[#allocation69_spill] sm:$0xff] %v14680_v2  ;;  %v5528_v58 = vmul.f32 %v5506_v59, %v5493_v16  ;;  %v18702_v47 = vrot.slane %v14517_v32, 1  ;;  %v5455_v5 = vrot.slane %v5429_v33, 4  ;;  %v5456_v39 = vrot.slane %v5433_v53, 4 }
 0x252   : > { %5798 = vst [vmem:[#allocation4 + $0x60] sm:$0xff] %v18700_v6  ;;  %v14671_v37 = vld [vmem:[#allocation4 + $0x48] sm:$0x7]  ;;  %v5466_v60 = vrot.slane %v5437_v35, 4  ;;  %v5546_v42 = vrot.slane %v5520_v28, 7  ;;  %v5547_v6 = vrot.slane %v5524_v63, 7  ;;  %v6523_v16 = vpop.permute.xlu1 %6522  ;;  %v6533_v59 = vpop.permute.xlu0 %6532 }
 0x253   : > { %v14673_v41 = vld [vmem:[#allocation4 + $0x48] sm:$0x3f]  ;;  %v5376_v56 = vsel %vm701_vm6, %v18702_v47, %v5375_v11  ;;  %v5557_v23 = vrot.slane %v5528_v58, 7  ;;  %v18703_v33 = vld [vmem:[#allocation86_spill] sm:$0xff]  ;;  %v14699_v35 = vld [vmem:[#allocation4] sm:$0xf8]  ;;  %v14705_v63 = vsel %vm415_vm4, %v6523_v16, %v14556_v0  ;;  %v14709_v28 = vsel %vm415_vm4, %v6533_v59, %v14607_v40 }
 0x254   : > { %v14675_v52 = vld [vmem:[#allocation4 + $0x48] sm:$0xfc]  ;;  %v5394_v48 = vadd.f32 %v5376_v56, %v5299_v19  ;;  %v5467_v32 = vsel %vm977_vm9, %v5456_v39, %v5466_v60  ;;  %v5615_v53 = vmul.f32 %v18703_v33, %v14570_v38  ;;  %v5619_v11 = vmul.f32 %v18703_v33, %v14528_v31  ;;  %18704 = vst [vmem:[#allocation59_spill] sm:$0xff] %v14705_v63  ;;  %v14712_v58 = vld [vmem:[#allocation4 + $0x20] sm:$0xfe] }
 0x255   : > { %6621 = vst [vmem:[#allocation4 + $0x48] sm:$0xff] %v14680_v2  ;;  %4969 = vrot.lane.b32.xlu1 %v14583_v9, %s11058_s14  ;;  %v5457_v2 = vsel %vm977_vm9, %v5455_v5, %v5456_v39  ;;  %v14697_v9 = vld [vmem:[#allocation5 + $0x3] ss:$8 sm:$0xf]  ;;  %18705 = vst [vmem:[#allocation16_spill] sm:$0xff] %v14709_v28  ;;  %v5548_v56 = vsel %vm3256_vm5, %v5546_v42, %v5547_v6  ;;  %v5558_v5 = vsel %vm3256_vm5, %v5547_v6, %v5557_v23 }
 0x256   : > { %v5481_v19 = vadd.f32 %v5457_v2, %v14574_v46  ;;  %v5485_v38 = vadd.f32 %v5467_v32, %v5394_v48  ;;  %18706 = vst [vmem:[#allocation70_spill] sm:$0xff] %v14712_v58  ;;  %v14714_v31 = vld [vmem:[#allocation4 + $0x20] sm:$0xf0]  ;;  %v5641_v39 = vrot.slane %v5615_v53, 2  ;;  %v5642_v0 = vrot.slane %v5619_v11, 2  ;;  %6612 = vst [vmem:[#allocation4] sm:$0xff] %v14705_v63  ;;  %v6543_v16 = vpop.permute.xlu1 %6542 }
 0x257   : > { %18707 = vst [vmem:[#allocation58_spill] sm:$0xff] %v14714_v31  ;;  %v14716_v47 = vld [vmem:[#allocation4 + $0x20] sm:$0x80]  ;;  %v14720_v60 = vld [vmem:[#allocation5 + $0x22] ss:$8 sm:$0xf]  ;;  %v5824_v42 = vrot.slane %v14697_v9, %v18695_v3 }
 0x258   : > { %18708 = vst [vmem:[#allocation18_spill] sm:$0xff] %v14716_v47  ;;  %6616 = vst [vmem:[#allocation4 + $0x20] sm:$0xff] %v14709_v28  ;;  %v18709_v46 = vld [vmem:[#allocation34_spill] sm:$0xff]  ;;  %v5572_v40 = vadd.f32 %v5548_v56, %v5481_v19  ;;  %v5576_v2 = vadd.f32 %v5558_v5, %v5485_v38  ;;  %v5643_v59 = vsel %vm793_vm7, %v5641_v39, %v5642_v0  ;;  %v14742_v19 = vpop.permute.xlu0 %6554  ;;  %v14744_v38 = vld [vmem:[#allocation3 + $0x1c8] sm:$0x1] }
 0x259   : > { %4979 = vrot.lane.b32.xlu1 %v14562_v7, %s11058_s14  ;;  %8206 = vrot.lane.b32.xlu0 %v18709_v46, %s11058_s14  ;;  %v14730_v6 = vld [vmem:[#allocation5 + $0x41] ss:$8 sm:$0xf]  ;;  %v5871_v53 = vrot.slane %v14720_v60, %v18695_v3  ;;  %18712 = vst [vmem:[#allocation75_spill] sm:$0xff] %v14744_v38  ;;  %v14750_v46 = vld [vmem:[#allocation4 + $0x40] sm:$0xfc]  ;;  %v6580_v39 = vsel %vm415_vm4, %v6543_v16, %v14665_v44 }
 0x25a   : > { %v10948_v48 = vld [vmem:[#allocation3 + $0x50] sm:$0xff]  ;;  %v5962_v11 = vrot.slane %v14730_v6, %v18695_v3  ;;  %v14746_v56 = vld [vmem:[#allocation4 + $0x40] sm:$0x7]  ;;  %18713 = vst [vmem:[#allocation68_spill] sm:$0xff] %v14750_v46  ;;  %v5842_v28 = vmul.f32 %v5824_v42, %v18649_v4  ;;  %v14770_v16 = vpop.permute.xlu1 %6556 }
 0x25b   : > { %v14732_v23 = vrot.slane %v10948_v48, 7  ;;  %v18710_v32 = vld [vmem:[#allocation78_spill] sm:$0xff]  ;;  %v14748_v5 = vld [vmem:[#allocation4 + $0x40] sm:$0x3f]  ;;  %v5885_v63 = vmul.f32 %v5871_v53, %v14566_v21  ;;  %v5889_v47 = vmul.f32 %v5871_v53, %v18649_v4  ;;  %v5893_v31 = vmul.f32 %v5871_v53, %v14671_v37  ;;  %18715 = vst [vmem:[#allocation29_spill] sm:$0xff] %v14770_v16 }
 0x25c   : > { %v18711_v33 = vrot.slane %v18710_v32, 2  ;;  %v18714_v32 = vld [vmem:[#allocation25_spill] sm:$0xff]  ;;  %6620 = vst [vmem:[#allocation4 + $0x40] sm:$0xff] %v6580_v39 }
 0x25d   : > { %v14759_v58 = vld [vmem:[#allocation5 + $0x60] ss:$8 sm:$0xf]  ;;  %4989 = vrot.lane.b32.xlu1 %v14540_v25, %s11058_s14  ;;  %8204 = vrot.lane.b32.xlu0 %v14603_v10, %s11058_s14  ;;  %v5922_v53 = vrot.slane %v5893_v31, 3  ;;  %v14774_v25 = vpop.permute.xlu0 %6552  ;;  %v5984_v10 = vmul.f32 %v5962_v11, %v14673_v41 }
 0x25e   : > { %v5653_v7 = vsel %vm793_vm7, %v5642_v0, %v18711_v33  ;;  %v5667_v0 = vadd.f32 %v5643_v59, %v5572_v40  ;;  %v5838_v33 = vmul.f32 %v5824_v42, %v18714_v32  ;;  %v5976_v40 = vmul.f32 %v5962_v11, %v14568_v45  ;;  %v14767_v42 = vld [vmem:[#allocation5 + $0x67] ss:$8 sm:$0xf]  ;;  %v14772_v39 = vld [vmem:[#allocation5 + $0x86] ss:$8 sm:$0xf] }
 0x25f   : > { %v5671_v48 = vadd.f32 %v5653_v7, %v5576_v2  ;;  %v5980_v2 = vmul.f32 %v5962_v11, %v18649_v4  ;;  %v5911_v59 = vrot.slane %v5885_v63, 3  ;;  %v5912_v7 = vrot.slane %v5889_v47, 3  ;;  %18716 = vst [vmem:[#allocation12_spill] sm:$0xff] %v14772_v39  ;;  %18717 = vst [vmem:[#allocation21_spill] sm:$0xff] %v14774_v25  ;;  %v6044_v32 = vld [vmem:[#allocation4 + $0x68] sm:$0x1] }
 0x260   : > { %v5846_v44 = vadd.f32 %v5838_v33, %v5667_v0  ;;  %v6002_v0 = vrot.slane %v5976_v40, 6  ;;  %v6057_v4 = vrot.slane %v14759_v58, %v18695_v3  ;;  %v6148_v63 = vrot.slane %v14767_v42, %v18695_v3  ;;  %v10718_v40 = vld [vmem:[%s17894_s5 + $0x4] ss:$16 sps:$4 sm:$0xff]  }
 0x261   : > { %v5850_v37 = vadd.f32 %v5842_v28, %v5671_v48  ;;  %v6003_v45 = vrot.slane %v5980_v2, 6  ;;  %v5913_v33 = vsel %vm885_vm8, %v5911_v59, %v5912_v7  ;;  %v5923_v21 = vsel %vm885_vm8, %v5912_v7, %v5922_v53  ;;  %8216 = vrot.lane.b32.xlu1 %v14626_v43, %s11058_s14  ;;  %4971 = vrot.lane.b32.xlu0 %v14630_v14, %s11058_s14  ;;  %v6135_v48 = vld [vmem:[#allocation4 + $0x68] sm:$0xf]  ;;  %v14793_v2 = vpop.permute.xlu1 %3318  ;;  %v14798_v14 = vpop.permute.xlu0 %3320  ;;  %v14814_v46 = vld [vmem:[#allocation5 + $0x4] ss:$8 sm:$0xf] }
 0x262   : > { %v6239_v28 = vrot.slane %v14772_v39, %v18695_v3  ;;  %v5937_v41 = vadd.f32 %v5913_v33, %v5846_v44  ;;  %v6013_v11 = vrot.slane %v5984_v10, 6  ;;  %v6071_v59 = vmul.f32 %v6057_v4, %v14605_v61  ;;  %18718 = vst [vmem:[#allocation73_spill] sm:$0xff] %v14798_v14  ;;  %v10720_v44 = vld [vmem:[%s17894_s5 + $0xc] ss:$16 sps:$4 sm:$0xff]   ;;  %9679 = vmatprep.subr.bf16.mxu0 %v10718_v40 }
 0x263   : > { %v5941_v31 = vadd.f32 %v5923_v21, %v5850_v37  ;;  %v6004_v47 = vsel %vm498_vm3, %v6002_v0, %v6003_v45  ;;  %v6075_v7 = vmul.f32 %v6057_v4, %v18693_v36  ;;  %v6079_v43 = vmul.f32 %v6057_v4, %v6044_v32  ;;  %v10722_v21 = vld [vmem:[%s17894_s5] ss:$16 sps:$4 sm:$0xff]   ;;  %v10723_v37 = vld [vmem:[%s17894_s5 + $0x8] ss:$16 sps:$4 sm:$0xff]   ;;  %9765 = vmatprep.subr.bf16.mxu1 %v10720_v44  ;;  %v10726_v40 = vld [vmem:[%s17894_s5 + $0x2c] ss:$16 sps:$4 sm:$0xff]  }
 0x264   : > { %v6162_v53 = vmul.f32 %v6148_v63, %v14615_v57  ;;  %v18719_v61 = vld [vmem:[#allocation43_spill] sm:$0xff]  ;;  %v6014_v57 = vsel %vm498_vm3, %v6003_v45, %v6013_v11  ;;  %v6028_v0 = vadd.f32 %v6004_v47, %v5937_v41  ;;  %v6166_v32 = vmul.f32 %v6148_v63, %v18693_v36  ;;  %v6226_v4 = vld [vmem:[#allocation4 + $0x68] sm:$0x7f]  ;;  %9680 = vmatpush1.bf16.msra.mxu0 %v10722_v21  ;;  %v10724_v11 = vld [vmem:[%s17894_s5 + $0x24] ss:$16 sps:$4 sm:$0xff]  }
 0x265   : > { %v3364_v10 = vsel %vm415_vm4, %v18719_v61, %v14793_v2  ;;  %v6032_v33 = vadd.f32 %v6014_v57, %v5941_v31  ;;  %v6097_v14 = vrot.slane %v6071_v59, 1  ;;  %v6098_v38 = vrot.slane %v6075_v7, 1  ;;  %v14816_v39 = vld [vmem:[#allocation5 + $0x23] ss:$8 sm:$0xf]  ;;  %8214 = vrot.lane.b32.xlu1 %v14634_v54, %s11058_s14  ;;  %4981 = vrot.lane.b32.xlu0 %v14168_v20, %s11058_s14  ;;  %v14829_v59 = vpop.permute.xlu1 %3328 }
 0x266   : > { %3404 = vst [vmem:[#allocation4 + $0x10] sm:$0xff] %v3364_v10  ;;  %v6108_v25 = vrot.slane %v6079_v43, 1  ;;  %v6170_v45 = vmul.f32 %v6148_v63, %v6135_v48  ;;  %v6188_v41 = vrot.slane %v6162_v53, 4  ;;  %v6189_v47 = vrot.slane %v6166_v32, 4  ;;  %9766 = vmatpush1.bf16.msra.mxu1 %v10723_v37  ;;  %v10728_v43 = vld [vmem:[%s17894_s5 + $0x20] ss:$16 sps:$4 sm:$0xff]   ;;  %9681 = vmatprep.subr.bf16.mxu0 %v10724_v11 }
 0x267   : > { %v6253_v31 = vmul.f32 %v6239_v28, %v14617_v13  ;;  %v6099_v54 = vsel %vm701_vm6, %v6097_v14, %v6098_v38  ;;  %v6257_v20 = vmul.f32 %v6239_v28, %v18693_v36  ;;  %v6261_v63 = vmul.f32 %v6239_v28, %v6226_v4  ;;  %v14834_v48 = vld [vmem:[#allocation5 + $0xa5] ss:$8 sm:$0xf]  ;;  %v14836_v13 = vpop.permute.xlu0 %3330  ;;  %v10729_v53 = vld [vmem:[%s17894_s5 + $0x28] ss:$16 sps:$4 sm:$0xff]   ;;  %9767 = vmatprep.subr.bf16.mxu1 %v10726_v40 }
 0x268   : > { %v6109_v7 = vsel %vm701_vm6, %v6098_v38, %v6108_v25  ;;  %v10730_v38 = vld [vmem:[%s17894_s5 + $0x44] ss:$16 sps:$4 sm:$0xff]   ;;  %v6123_v28 = vadd.f32 %v6099_v54, %v6028_v0  ;;  %v6190_v44 = vsel %vm977_vm9, %v6188_v41, %v6189_v47  ;;  %v14851_v21 = vld [vmem:[#allocation5 + $0x42] ss:$8 sm:$0xf]  ;;  %v6199_v61 = vrot.slane %v6170_v45, 4  ;;  %9682 = vmatpush1.bf16.msra.mxu0 %v10728_v43 }
 0x269   : > { %v18720_v36 = vld [vmem:[#allocation44_spill] sm:$0xff]  ;;  %v6127_v14 = vadd.f32 %v6109_v7, %v6032_v33  ;;  %v10732_v37 = vld [vmem:[%s17894_s5 + $0x4c] ss:$16 sps:$4 sm:$0xff]   ;;  %v6279_v10 = vrot.slane %v6253_v31, 7  ;;  %v6280_v57 = vrot.slane %v6257_v20, 7  ;;  %v6290_v32 = vrot.slane %v6261_v63, 7  ;;  %9683 = vmatprep.subr.bf16.mxu0 %v10730_v38  ;;  %v14881_v43 = vpop.permute.xlu1 %3338 }
 0x26a   : > { %v3368_v25 = vsel %vm415_vm4, %v18720_v36, %v14829_v59  ;;  %v10734_v0 = vld [vmem:[%s17894_s5 + $0x40] ss:$16 sps:$4 sm:$0xff]   ;;  %v6214_v4 = vadd.f32 %v6190_v44, %v6123_v28  ;;  %v14861_v33 = vrot.slane %v14834_v48, %v18695_v3  ;;  %v14865_v41 = vrot.slane %v14814_v46, %v18695_v3  ;;  %v6680_v11 = vld [vmem:[#allocation4 + $0x8] sm:$0xf8]  ;;  %v10736_v40 = vld [vmem:[%s17894_s5 + $0x64] ss:$16 sps:$4 sm:$0xff]   ;;  %9768 = vmatpush1.bf16.msra.mxu1 %v10729_v53 }
 0x26b   : > { %3408 = vst [vmem:[#allocation4 + $0x30] sm:$0xff] %v3368_v25  ;;  %v14869_v45 = vrot.slane %v14816_v39, %v18695_v3  ;;  %v6771_v31 = vld [vmem:[#allocation4 + $0x8] sm:$0xc0]  ;;  %v6200_v54 = vsel %vm977_vm9, %v6189_v47, %v6199_v61  ;;  %v6281_v7 = vsel %vm3256_vm5, %v6279_v10, %v6280_v57  ;;  %v6291_v20 = vsel %vm3256_vm5, %v6280_v57, %v6290_v32  ;;  %v14883_v36 = vpop.permute.xlu0 %3340  ;;  %v10735_v38 = vld [vmem:[%s17894_s5 + $0x48] ss:$16 sps:$4 sm:$0xff]  }
 0x26c   : > { %v14879_v63 = vrot.slane %v14851_v21, %v18695_v3  ;;  %v6218_v25 = vadd.f32 %v6200_v54, %v6127_v14  ;;  %v6305_v28 = vadd.f32 %v6281_v7, %v6214_v4  ;;  %v6348_v47 = vmul.f32 %v14861_v33, %v14675_v52  ;;  %9769 = vmatprep.subr.bf16.mxu1 %v10732_v37  ;;  %v10738_v61 = vld [vmem:[%s17894_s5 + $0x6c] ss:$16 sps:$4 sm:$0xff]   ;;  %v14912_v4 = vld [vmem:[#allocation3 + $0x1c0] sm:$0x1] }
 0x26d   : > { %18721 = vst [vmem:[#allocation77_spill] sm:$0xff] %v14869_v45  ;;  %v14892_v44 = vmul.f32 %v18698_v15, %v14861_v33  ;;  %v6664_v53 = vmul.f32 %v14865_v41, %v14579_v55  ;;  %v6711_v10 = vmul.f32 %v14869_v45, %v6680_v11  ;;  %v14902_v14 = vmul.f32 %v14869_v45, %v14622_v50  ;;  %v10740_v55 = vld [vmem:[%s17894_s5 + $0x60] ss:$16 sps:$4 sm:$0xff]   ;;  %v14923_v7 = vpop.permute.xlu1 %6564 }
 0x26e   : > { %18722 = vst [vmem:[#allocation30_spill] sm:$0xff] %v14879_v63  ;;  %v6802_v52 = vmul.f32 %v14879_v63, %v6771_v31  ;;  %9684 = vmatpush1.bf16.msra.mxu0 %v10734_v0  ;;  %v14905_v57 = vadd.f32 %v6291_v20, %v6218_v25  ;;  %v6374_v15 = vrot.slane %v6348_v47, 2  ;;  %v14910_v32 = vmul.f32 %v14879_v63, %v14622_v50  ;;  %v10742_v31 = vld [vmem:[%s17894_s5 + $0x84] ss:$16 sps:$4 sm:$0xff]  }
 0x26f   : > { %18723 = vst [vmem:[#allocation14_spill] sm:$0xff] %v14902_v14  ;;  %v18148_v37 = vrot.slane %v14892_v44, 2  ;;  %9685 = vmatprep.subr.bf16.mxu0 %v10736_v40  ;;  %v6737_v11 = vrot.slane %v6711_v10, 3  ;;  %v14921_v54 = vsel %vm415_vm4, %v14742_v19, %v14770_v16  ;;  %v14925_v20 = vpop.permute.xlu0 %6566  ;;  %9770 = vmatpush1.bf16.msra.mxu1 %v10735_v38  ;;  %v10741_v40 = vld [vmem:[%s17894_s5 + $0x68] ss:$16 sps:$4 sm:$0xff]   ;;  %v14938_v10 = vsel %vm3256_vm5, %v14660_v1, %v14732_v23 }
 0x270   : > { %18724 = vst [vmem:[#allocation65_spill] sm:$0xff] %v14910_v32  ;;  %v6828_v0 = vrot.slane %v6802_v52, 6  ;;  %18725 = vst [vmem:[#allocation85_spill] sm:$0xff] %v14921_v54  ;;  %v18728_v52 = vld [vmem:[#allocation39_spill] sm:$0xff]  ;;  %9771 = vmatprep.subr.bf16.mxu1 %v10738_v61  ;;  %v18729_v47 = vrot.slane %v14902_v14, 3  ;;  %5001 = vrot.lane.b32.xlu1 %v14938_v10, %s11058_s14  ;;  %v18730_v61 = vld [vmem:[#allocation45_spill] sm:$0xff] }
 0x271   : > { %18726 = vst [vmem:[#allocation32_spill] sm:$0xff] %v14925_v20  ;;  %v6376_v25 = vsel %vm793_vm7, %v6374_v15, %v18148_v37  ;;  %6625 = vst [vmem:[#allocation4 + $0x68] sm:$0xff] %v14921_v54  ;;  %v4942_v38 = vsel %vm3256_vm5, %v18728_v52, %v14660_v1  ;;  %v10744_v15 = vld [vmem:[%s17894_s5 + $0x8c] ss:$16 sps:$4 sm:$0xff]   ;;  %v3372_v52 = vsel %vm415_vm4, %v18730_v61, %v14881_v43  ;;  %v18731_v3 = vrot.slane %v14910_v32, 6 }
 0x272   : > { %18727 = vst [vmem:[#allocation67_spill] sm:$0xff] %v14938_v10  ;;  %v6400_v37 = vadd.f32 %v6376_v25, %v6305_v28  ;;  %v6739_v16 = vsel %vm885_vm8, %v6737_v11, %v18729_v47  ;;  %4991 = vrot.lane.b32.xlu0 %v4942_v38, %s11058_s14  ;;  %3412 = vst [vmem:[#allocation4 + $0x50] sm:$0xff] %v3372_v52  ;;  %v5345_v28 = vmul.f32 %v18683_v27, %v14648_v18  ;;  %v18732_v11 = vld [vmem:[#allocation10_spill] sm:$0xff]  ;;  %v14977_v18 = vpop.permute.xlu1 %6562 }
 0x273   : > { %v6830_v63 = vsel %vm498_vm3, %v6828_v0, %v18731_v3  ;;  %v5411_v25 = vrot.slane %v14592_v24, %v18732_v11  ;;  %v5502_v47 = vrot.slane %v14594_v34, %v18732_v11  ;;  %9686 = vmatpush1.bf16.msra.mxu0 %v10740_v55  ;;  %v10746_v38 = vld [vmem:[%s17894_s5 + $0x80] ss:$16 sps:$4 sm:$0xff]   ;;  %v5618_v54 = vmul.f32 %v18696_v29, %v14524_v17  ;;  %v14979_v24 = vpop.permute.xlu0 %3348  ;;  %v10747_v34 = vld [vmem:[%s17894_s5 + $0x88] ss:$16 sps:$4 sm:$0xff]   ;;  %v10750_v55 = vld [vmem:[%s17894_s5 + $0xac] ss:$16 sps:$4 sm:$0xff]  }
 0x274   : > { %v6672_v61 = vadd.f32 %v6664_v53, %v6400_v37  ;;  %v5820_v3 = vrot.slane %v14697_v9, %v18732_v11  ;;  %v5867_v27 = vrot.slane %v14720_v60, %v18732_v11  ;;  %9772 = vmatpush1.bf16.msra.mxu1 %v10741_v40  ;;  %v10748_v53 = vld [vmem:[%s17894_s5 + $0xa4] ss:$16 sps:$4 sm:$0xff]   ;;  %v5373_v17 = vrot.slane %v5345_v28, 1  ;;  %9687 = vmatprep.subr.bf16.mxu0 %v10742_v31  ;;  %v18734_v40 = vld [vmem:[#allocation53_spill] sm:$0xff]  ;;  %v10752_v31 = vld [vmem:[%s17894_s5 + $0xa0] ss:$16 sps:$4 sm:$0xff]  }
 0x275   : > { %v18733_v29 = vld [vmem:[#allocation42_spill] sm:$0xff]  ;;  %v5432_v9 = vmul.f32 %v5411_v25, %v18685_v30  ;;  %v5436_v60 = vmul.f32 %v5411_v25, %v14650_v26  ;;  %9773 = vmatprep.subr.bf16.mxu1 %v10744_v15  ;;  %v5519_v52 = vmul.f32 %v5502_v47, %v18734_v40  ;;  %v5523_v32 = vmul.f32 %v5502_v47, %v18685_v30 }
 0x276   : > { %v5428_v37 = vmul.f32 %v5411_v25, %v18733_v29  ;;  %v6763_v0 = vadd.f32 %v6739_v16, %v6672_v61  ;;  %v5527_v14 = vmul.f32 %v5502_v47, %v14662_v51  ;;  %v18735_v28 = vrot.slane %v14513_v49, 1  ;;  %v15005_v61 = vpop.permute.xlu1 %3350  ;;  %v10753_v49 = vld [vmem:[%s17894_s5 + $0xa8] ss:$16 sps:$4 sm:$0xff]  }
 0x277   : > { %v5453_v10 = vrot.slane %v5432_v9, 4  ;;  %v5464_v26 = vrot.slane %v5436_v60, 4  ;;  %9688 = vmatpush1.bf16.msra.mxu0 %v10746_v38  ;;  %v5543_v25 = vrot.slane %v5519_v52, 7  ;;  %v5544_v30 = vrot.slane %v5523_v32, 7  ;;  %v15007_v51 = vpop.permute.xlu0 %7350  ;;  %v10758_v52 = vld [vmem:[%s17894_s5 + $0xc0] ss:$16 sps:$4 sm:$0xff]  }
 0x278   : > { %v5374_v29 = vsel %vm701_vm6, %v18735_v28, %v5373_v17  ;;  %v5452_v45 = vrot.slane %v5428_v37, 4  ;;  %v15002_v15 = vadd.f32 %v6830_v63, %v6763_v0  ;;  %9774 = vmatpush1.bf16.msra.mxu1 %v10747_v34  ;;  %9689 = vmatprep.subr.bf16.mxu0 %v10748_v53  ;;  %v5555_v63 = vrot.slane %v5527_v14, 7  ;;  %v18737_v53 = vld [vmem:[#allocation19_spill] sm:$0xff]  ;;  %v18738_v14 = vld [vmem:[#allocation22_spill] sm:$0xff] }
 0x279   : > { %v5393_v16 = vadd.f32 %v5374_v29, %v14530_v62  ;;  %v5465_v38 = vsel %vm977_vm9, %v5453_v10, %v5464_v26  ;;  %v5639_v17 = vrot.slane %v5618_v54, 2  ;;  %9775 = vmatprep.subr.bf16.mxu1 %v10750_v55  ;;  %v10754_v62 = vld [vmem:[%s17894_s5 + $0xc4] ss:$16 sps:$4 sm:$0xff]   ;;  %v5545_v34 = vsel %vm3256_vm5, %v5543_v25, %v5544_v30 }
 0x27a   : > { %18736 = vst [vmem:[#allocation17_spill] sm:$0xff] %v15002_v15  ;;  %v5454_v47 = vsel %vm977_vm9, %v5452_v45, %v5453_v10  ;;  %v5837_v9 = vmul.f32 %v5820_v3, %v18737_v53  ;;  %v10756_v45 = vld [vmem:[%s17894_s5 + $0xcc] ss:$16 sps:$4 sm:$0xff]   ;;  %v5556_v10 = vsel %vm3256_vm5, %v5544_v30, %v5555_v63  ;;  %v18739_v54 = vrot.slane %v18738_v14, 2  ;;  %v15036_v25 = vpop.permute.xlu1 %7352  ;;  %v18743_v14 = vld [vmem:[#allocation70_spill] sm:$0xff] }
 0x27b   : > { %v5480_v32 = vadd.f32 %v5454_v47, %v14572_v22  ;;  %v5484_v37 = vadd.f32 %v5465_v38, %v5393_v16  ;;  %v18740_v55 = vrot.slane %v14637_v12, 2  ;;  %v18741_v22 = vld [vmem:[#allocation55_spill] sm:$0xff]  ;;  %9690 = vmatpush1.bf16.msra.mxu0 %v10752_v31  ;;  %v5884_v26 = vmul.f32 %v5867_v27, %v14699_v35  ;;  %18742 = vst [vmem:[#allocation49_spill] sm:$0xff] %v15036_v25  ;;  %v15038_v30 = vpop.permute.xlu0 %7360 }
 0x27c   : > { %v5640_v60 = vsel %vm793_vm7, %v18739_v54, %v5639_v17  ;;  %v5841_v40 = vmul.f32 %v5820_v3, %v18741_v22  ;;  %v5888_v16 = vmul.f32 %v5867_v27, %v18741_v22  ;;  %9776 = vmatpush1.bf16.msra.mxu1 %v10753_v49  ;;  %v10759_v12 = vld [vmem:[%s17894_s5 + $0xc8] ss:$16 sps:$4 sm:$0xff]   ;;  %v5892_v3 = vmul.f32 %v5867_v27, %v14746_v56  ;;  %v10760_v49 = vld [vmem:[%s17894_s5 + $0xe4] ss:$16 sps:$4 sm:$0xff]   ;;  %v10762_v38 = vld [vmem:[%s17894_s5 + $0xec] ss:$16 sps:$4 sm:$0xff]  }
 0x27d   : > { %v5651_v0 = vsel %vm793_vm7, %v5639_v17, %v18740_v55  ;;  %v5571_v28 = vadd.f32 %v5545_v34, %v5480_v32  ;;  %v5575_v29 = vadd.f32 %v5556_v10, %v5484_v37  ;;  %v5958_v31 = vrot.slane %v14730_v6, %v18732_v11  ;;  %9691 = vmatprep.subr.bf16.mxu0 %v10754_v62  ;;  %v6043_v62 = vld [vmem:[#allocation4 + $0x60] sm:$0x1] }
 0x27e   : > { %v6053_v47 = vrot.slane %v14759_v58, %v18732_v11  ;;  %v6144_v35 = vrot.slane %v14767_v42, %v18732_v11  ;;  %v5908_v27 = vrot.slane %v5884_v26, 3  ;;  %v5909_v17 = vrot.slane %v5888_v16, 3  ;;  %9777 = vmatprep.subr.bf16.mxu1 %v10756_v45  ;;  %v10764_v37 = vld [vmem:[%s17894_s5 + $0xe0] ss:$16 sps:$4 sm:$0xff]   ;;  %v15064_v45 = vpop.permute.xlu1 %7362 }
 0x27f   : > { %v5666_v63 = vadd.f32 %v5640_v60, %v5571_v28  ;;  %v5670_v56 = vadd.f32 %v5651_v0, %v5575_v29  ;;  %v5920_v6 = vrot.slane %v5892_v3, 3  ;;  %v5975_v58 = vmul.f32 %v5958_v31, %v14701_v8  ;;  %9692 = vmatpush1.bf16.msra.mxu0 %v10758_v52  ;;  %18744 = vst [vmem:[#allocation26_spill] sm:$0xff] %v15064_v45  ;;  %v15066_v60 = vpop.permute.xlu0 %7370  ;;  %v10765_v8 = vld [vmem:[%s17894_s5 + $0xe8] ss:$16 sps:$4 sm:$0xff]   ;;  %v18745_v29 = vld [vmem:[#allocation50_spill] sm:$0xff] }
 0x280   : > { %v5979_v32 = vmul.f32 %v5958_v31, %v18741_v22  ;;  %v5983_v42 = vmul.f32 %v5958_v31, %v14748_v5  ;;  %v5910_v10 = vsel %vm885_vm8, %v5908_v27, %v5909_v17  ;;  %v6070_v54 = vmul.f32 %v6053_v47, %v18743_v14  ;;  %9778 = vmatpush1.bf16.msra.mxu1 %v10759_v12  ;;  %v10766_v5 = vld [vmem:[%s17894_s5 + $0x104] ss:$16 sps:$4 sm:$0xff]   ;;  %v6134_v12 = vld [vmem:[#allocation4 + $0x60] sm:$0xf] }
 0x281   : > { %v5845_v34 = vadd.f32 %v5837_v9, %v5666_v63  ;;  %v5849_v53 = vadd.f32 %v5841_v40, %v5670_v56  ;;  %v5921_v9 = vsel %vm885_vm8, %v5909_v17, %v5920_v6  ;;  %v5999_v55 = vrot.slane %v5975_v58, 6  ;;  %9693 = vmatprep.subr.bf16.mxu0 %v10760_v49  ;;  %9779 = vmatprep.subr.bf16.mxu1 %v10762_v38  ;;  %v10768_v40 = vld [vmem:[%s17894_s5 + $0x10c] ss:$16 sps:$4 sm:$0xff]   ;;  %v18746_v56 = vld [vmem:[#allocation58_spill] sm:$0xff] }
 0x282   : > { %v6000_v0 = vrot.slane %v5979_v32, 6  ;;  %v6011_v22 = vrot.slane %v5983_v42, 6  ;;  %v6074_v26 = vmul.f32 %v6053_v47, %v18745_v29  ;;  %v6078_v16 = vmul.f32 %v6053_v47, %v6043_v62  ;;  %v10770_v49 = vld [vmem:[%s17894_s5 + $0x100] ss:$16 sps:$4 sm:$0xff]   ;;  %v15085_v32 = vpop.permute.xlu1 %7372  ;;  %v10771_v42 = vld [vmem:[%s17894_s5 + $0x108] ss:$16 sps:$4 sm:$0xff]  }
 0x283   : > { %v5936_v52 = vadd.f32 %v5910_v10, %v5845_v34  ;;  %v5940_v28 = vadd.f32 %v5921_v9, %v5849_v53  ;;  %v6094_v63 = vrot.slane %v6070_v54, 1  ;;  %v6161_v27 = vmul.f32 %v6144_v35, %v18746_v56  ;;  %9694 = vmatpush1.bf16.msra.mxu0 %v10764_v37  ;;  %18747 = vst [vmem:[#allocation31_spill] sm:$0xff] %v15085_v32  ;;  %v15087_v47 = vpop.permute.xlu0 %7348  ;;  %v6225_v53 = vld [vmem:[#allocation4 + $0x60] sm:$0x7f]  ;;  %v10777_v56 = vld [vmem:[%s17894_s5 + $0x128] ss:$16 sps:$4 sm:$0xff]  }
 0x284   : > { %v6001_v3 = vsel %vm498_vm3, %v5999_v55, %v6000_v0  ;;  %v6012_v31 = vsel %vm498_vm3, %v6000_v0, %v6011_v22  ;;  %v6095_v6 = vrot.slane %v6074_v26, 1  ;;  %v6106_v58 = vrot.slane %v6078_v16, 1  ;;  %9780 = vmatpush1.bf16.msra.mxu1 %v10765_v8  ;;  %9695 = vmatprep.subr.bf16.mxu0 %v10766_v5  ;;  %v18748_v10 = vld [vmem:[#allocation12_spill] sm:$0xff]  ;;  %v10774_v55 = vld [vmem:[%s17894_s5 + $0x12c] ss:$16 sps:$4 sm:$0xff]   ;;  %v18749_v26 = vld [vmem:[#allocation18_spill] sm:$0xff] }
 0x285   : > { %v6027_v38 = vadd.f32 %v6001_v3, %v5936_v52  ;;  %v6031_v17 = vadd.f32 %v6012_v31, %v5940_v28  ;;  %v6165_v62 = vmul.f32 %v6144_v35, %v18745_v29  ;;  %v6169_v37 = vmul.f32 %v6144_v35, %v6134_v12  ;;  %9781 = vmatprep.subr.bf16.mxu1 %v10768_v40  ;;  %v10772_v54 = vld [vmem:[%s17894_s5 + $0x124] ss:$16 sps:$4 sm:$0xff]   ;;  %v10776_v28 = vld [vmem:[%s17894_s5 + $0x120] ss:$16 sps:$4 sm:$0xff]  }
 0x286   : > { %v6185_v34 = vrot.slane %v6161_v27, 4  ;;  %v6235_v14 = vrot.slane %v18748_v10, %v18732_v11  ;;  %v6096_v8 = vsel %vm701_vm6, %v6094_v63, %v6095_v6  ;;  %v6107_v5 = vsel %vm701_vm6, %v6095_v6, %v6106_v58  ;;  %v15118_v31 = vpop.permute.xlu1 %7358  ;;  %v6679_v58 = vld [vmem:[#allocation4] sm:$0xf8] }
 0x287   : > { %v15102_v9 = vrot.slane %v14834_v48, %v18732_v11  ;;  %v15106_v35 = vrot.slane %v14814_v46, %v18732_v11  ;;  %v6122_v0 = vadd.f32 %v6096_v8, %v6027_v38  ;;  %v6126_v22 = vadd.f32 %v6107_v5, %v6031_v17  ;;  %9696 = vmatpush1.bf16.msra.mxu0 %v10770_v49  ;;  %v18750_v46 = vld [vmem:[#allocation68_spill] sm:$0xff]  ;;  %v15120_v63 = vpop.permute.xlu0 %7368  ;;  %v18751_v38 = vld [vmem:[#allocation71_spill] sm:$0xff] }
 0x288   : > { %v6186_v40 = vrot.slane %v6165_v62, 4  ;;  %v6197_v52 = vrot.slane %v6169_v37, 4  ;;  %v6252_v48 = vmul.f32 %v6235_v14, %v18749_v26  ;;  %v6256_v16 = vmul.f32 %v6235_v14, %v18745_v29  ;;  %9782 = vmatpush1.bf16.msra.mxu1 %v10771_v42  ;;  %v18752_v17 = vld [vmem:[#allocation59_spill] sm:$0xff]  ;;  %v6770_v62 = vld [vmem:[#allocation4] sm:$0xc0]  ;;  %9697 = vmatprep.subr.bf16.mxu0 %v10772_v54 }
 0x289   : > { %v6260_v12 = vmul.f32 %v6235_v14, %v6225_v53  ;;  %v6347_v3 = vmul.f32 %v15102_v9, %v18750_v46  ;;  %v15129_v29 = vmul.f32 %v15102_v9, %v18751_v38  ;;  %v6663_v6 = vmul.f32 %v15106_v35, %v18752_v17  ;;  %9783 = vmatprep.subr.bf16.mxu1 %v10774_v55  ;;  %v10780_v14 = vld [vmem:[%s17894_s5 + $0x14c] ss:$16 sps:$4 sm:$0xff]   ;;  %v10782_v55 = vld [vmem:[%s17894_s5 + $0x140] ss:$16 sps:$4 sm:$0xff]  }
 0x28a   : > { %v6187_v27 = vsel %vm977_vm9, %v6185_v34, %v6186_v40  ;;  %v6198_v49 = vsel %vm977_vm9, %v6186_v40, %v6197_v52  ;;  %v6276_v53 = vrot.slane %v6252_v48, 7  ;;  %v6277_v10 = vrot.slane %v6256_v16, 7  ;;  %v10778_v34 = vld [vmem:[%s17894_s5 + $0x144] ss:$16 sps:$4 sm:$0xff]   ;;  %v18753_v52 = vld [vmem:[#allocation21_spill] sm:$0xff]  ;;  %v18754_v48 = vld [vmem:[#allocation75_spill] sm:$0xff] }
 0x28b   : > { %v6213_v37 = vadd.f32 %v6187_v27, %v6122_v0  ;;  %v6217_v42 = vadd.f32 %v6198_v49, %v6126_v22  ;;  %v6288_v8 = vrot.slane %v6260_v12, 7  ;;  %v6371_v5 = vrot.slane %v6347_v3, 2  ;;  %9698 = vmatpush1.bf16.msra.mxu0 %v10776_v28  ;;  %v15161_v12 = vpop.permute.xlu1 %3358  ;;  %v15163_v46 = vpop.permute.xlu0 %3360  ;;  %v10784_v3 = vld [vmem:[%s17894_s5 + $0x164] ss:$16 sps:$4 sm:$0xff]  }
 0x28c   : > { %v6372_v40 = vrot.slane %v15129_v29, 2  ;;  %v15142_v54 = vrot.slane %v14816_v39, %v18732_v11  ;;  %v6278_v0 = vsel %vm3256_vm5, %v6276_v53, %v6277_v10  ;;  %v15150_v22 = vrot.slane %v14851_v21, %v18732_v11  ;;  %v18756_v39 = vld [vmem:[#allocation24_spill] sm:$0xff]  ;;  %9784 = vmatpush1.bf16.msra.mxu1 %v10777_v56  ;;  %v10783_v21 = vld [vmem:[%s17894_s5 + $0x148] ss:$16 sps:$4 sm:$0xff]   ;;  %9699 = vmatprep.subr.bf16.mxu0 %v10778_v34 }
 0x28d   : > { %v15155_v26 = vsel %vm415_vm4, %v18753_v52, %v14742_v19  ;;  %v18755_v16 = vrot.slane %v18754_v48, 7  ;;  %v6289_v19 = vsel %vm3256_vm5, %v6277_v10, %v6288_v8  ;;  %v6304_v27 = vadd.f32 %v6278_v0, %v6213_v37  ;;  %v6320_v56 = vld [vmem:[#allocation4 + $0x80] sm:$0x3]  ;;  %v4876_v10 = vld [vmem:[#allocation3 + $0x1b8] sm:$0x1]  ;;  %9785 = vmatprep.subr.bf16.mxu1 %v10780_v14 }
 0x28e   : > { %v6373_v49 = vsel %vm793_vm7, %v6371_v5, %v6372_v40  ;;  %v6710_v38 = vmul.f32 %v15142_v54, %v6679_v58  ;;  %6624 = vst [vmem:[#allocation4 + $0x60] sm:$0xff] %v15155_v26  ;;  %v6308_v17 = vadd.f32 %v6289_v19, %v6217_v42  ;;  %v18757_v53 = vld [vmem:[#allocation16_spill] sm:$0xff]  ;;  %v6801_v48 = vmul.f32 %v15150_v22, %v6770_v62  ;;  %v6411_v8 = vld [vmem:[#allocation3 + $0x38] sm:$0x80]  ;;  %v18758_v42 = vld [vmem:[#allocation73_spill] sm:$0xff] }
 0x28f   : > { %v8169_v28 = vsel %vm3256_vm5, %v18756_v39, %v18755_v16  ;;  %v15180_v52 = vmul.f32 %v15142_v54, %v18757_v53  ;;  %v15185_v37 = vmul.f32 %v15150_v22, %v18757_v53  ;;  %v10786_v58 = vld [vmem:[%s17894_s5 + $0x16c] ss:$16 sps:$4 sm:$0xff]   ;;  %v6399_v5 = vadd.f32 %v6373_v49, %v6304_v27  ;;  %9700 = vmatpush1.bf16.msra.mxu0 %v10782_v55  ;;  %v10788_v34 = vld [vmem:[%s17894_s5 + $0x160] ss:$16 sps:$4 sm:$0xff]   ;;  %v15210_v14 = vpop.permute.xlu0 %7382  ;;  %v10790_v55 = vld [vmem:[%s17894_s5 + $0x184] ss:$16 sps:$4 sm:$0xff]  }
 0x290   : > { %8218 = vrot.lane.b32.xlu0 %v8169_v28, %s11058_s14  ;;  %v6734_v0 = vrot.slane %v6710_v38, 3  ;;  %v15193_v16 = vsel %vm415_vm4, %v14793_v2, %v18758_v42  ;;  %v18759_v62 = vld [vmem:[#allocation9_spill] sm:$0xff]  ;;  %v6825_v27 = vrot.slane %v6801_v48, 6  ;;  %v6355_v49 = vmul.f32 %v15102_v9, %v6320_v56  ;;  %v15208_v38 = vpop.permute.xlu1 %7380  ;;  %18760 = vst [vmem:[#allocation56_spill] sm:$0xff] %v15210_v14  ;;  %9786 = vmatpush1.bf16.msra.mxu1 %v10783_v21  ;;  %v6410_v21 = vld [vmem:[#allocation3 + $0x30] sm:$0x80] }
 0x291   : > { %v4950_v39 = vsel %vm3256_vm5, %v18759_v62, %v14732_v23  ;;  %v10789_v28 = vld [vmem:[%s17894_s5 + $0x168] ss:$16 sps:$4 sm:$0xff]   ;;  %v18158_v19 = vrot.slane %v15180_v52, 3  ;;  %v18157_v2 = vrot.slane %v15185_v37, 6  ;;  %3405 = vst [vmem:[#allocation4 + $0x18] sm:$0xff] %v15193_v16  ;;  %9701 = vmatprep.subr.bf16.mxu0 %v10784_v3  ;;  %v6671_v42 = vadd.f32 %v6663_v6, %v6399_v5  ;;  %9787 = vmatprep.subr.bf16.mxu1 %v10786_v58 }
 0x292   : > { %v6588_v48 = vsel %vm415_vm4, %v14977_v18, %v14923_v7  ;;  %v6667_v9 = vmul.f32 %v15106_v35, %v18757_v53  ;;  %v15224_v56 = vsel %vm415_vm4, %v14829_v59, %v14836_v13  ;;  %v6321_v3 = vld [vmem:[#allocation4 + $0x88] sm:$0x3]  ;;  %v10792_v6 = vld [vmem:[%s17894_s5 + $0x18c] ss:$16 sps:$4 sm:$0xff]   ;;  %v6383_v35 = vrot.slane %v6355_v49, 2 }
 0x293   : > { %v6736_v5 = vsel %vm885_vm8, %v6734_v0, %v18158_v19  ;;  %v6827_v18 = vsel %vm498_vm3, %v6825_v27, %v18157_v2  ;;  %6628 = vst [vmem:[#allocation4 + $0x80] sm:$0x3] %v6588_v48  ;;  %3409 = vst [vmem:[#allocation4 + $0x38] sm:$0xff] %v15224_v56  ;;  %v18761_v59 = vrot.slane %v14912_v4, 7  ;;  %v4959_v62 = vrot.slane %v4876_v10, 7  ;;  %9702 = vmatpush1.bf16.msra.mxu0 %v10788_v34  ;;  %v6420_v10 = vld [vmem:[#allocation3 + $0xd0] sm:$0xff] }
 0x294   : > { %4999 = vrot.lane.b32.xlu0 %v4950_v39, %s11058_s14  ;;  %v6762_v53 = vadd.f32 %v6736_v5, %v6671_v42  ;;  %v15244_v0 = vsel %vm415_vm4, %v14881_v43, %v14883_v36  ;;  %v6479_v39 = vrot.slane %v6411_v8, 7  ;;  %v6384_v27 = vsel %vm793_vm7, %v6372_v40, %v6383_v35  ;;  %v15253_v42 = vpop.permute.xlu1 %7378  ;;  %9788 = vmatpush1.bf16.msra.mxu1 %v10789_v28  ;;  %v15261_v8 = vpop.permute.xlu0 %4143  ;;  %v6435_v34 = vld [vmem:[#allocation3 + $0x1c0] sm:$0x1]  ;;  %v18763_v48 = vld [vmem:[#allocation47_spill] sm:$0xff] }
 0x295   : > { %v4962_v13 = vsel %vm3256_vm5, %v14732_v23, %v18761_v59  ;;  %18762 = vst [vmem:[#allocation81_spill] sm:$0xff] %v15244_v0  ;;  %3413 = vst [vmem:[#allocation4 + $0x58] sm:$0xff] %v15244_v0  ;;  %v6476_v4 = vrot.slane %v6410_v21, 7  ;;  %v6356_v58 = vmul.f32 %v14861_v33, %v6321_v3  ;;  %v6668_v49 = vmul.f32 %v14865_v41, %v14622_v50  ;;  %v15292_v59 = vld [vmem:[#allocation4 + $0x28] sm:$0xfe] }
 0x296   : > { %5011 = vrot.lane.b32.xlu1 %v4962_v13, %s11058_s14  ;;  %9703 = vmatprep.subr.bf16.mxu0 %v10790_v55  ;;  %v15255_v43 = vadd.f32 %v6827_v18, %v6762_v53  ;;  %v6403_v36 = vadd.f32 %v6384_v27, %v6308_v17  ;;  %v4960_v29 = vsel %vm3256_vm5, %v14732_v23, %v4959_v62  ;;  %v6436_v17 = vld [vmem:[#allocation3 + $0x1c8] sm:$0x1]  ;;  %v6488_v55 = vrot.slane %v6420_v10, 7  ;;  %v6956_v27 = vld [vmem:[#allocation4 + $0x20] sm:$0xf0] }
 0x297   : > { %v6481_v40 = vsel %vm3256_vm5, %v6479_v39, %v14732_v23  ;;  %9789 = vmatprep.subr.bf16.mxu1 %v10792_v6  ;;  %v6478_v50 = vsel %vm3256_vm5, %v6476_v4, %v14732_v23  ;;  %v6385_v33 = vrot.slane %v6356_v58, 2  ;;  %v6589_v41 = vsel %vm415_vm4, %v14923_v7, %v14925_v20  ;;  %v7237_v6 = vld [vmem:[#allocation3 + $0x40] sm:$0x80]  ;;  %v7236_v7 = vld [vmem:[#allocation3 + $0x38] sm:$0x80] }
 0x298   : > { %5009 = vrot.lane.b32.xlu0 %v4960_v29, %s11058_s14  ;;  %v15269_v28 = vadd.f32 %v6667_v9, %v6403_v36  ;;  %6629 = vst [vmem:[#allocation4 + $0x88] sm:$0x3] %v6589_v41  ;;  %v15275_v21 = vsel %vm415_vm4, %v18763_v48, %v14979_v24  ;;  %v15280_v3 = vsel %vm415_vm4, %v14979_v24, %v15005_v61  ;;  %v18766_v5 = vrot.slane %v14892_v44, 2  ;;  %v15290_v35 = vpop.permute.xlu1 %4145  ;;  %v15294_v24 = vld [vmem:[#allocation4 + $0x28] sm:$0xf0]  ;;  %v18767_v29 = vld [vmem:[#allocation46_spill] sm:$0xff] }
 0x299   : > { %18764 = vst [vmem:[#allocation13_spill] sm:$0xff] %v15275_v21  ;;  %18765 = vst [vmem:[#allocation63_spill] sm:$0xff] %v15280_v3  ;;  %v7399_v18 = vsel %vm363_vm1, %v15007_v51, %v15036_v25  ;;  %v15296_v61 = vld [vmem:[#allocation4 + $0x28] sm:$0x80]  ;;  %v6489_v13 = vsel %vm3256_vm5, %v14732_v23, %v6488_v55  ;;  %v6499_v53 = vsel %vm3256_vm5, %v6488_v55, %v14660_v1  ;;  %v6861_v39 = vld [vmem:[#allocation4 + $0x20] sm:$0xfe] }
 0x29a   : > { %6530 = vrot.lane.b32.xlu1 %v6481_v40, %s11057_s13  ;;  %v6386_v9 = vsel %vm793_vm7, %v18766_v5, %v6385_v33  ;;  %3416 = vst [vmem:[#allocation4 + $0x70] sm:$0xff] %v15275_v21  ;;  %3417 = vst [vmem:[#allocation4 + $0x78] sm:$0xff] %v15280_v3  ;;  %v7402_v62 = vsel %vm363_vm1, %v15118_v31, %v15038_v30  ;;  %v7047_v4 = vld [vmem:[#allocation4 + $0x20] sm:$0x80]  ;;  %v15306_v58 = vld [vmem:[#allocation4 + $0x48] sm:$0x7]  ;;  %v3380_v40 = vsel %vm415_vm4, %v18767_v29, %v15161_v12  ;;  %v15332_v5 = vpop.permute.xlu0 %4153 }
 0x29b   : > { %v6404_v44 = vadd.f32 %v6386_v9, %v14905_v57  ;;  %7439 = vst [vmem:[#allocation4 + $0x8] sm:$0xff] %v7399_v18  ;;  %v15308_v10 = vld [vmem:[#allocation4 + $0x48] sm:$0x3f]  ;;  %v7403_v57 = vsel %vm363_vm1, %v15038_v30, %v15064_v45  ;;  %v6520_v36 = vrot.slane %v6436_v17, 7  ;;  %v6518_v1 = vrot.slane %v6435_v34, 7  ;;  %7442 = vst [vmem:[#allocation4 + $0x20] sm:$0xff] %v7402_v62 }
 0x29c   : > { %6528 = vrot.lane.b32.xlu0 %v6478_v50, %s11057_s13  ;;  %v15317_v31 = vld [vmem:[#allocation5 + $0x61] ss:$8 sm:$0xf]  ;;  %v15319_v33 = vld [vmem:[#allocation4 + $0x48] sm:$0xfc]  ;;  %v7407_v30 = vsel %vm363_vm1, %v15066_v60, %v15085_v32  ;;  %v7305_v50 = vrot.slane %v7237_v6, 7  ;;  %v7398_v6 = vsel %vm363_vm1, %v15087_v47, %v15007_v51  ;;  %v15343_v62 = vpop.permute.xlu1 %4155 }
 0x29d   : > { %v15321_v41 = vadd.f32 %v6668_v49, %v6404_v44  ;;  %3420 = vst [vmem:[#allocation4 + $0x90] sm:$0x3] %v3380_v40  ;;  %v7302_v17 = vrot.slane %v7236_v7, 7  ;;  %v15328_v34 = vld [vmem:[#allocation5 + $0x80] ss:$8 sm:$0xf]  ;;  %v6521_v49 = vsel %vm3256_vm5, %v14732_v23, %v6520_v36  ;;  %v15338_v9 = vsel %vm3256_vm5, %v14732_v23, %v6518_v1 }
 0x29e   : > { %6540 = vrot.lane.b32.xlu1 %v14732_v23, %s11057_s13  ;;  %v15330_v55 = vld [vmem:[#allocation5 + $0x87] ss:$8 sm:$0xf]  ;;  %v6683_v48 = vld [vmem:[#allocation4 + $0x40] sm:$0x7]  ;;  %7443 = vst [vmem:[#allocation4 + $0x28] sm:$0xff] %v7403_v57  ;;  %v15347_v57 = vsel %vm3256_vm5, %v7305_v50, %v14732_v23  ;;  %v6879_v1 = vrot.slane %v15317_v31, %v18732_v11  ;;  %v6970_v47 = vrot.slane %v15328_v34, %v18732_v11  ;;  %v15370_v0 = vpop.permute.xlu0 %4163 }
 0x29f   : > { %7447 = vst [vmem:[#allocation4 + $0x48] sm:$0xff] %v7407_v30  ;;  %v6774_v7 = vld [vmem:[#allocation4 + $0x40] sm:$0x3f]  ;;  %v15351_v36 = vsel %vm3256_vm5, %v7302_v17, %v14732_v23  ;;  %7438 = vst [vmem:[#allocation4] sm:$0xff] %v7398_v6  ;;  %v7061_v40 = vrot.slane %v15330_v55, %v18732_v11  ;;  %v6718_v50 = vmul.f32 %v15142_v54, %v6683_v48 }
 0x2a0   : > { %v6865_v18 = vld [vmem:[#allocation4 + $0x40] sm:$0xff]  ;;  %6538 = vrot.lane.b32.xlu0 %v6489_v13, %s11057_s13  ;;  %v6809_v17 = vmul.f32 %v15150_v22, %v6774_v7  ;;  %v6896_v6 = vmul.f32 %v6879_v1, %v6861_v39  ;;  %v6987_v13 = vmul.f32 %v6970_v47, %v6956_v27  ;;  %v15368_v20 = vpop.permute.xlu1 %4165  ;;  %v18768_v27 = vrot.slane %v15180_v52, 3 }
 0x2a1   : > { %v6869_v44 = vld [vmem:[#allocation4 + $0x60] sm:$0x1]  ;;  %v15355_v29 = vld [vmem:[#allocation5 + $0xa6] ss:$8 sm:$0xf]  ;;  %v6900_v2 = vmul.f32 %v6879_v1, %v6865_v18  ;;  %v6991_v32 = vmul.f32 %v6970_v47, %v6865_v18  ;;  %v7078_v25 = vmul.f32 %v7061_v40, %v7047_v4  ;;  %v6746_v15 = vrot.slane %v6718_v50, 3 }
 0x2a2   : > { %v6960_v51 = vld [vmem:[#allocation4 + $0x60] sm:$0xf]  ;;  %v7156_v30 = vrot.slane %v15355_v29, %v18732_v11  ;;  %6550 = vrot.lane.b32.xlu1 %v14732_v23, %s11057_s13  ;;  %v6904_v19 = vmul.f32 %v6879_v1, %v6869_v44  ;;  %v6837_v3 = vrot.slane %v6809_v17, 6  ;;  %v6920_v21 = vrot.slane %v6896_v6, 1 }
 0x2a3   : > { %v6995_v45 = vmul.f32 %v6970_v47, %v6960_v51  ;;  %v6921_v11 = vrot.slane %v6900_v2, 1  ;;  %v7011_v48 = vrot.slane %v6987_v13, 4  ;;  %v7012_v22 = vrot.slane %v6991_v32, 4  ;;  %v7051_v7 = vld [vmem:[#allocation4 + $0x60] sm:$0x7f] }
 0x2a4   : > { %6548 = vrot.lane.b32.xlu0 %v6499_v53, %s11057_s13  ;;  %v6932_v54 = vrot.slane %v6904_v19, 1  ;;  %v6747_v4 = vsel %vm885_vm8, %v18768_v27, %v6746_v15  ;;  %v18769_v44 = vrot.slane %v15185_v37, 6  ;;  %v7082_v51 = vmul.f32 %v7061_v40, %v6865_v18  ;;  %v7138_v53 = vld [vmem:[#allocation4 + $0x40] sm:$0xfc]  ;;  %v7146_v50 = vld [vmem:[#allocation4 + $0x80] sm:$0x3]  ;;  %v15386_v52 = vpop.permute.xlu1 %7392 }
 0x2a5   : > { %v7023_v39 = vrot.slane %v6995_v45, 4  ;;  %v6922_v1 = vsel %vm701_vm6, %v6920_v21, %v6921_v11  ;;  %v6766_v19 = vadd.f32 %v6747_v4, %v15269_v28  ;;  %v7013_v47 = vsel %vm977_vm9, %v7011_v48, %v7012_v22  ;;  %18770 = vst [vmem:[#allocation20_spill] sm:$0xff] %v15386_v52  ;;  %v18771_v21 = vld [vmem:[#allocation67_spill] sm:$0xff] }
 0x2a6   : > { %6560 = vrot.lane.b32.xlu1 %v14732_v23, %s11057_s13  ;;  %v6838_v2 = vsel %vm498_vm3, %v18769_v44, %v6837_v3  ;;  %v6933_v45 = vsel %vm701_vm6, %v6921_v11, %v6932_v54  ;;  %v6948_v32 = vadd.f32 %v6922_v1, %v15255_v43  ;;  %v7086_v37 = vmul.f32 %v7061_v40, %v7051_v7  ;;  %v10795_v4 = vld [vmem:[%s17894_s5 + $0x188] ss:$16 sps:$4 sm:$0xff]  }
 0x2a7   : > { %v7024_v15 = vsel %vm977_vm9, %v7012_v22, %v7023_v39  ;;  %v7102_v17 = vrot.slane %v7078_v25, 7  ;;  %v7103_v3 = vrot.slane %v7082_v51, 7  ;;  %v6857_v18 = vadd.f32 %v6838_v2, %v6766_v19  ;;  %v15397_v25 = vpop.permute.xlu0 %7390  ;;  %v10796_v51 = vld [vmem:[%s17894_s5 + $0x1a4] ss:$16 sps:$4 sm:$0xff]   ;;  %9790 = vmatpush1.bf16.msra.mxu1 %v10795_v4 }
 0x2a8   : > { %6558 = vrot.lane.b32.xlu0 %v18771_v21, %s11057_s13  ;;  %v7039_v6 = vadd.f32 %v7013_v47, %v6948_v32  ;;  %v7173_v28 = vmul.f32 %v7156_v30, %v7138_v53  ;;  %v7177_v11 = vmul.f32 %v7156_v30, %v15155_v26  ;;  %v7114_v13 = vrot.slane %v7086_v37, 7  ;;  %v15399_v27 = vpop.permute.xlu1 %4173  ;;  %v10794_v26 = vld [vmem:[%s17894_s5 + $0x180] ss:$16 sps:$4 sm:$0xff]   ;;  %v18773_v53 = vld [vmem:[#allocation77_spill] sm:$0xff] }
 0x2a9   : > { %v7104_v43 = vsel %vm3256_vm5, %v7102_v17, %v7103_v3  ;;  %v7181_v54 = vmul.f32 %v7156_v30, %v7146_v50  ;;  %v7410_v40 = vsel %vm363_vm1, %v15253_v42, %v15208_v38  ;;  %v6952_v48 = vadd.f32 %v6933_v45, %v6857_v18  ;;  %v18774_v45 = vld [vmem:[#allocation30_spill] sm:$0xff]  ;;  %9704 = vmatpush1.bf16.msra.mxu0 %v10794_v26  ;;  %v7052_v17 = vld [vmem:[#allocation4 + $0x68] sm:$0x7f] }
 0x2aa   : > { %6570 = vrot.lane.b32.xlu1 %v6521_v49, %s11057_s13  ;;  %v7130_v22 = vadd.f32 %v7104_v43, %v7039_v6  ;;  %v7197_v39 = vrot.slane %v7173_v28, 2  ;;  %v7198_v7 = vrot.slane %v7177_v11, 2  ;;  %7450 = vst [vmem:[#allocation4 + $0x60] sm:$0xff] %v7410_v40  ;;  %v7115_v49 = vsel %vm3256_vm5, %v7103_v3, %v7114_v13  ;;  %9705 = vmatprep.subr.bf16.mxu0 %v10796_v51  ;;  %v18783_v11 = vld [vmem:[#allocation14_spill] sm:$0xff]  ;;  %v18785_v13 = vld [vmem:[#allocation65_spill] sm:$0xff] }
 0x2ab   : > { %v7209_v30 = vrot.slane %v7181_v54, 2  ;;  %v7406_v42 = vsel %vm363_vm1, %v15120_v63, %v15066_v60  ;;  %v7043_v44 = vadd.f32 %v7024_v15, %v6952_v48  ;;  %v3381_v1 = vsel %vm415_vm4, %v15161_v12, %v15163_v46  ;;  %v6870_v12 = vld [vmem:[#allocation4 + $0x68] sm:$0x1]  ;;  %v18775_v46 = vld [vmem:[#allocation8_spill] sm:$0xff]  ;;  %v15447_v3 = vpop.permute.xlu0 %7388 }
 0x2ac   : > { %6568 = vrot.lane.b32.xlu0 %v15338_v9, %s11057_s13  ;;  %v7199_v2 = vsel %vm793_vm7, %v7197_v39, %v7198_v7  ;;  %7446 = vst [vmem:[#allocation4 + $0x40] sm:$0xff] %v7406_v42  ;;  %3421 = vst [vmem:[#allocation4 + $0x98] sm:$0x3] %v3381_v1  ;;  %v6719_v19 = vmul.f32 %v18773_v53, %v15306_v58  ;;  %v6810_v32 = vmul.f32 %v18774_v45, %v15308_v10  ;;  %v15431_v50 = vpop.permute.xlu1 %8176  ;;  %v6961_v15 = vld [vmem:[#allocation4 + $0x68] sm:$0xf] }
 0x2ad   : > { %v7210_v60 = vsel %vm793_vm7, %v7198_v7, %v7209_v30  ;;  %v15423_v63 = vadd.f32 %v7199_v2, %v7130_v22  ;;  %v7134_v9 = vadd.f32 %v7115_v49, %v7043_v44  ;;  %v6883_v47 = vrot.slane %v15317_v31, %v18775_v46  ;;  %v7147_v2 = vld [vmem:[#allocation4 + $0x88] sm:$0x3] }
 0x2ae   : > { %7356 = vrot.lane.b32.xlu1 %v15347_v57, %s11056_s12  ;;  %v10798_v57 = vld [vmem:[%s17894_s5 + $0x1ac] ss:$16 sps:$4 sm:$0xff]   ;;  %v6974_v37 = vrot.slane %v15328_v34, %v18775_v46  ;;  %v7065_v58 = vrot.slane %v15330_v55, %v18775_v46  ;;  %v7160_v10 = vrot.slane %v15355_v29, %v18775_v46  ;;  %v15445_v31 = vsel %vm363_vm1, %v15208_v38, %v15210_v14  ;;  %v7261_v53 = vld [vmem:[#allocation3 + $0x1c8] sm:$0x1] }
 0x2af   : > { %18772 = vst [vmem:[#allocation80_spill] sm:$0xff] %v15423_v63  ;;  %18776 = vst [vmem:[#allocation37_spill] sm:$0xff] %v15445_v31  ;;  %v15451_v21 = vadd.f32 %v7210_v60, %v7134_v9  ;;  %v6748_v34 = vrot.slane %v6719_v19, 3  ;;  %v6839_v18 = vrot.slane %v6810_v32, 6  ;;  %v15454_v55 = vmul.f32 %v6883_v47, %v15292_v59  ;;  %v18779_v38 = vld [vmem:[#allocation69_spill] sm:$0xff]  ;;  %9791 = vmatprep.subr.bf16.mxu1 %v10798_v57  ;;  %v15495_v19 = vpop.permute.xlu0 %4175 }
 0x2b0   : > { %7354 = vrot.lane.b32.xlu0 %v15351_v36, %s11056_s12  ;;  %7451 = vst [vmem:[#allocation4 + $0x68] sm:$0xff] %v15445_v31  ;;  %v15460_v29 = vmul.f32 %v6883_v47, %v18779_v38  ;;  %v6905_v6 = vmul.f32 %v6883_v47, %v6870_v12  ;;  %v15463_v28 = vmul.f32 %v6974_v37, %v15294_v24  ;;  %v18784_v43 = vrot.slane %v18783_v11, 3  ;;  %v15475_v39 = vpop.permute.xlu1 %8186  ;;  %v7262_v9 = vld [vmem:[#allocation3 + $0x1d0] sm:$0x1]  ;;  %v18789_v12 = vld [vmem:[#allocation85_spill] sm:$0xff] }
 0x2b1   : > { %18777 = vst [vmem:[#allocation35_spill] sm:$0xff] %v15451_v21  ;;  %18778 = vst [vmem:[#allocation41_spill] sm:$0xff] %v15454_v55  ;;  %v15466_v36 = vmul.f32 %v6974_v37, %v18779_v38  ;;  %v18786_v54 = vrot.slane %v18785_v13, 6  ;;  %v6996_v22 = vmul.f32 %v6974_v37, %v6961_v15  ;;  %v15484_v4 = vmul.f32 %v7065_v58, %v15296_v61  ;;  %v8063_v57 = vld [vmem:[#allocation3 + $0x48] sm:$0x80]  ;;  %v3424_v13 = vld [vmem:[#allocation4 + $0x10] sm:$0xff] }
 0x2b2   : > { %7366 = vrot.lane.b32.xlu1 %v14732_v23, %s11056_s12  ;;  %18780 = vst [vmem:[#allocation28_spill] sm:$0xff] %v15460_v29  ;;  %18781 = vst [vmem:[#allocation27_spill] sm:$0xff] %v15463_v28  ;;  %v6749_v59 = vsel %vm885_vm8, %v18784_v43, %v6748_v34  ;;  %v18170_v7 = vrot.slane %v15460_v29, 1  ;;  %v6934_v26 = vrot.slane %v6905_v6, 1  ;;  %v15487_v44 = vmul.f32 %v7065_v58, %v18779_v38  ;;  %v3470_v34 = vld [vmem:[#allocation4 + $0x10] sm:$0xf8] }
 0x2b3   : > { %18782 = vst [vmem:[#allocation84_spill] sm:$0xff] %v15466_v36  ;;  %v6840_v40 = vsel %vm498_vm3, %v18786_v54, %v6839_v18  ;;  %v6767_v24 = vadd.f32 %v6749_v59, %v15321_v41  ;;  %v18169_v30 = vrot.slane %v15466_v36, 4  ;;  %v7025_v42 = vrot.slane %v6996_v22, 4  ;;  %18787 = vst [vmem:[#allocation76_spill] sm:$0xff] %v15484_v4  ;;  %v18790_v43 = vld [vmem:[#allocation54_spill] sm:$0xff]  ;;  %v15576_v49 = vld [vmem:[#allocation3 + $0xe8] sm:$0xff] }
 0x2b4   : > { %7364 = vrot.lane.b32.xlu0 %v14732_v23, %s11056_s12  ;;  %18788 = vst [vmem:[#allocation38_spill] sm:$0xff] %v15487_v44  ;;  %v6935_v1 = vsel %vm701_vm6, %v18170_v7, %v6934_v26  ;;  %v7087_v51 = vmul.f32 %v7065_v58, %v7052_v17  ;;  %v7174_v60 = vmul.f32 %v7160_v10, %v15319_v33  ;;  %v18168_v32 = vrot.slane %v15487_v44, 7  ;;  %v8062_v33 = vld [vmem:[#allocation3 + $0x40] sm:$0x80]  ;;  %v15503_v18 = vpop.permute.xlu1 %8196  ;;  %v3561_v54 = vld [vmem:[#allocation4 + $0x10] sm:$0xc0] }
 0x2b5   : > { %v6858_v41 = vadd.f32 %v6840_v40, %v6767_v24  ;;  %v7026_v61 = vsel %vm977_vm9, %v18169_v30, %v7025_v42  ;;  %v7178_v47 = vmul.f32 %v7160_v10, %v18789_v12  ;;  %v7182_v17 = vmul.f32 %v7160_v10, %v7147_v2  ;;  %v3471_v26 = vld [vmem:[#allocation4 + $0x18] sm:$0xf8]  ;;  %v3428_v12 = vld [vmem:[#allocation4 + $0x30] sm:$0xff] }
 0x2b6   : > { %7376 = vrot.lane.b32.xlu1 %v14732_v23, %s11056_s12  ;;  %v7116_v37 = vrot.slane %v7087_v51, 7  ;;  %v7200_v58 = vrot.slane %v7174_v60, 2  ;;  %v7346_v6 = vrot.slane %v7262_v9, 7  ;;  %v7344_v11 = vrot.slane %v7261_v53, 7  ;;  %v15522_v42 = vld [vmem:[#allocation4 + $0x18] sm:$0xc0] }
 0x2b7   : > { %v6953_v15 = vadd.f32 %v6935_v1, %v6858_v41  ;;  %v7201_v38 = vrot.slane %v7178_v47, 2  ;;  %v15510_v59 = vsel %vm363_vm1, %v18790_v43, %v15261_v8  ;;  %v7211_v22 = vrot.slane %v7182_v17, 2  ;;  %v10949_v9 = vld [vmem:[%s17893_s4] sm:$0xf]  ;;  %v18794_v53 = vld [vmem:[#allocation61_spill] sm:$0xff]  ;;  %v15542_v47 = vpop.permute.xlu0 %8178 }
 0x2b8   : > { %7374 = vrot.lane.b32.xlu0 %v14732_v23, %s11056_s12  ;;  %v7117_v40 = vsel %vm3256_vm5, %v18168_v32, %v7116_v37  ;;  %v15520_v24 = vsel %vm363_vm1, %v15261_v8, %v15290_v35  ;;  %4229 = vst [vmem:[#allocation4 + $0x10] sm:$0xff] %v15510_v59  ;;  %v7347_v41 = vsel %vm3256_vm5, %v14732_v23, %v7346_v6  ;;  %v8131_v51 = vrot.slane %v8063_v57, 7  ;;  %v10950_v17 = vld [vmem:[#allocation5] ss:$8 sm:$0xf] }
 0x2b9   : > { %v7044_v10 = vadd.f32 %v7026_v61, %v6953_v15  ;;  %v15526_v2 = vsel %vm793_vm7, %v7200_v58, %v7201_v38  ;;  %v7345_v1 = vsel %vm3256_vm5, %v14732_v23, %v7344_v11  ;;  %4230 = vst [vmem:[#allocation4 + $0x18] sm:$0xff] %v15520_v24  ;;  %v15536_v8 = vsel %vm793_vm7, %v7201_v38, %v7211_v22  ;;  %v18796_v15 = vld [vmem:[#allocation83_spill] sm:$0xff]  ;;  %v15563_v22 = vpop.permute.xlu1 %8174  ;;  %v15587_v30 = vld [vmem:[#allocation4 + $0x30] sm:$0x80]  ;;  %v15654_v44 = vld [vmem:[#allocation4 + $0x70] sm:$0x7f] }
 0x2ba   : > { %7386 = vrot.lane.b32.xlu1 %v14732_v23, %s11056_s12  ;;  %18791 = vst [vmem:[#allocation40_spill] sm:$0xff] %v15526_v2  ;;  %18793 = vst [vmem:[#allocation48_spill] sm:$0xff] %v15536_v8  ;;  %v8128_v35 = vrot.slane %v8062_v33, 7  ;;  %v3187_v61 = vrot.slane %v10949_v9, %v18794_v53  ;;  %v8133_v57 = vsel %vm3256_vm5, %v8131_v51, %v14732_v23  ;;  %v10951_v6 = vld [vmem:[#allocation5 + $0x7] ss:$8 sm:$0xf] }
 0x2bb   : > { %v15533_v60 = vadd.f32 %v7117_v40, %v7044_v10  ;;  %18795 = vst [vmem:[#allocation52_spill] sm:$0xff] %v15542_v47  ;;  %v3191_v37 = vrot.slane %v10949_v9, %v18796_v15  ;;  %v3443_v58 = vrot.slane %v10950_v17, %v18794_v53  ;;  %v3447_v33 = vrot.slane %v10950_v17, %v18796_v15  ;;  %v10952_v10 = vld [vmem:[#allocation5 + $0x26] ss:$8 sm:$0xf]  ;;  %v3566_v2 = vld [vmem:[#allocation4 + $0x58] sm:$0x3f] }
 0x2bc   : > { %7384 = vrot.lane.b32.xlu0 %v14732_v23, %s11056_s12  ;;  %v8130_v38 = vsel %vm3256_vm5, %v8128_v35, %v14732_v23  ;;  %v15555_v11 = vrot.slane %v10951_v6, %v18794_v53  ;;  %v15558_v43 = vrot.slane %v10951_v6, %v18796_v15  ;;  %v15561_v40 = vrot.slane %v10952_v10, %v18794_v53  ;;  %v15601_v21 = vld [vmem:[#allocation4 + $0x38] sm:$0xf0]  ;;  %v10801_v31 = vld [vmem:[%s17894_s5 + $0x1a8] ss:$16 sps:$4 sm:$0xff]  }
 0x2bd   : > { %18792 = vst [vmem:[#allocation36_spill] sm:$0xff] %v15533_v60  ;;  %v3454_v51 = vmul.f32 %v3443_v58, %v3424_v13  ;;  %v3455_v9 = vmul.f32 %v3447_v33, %v15193_v16  ;;  %v3459_v17 = vmul.f32 %v3447_v33, %v15224_v56  ;;  %v15619_v63 = vsel %vm363_vm1, %v15332_v5, %v15343_v62  ;;  %v15623_v8 = vpop.permute.xlu1 %8194  ;;  %v15625_v60 = vld [vmem:[#allocation4 + $0x70] sm:$0x1]  ;;  %v10804_v4 = vld [vmem:[%s17894_s5 + $0x1cc] ss:$16 sps:$4 sm:$0xff]  }
 0x2be   : > { %7396 = vrot.lane.b32.xlu1 %v7347_v41, %s11056_s12  ;;  %v3458_v41 = vmul.f32 %v3443_v58, %v3428_v12  ;;  %v3501_v35 = vmul.f32 %v15555_v11, %v3470_v34  ;;  %v3502_v45 = vmul.f32 %v15558_v43, %v3471_v26  ;;  %v15570_v32 = vmul.f32 %v15555_v11, %v3428_v12  ;;  %v15583_v34 = vld [vmem:[#allocation4 + $0x30] sm:$0xfe] }
 0x2bf   : > { %v15574_v6 = vmul.f32 %v15558_v43, %v15224_v56  ;;  %v3462_v13 = vadd.f32 %v3454_v51, %v3187_v61  ;;  %v3463_v16 = vadd.f32 %v3455_v9, %v3191_v37  ;;  %v15581_v33 = vadd.f32 %v3459_v17, %v3191_v37  ;;  %v15585_v26 = vld [vmem:[#allocation4 + $0x30] sm:$0xf0]  ;;  %v3474_v51 = vld [vmem:[#allocation4 + $0x50] sm:$0x7]  ;;  %v15592_v9 = vpop.permute.xlu0 %8188  ;;  %v15599_v17 = vld [vmem:[#allocation4 + $0x38] sm:$0xfe]  ;;  %9792 = vmatpush1.bf16.msra.mxu1 %v10801_v31 }
 0x2c0   : > { %7394 = vrot.lane.b32.xlu0 %v7345_v1, %s11056_s12  ;;  %v15579_v58 = vadd.f32 %v3458_v41, %v3187_v61  ;;  %v3529_v48 = vrot.slane %v3501_v35, 3  ;;  %v18173_v7 = vrot.slane %v15570_v32, 3  ;;  %v3532_v14 = vrot.slane %v3502_v45, 3  ;;  %18797 = vst [vmem:[#allocation86_spill] sm:$0xff] %v15592_v9  ;;  %v18798_v45 = vld [vmem:[#allocation33_spill] sm:$0xff]  ;;  %18800 = vst [vmem:[#allocation34_spill] sm:$0xff] %v15619_v63  ;;  %9793 = vmatprep.subr.bf16.mxu1 %v10804_v4 }
 0x2c1   : > { %v3585_v61 = vrot.slane %v10952_v10, %v18796_v15  ;;  %v3592_v37 = vmul.f32 %v15561_v40, %v3561_v54  ;;  %v15597_v41 = vmul.f32 %v15561_v40, %v3428_v12  ;;  %v15608_v35 = vsel %vm363_vm1, %v18798_v45, %v15332_v5  ;;  %v3565_v1 = vld [vmem:[#allocation4 + $0x50] sm:$0x3f]  ;;  %v3475_v45 = vld [vmem:[#allocation4 + $0x58] sm:$0x7]  ;;  %v10810_v31 = vld [vmem:[%s17894_s5 + $0x1ec] ss:$16 sps:$4 sm:$0xff]  }
 0x2c2   : > { %8182 = vrot.lane.b32.xlu1 %v8133_v57, %s11058_s14  ;;  %v15603_v57 = vld [vmem:[#allocation4 + $0x38] sm:$0x80]  ;;  %v3531_v10 = vsel %vm885_vm8, %v3529_v48, %v18173_v7  ;;  %v18799_v54 = vrot.slane %v15574_v6, 3  ;;  %4233 = vst [vmem:[#allocation4 + $0x30] sm:$0xff] %v15608_v35  ;;  %v15627_v48 = vld [vmem:[#allocation4 + $0x70] sm:$0xf] }
 0x2c3   : > { %v3593_v7 = vmul.f32 %v3585_v61, %v15522_v42  ;;  %v15632_v5 = vmul.f32 %v3585_v61, %v15224_v56  ;;  %4234 = vst [vmem:[#allocation4 + $0x38] sm:$0xff] %v15619_v63  ;;  %v10800_v62 = vld [vmem:[%s17894_s5 + $0x1a0] ss:$16 sps:$4 sm:$0xff]   ;;  %v3621_v42 = vrot.slane %v15597_v41, 6  ;;  %v18801_v56 = vrot.slane %v15576_v49, 7  ;;  %v15671_v29 = vpop.permute.xlu0 %8198 }
 0x2c4   : > { %v3534_v12 = vsel %vm885_vm8, %v3532_v14, %v18799_v54  ;;  %8180 = vrot.lane.b32.xlu0 %v8130_v38, %s11058_s14  ;;  %v3553_v14 = vadd.f32 %v3531_v10, %v3462_v13  ;;  %v10802_v38 = vld [vmem:[%s17894_s5 + $0x1c4] ss:$16 sps:$4 sm:$0xff]   ;;  %v3620_v13 = vrot.slane %v3592_v37, 6  ;;  %v18802_v37 = vld [vmem:[#allocation11_spill] sm:$0xff]  ;;  %9706 = vmatpush1.bf16.msra.mxu0 %v10800_v62  ;;  %18803 = vst [vmem:[#allocation78_spill] sm:$0xff] %v15671_v29 }
 0x2c5   : > { %v3554_v54 = vadd.f32 %v3534_v12, %v3463_v16  ;;  %v8143_v16 = vsel %vm3256_vm5, %v14732_v23, %v18801_v56  ;;  %v10953_v10 = vld [vmem:[#allocation3 + $0x50] sm:$0xff]  ;;  %v3623_v28 = vrot.slane %v3593_v7, 6  ;;  %v3624_v36 = vrot.slane %v15632_v5, 6  ;;  %9707 = vmatprep.subr.bf16.mxu0 %v10802_v38 }
 0x2c6   : > { %v15649_v12 = vrot.slane %v10953_v10, 7  ;;  %8192 = vrot.lane.b32.xlu1 %v8143_v16, %s11058_s14  ;;  %v4201_v41 = vsel %vm363_vm1, %v18802_v37, %v15399_v27  ;;  %v3509_v56 = vmul.f32 %v15555_v11, %v3474_v51  ;;  %v10806_v10 = vld [vmem:[%s17894_s5 + $0x1c0] ss:$16 sps:$4 sm:$0xff]   ;;  %v3622_v55 = vsel %vm498_vm3, %v3620_v13, %v3621_v42  ;;  %v10807_v11 = vld [vmem:[%s17894_s5 + $0x1c8] ss:$16 sps:$4 sm:$0xff]  }
 0x2c7   : > { %4241 = vst [vmem:[#allocation4 + $0x70] sm:$0xff] %v4201_v41  ;;  %v3510_v5 = vmul.f32 %v15558_v43, %v3475_v45  ;;  %v3600_v16 = vmul.f32 %v15561_v40, %v3565_v1  ;;  %v3625_v51 = vsel %vm498_vm3, %v3623_v28, %v3624_v36  ;;  %v3644_v62 = vadd.f32 %v3622_v55, %v3553_v14  ;;  %v15684_v45 = vld [vmem:[#allocation4 + $0x50] sm:$0xff]  ;;  %v15687_v14 = vpop.permute.xlu1 %4185 }
 0x2c8   : > { %v8141_v7 = vsel %vm3256_vm5, %v14732_v23, %v15649_v12  ;;  %v3539_v13 = vrot.slane %v3509_v56, 3  ;;  %v3601_v37 = vmul.f32 %v3585_v61, %v3566_v2  ;;  %v10808_v23 = vld [vmem:[%s17894_s5 + $0x1e4] ss:$16 sps:$4 sm:$0xff]   ;;  %v3645_v43 = vadd.f32 %v3625_v51, %v3554_v54  ;;  %v3661_v2 = vld [vmem:[#allocation4 + $0x78] sm:$0x1]  ;;  %9708 = vmatpush1.bf16.msra.mxu0 %v10806_v10  ;;  %9794 = vmatpush1.bf16.msra.mxu1 %v10807_v11  ;;  %v15712_v11 = vpop.permute.xlu0 %8184 }
 0x2c9   : > { %8190 = vrot.lane.b32.xlu0 %v8141_v7, %s11058_s14  ;;  %v3541_v40 = vrot.slane %v3510_v5, 3  ;;  %v3630_v1 = vrot.slane %v3600_v16, 6  ;;  %v10954_v28 = vld [vmem:[#allocation5 + $0x45] ss:$8 sm:$0xf]  ;;  %v18804_v61 = vrot.slane %v15570_v32, 3  ;;  %9709 = vmatprep.subr.bf16.mxu0 %v10808_v23 }
 0x2ca   : > { %v3676_v55 = vrot.slane %v10954_v28, %v18794_v53  ;;  %v3680_v41 = vrot.slane %v10954_v28, %v18796_v15  ;;  %v10955_v56 = vld [vmem:[#allocation5 + $0x64] ss:$8 sm:$0xf]  ;;  %v10812_v5 = vld [vmem:[%s17894_s5 + $0x1e0] ss:$16 sps:$4 sm:$0xff]   ;;  %v18805_v16 = vrot.slane %v15574_v6, 3  ;;  %9795 = vmatprep.subr.bf16.mxu1 %v10810_v31 }
 0x2cb   : > { %v3540_v38 = vsel %vm885_vm8, %v18804_v61, %v3539_v13  ;;  %v3767_v54 = vrot.slane %v10955_v56, %v18794_v53  ;;  %v3771_v7 = vrot.slane %v10955_v56, %v18796_v15  ;;  %v3631_v51 = vsel %vm498_vm3, %v3621_v42, %v3630_v1  ;;  %v10813_v28 = vld [vmem:[%s17894_s5 + $0x1e8] ss:$16 sps:$4 sm:$0xff]   ;;  %v15715_v23 = vpop.permute.xlu1 %8208 }
 0x2cc   : > { %v3542_v4 = vsel %vm885_vm8, %v18805_v16, %v3541_v40  ;;  %v3557_v32 = vadd.f32 %v3540_v38, %v15579_v58  ;;  %v3687_v13 = vmul.f32 %v3676_v55, %v15583_v34  ;;  %v3632_v61 = vrot.slane %v3601_v37, 6  ;;  %v18806_v58 = vld [vmem:[#allocation81_spill] sm:$0xff]  ;;  %9710 = vmatpush1.bf16.msra.mxu0 %v10812_v5  ;;  %18807 = vst [vmem:[#allocation25_spill] sm:$0xff] %v15715_v23  ;;  %v3752_v31 = vld [vmem:[#allocation4 + $0x78] sm:$0xf] }
 0x2cd   : > { %v3558_v10 = vadd.f32 %v3542_v4, %v15581_v33  ;;  %v3688_v56 = vmul.f32 %v3680_v41, %v15599_v17  ;;  %v3691_v6 = vmul.f32 %v3676_v55, %v15684_v45  ;;  %v3692_v38 = vmul.f32 %v3680_v41, %v18806_v58  ;;  %9796 = vmatpush1.bf16.msra.mxu1 %v10813_v28 }
 0x2ce   : > { %v3648_v40 = vadd.f32 %v3631_v51, %v3557_v32  ;;  %v3695_v42 = vmul.f32 %v3676_v55, %v15625_v60  ;;  %v3696_v34 = vmul.f32 %v3680_v41, %v3661_v2  ;;  %v3633_v1 = vsel %vm498_vm3, %v3624_v36, %v3632_v61  ;;  %8200 = vrot.lane.b32.xlu0 %v15649_v12, %s11058_s14 }
 0x2cf   : > { %v3715_v16 = vrot.slane %v3687_v13, 1  ;;  %v3716_v46 = vrot.slane %v3691_v6, 1  ;;  %v3718_v33 = vrot.slane %v3688_v56, 1  ;;  %v3649_v37 = vadd.f32 %v3633_v1, %v3558_v10  ;;  %v10956_v1 = vld [vmem:[#allocation5 + $0x83] ss:$8 sm:$0xf] }
 0x2d0   : > { %v3719_v17 = vrot.slane %v3692_v38, 1  ;;  %v3725_v4 = vrot.slane %v3695_v42, 1  ;;  %v3727_v63 = vrot.slane %v3696_v34, 1  ;;  %v3778_v60 = vmul.f32 %v3767_v54, %v15585_v26 }
 0x2d1   : > { %v3717_v32 = vsel %vm701_vm6, %v3715_v16, %v3716_v46  ;;  %v3779_v55 = vmul.f32 %v3771_v7, %v15601_v21  ;;  %v3782_v36 = vmul.f32 %v3767_v54, %v15684_v45  ;;  %v3783_v28 = vmul.f32 %v3771_v7, %v18806_v58  ;;  %v15726_v21 = vpop.permute.xlu0 %4183  ;;  %v15731_v16 = vld [vmem:[#allocation4 + $0x50] sm:$0xfc] }
 0x2d2   : > { %v3720_v2 = vsel %vm701_vm6, %v3718_v33, %v3719_v17  ;;  %v3726_v41 = vsel %vm701_vm6, %v3716_v46, %v3725_v4  ;;  %v3728_v5 = vsel %vm701_vm6, %v3719_v17, %v3727_v63  ;;  %v3739_v51 = vadd.f32 %v3717_v32, %v3644_v62  ;;  %v3843_v33 = vld [vmem:[#allocation4 + $0x78] sm:$0x7f]  ;;  %8210 = vrot.lane.b32.xlu0 %v15649_v12, %s11058_s14 }
 0x2d3   : > { %v3740_v13 = vadd.f32 %v3720_v2, %v3645_v43  ;;  %v3743_v10 = vadd.f32 %v3726_v41, %v3648_v40  ;;  %v3744_v61 = vadd.f32 %v3728_v5, %v3649_v37  ;;  %v3786_v56 = vmul.f32 %v3767_v54, %v15627_v48  ;;  %v18808_v48 = vld [vmem:[#allocation79_spill] sm:$0xff] }
 0x2d4   : > { %v3787_v6 = vmul.f32 %v3771_v7, %v3752_v31  ;;  %v3806_v26 = vrot.slane %v3778_v60, 4  ;;  %v3807_v38 = vrot.slane %v3782_v36, 4  ;;  %v3809_v42 = vrot.slane %v3779_v55, 4  ;;  %v15738_v7 = vpop.permute.xlu1 %4969  ;;  %v8078_v2 = vld [vmem:[#allocation3 + $0x138] sm:$0xff] }
 0x2d5   : > { %v3810_v34 = vrot.slane %v3783_v28, 4  ;;  %v3858_v46 = vrot.slane %v10956_v1, %v18794_v53  ;;  %v3862_v63 = vrot.slane %v10956_v1, %v18796_v15  ;;  %v3816_v43 = vrot.slane %v3786_v56, 4  ;;  %v15751_v1 = vld [vmem:[#allocation4 + $0x58] sm:$0xfc] }
 0x2d6   : > { %v3808_v62 = vsel %vm977_vm9, %v3806_v26, %v3807_v38  ;;  %v3818_v40 = vrot.slane %v3787_v6, 4  ;;  %v15736_v54 = vsel %vm363_vm1, %v18808_v48, %v15370_v0  ;;  %v15749_v26 = vpop.permute.xlu0 %8206 }
 0x2d7   : > { %v3811_v37 = vsel %vm977_vm9, %v3809_v42, %v3810_v34  ;;  %v3830_v17 = vadd.f32 %v3808_v62, %v3739_v51  ;;  %v3869_v4 = vmul.f32 %v3858_v46, %v15587_v30  ;;  %v3870_v31 = vmul.f32 %v3862_v63, %v15603_v57  ;;  %4237 = vst [vmem:[#allocation4 + $0x50] sm:$0xff] %v15736_v54 }
 0x2d8   : > { %v3817_v32 = vsel %vm977_vm9, %v3807_v38, %v3816_v43  ;;  %v3819_v60 = vsel %vm977_vm9, %v3810_v34, %v3818_v40  ;;  %v3831_v55 = vadd.f32 %v3811_v37, %v3740_v13  ;;  %v3873_v36 = vmul.f32 %v3858_v46, %v15684_v45  ;;  %v8087_v34 = vld [vmem:[#allocation3 + $0x1d0] sm:$0x1] }
 0x2d9   : > { %v3834_v41 = vadd.f32 %v3817_v32, %v3743_v10  ;;  %v3835_v5 = vadd.f32 %v3819_v60, %v3744_v61  ;;  %v3874_v28 = vmul.f32 %v3862_v63, %v18806_v58  ;;  %v3877_v51 = vmul.f32 %v3858_v46, %v15654_v44  ;;  %v8088_v61 = vld [vmem:[#allocation3 + $0x1d8] sm:$0x1]  ;;  %v15763_v46 = vpop.permute.xlu1 %4979 }
 0x2da   : > { %v3878_v56 = vmul.f32 %v3862_v63, %v3843_v33  ;;  %v3897_v30 = vrot.slane %v3869_v4, 7  ;;  %v3898_v6 = vrot.slane %v3873_v36, 7  ;;  %v3900_v57 = vrot.slane %v3870_v31, 7  ;;  %v15793_v36 = vld [vmem:[#allocation4 + $0x48] sm:$0x7] }
 0x2db   : > { %v3901_v42 = vrot.slane %v3874_v28, 7  ;;  %v3907_v38 = vrot.slane %v3877_v51, 7  ;;  %v15756_v45 = vsel %vm363_vm1, %v15370_v0, %v15368_v20  ;;  %v8152_v13 = vrot.slane %v8078_v2, 7  ;;  %18813 = vst [vmem:[#allocation45_spill] sm:$0xff] %v15793_v36  ;;  %v15795_v2 = vld [vmem:[#allocation4 + $0x48] sm:$0xff]  ;;  %v15815_v51 = vpop.permute.xlu0 %8204 }
 0x2dc   : > { %v3899_v58 = vsel %vm3256_vm5, %v3897_v30, %v3898_v6  ;;  %v3909_v10 = vrot.slane %v3878_v56, 7  ;;  %4238 = vst [vmem:[#allocation4 + $0x58] sm:$0xff] %v15756_v45  ;;  %v7415_v44 = vsel %vm363_vm1, %v15397_v25, %v15386_v52  ;;  %v18809_v0 = vrot.slane %v15576_v49, 7  ;;  %v15784_v49 = vld [vmem:[#allocation4 + $0x8] sm:$0xf8]  ;;  %18814 = vst [vmem:[#allocation42_spill] sm:$0xff] %v15795_v2 }
 0x2dd   : > { %v3902_v63 = vsel %vm3256_vm5, %v3900_v57, %v3901_v42  ;;  %v3908_v62 = vsel %vm3256_vm5, %v3898_v6, %v3907_v38  ;;  %v15767_v20 = vadd.f32 %v3899_v58, %v3830_v17  ;;  %7455 = vst [vmem:[#allocation4 + $0x88] sm:$0x3] %v7415_v44  ;;  %v8163_v37 = vsel %vm3256_vm5, %v8152_v13, %v15649_v12  ;;  %v15782_v17 = vld [vmem:[#allocation4 + $0x8] sm:$0xff]  ;;  %v3937_v28 = vld [vmem:[#allocation4 + $0x90] sm:$0x3]  ;;  %v16017_v2 = vld [vmem:[#allocation4 + $0x60] sm:$0xff] }
 0x2de   : > { %v8153_v43 = vsel %vm3256_vm5, %v18809_v0, %v8152_v13  ;;  %v3910_v40 = vsel %vm3256_vm5, %v3901_v42, %v3909_v10  ;;  %v15775_v48 = vadd.f32 %v3902_v63, %v3831_v55  ;;  %v15777_v33 = vadd.f32 %v3908_v62, %v3834_v41  ;;  %18810 = vst [vmem:[#allocation43_spill] sm:$0xff] %v15782_v17  ;;  %v15791_v55 = vld [vmem:[#allocation4 + $0x28] sm:$0xff]  ;;  %v18821_v13 = vld [vmem:[#allocation74_spill] sm:$0xff] }
 0x2df   : > { %8202 = vrot.lane.b32.xlu1 %v8153_v43, %s11058_s14  ;;  %18811 = vst [vmem:[#allocation44_spill] sm:$0xff] %v15784_v49  ;;  %v15786_v4 = vadd.f32 %v3910_v40, %v3835_v5  ;;  %v7414_v31 = vsel %vm363_vm1, %v15447_v3, %v15397_v25  ;;  %v8172_v32 = vrot.slane %v8088_v61, 7  ;;  %v8170_v60 = vrot.slane %v8087_v34, 7  ;;  %18812 = vst [vmem:[#allocation39_spill] sm:$0xff] %v15791_v55  ;;  %v15817_v56 = vld [vmem:[#allocation4 + $0x8] sm:$0xc0]  ;;  %v15855_v34 = vpop.permute.xlu1 %4989 }
 0x2e0   : > { %7454 = vst [vmem:[#allocation4 + $0x80] sm:$0x3] %v7414_v31  ;;  %v15800_v41 = vsel %vm363_vm1, %v15399_v27, %v15495_v19  ;;  %v15805_v5 = vsel %vm2166_vm10, %v15563_v22, %v15431_v50  ;;  %v8225_v25 = vsel %vm2166_vm10, %v15431_v50, %v15542_v47  ;;  %v15813_v3 = vsel %vm2166_vm10, %v15623_v8, %v15503_v18  ;;  %v15819_v27 = vld [vmem:[#allocation4 + $0x48] sm:$0x3f]  ;;  %v15838_v57 = vld [vmem:[#allocation4 + $0x28] sm:$0x80] }
 0x2e1   : > { %18815 = vst [vmem:[#allocation53_spill] sm:$0xff] %v15817_v56  ;;  %18816 = vst [vmem:[#allocation19_spill] sm:$0xff] %v15819_v27  ;;  %v15821_v19 = vld [vmem:[#allocation4 + $0x28] sm:$0xfe]  ;;  %v8173_v50 = vsel %vm3256_vm5, %v15649_v12, %v8172_v32  ;;  %v8171_v22 = vsel %vm3256_vm5, %v15649_v12, %v8170_v60  ;;  %v8229_v8 = vsel %vm2166_vm10, %v15475_v39, %v15592_v9  ;;  %v15857_v63 = vld [vmem:[#allocation4 + $0x10] sm:$0xf8] }
 0x2e2   : > { %18817 = vst [vmem:[#allocation22_spill] sm:$0xff] %v15821_v19  ;;  %4242 = vst [vmem:[#allocation4 + $0x78] sm:$0xff] %v15800_v41  ;;  %v8233_v30 = vsel %vm2166_vm10, %v15503_v18, %v15671_v29  ;;  %v15836_v6 = vld [vmem:[#allocation4 + $0x28] sm:$0xf0]  ;;  %v15846_v38 = vsel %vm2166_vm10, %v15712_v11, %v15475_v39  ;;  %v15851_v58 = vsel %vm2166_vm10, %v18821_v13, %v15738_v7  ;;  %v3938_v18 = vld [vmem:[#allocation4 + $0x98] sm:$0x3]  ;;  %8220 = vrot.lane.b32.xlu0 %v8171_v22, %s11058_s14 }
 0x2e3   : > { %18818 = vst [vmem:[#allocation55_spill] sm:$0xff] %v15836_v6  ;;  %18819 = vst [vmem:[#allocation70_spill] sm:$0xff] %v15838_v57  ;;  %v15840_v42 = vld [vmem:[#allocation4 + $0x48] sm:$0xfc]  ;;  %8212 = vrot.lane.b32.xlu1 %v8163_v37, %s11058_s14  ;;  %v15859_v62 = vld [vmem:[#allocation4 + $0x10] sm:$0xc0]  ;;  %v4206_v37 = vsel %vm363_vm1, %v15726_v21, %v15687_v14  ;;  %v8236_v6 = vsel %vm2166_vm10, %v15815_v51, %v15749_v26 }
 0x2e4   : > { %18820 = vst [vmem:[#allocation50_spill] sm:$0xff] %v15840_v42  ;;  %8265 = vst [vmem:[#allocation4 + $0x8] sm:$0xff] %v8225_v25  ;;  %v10957_v10 = vld [vmem:[#allocation5 + $0xa2] ss:$8 sm:$0xf] }
 0x2e5   : > { %v3953_v44 = vrot.slane %v10957_v10, %v18794_v53  ;;  %v3957_v61 = vrot.slane %v10957_v10, %v18796_v15  ;;  %8269 = vst [vmem:[#allocation4 + $0x28] sm:$0xff] %v8229_v8  ;;  %8273 = vst [vmem:[#allocation4 + $0x48] sm:$0xff] %v8233_v30  ;;  %v10958_v39 = vld [vmem:[#allocation5 + $0x1] ss:$8 sm:$0xf] }
 0x2e6   : > { %v4269_v11 = vrot.slane %v10958_v39, %v18794_v53  ;;  %v4273_v0 = vrot.slane %v10958_v39, %v18796_v15  ;;  %v18822_v43 = vld [vmem:[#allocation72_spill] sm:$0xff]  ;;  %5055 = vst [vmem:[#allocation4 + $0x10] sm:$0xff] %v15851_v58  ;;  %v18823_v60 = vld [vmem:[#allocation13_spill] sm:$0xff]  ;;  %v18824_v8 = vld [vmem:[#allocation63_spill] sm:$0xff] }
 0x2e7   : > { %v4205_v40 = vsel %vm363_vm1, %v18822_v43, %v15726_v21  ;;  %v3964_v31 = vmul.f32 %v3953_v44, %v15731_v16  ;;  %v3965_v32 = vmul.f32 %v3957_v61, %v15751_v1  ;;  %v3968_v25 = vmul.f32 %v3953_v44, %v18823_v60  ;;  %4246 = vst [vmem:[#allocation4 + $0x98] sm:$0x3] %v4206_v37  ;;  %v15874_v13 = vld [vmem:[#allocation5 + $0x62] ss:$8 sm:$0xf] }
 0x2e8   : > { %v3969_v30 = vmul.f32 %v3957_v61, %v18824_v8  ;;  %4245 = vst [vmem:[#allocation4 + $0x90] sm:$0x3] %v4205_v40  ;;  %v3972_v10 = vmul.f32 %v3953_v44, %v3937_v28  ;;  %v3973_v39 = vmul.f32 %v3957_v61, %v3938_v18  ;;  %v15878_v14 = vmul.f32 %v4269_v11, %v15510_v59  ;;  %v7696_v16 = vld [vmem:[#allocation4 + $0x68] sm:$0x1]  ;;  %v15886_v8 = vpop.permute.xlu0 %4971  ;;  %v15888_v22 = vld [vmem:[#allocation4] sm:$0xff]  ;;  %v18826_v44 = vld [vmem:[#allocation34_spill] sm:$0xff] }
 0x2e9   : > { %v15881_v21 = vmul.f32 %v4273_v0, %v15520_v24  ;;  %v15883_v1 = vld [vmem:[#allocation5 + $0x81] ss:$8 sm:$0xf]  ;;  %8222 = vrot.lane.b32.xlu1 %v8173_v50, %s11058_s14  ;;  %v3992_v43 = vrot.slane %v3964_v31, 2  ;;  %v3993_v40 = vrot.slane %v3968_v25, 2  ;;  %v3995_v37 = vrot.slane %v3965_v32, 2 }
 0x2ea   : > { %v3996_v60 = vrot.slane %v3969_v30, 2  ;;  %18825 = vst [vmem:[#allocation58_spill] sm:$0xff] %v15888_v22  ;;  %v4002_v28 = vrot.slane %v3972_v10, 2  ;;  %v4004_v18 = vrot.slane %v3973_v39, 2  ;;  %v4284_v59 = vmul.f32 %v4269_v11, %v15608_v35  ;;  %v15892_v61 = vld [vmem:[#allocation4] sm:$0xf8]  ;;  %v15913_v39 = vpop.permute.xlu1 %8216 }
 0x2eb   : > { %v4285_v24 = vmul.f32 %v4273_v0, %v18826_v44  ;;  %18827 = vst [vmem:[#allocation12_spill] sm:$0xff] %v15892_v61  ;;  %v15894_v29 = vld [vmem:[#allocation4] sm:$0xc0]  ;;  %v15896_v9 = vld [vmem:[#allocation4 + $0x30] sm:$0xfe]  ;;  %v3994_v32 = vsel %vm793_vm7, %v3992_v43, %v3993_v40  ;;  %18850 = vst [vmem:[#allocation69_spill] sm:$0xff] %v16017_v2 }
 0x2ec   : > { %18828 = vst [vmem:[#allocation18_spill] sm:$0xff] %v15894_v29  ;;  %v15898_v50 = vld [vmem:[#allocation4 + $0x30] sm:$0xf0]  ;;  %v3997_v25 = vsel %vm793_vm7, %v3995_v37, %v3996_v60  ;;  %v18830_v0 = vld [vmem:[#allocation8_spill] sm:$0xff]  ;;  %8264 = vst [vmem:[#allocation4] sm:$0xff] %v15805_v5  ;;  %v4003_v47 = vsel %vm793_vm7, %v3993_v40, %v4002_v28  ;;  %v4005_v52 = vsel %vm793_vm7, %v3996_v60, %v4004_v18  ;;  %v4982_v49 = vpop.permute.xlu0 %4981 }
 0x2ed   : > { %v15900_v31 = vld [vmem:[#allocation4 + $0x30] sm:$0x80]  ;;  %v15911_v10 = vrot.slane %v15874_v13, %v18830_v0  ;;  %v15919_v43 = vadd.f32 %v3994_v32, %v15767_v20  ;;  %v15922_v37 = vadd.f32 %v3997_v25, %v15775_v48  ;;  %v5684_v29 = vld [vmem:[#allocation3 + $0xc8] sm:$0xff]  ;;  %v4020_v61 = vadd.f32 %v4003_v47, %v15777_v33  ;;  %v15936_v60 = vld [vmem:[#allocation3 + $0x118] sm:$0xff] }
 0x2ee   : > { %v18829_v30 = vld [vmem:[#allocation62_spill] sm:$0xff]  ;;  %v4021_v22 = vadd.f32 %v4005_v52, %v15786_v4  ;;  %v15932_v40 = vrot.slane %v15883_v1, %v18830_v0  ;;  %v15934_v20 = vld [vmem:[#allocation4 + $0x68] sm:$0x7f]  ;;  %18835 = vst [vmem:[#allocation75_spill] sm:$0xff] %v15936_v60  ;;  %v8237_v28 = vsel %vm2166_vm10, %v15749_v26, %v15715_v23  ;;  %v16023_v19 = vld [vmem:[#allocation4 + $0x40] sm:$0xfc] }
 0x2ef   : > { %v15907_v11 = vsel %vm2166_vm10, %v18829_v30, %v15763_v46  ;;  %18831 = vst [vmem:[#allocation68_spill] sm:$0xff] %v15911_v10  ;;  %v7787_v30 = vld [vmem:[#allocation4 + $0x68] sm:$0xf]  ;;  %v15928_v5 = vmul.f32 %v15911_v10, %v7696_v16  ;;  %18834 = vst [vmem:[#allocation21_spill] sm:$0xff] %v15934_v20  ;;  %v4300_v48 = vld [vmem:[#allocation4 + $0x50] sm:$0x7]  ;;  %v15961_v20 = vadd.f32 %v4284_v59, %v4020_v61 }
 0x2f0   : > { %5059 = vst [vmem:[#allocation4 + $0x30] sm:$0xff] %v15907_v11  ;;  %18833 = vst [vmem:[#allocation59_spill] sm:$0xff] %v15932_v40  ;;  %v15941_v18 = vld [vmem:[#allocation5 + $0x20] ss:$8 sm:$0xf]  ;;  %v15963_v57 = vadd.f32 %v4285_v24, %v4021_v22  ;;  %v15967_v56 = vmul.f32 %v15932_v40, %v7787_v30 }
 0x2f1   : > { %18832 = vst [vmem:[#allocation71_spill] sm:$0xff] %v15928_v5  ;;  %v15945_v52 = vrot.slane %v15941_v18, %v18794_v53  ;;  %v15947_v47 = vld [vmem:[#allocation5 + $0x27] ss:$8 sm:$0xf]  ;;  %v4391_v25 = vld [vmem:[#allocation4 + $0x50] sm:$0x3f]  ;;  %v4320_v26 = vrot.slane %v15941_v18, %v18796_v15 }
 0x2f2   : > { %v15951_v33 = vrot.slane %v15947_v47, %v18794_v53  ;;  %v18836_v4 = vld [vmem:[#allocation82_spill] sm:$0xff]  ;;  %18838 = vst [vmem:[#allocation24_spill] sm:$0xff] %v15967_v56  ;;  %8277 = vst [vmem:[#allocation4 + $0x68] sm:$0xff] %v8237_v28  ;;  %v7786_v24 = vld [vmem:[#allocation4 + $0x60] sm:$0xf] }
 0x2f3   : > { %v18837_v16 = vrot.slane %v18836_v4, 7  ;;  %v15957_v42 = vld [vmem:[#allocation4 + $0x10] sm:$0xf8]  ;;  %v7695_v4 = vld [vmem:[#allocation4 + $0x60] sm:$0x1]  ;;  %v15974_v59 = vmul.f32 %v15945_v52, %v15857_v63  ;;  %v15977_v22 = vmul.f32 %v15945_v52, %v4300_v48  ;;  %v18842_v63 = vld [vmem:[#allocation51_spill] sm:$0xff] }
 0x2f4   : > { %v15959_v23 = vld [vmem:[#allocation4 + $0x10] sm:$0xc0]  ;;  %v15979_v61 = vld [vmem:[#allocation4 + $0x20] sm:$0xff]  ;;  %v15995_v27 = vsel %vm2166_vm10, %v18842_v63, %v15855_v34  ;;  %v18849_v63 = vrot.slane %v15936_v60, 7  ;;  %v4388_v10 = vld [vmem:[#allocation4 + $0x18] sm:$0xc0] }
 0x2f5   : > { %v5730_v32 = vsel %vm3256_vm5, %v18837_v16, %v15649_v12  ;;  %v15969_v36 = vld [vmem:[#allocation4 + $0x50] sm:$0xfc]  ;;  %v5738_v16 = vrot.slane %v5684_v29, 7  ;;  %18839 = vst [vmem:[#allocation16_spill] sm:$0xff] %v15979_v61  ;;  %v15981_v30 = vld [vmem:[#allocation4 + $0x40] sm:$0x7]  ;;  %v15990_v29 = vmul.f32 %v15951_v33, %v4391_v25 }
 0x2f6   : > { %5788 = vst [vmem:[#allocation4 + $0x10] sm:$0xff] %v5730_v32  ;;  %18840 = vst [vmem:[#allocation73_spill] sm:$0xff] %v15981_v30  ;;  %v15983_v28 = vld [vmem:[#allocation4 + $0x40] sm:$0xff]  ;;  %v15987_v32 = vmul.f32 %v15951_v33, %v15859_v62  ;;  %v18843_v48 = vld [vmem:[#allocation10_spill] sm:$0xff] }
 0x2f7   : > { %18841 = vst [vmem:[#allocation9_spill] sm:$0xff] %v15983_v28  ;;  %v15999_v55 = vrot.slane %v15874_v13, %v18843_v48  ;;  %v7877_v61 = vld [vmem:[#allocation4 + $0x60] sm:$0x7f]  ;;  %v8215_v28 = vpop.permute.xlu1 %8214  ;;  %v5685_v56 = vld [vmem:[#allocation3 + $0xd0] sm:$0xff]  ;;  %v16007_v25 = vld [vmem:[#allocation4 + $0x20] sm:$0x80]  ;;  %v5739_v17 = vsel %vm3256_vm5, %v15649_v12, %v5738_v16  ;;  %v5747_v40 = vsel %vm3256_vm5, %v5738_v16, %v18849_v63  ;;  %v16037_v2 = vrot.slane %v15883_v1, %v18843_v48 }
 0x2f8   : > { %v16001_v30 = vld [vmem:[#allocation5 + $0xa0] ss:$8 sm:$0xf]  ;;  %v16003_v5 = vld [vmem:[#allocation4 + $0x20] sm:$0xfe]  ;;  %18848 = vst [vmem:[#allocation30_spill] sm:$0xff] %v16007_v25  ;;  %v8240_v63 = vsel %vm2166_vm10, %v8215_v28, %v15913_v39 }
 0x2f9   : > { %18844 = vst [vmem:[#allocation47_spill] sm:$0xff] %v15999_v55  ;;  %18845 = vst [vmem:[#allocation46_spill] sm:$0xff] %v16001_v30  ;;  %v16005_v62 = vld [vmem:[#allocation4 + $0x20] sm:$0xf0]  ;;  %v16026_v0 = vld [vmem:[#allocation4 + $0x38] sm:$0xfe]  ;;  %v16033_v13 = vmul.f32 %v15999_v55, %v7695_v4  ;;  %v16054_v4 = vsel %vm2166_vm10, %v15738_v7, %v15886_v8  ;;  %v16070_v7 = vsel %vm2166_vm10, %v15763_v46, %v4982_v49  ;;  %v4992_v8 = vpop.permute.xlu0 %4991 }
 0x2fa   : > { %18846 = vst [vmem:[#allocation67_spill] sm:$0xff] %v16003_v5  ;;  %18847 = vst [vmem:[#allocation77_spill] sm:$0xff] %v16005_v62  ;;  %v4297_v5 = vld [vmem:[#allocation4 + $0x18] sm:$0xf8]  ;;  %v16019_v62 = vld [vmem:[#allocation3 + $0x120] sm:$0xff] }
 0x2fb   : > { %5063 = vst [vmem:[#allocation4 + $0x50] sm:$0xff] %v15995_v27  ;;  %18851 = vst [vmem:[#allocation14_spill] sm:$0xff] %v16019_v62  ;;  %v16021_v25 = vld [vmem:[#allocation4 + $0x40] sm:$0x3f]  ;;  %v16028_v16 = vld [vmem:[#allocation4 + $0x38] sm:$0xf0] }
 0x2fc   : > { %18852 = vst [vmem:[#allocation65_spill] sm:$0xff] %v16021_v25  ;;  %18853 = vst [vmem:[#allocation85_spill] sm:$0xff] %v16023_v19  ;;  %v16039_v25 = vld [vmem:[#allocation4 + $0x30] sm:$0xfe]  ;;  %v16056_v1 = vld [vmem:[#allocation4 + $0x80] sm:$0x3] }
 0x2fd   : > { %8268 = vst [vmem:[#allocation4 + $0x20] sm:$0xff] %v15846_v38  ;;  %18854 = vst [vmem:[#allocation54_spill] sm:$0xff] %v16033_v13  ;;  %v16041_v19 = vld [vmem:[#allocation4 + $0x30] sm:$0xf0]  ;;  %v16046_v38 = vrot.slane %v16001_v30, %v18843_v48  ;;  %v4301_v55 = vld [vmem:[#allocation4 + $0x58] sm:$0x7]  ;;  %v16066_v30 = vmul.f32 %v16037_v2, %v7786_v24  ;;  %v4328_v48 = vmul.f32 %v4320_v26, %v4297_v5 }
 0x2fe   : > { %18855 = vst [vmem:[#allocation61_spill] sm:$0xff] %v16037_v2  ;;  %8272 = vst [vmem:[#allocation4 + $0x40] sm:$0xff] %v15813_v3  ;;  %v16060_v3 = vld [vmem:[#allocation4 + $0x30] sm:$0x80]  ;;  %v16062_v60 = vld [vmem:[#allocation4 + $0x38] sm:$0x80] }
 0x2ff   : > { %18856 = vst [vmem:[#allocation83_spill] sm:$0xff] %v16046_v38  ;;  %18857 = vst [vmem:[#allocation33_spill] sm:$0xff] %v16056_v1  ;;  %v4392_v51 = vld [vmem:[#allocation4 + $0x58] sm:$0x3f]  ;;  %v16076_v28 = vmul.f32 %v16046_v38, %v7877_v61  ;;  %v18860_v24 = vld [vmem:[#allocation57_spill] sm:$0xff]  ;;  %v4336_v1 = vmul.f32 %v4320_v26, %v4301_v55  ;;  %v4358_v5 = vrot.slane %v4328_v48, 3 }
 0x300   : > { %18858 = vst [vmem:[#allocation11_spill] sm:$0xff] %v16066_v30  ;;  %8276 = vst [vmem:[#allocation4 + $0x60] sm:$0xff] %v8236_v6  ;;  %v4411_v6 = vrot.slane %v15947_v47, %v18796_v15  ;;  %v18861_v46 = vrot.slane %v18860_v24, 7  ;;  %v16093_v47 = vsel %vm2166_vm10, %v15855_v34, %v4992_v8  ;;  %v4331_v34 = vmul.f32 %v15945_v52, %v15608_v35 }
 0x301   : > { %8280 = vst [vmem:[#allocation4 + $0x80] sm:$0x3] %v8240_v63  ;;  %5056 = vst [vmem:[#allocation4 + $0x18] sm:$0xff] %v16054_v4  ;;  %v5740_v63 = vrot.slane %v5685_v56, 7  ;;  %v4332_v30 = vmul.f32 %v4320_v26, %v18826_v44 }
 0x302   : > { %5792 = vst [vmem:[#allocation4 + $0x30] sm:$0xff] %v5739_v17  ;;  %18859 = vst [vmem:[#allocation81_spill] sm:$0xff] %v16076_v28  ;;  %v5733_v49 = vsel %vm3256_vm5, %v18861_v46, %v15649_v12  ;;  %v18209_v17 = vrot.slane %v16019_v62, 7  ;;  %v4419_v13 = vmul.f32 %v4411_v6, %v4388_v10  ;;  %v4427_v61 = vmul.f32 %v4411_v6, %v4392_v51  ;;  %v16087_v28 = vld [vmem:[#allocation4 + $0x58] sm:$0xfc] }
 0x303   : > { %5060 = vst [vmem:[#allocation4 + $0x38] sm:$0xff] %v16070_v7  ;;  %v5741_v38 = vsel %vm3256_vm5, %v15649_v12, %v5740_v63  ;;  %v16095_v24 = vld [vmem:[#allocation4 + $0x50] sm:$0x7]  ;;  %5064 = vst [vmem:[#allocation4 + $0x58] sm:$0xff] %v16093_v47  ;;  %v4288_v10 = vadd.f32 %v15878_v14, %v15919_v43  ;;  %v4289_v12 = vadd.f32 %v15881_v21, %v15922_v37  ;;  %v4367_v51 = vrot.slane %v4336_v1, 3 }
 0x304   : > { %v16097_v56 = vld [vmem:[#allocation4 + $0x50] sm:$0x3f]  ;;  %v5749_v55 = vsel %vm3256_vm5, %v5740_v63, %v18209_v17  ;;  %v4449_v8 = vrot.slane %v4419_v13, 6  ;;  %v4458_v18 = vrot.slane %v4427_v61, 6  ;;  %v4356_v2 = vrot.slane %v4331_v34, 3 }
 0x305   : > { %18862 = vst [vmem:[#allocation79_spill] sm:$0xff] %v16097_v56  ;;  %v16099_v46 = vld [vmem:[#allocation4 + $0x50] sm:$0xfc]  ;;  %v4422_v63 = vmul.f32 %v15951_v33, %v15608_v35  ;;  %v4423_v17 = vmul.f32 %v4411_v6, %v18826_v44  ;;  %v18864_v35 = vrot.slane %v15974_v59, 3  ;;  %v4359_v33 = vrot.slane %v4332_v30, 3 }
 0x306   : > { %18863 = vst [vmem:[#allocation74_spill] sm:$0xff] %v16099_v46  ;;  %5796 = vst [vmem:[#allocation4 + $0x50] sm:$0xff] %v5747_v40  ;;  %v10961_v14 = vld [vmem:[#allocation5 + $0x46] ss:$8 sm:$0xf]  ;;  %v18865_v1 = vrot.slane %v15977_v22, 3 }
 0x307   : > { %v4502_v43 = vrot.slane %v10961_v14, %v18794_v53  ;;  %v4506_v21 = vrot.slane %v10961_v14, %v18796_v15  ;;  %v10962_v37 = vld [vmem:[#allocation5 + $0x65] ss:$8 sm:$0xf]  ;;  %v4357_v44 = vsel %vm885_vm8, %v18864_v35, %v4356_v2  ;;  %v4447_v6 = vrot.slane %v4422_v63, 6  ;;  %v4577_v56 = vld [vmem:[#allocation4 + $0x70] sm:$0xf] }
 0x308   : > { %v16118_v40 = vrot.slane %v10962_v37, %v18794_v53  ;;  %v16121_v52 = vrot.slane %v10962_v37, %v18796_v15  ;;  %v16123_v48 = vld [vmem:[#allocation4 + $0x18] sm:$0xf8]  ;;  %v4366_v26 = vsel %vm885_vm8, %v4356_v2, %v18865_v1  ;;  %v4379_v14 = vadd.f32 %v4357_v44, %v4288_v10  ;;  %v4486_v10 = vld [vmem:[#allocation4 + $0x70] sm:$0x1]  ;;  %v4487_v44 = vld [vmem:[#allocation4 + $0x78] sm:$0x1] }
 0x309   : > { %v16125_v13 = vld [vmem:[#allocation4 + $0x18] sm:$0xc0]  ;;  %v4383_v37 = vadd.f32 %v4366_v26, %v15961_v20  ;;  %v4450_v62 = vrot.slane %v4423_v17, 6  ;;  %v4513_v46 = vmul.f32 %v4502_v43, %v15896_v9  ;;  %v4360_v30 = vsel %vm885_vm8, %v4358_v5, %v4359_v33 }
 0x30a   : > { %v16133_v61 = vld [vmem:[#allocation4 + $0x38] sm:$0xfe]  ;;  %5789 = vst [vmem:[#allocation4 + $0x18] sm:$0xff] %v5733_v49  ;;  %v4368_v22 = vsel %vm885_vm8, %v4359_v33, %v4367_v51  ;;  %v18866_v2 = vrot.slane %v15987_v32, 6  ;;  %v18867_v35 = vrot.slane %v15990_v29, 6  ;;  %v4380_v5 = vadd.f32 %v4360_v30, %v4289_v12 }
 0x30b   : > { %v16135_v34 = vld [vmem:[#allocation4 + $0x38] sm:$0xf0]  ;;  %v16149_v20 = vld [vmem:[#allocation4 + $0x58] sm:$0x7]  ;;  %v4384_v51 = vadd.f32 %v4368_v22, %v15963_v57  ;;  %v4451_v32 = vsel %vm498_vm3, %v4449_v8, %v4450_v62  ;;  %v4459_v33 = vsel %vm498_vm3, %v4450_v62, %v4458_v18  ;;  %v4514_v26 = vmul.f32 %v4506_v21, %v16026_v0  ;;  %v16165_v18 = vpop.permute.xlu0 %8218 }
 0x30c   : > { %v16139_v59 = vld [vmem:[#allocation4 + $0x38] sm:$0x80]  ;;  %v4448_v63 = vsel %vm498_vm3, %v18866_v2, %v4447_v6  ;;  %v4457_v49 = vsel %vm498_vm3, %v4447_v6, %v18867_v35  ;;  %v16151_v9 = vld [vmem:[#allocation4 + $0x58] sm:$0x3f]  ;;  %v4471_v6 = vadd.f32 %v4451_v32, %v4380_v5  ;;  %v4518_v35 = vmul.f32 %v4506_v21, %v15756_v45  ;;  %18870 = vst [vmem:[#allocation63_spill] sm:$0xff] %v16165_v18 }
 0x30d   : > { %5793 = vst [vmem:[#allocation4 + $0x38] sm:$0xff] %v5741_v38  ;;  %18868 = vst [vmem:[#allocation72_spill] sm:$0xff] %v16151_v9  ;;  %v16153_v17 = vld [vmem:[#allocation4 + $0x58] sm:$0xfc]  ;;  %v4470_v29 = vadd.f32 %v4448_v63, %v4379_v14  ;;  %v4474_v1 = vadd.f32 %v4457_v49, %v4383_v37  ;;  %v4517_v38 = vmul.f32 %v4502_v43, %v15736_v54  ;;  %v4541_v12 = vrot.slane %v4513_v46, 1 }
 0x30e   : > { %18869 = vst [vmem:[#allocation13_spill] sm:$0xff] %v16153_v17  ;;  %5797 = vst [vmem:[#allocation4 + $0x58] sm:$0xff] %v5749_v55  ;;  %v4475_v2 = vadd.f32 %v4459_v33, %v4384_v51  ;;  %v4521_v9 = vmul.f32 %v4502_v43, %v4486_v10  ;;  %v4522_v17 = vmul.f32 %v4506_v21, %v4487_v44  ;;  %v4544_v57 = vrot.slane %v4514_v26, 1  ;;  %v4578_v37 = vld [vmem:[#allocation4 + $0x78] sm:$0xf] }
 0x30f   : > { %v4542_v30 = vrot.slane %v4517_v38, 1  ;;  %v4545_v22 = vrot.slane %v4518_v35, 1  ;;  %v4604_v62 = vmul.f32 %v16118_v40, %v15898_v50  ;;  %v4605_v0 = vmul.f32 %v16121_v52, %v16028_v16  ;;  %v16172_v21 = vld [vmem:[#allocation4 + $0x88] sm:$0x3] }
 0x310   : > { %v4551_v8 = vrot.slane %v4521_v9, 1  ;;  %v4553_v14 = vrot.slane %v4522_v17, 1  ;;  %v4608_v46 = vmul.f32 %v16118_v40, %v15736_v54  ;;  %v4609_v43 = vmul.f32 %v16121_v52, %v15756_v45  ;;  %v10963_v35 = vld [vmem:[#allocation5 + $0x84] ss:$8 sm:$0xf] }
 0x311   : > { %v4543_v55 = vsel %vm701_vm6, %v4541_v12, %v4542_v30  ;;  %v8241_v50 = vsel %vm2166_vm10, %v15913_v39, %v16165_v18  ;;  %v4546_v16 = vsel %vm701_vm6, %v4544_v57, %v4545_v22  ;;  %v4612_v17 = vmul.f32 %v16118_v40, %v4577_v56  ;;  %v4668_v57 = vld [vmem:[#allocation4 + $0x70] sm:$0x7f]  ;;  %v18915_v18 = vld [vmem:[#allocation40_spill] sm:$0xff] }
 0x312   : > { %v4552_v63 = vsel %vm701_vm6, %v4542_v30, %v4551_v8  ;;  %v4565_v49 = vadd.f32 %v4543_v55, %v4470_v29  ;;  %8281 = vst [vmem:[#allocation4 + $0x88] sm:$0x3] %v8241_v50  ;;  %v4554_v10 = vsel %vm701_vm6, %v4545_v22, %v4553_v14  ;;  %v4566_v44 = vadd.f32 %v4546_v16, %v4471_v6  ;;  %v4669_v22 = vld [vmem:[#allocation4 + $0x78] sm:$0x7f]  ;;  %v4759_v16 = vld [vmem:[#allocation4 + $0x70] sm:$0xff] }
 0x313   : > { %v4569_v9 = vadd.f32 %v4552_v63, %v4474_v1  ;;  %v4570_v5 = vadd.f32 %v4554_v10, %v4475_v2  ;;  %v4613_v51 = vmul.f32 %v16121_v52, %v4578_v37  ;;  %v4632_v32 = vrot.slane %v4604_v62, 4  ;;  %v10964_v1 = vld [vmem:[#allocation5 + $0xa3] ss:$8 sm:$0xf] }
 0x314   : > { %v4633_v33 = vrot.slane %v4608_v46, 4  ;;  %v4635_v26 = vrot.slane %v4605_v0, 4  ;;  %v4636_v38 = vrot.slane %v4609_v43, 4  ;;  %v4642_v39 = vrot.slane %v4612_v17, 4 }
 0x315   : > { %v4684_v12 = vrot.slane %v10963_v35, %v18794_v53  ;;  %v4644_v30 = vrot.slane %v4613_v51, 4  ;;  %v4688_v6 = vrot.slane %v10963_v35, %v18796_v15  ;;  %v16186_v56 = vrot.slane %v10964_v1, %v18794_v53 }
 0x316   : > { %v4634_v29 = vsel %vm977_vm9, %v4632_v32, %v4633_v33  ;;  %v4637_v40 = vsel %vm977_vm9, %v4635_v26, %v4636_v38  ;;  %v4643_v52 = vsel %vm977_vm9, %v4633_v33, %v4642_v39 }
 0x317   : > { %v4656_v2 = vadd.f32 %v4634_v29, %v4565_v49  ;;  %v4695_v8 = vmul.f32 %v4684_v12, %v15900_v31  ;;  %v4645_v62 = vsel %vm977_vm9, %v4636_v38, %v4644_v30  ;;  %v4657_v0 = vadd.f32 %v4637_v40, %v4566_v44  ;;  %v10966_v40 = vld [vmem:[#allocation5 + $0x21] ss:$8 sm:$0xf] }
 0x318   : > { %v4660_v55 = vadd.f32 %v4643_v52, %v4569_v9  ;;  %v4696_v14 = vmul.f32 %v4688_v6, %v16062_v60  ;;  %v4661_v37 = vadd.f32 %v4645_v62, %v4570_v5  ;;  %v4699_v46 = vmul.f32 %v4684_v12, %v15736_v54  ;;  %v10967_v62 = vld [vmem:[#allocation5 + $0x40] ss:$8 sm:$0xf] }
 0x319   : > { %v4700_v43 = vmul.f32 %v4688_v6, %v15756_v45  ;;  %v4703_v50 = vmul.f32 %v4684_v12, %v4668_v57  ;;  %v4704_v63 = vmul.f32 %v4688_v6, %v4669_v22  ;;  %v4723_v10 = vrot.slane %v4695_v8, 7  ;;  %v10965_v57 = vld [vmem:[#allocation5 + $0x2] ss:$8 sm:$0xf] }
 0x31a   : > { %v4726_v17 = vrot.slane %v4696_v14, 7  ;;  %v16196_v49 = vrot.slane %v10964_v1, %v18796_v15  ;;  %v4724_v31 = vrot.slane %v4699_v46, 7  ;;  %v4790_v44 = vmul.f32 %v16186_v56, %v15969_v36 }
 0x31b   : > { %v4727_v51 = vrot.slane %v4700_v43, 7  ;;  %v4733_v32 = vrot.slane %v4703_v50, 7  ;;  %v4735_v60 = vrot.slane %v4704_v63, 7  ;;  %v16203_v45 = vmul.f32 %v16186_v56, %v4759_v16 }
 0x31c   : > { %v4791_v54 = vmul.f32 %v16196_v49, %v16087_v28  ;;  %v16207_v9 = vmul.f32 %v16196_v49, %v15800_v41  ;;  %v4725_v5 = vsel %vm3256_vm5, %v4723_v10, %v4724_v31  ;;  %v4818_v38 = vrot.slane %v4790_v44, 2 }
 0x31d   : > { %v4728_v33 = vsel %vm3256_vm5, %v4726_v17, %v4727_v51  ;;  %v4734_v26 = vsel %vm3256_vm5, %v4724_v31, %v4733_v32  ;;  %v4736_v36 = vsel %vm3256_vm5, %v4727_v51, %v4735_v60  ;;  %v4747_v39 = vadd.f32 %v4725_v5, %v4656_v2 }
 0x31e   : > { %v4748_v35 = vadd.f32 %v4728_v33, %v4657_v0  ;;  %v16213_v12 = vadd.f32 %v4734_v26, %v4660_v55  ;;  %v16215_v28 = vadd.f32 %v4736_v36, %v4661_v37  ;;  %v4819_v29 = vrot.slane %v16203_v45, 2  ;;  %v10968_v33 = vld [vmem:[#allocation5 + $0x47] ss:$8 sm:$0xf] }
 0x31f   : > { %v4821_v30 = vrot.slane %v4791_v54, 2  ;;  %v4822_v41 = vrot.slane %v16207_v9, 2  ;;  %v16220_v6 = vrot.slane %v10965_v57, %v18794_v53  ;;  %v16223_v1 = vrot.slane %v10965_v57, %v18796_v15 }
 0x320   : > { %v16226_v52 = vrot.slane %v10966_v40, %v18794_v53  ;;  %v16229_v2 = vrot.slane %v10966_v40, %v18796_v15  ;;  %v4820_v22 = vsel %vm793_vm7, %v4818_v38, %v4819_v29  ;;  %v16238_v0 = vrot.slane %v10967_v62, %v18794_v53 }
 0x321   : > { %v4823_v8 = vsel %vm793_vm7, %v4821_v30, %v4822_v41  ;;  %v16241_v55 = vrot.slane %v10967_v62, %v18796_v15  ;;  %v4842_v14 = vadd.f32 %v4820_v22, %v4747_v39  ;;  %v5106_v46 = vmul.f32 %v16220_v6, %v15851_v58 }
 0x322   : > { %v4843_v37 = vadd.f32 %v4823_v8, %v4748_v35  ;;  %v5107_v43 = vmul.f32 %v16223_v1, %v16054_v4  ;;  %v5153_v50 = vmul.f32 %v16226_v52, %v15957_v42  ;;  %v5154_v16 = vmul.f32 %v16229_v2, %v16123_v48 }
 0x323   : > { %v16253_v63 = vmul.f32 %v16226_v52, %v15907_v11  ;;  %v16257_v10 = vmul.f32 %v16229_v2, %v16070_v7  ;;  %v5114_v17 = vadd.f32 %v5106_v46, %v4842_v14  ;;  %v5244_v58 = vmul.f32 %v16238_v0, %v15959_v23 }
 0x324   : > { %v5115_v31 = vadd.f32 %v5107_v43, %v4843_v37  ;;  %v5245_v4 = vmul.f32 %v16241_v55, %v16125_v13  ;;  %v5181_v42 = vrot.slane %v5153_v50, 3  ;;  %v5184_v48 = vrot.slane %v5154_v16, 3 }
 0x325   : > { %v5182_v51 = vrot.slane %v16253_v63, 3  ;;  %v5185_v32 = vrot.slane %v16257_v10, 3  ;;  %v16267_v44 = vmul.f32 %v16238_v0, %v15907_v11  ;;  %v16271_v60 = vmul.f32 %v16241_v55, %v16070_v7 }
 0x326   : > { %v5272_v54 = vrot.slane %v5244_v58, 6  ;;  %v5275_v5 = vrot.slane %v5245_v4, 6  ;;  %v16280_v26 = vrot.slane %v10968_v33, %v18794_v53  ;;  %v16283_v38 = vrot.slane %v10968_v33, %v18796_v15 }
 0x327   : > { %v5183_v23 = vsel %vm885_vm8, %v5181_v42, %v5182_v51  ;;  %v5186_v13 = vsel %vm885_vm8, %v5184_v48, %v5185_v32  ;;  %v5273_v35 = vrot.slane %v16267_v44, 6  ;;  %v5276_v30 = vrot.slane %v16271_v60, 6 }
 0x328   : > { %v5205_v36 = vadd.f32 %v5183_v23, %v5114_v17  ;;  %v5206_v39 = vadd.f32 %v5186_v13, %v5115_v31  ;;  %v5339_v57 = vmul.f32 %v16280_v26, %v16039_v25  ;;  %v5340_v40 = vmul.f32 %v16283_v38, %v16133_v61  ;;  %v10969_v25 = vld [vmem:[#allocation5 + $0x66] ss:$8 sm:$0xf] }
 0x329   : > { %v16293_v22 = vmul.f32 %v16280_v26, %v15995_v27  ;;  %v16297_v8 = vmul.f32 %v16283_v38, %v16093_v47  ;;  %v5274_v62 = vsel %vm498_vm3, %v5272_v54, %v5273_v35  ;;  %v5277_v14 = vsel %vm498_vm3, %v5275_v5, %v5276_v30  ;;  %v10970_v5 = vld [vmem:[#allocation5 + $0x85] ss:$8 sm:$0xf] }
 0x32a   : > { %v16306_v37 = vrot.slane %v10969_v25, %v18794_v53  ;;  %v16309_v61 = vrot.slane %v10969_v25, %v18796_v15  ;;  %v5296_v46 = vadd.f32 %v5274_v62, %v5205_v36  ;;  %v5297_v43 = vadd.f32 %v5277_v14, %v5206_v39  ;;  %v5002_v39 = vpop.permute.xlu1 %5001 }
 0x32b   : > { %v5367_v50 = vrot.slane %v5339_v57, 1  ;;  %v5368_v16 = vrot.slane %v16293_v22, 1  ;;  %v5370_v17 = vrot.slane %v5340_v40, 1  ;;  %v5371_v31 = vrot.slane %v16297_v8, 1 }
 0x32c   : > { %v5430_v58 = vmul.f32 %v16306_v37, %v16041_v19  ;;  %v5431_v4 = vmul.f32 %v16309_v61, %v16135_v34  ;;  %v16322_v48 = vmul.f32 %v16306_v37, %v15995_v27  ;;  %v16326_v54 = vmul.f32 %v16309_v61, %v16093_v47  ;;  %v5000_v19 = vpop.permute.xlu0 %4999 }
 0x32d   : > { %v5369_v42 = vsel %vm701_vm6, %v5367_v50, %v5368_v16  ;;  %v16329_v23 = vrot.slane %v10970_v5, %v18794_v53  ;;  %v5372_v34 = vsel %vm701_vm6, %v5370_v17, %v5371_v31  ;;  %v16337_v14 = vrot.slane %v10970_v5, %v18796_v15  ;;  %v18871_v17 = vld [vmem:[#allocation60_spill] sm:$0xff] }
 0x32e   : > { %v5391_v13 = vadd.f32 %v5369_v42, %v5296_v46  ;;  %v5458_v33 = vrot.slane %v5430_v58, 4  ;;  %v5461_v36 = vrot.slane %v5431_v4, 4  ;;  %v5392_v57 = vadd.f32 %v5372_v34, %v5297_v43  ;;  %v4763_v58 = vld [vmem:[#allocation4 + $0x90] sm:$0x3]  ;;  %v4764_v4 = vld [vmem:[#allocation4 + $0x98] sm:$0x3] }
 0x32f   : > { %v18211_v40 = vrot.slane %v16322_v48, 4  ;;  %v18212_v62 = vrot.slane %v16326_v54, 4  ;;  %v5521_v25 = vmul.f32 %v16329_v23, %v16060_v3  ;;  %v16343_v50 = vmul.f32 %v16329_v23, %v15995_v27 }
 0x330   : > { %v16347_v46 = vsel %vm2166_vm10, %v18871_v17, %v5000_v19  ;;  %v16350_v43 = vsel %vm2166_vm10, %v5000_v19, %v5002_v39  ;;  %v5522_v27 = vmul.f32 %v16337_v14, %v16139_v59  ;;  %v16362_v5 = vmul.f32 %v16337_v14, %v16093_v47 }
 0x331   : > { %v5460_v42 = vsel %vm977_vm9, %v5458_v33, %v18211_v40  ;;  %v5463_v3 = vsel %vm977_vm9, %v5461_v36, %v18212_v62  ;;  %5067 = vst [vmem:[#allocation4 + $0x70] sm:$0xff] %v16347_v46  ;;  %5068 = vst [vmem:[#allocation4 + $0x78] sm:$0xff] %v16350_v43  ;;  %v5549_v39 = vrot.slane %v5521_v25, 7  ;;  %v5550_v33 = vrot.slane %v16343_v50, 7  ;;  %v18878_v50 = vld [vmem:[#allocation75_spill] sm:$0xff] }
 0x332   : > { %v5482_v19 = vadd.f32 %v5460_v42, %v5391_v13  ;;  %v5483_v34 = vadd.f32 %v5463_v3, %v5392_v57  ;;  %v5552_v17 = vrot.slane %v5522_v27, 7  ;;  %v5553_v40 = vrot.slane %v16362_v5, 7  ;;  %v10971_v27 = vld [vmem:[#allocation5 + $0xa4] ss:$8 sm:$0xf] }
 0x333   : > { %v4798_v36 = vmul.f32 %v16186_v56, %v4763_v58  ;;  %v4799_v59 = vmul.f32 %v16196_v49, %v4764_v4  ;;  %v5551_v47 = vsel %vm3256_vm5, %v5549_v39, %v5550_v33  ;;  %v5110_v62 = vmul.f32 %v16220_v6, %v15907_v11  ;;  %v18872_v6 = vld [vmem:[#allocation79_spill] sm:$0xff]  ;;  %v16401_v39 = vpop.permute.xlu1 %5011 }
 0x334   : > { %v5111_v13 = vmul.f32 %v16223_v1, %v16070_v7  ;;  %v5161_v57 = vmul.f32 %v16226_v52, %v16095_v24  ;;  %v5554_v25 = vsel %vm3256_vm5, %v5552_v17, %v5553_v40  ;;  %v16382_v56 = vadd.f32 %v5551_v47, %v5482_v19  ;;  %v18873_v52 = vld [vmem:[#allocation72_spill] sm:$0xff]  ;;  %v18874_v47 = vld [vmem:[#allocation74_spill] sm:$0xff] }
 0x335   : > { %v4828_v49 = vrot.slane %v4798_v36, 2  ;;  %v4830_v58 = vrot.slane %v4799_v59, 2  ;;  %v16384_v4 = vadd.f32 %v5554_v25, %v5483_v34  ;;  %v5162_v42 = vmul.f32 %v16229_v2, %v16149_v20 }
 0x336   : > { %v5191_v11 = vrot.slane %v5161_v57, 3  ;;  %v5252_v7 = vmul.f32 %v16238_v0, %v18872_v6  ;;  %v5253_v3 = vmul.f32 %v16241_v55, %v18873_v52  ;;  %v16399_v19 = vrot.slane %v10971_v27, %v18794_v53  ;;  %v16411_v0 = vpop.permute.xlu0 %5009 }
 0x337   : > { %v4829_v24 = vsel %vm793_vm7, %v4819_v29, %v4828_v49  ;;  %v4831_v1 = vsel %vm793_vm7, %v4822_v41, %v4830_v58  ;;  %v16409_v41 = vrot.slane %v10971_v27, %v18796_v15  ;;  %v18875_v44 = vrot.slane %v16322_v48, 4  ;;  %v6531_v22 = vpop.permute.xlu1 %6530 }
 0x338   : > { %v5312_v20 = vld [vmem:[#allocation4 + $0x70] sm:$0x1]  ;;  %v5313_v2 = vld [vmem:[#allocation4 + $0x78] sm:$0x1]  ;;  %v4846_v45 = vadd.f32 %v4829_v24, %v16213_v12  ;;  %v4847_v29 = vadd.f32 %v4831_v1, %v16215_v28  ;;  %v5192_v9 = vsel %vm885_vm8, %v5182_v51, %v5191_v11  ;;  %v5616_v12 = vmul.f32 %v16399_v19, %v18874_v47 }
 0x339   : > { %v5403_v34 = vld [vmem:[#allocation4 + $0x70] sm:$0xf]  ;;  %v5404_v55 = vld [vmem:[#allocation4 + $0x78] sm:$0xf]  ;;  %v5347_v36 = vmul.f32 %v16280_v26, %v5312_v20  ;;  %v5348_v59 = vmul.f32 %v16283_v38, %v5313_v2  ;;  %v5193_v51 = vrot.slane %v5162_v42, 3  ;;  %v5282_v49 = vrot.slane %v5252_v7, 6 }
 0x33a   : > { %v5438_v17 = vmul.f32 %v16306_v37, %v5403_v34  ;;  %v5439_v28 = vmul.f32 %v16309_v61, %v5404_v55  ;;  %v5118_v63 = vadd.f32 %v5110_v62, %v4846_v45  ;;  %v5119_v57 = vadd.f32 %v5111_v13, %v4847_v29  ;;  %v5494_v25 = vld [vmem:[#allocation4 + $0x70] sm:$0x7f]  ;;  %v5495_v24 = vld [vmem:[#allocation4 + $0x78] sm:$0x7f]  ;;  %v18877_v2 = vld [vmem:[#allocation13_spill] sm:$0xff] }
 0x33b   : > { %v5284_v58 = vrot.slane %v5253_v3, 6  ;;  %v5377_v11 = vrot.slane %v5347_v36, 1  ;;  %v5379_v6 = vrot.slane %v5348_v59, 1  ;;  %v5194_v26 = vsel %vm885_vm8, %v5185_v32, %v5193_v51  ;;  %v10816_v61 = vld [vmem:[%s17894_s5 + $0x204] ss:$16 sps:$4 sm:$0xff]   ;;  %v6529_v3 = vpop.permute.xlu0 %6528  ;;  %v6541_v5 = vpop.permute.xlu1 %6540 }
 0x33c   : > { %v5209_v37 = vadd.f32 %v5192_v9, %v5118_v63  ;;  %v5468_v38 = vrot.slane %v5438_v17, 4  ;;  %v5470_v1 = vrot.slane %v5439_v28, 4  ;;  %v5210_v62 = vadd.f32 %v5194_v26, %v5119_v57  ;;  %v10819_v32 = vld [vmem:[%s17894_s5 + $0x20c] ss:$16 sps:$4 sm:$0xff]   ;;  %9722 = vmatprep.subr.bf16.mxu0 %v10816_v61  ;;  %v5696_v45 = vld [vmem:[#allocation3 + $0x1b8] sm:$0x1] }
 0x33d   : > { %v5283_v13 = vsel %vm498_vm3, %v5273_v35, %v5282_v49  ;;  %v5285_v42 = vsel %vm498_vm3, %v5276_v30, %v5284_v58  ;;  %v5378_v10 = vsel %vm701_vm6, %v5368_v16, %v5377_v11  ;;  %v5380_v52 = vsel %vm701_vm6, %v5371_v31, %v5379_v6  ;;  %9808 = vmatprep.subr.bf16.mxu1 %v10819_v32  ;;  %v5697_v59 = vld [vmem:[#allocation3 + $0x1c0] sm:$0x1]  ;;  %v10972_v47 = vld [vmem:[#allocation3 + $0x50] sm:$0xff]  ;;  %v16489_v26 = vld [vmem:[#allocation4 + $0x18] sm:$0xff] }
 0x33e   : > { %v5300_v7 = vadd.f32 %v5283_v13, %v5209_v37  ;;  %v5469_v35 = vsel %vm977_vm9, %v18875_v44, %v5468_v38  ;;  %v18876_v60 = vrot.slane %v16326_v54, 4  ;;  %v5301_v16 = vadd.f32 %v5285_v42, %v5210_v62  ;;  %v16483_v11 = vld [vmem:[#allocation5 + $0x24] ss:$8 sm:$0xf]  ;;  %v16507_v44 = vld [vmem:[#allocation4 + $0x18] sm:$0xc0] }
 0x33f   : > { %v5529_v27 = vmul.f32 %v16329_v23, %v5494_v25  ;;  %v5530_v20 = vmul.f32 %v16337_v14, %v5495_v24  ;;  %v5617_v8 = vmul.f32 %v16409_v41, %v18877_v2  ;;  %v16452_v48 = vmul.f32 %v16399_v19, %v16347_v46  ;;  %v6539_v58 = vpop.permute.xlu0 %6538  ;;  %v16485_v6 = vld [vmem:[#allocation5 + $0x43] ss:$8 sm:$0xf] }
 0x340   : > { %v5471_v30 = vsel %vm977_vm9, %v18876_v60, %v5470_v1  ;;  %v5395_v31 = vadd.f32 %v5378_v10, %v5300_v7  ;;  %v16456_v54 = vmul.f32 %v16409_v41, %v16350_v43  ;;  %v5644_v34 = vrot.slane %v5616_v12, 2  ;;  %v16487_v24 = vld [vmem:[#allocation4 + $0x10] sm:$0xff]  ;;  %v16493_v38 = vld [vmem:[#allocation4 + $0x18] sm:$0xf8] }
 0x341   : > { %v5396_v29 = vadd.f32 %v5380_v52, %v5301_v16  ;;  %v5559_v9 = vrot.slane %v5529_v27, 7  ;;  %v5561_v23 = vrot.slane %v5530_v20, 7  ;;  %v5647_v55 = vrot.slane %v5617_v8, 2  ;;  %v16491_v37 = vld [vmem:[#allocation4 + $0x10] sm:$0xf8]  ;;  %v16503_v7 = vld [vmem:[#allocation4 + $0x38] sm:$0xff] }
 0x342   : > { %v5486_v14 = vadd.f32 %v5469_v35, %v5395_v31  ;;  %v18214_v17 = vrot.slane %v16452_v48, 2  ;;  %v18213_v36 = vrot.slane %v16456_v54, 2  ;;  %v5754_v28 = vrot.slane %v10972_v47, 7  ;;  %v18880_v61 = vld [vmem:[#allocation14_spill] sm:$0xff]  ;;  %v18882_v35 = vld [vmem:[#allocation15_spill] sm:$0xff]  ;;  %v18883_v16 = vld [vmem:[#allocation64_spill] sm:$0xff] }
 0x343   : > { %v5487_v46 = vadd.f32 %v5471_v30, %v5396_v29  ;;  %v5560_v43 = vsel %vm3256_vm5, %v5550_v33, %v5559_v9  ;;  %v5562_v12 = vsel %vm3256_vm5, %v5553_v40, %v5561_v23  ;;  %v5762_v63 = vrot.slane %v5696_v45, 7  ;;  %v16481_v40 = vld [vmem:[#allocation5 + $0x5] ss:$8 sm:$0xf]  ;;  %v16505_v52 = vld [vmem:[#allocation4 + $0x10] sm:$0xc0] }
 0x344   : > { %v16466_v57 = vadd.f32 %v5560_v43, %v5486_v14  ;;  %v16471_v51 = vsel %vm793_vm7, %v5644_v34, %v18214_v17  ;;  %v16476_v25 = vsel %vm793_vm7, %v5647_v55, %v18213_v36  ;;  %v18879_v49 = vrot.slane %v18878_v50, 7  ;;  %v16501_v32 = vld [vmem:[#allocation4 + $0x30] sm:$0xff]  ;;  %v16520_v8 = vld [vmem:[#allocation4 + $0x38] sm:$0xfe]  ;;  %v18887_v23 = vld [vmem:[#allocation41_spill] sm:$0xff] }
 0x345   : > { %v16495_v1 = vadd.f32 %v5562_v12, %v5487_v46  ;;  %v18881_v62 = vrot.slane %v18880_v61, 7  ;;  %v5763_v42 = vsel %vm3256_vm5, %v5754_v28, %v5762_v63  ;;  %v5764_v10 = vrot.slane %v5697_v59, 7  ;;  %v16518_v2 = vld [vmem:[#allocation4 + $0x30] sm:$0xfe]  ;;  %v18884_v45 = vld [vmem:[#allocation23_spill] sm:$0xff]  ;;  %v18892_v47 = vld [vmem:[#allocation17_spill] sm:$0xff] }
 0x346   : > { %v5755_v33 = vsel %vm3256_vm5, %v18879_v49, %v5754_v28  ;;  %v5031_v60 = vsel %vm2166_vm10, %v18882_v35, %v16411_v0  ;;  %v5032_v30 = vsel %vm2166_vm10, %v16411_v0, %v16401_v39  ;;  %v6574_v27 = vsel %vm415_vm4, %v18883_v16, %v6529_v3  ;;  %v16522_v31 = vld [vmem:[#allocation4 + $0x30] sm:$0xf0]  ;;  %v18885_v0 = vld [vmem:[#allocation28_spill] sm:$0xff]  ;;  %v16537_v59 = vld [vmem:[#allocation4 + $0x38] sm:$0x80] }
 0x347   : > { %v5757_v13 = vsel %vm3256_vm5, %v18881_v62, %v5754_v28  ;;  %5800 = vst [vmem:[#allocation4 + $0x70] sm:$0xff] %v5755_v33  ;;  %v6575_v20 = vsel %vm415_vm4, %v6529_v3, %v6531_v22  ;;  %v5765_v34 = vsel %vm3256_vm5, %v5754_v28, %v5764_v10  ;;  %5071 = vst [vmem:[#allocation4 + $0x90] sm:$0x3] %v5031_v60  ;;  %v18886_v9 = vrot.slane %v18885_v0, 1  ;;  %v16533_v3 = vld [vmem:[#allocation4 + $0x38] sm:$0xf0] }
 0x348   : > { %5801 = vst [vmem:[#allocation4 + $0x78] sm:$0xff] %v5757_v13  ;;  %5072 = vst [vmem:[#allocation4 + $0x98] sm:$0x3] %v5032_v30  ;;  %v6578_v29 = vsel %vm415_vm4, %v18884_v45, %v6539_v58  ;;  %v6579_v39 = vsel %vm415_vm4, %v6539_v58, %v6541_v5  ;;  %v18888_v55 = vrot.slane %v18887_v23, 1  ;;  %v16535_v14 = vld [vmem:[#allocation4 + $0x30] sm:$0x80] }
 0x349   : > { %18889 = vst [vmem:[#allocation34_spill] sm:$0xff] %v16533_v3  ;;  %18890 = vst [vmem:[#allocation62_spill] sm:$0xff] %v16535_v14  ;;  %v18893_v46 = vld [vmem:[#allocation84_spill] sm:$0xff]  ;;  %v18895_v12 = vld [vmem:[#allocation27_spill] sm:$0xff] }
 0x34a   : > { %v6925_v22 = vsel %vm701_vm6, %v18888_v55, %v18886_v9  ;;  %18891 = vst [vmem:[#allocation82_spill] sm:$0xff] %v16537_v59  ;;  %6614 = vst [vmem:[#allocation4 + $0x10] sm:$0xff] %v6574_v27  ;;  %v18894_v43 = vrot.slane %v18893_v46, 4  ;;  %v18896_v63 = vrot.slane %v18895_v12, 4  ;;  %v18897_v49 = vld [vmem:[#allocation38_spill] sm:$0xff]  ;;  %v18899_v5 = vld [vmem:[#allocation76_spill] sm:$0xff] }
 0x34b   : > { %6615 = vst [vmem:[#allocation4 + $0x18] sm:$0xff] %v6575_v20  ;;  %v6949_v28 = vadd.f32 %v6925_v22, %v18892_v47  ;;  %v18898_v33 = vrot.slane %v18897_v49, 7  ;;  %v18900_v58 = vrot.slane %v18899_v5, 7  ;;  %v18901_v62 = vld [vmem:[#allocation36_spill] sm:$0xff]  ;;  %6618 = vst [vmem:[#allocation4 + $0x30] sm:$0xff] %v6578_v29  ;;  %v18904_v27 = vld [vmem:[#allocation22_spill] sm:$0xff] }
 0x34c   : > { %v7016_v50 = vsel %vm977_vm9, %v18896_v63, %v18894_v43  ;;  %v18902_v13 = vld [vmem:[#allocation48_spill] sm:$0xff]  ;;  %6619 = vst [vmem:[#allocation4 + $0x38] sm:$0xff] %v6579_v39  ;;  %v18906_v9 = vld [vmem:[#allocation42_spill] sm:$0xff]  ;;  %v18907_v55 = vld [vmem:[#allocation55_spill] sm:$0xff] }
 0x34d   : > { %v7107_v61 = vsel %vm3256_vm5, %v18900_v58, %v18898_v33  ;;  %v7230_v10 = vadd.f32 %v18902_v13, %v18901_v62  ;;  %v18903_v35 = vld [vmem:[#allocation8_spill] sm:$0xff]  ;;  %v7040_v0 = vadd.f32 %v7016_v50, %v6949_v28  ;;  %v18908_v22 = vld [vmem:[#allocation59_spill] sm:$0xff]  ;;  %v18912_v58 = vld [vmem:[#allocation45_spill] sm:$0xff] }
 0x34e   : > { %v7476_v60 = vrot.slane %v16481_v40, %v18903_v35  ;;  %v7523_v30 = vrot.slane %v16483_v11, %v18903_v35  ;;  %v7614_v16 = vrot.slane %v16485_v6, %v18903_v35  ;;  %v18905_v20 = vld [vmem:[#allocation68_spill] sm:$0xff]  ;;  %v7814_v29 = vmul.f32 %v18908_v22, %v18907_v55  ;;  %v18909_v47 = vld [vmem:[#allocation43_spill] sm:$0xff]  ;;  %v18913_v50 = vld [vmem:[#allocation53_spill] sm:$0xff] }
 0x34f   : > { %v7723_v45 = vmul.f32 %v18905_v20, %v18904_v27  ;;  %v7727_v23 = vmul.f32 %v18905_v20, %v18906_v9  ;;  %v7818_v39 = vmul.f32 %v18908_v22, %v18906_v9  ;;  %v18910_v43 = vld [vmem:[#allocation39_spill] sm:$0xff]  ;;  %v18911_v63 = vld [vmem:[#allocation44_spill] sm:$0xff]  ;;  %v7131_v5 = vadd.f32 %v7107_v61, %v7040_v0  ;;  %v5589_v17 = vld [vmem:[#allocation4 + $0x90] sm:$0x3] }
 0x350   : > { %v7490_v46 = vmul.f32 %v7476_v60, %v18909_v47  ;;  %v7494_v12 = vmul.f32 %v7476_v60, %v18910_v43  ;;  %v7537_v49 = vmul.f32 %v7523_v30, %v18911_v63  ;;  %v7541_v33 = vmul.f32 %v7523_v30, %v18910_v43  ;;  %v18914_v36 = vld [vmem:[#allocation19_spill] sm:$0xff]  ;;  %v18916_v14 = vld [vmem:[#allocation46_spill] sm:$0xff]  ;;  %5804 = vst [vmem:[#allocation4 + $0x90] sm:$0x3] %v5763_v42 }
 0x351   : > { %v7545_v28 = vmul.f32 %v7523_v30, %v18912_v58  ;;  %v7628_v62 = vmul.f32 %v7614_v16, %v18913_v50  ;;  %v7632_v13 = vmul.f32 %v7614_v16, %v18910_v43  ;;  %v7636_v22 = vmul.f32 %v7614_v16, %v18914_v36  ;;  %v5590_v47 = vld [vmem:[#allocation4 + $0x98] sm:$0x3] }
 0x352   : > { %v7502_v27 = vadd.f32 %v7494_v12, %v7230_v10  ;;  %v7563_v20 = vrot.slane %v7537_v49, 3  ;;  %v7564_v55 = vrot.slane %v7541_v33, 3  ;;  %v7226_v60 = vadd.f32 %v18915_v18, %v7131_v5  ;;  %5805 = vst [vmem:[#allocation4 + $0x98] sm:$0x3] %v5765_v34 }
 0x353   : > { %v7574_v59 = vrot.slane %v7545_v28, 3  ;;  %v7654_v63 = vrot.slane %v7628_v62, 6  ;;  %v7891_v61 = vrot.slane %v18916_v14, %v18903_v35  ;;  %v5624_v30 = vmul.f32 %v16399_v19, %v5589_v17 }
 0x354   : > { %v5625_v0 = vmul.f32 %v16409_v41, %v5590_v47  ;;  %v7565_v10 = vsel %vm885_vm8, %v7563_v20, %v7564_v55  ;;  %v7655_v43 = vrot.slane %v7632_v13, 6  ;;  %v7498_v12 = vadd.f32 %v7490_v46, %v7226_v60 }
 0x355   : > { %v7575_v36 = vsel %vm885_vm8, %v7564_v55, %v7574_v59  ;;  %v7665_v16 = vrot.slane %v7636_v22, 6  ;;  %v7749_v49 = vrot.slane %v7723_v45, 1  ;;  %v5654_v18 = vrot.slane %v5624_v30, 2  ;;  %v18923_v30 = vld [vmem:[#allocation21_spill] sm:$0xff] }
 0x356   : > { %v5656_v33 = vrot.slane %v5625_v0, 2  ;;  %v7593_v5 = vadd.f32 %v7575_v36, %v7502_v27  ;;  %v7656_v58 = vsel %vm498_vm3, %v7654_v63, %v7655_v43  ;;  %v7589_v14 = vadd.f32 %v7565_v10, %v7498_v12  ;;  %v18919_v27 = vld [vmem:[#allocation71_spill] sm:$0xff] }
 0x357   : > { %v7666_v19 = vsel %vm498_vm3, %v7655_v43, %v7665_v16  ;;  %v7750_v17 = vrot.slane %v7727_v23, 1  ;;  %v7840_v41 = vrot.slane %v7814_v29, 4  ;;  %v18917_v42 = vrot.slane %v16452_v48, 2  ;;  %v16596_v29 = vld [vmem:[#allocation5 + $0xa7] ss:$8 sm:$0xf] }
 0x358   : > { %v18918_v46 = vrot.slane %v16456_v54, 2  ;;  %v7684_v28 = vadd.f32 %v7666_v19, %v7593_v5  ;;  %v7841_v45 = vrot.slane %v7818_v39, 4  ;;  %v7680_v13 = vadd.f32 %v7656_v58, %v7589_v14  ;;  %v16598_v48 = vld [vmem:[#allocation5 + $0x6] ss:$8 sm:$0xf] }
 0x359   : > { %v5655_v34 = vsel %vm793_vm7, %v18917_v42, %v5654_v18  ;;  %v7751_v23 = vsel %vm701_vm6, %v7749_v49, %v7750_v17  ;;  %v18920_v20 = vrot.slane %v18919_v27, 1  ;;  %v18921_v39 = vld [vmem:[#allocation24_spill] sm:$0xff]  ;;  %v7909_v63 = vmul.f32 %v7891_v61, %v18906_v9  ;;  %v18924_v9 = vld [vmem:[#allocation50_spill] sm:$0xff] }
 0x35a   : > { %v5657_v59 = vsel %vm793_vm7, %v18918_v46, %v5656_v33  ;;  %v16590_v50 = vadd.f32 %v5655_v34, %v16466_v57  ;;  %v7842_v55 = vsel %vm977_vm9, %v7840_v41, %v7841_v45  ;;  %v7851_v22 = vrot.slane %v18921_v39, 4  ;;  %v18922_v57 = vld [vmem:[#allocation70_spill] sm:$0xff]  ;;  %v10973_v41 = vld [vmem:[#allocation4 + $0x8] sm:$0xff] }
 0x35b   : > { %v16593_v62 = vadd.f32 %v5657_v59, %v16495_v1  ;;  %v7761_v54 = vsel %vm701_vm6, %v7750_v17, %v18920_v20  ;;  %v7905_v47 = vmul.f32 %v7891_v61, %v18922_v57  ;;  %v7775_v60 = vadd.f32 %v7751_v23, %v7680_v13  ;;  %v16613_v16 = vld [vmem:[#allocation5 + $0x25] ss:$8 sm:$0xf]  ;;  %v16615_v58 = vld [vmem:[#allocation5 + $0x44] ss:$8 sm:$0xf] }
 0x35c   : > { %v7779_v1 = vadd.f32 %v7761_v54, %v7684_v28  ;;  %v7913_v0 = vmul.f32 %v7891_v61, %v18923_v30  ;;  %v7852_v10 = vsel %vm977_vm9, %v7841_v45, %v7851_v22  ;;  %v7986_v12 = vrot.slane %v16596_v29, %v18903_v35  ;;  %v18925_v61 = vld [vmem:[#allocation37_spill] sm:$0xff] }
 0x35d   : > { %v7931_v43 = vrot.slane %v7905_v47, 7  ;;  %v8302_v36 = vrot.slane %v16598_v48, %v18903_v35  ;;  %v7866_v49 = vadd.f32 %v7842_v55, %v7775_v60  ;;  %v7932_v33 = vrot.slane %v7909_v63, 7  ;;  %v8332_v34 = vld [vmem:[#allocation4 + $0x8] sm:$0xf8]  ;;  %v8336_v46 = vld [vmem:[#allocation4 + $0x48] sm:$0x7] }
 0x35e   : > { %v7870_v18 = vadd.f32 %v7852_v10, %v7779_v1  ;;  %v7942_v5 = vrot.slane %v7913_v0, 7  ;;  %v8000_v14 = vmul.f32 %v7986_v12, %v18924_v9  ;;  %v8004_v19 = vmul.f32 %v7986_v12, %v18925_v61  ;;  %v10974_v45 = vld [vmem:[#allocation4 + $0x28] sm:$0xff] }
 0x35f   : > { %v8008_v17 = vmul.f32 %v7986_v12, %v16172_v21  ;;  %v8316_v42 = vmul.f32 %v10973_v41, %v8302_v36  ;;  %v7933_v59 = vsel %vm3256_vm5, %v7931_v43, %v7932_v33  ;;  %v8320_v13 = vmul.f32 %v10974_v45, %v8302_v36  ;;  %v16624_v27 = vld [vmem:[#allocation5 + $0x63] ss:$8 sm:$0xf]  ;;  %v16626_v20 = vld [vmem:[#allocation5 + $0x82] ss:$8 sm:$0xf] }
 0x360   : > { %v7943_v28 = vsel %vm3256_vm5, %v7932_v33, %v7942_v5  ;;  %v8349_v23 = vrot.slane %v16613_v16, %v18903_v35  ;;  %v7957_v54 = vadd.f32 %v7933_v59, %v7866_v49  ;;  %v8026_v21 = vrot.slane %v8000_v14, 2  ;;  %v8423_v1 = vld [vmem:[#allocation4 + $0x8] sm:$0xc0]  ;;  %v8427_v30 = vld [vmem:[#allocation4 + $0x48] sm:$0x3f] }
 0x361   : > { %v7961_v55 = vadd.f32 %v7943_v28, %v7870_v18  ;;  %v8027_v39 = vrot.slane %v8004_v19, 2  ;;  %v8037_v22 = vrot.slane %v8008_v17, 2  ;;  %v8440_v0 = vrot.slane %v16615_v58, %v18903_v35  ;;  %v8514_v10 = vld [vmem:[#allocation4 + $0x28] sm:$0xfe]  ;;  %v8522_v19 = vld [vmem:[#allocation4 + $0x68] sm:$0x1] }
 0x362   : > { %v8363_v57 = vmul.f32 %v8349_v23, %v8332_v34  ;;  %v8367_v47 = vmul.f32 %v10974_v45, %v8349_v23  ;;  %v8371_v60 = vmul.f32 %v8349_v23, %v8336_v46  ;;  %v8535_v43 = vrot.slane %v16624_v27, %v18903_v35  ;;  %v8609_v59 = vld [vmem:[#allocation4 + $0x28] sm:$0xf0] }
 0x363   : > { %v8028_v63 = vsel %vm793_vm7, %v8026_v21, %v8027_v39  ;;  %v8626_v12 = vrot.slane %v16626_v20, %v18903_v35  ;;  %v8038_v36 = vsel %vm793_vm7, %v8027_v39, %v8037_v22  ;;  %v8454_v14 = vmul.f32 %v8440_v0, %v8423_v1  ;;  %v10975_v22 = vld [vmem:[#allocation4 + $0x48] sm:$0xff] }
 0x364   : > { %v8052_v49 = vadd.f32 %v8028_v63, %v7957_v54  ;;  %v8389_v18 = vrot.slane %v8363_v57, 3  ;;  %v8390_v33 = vrot.slane %v8367_v47, 3  ;;  %v8056_v5 = vadd.f32 %v8038_v36, %v7961_v55  ;;  %v8613_v47 = vld [vmem:[#allocation4 + $0x68] sm:$0xf] }
 0x365   : > { %v8400_v9 = vrot.slane %v8371_v60, 3  ;;  %v8458_v61 = vmul.f32 %v10974_v45, %v8440_v0  ;;  %v8462_v34 = vmul.f32 %v8440_v0, %v8427_v30  ;;  %v8549_v46 = vmul.f32 %v8535_v43, %v8514_v10  ;;  %v16638_v60 = vld [vmem:[#allocation5 + $0xa1] ss:$8 sm:$0xf] }
 0x366   : > { %v8324_v17 = vadd.f32 %v8316_v42, %v8052_v49  ;;  %v8391_v41 = vsel %vm885_vm8, %v8389_v18, %v8390_v33  ;;  %v8328_v28 = vadd.f32 %v8320_v13, %v8056_v5  ;;  %v8480_v21 = vrot.slane %v8454_v14, 6  ;;  %v16641_v30 = vld [vmem:[#allocation5 + $0xc0] ss:$8 sm:$0xf]  ;;  %v8700_v49 = vld [vmem:[#allocation4 + $0x28] sm:$0x80] }
 0x367   : > { %v8401_v23 = vsel %vm885_vm8, %v8390_v33, %v8400_v9  ;;  %v8481_v3 = vrot.slane %v8458_v61, 6  ;;  %v8491_v54 = vrot.slane %v8462_v34, 6  ;;  %v8553_v57 = vmul.f32 %v10975_v22, %v8535_v43  ;;  %v8704_v9 = vld [vmem:[#allocation4 + $0x68] sm:$0x7f] }
 0x368   : > { %v8415_v39 = vadd.f32 %v8391_v41, %v8324_v17  ;;  %v8557_v55 = vmul.f32 %v8535_v43, %v8522_v19  ;;  %v8419_v45 = vadd.f32 %v8401_v23, %v8328_v28  ;;  %v8575_v1 = vrot.slane %v8549_v46, 1  ;;  %v8791_v14 = vld [vmem:[#allocation4 + $0x48] sm:$0xfc]  ;;  %v8799_v34 = vld [vmem:[#allocation4 + $0x88] sm:$0x3] }
 0x369   : > { %v8482_v42 = vsel %vm498_vm3, %v8480_v21, %v8481_v3  ;;  %v8640_v63 = vmul.f32 %v8626_v12, %v8609_v59  ;;  %v8492_v13 = vsel %vm498_vm3, %v8481_v3, %v8491_v54  ;;  %v8576_v10 = vrot.slane %v8553_v57, 1  ;;  %v8795_v41 = vld [vmem:[#allocation4 + $0x68] sm:$0xff] }
 0x36a   : > { %v8506_v0 = vadd.f32 %v8482_v42, %v8415_v39  ;;  %v8586_v36 = vrot.slane %v8557_v55, 1  ;;  %v8510_v18 = vadd.f32 %v8492_v13, %v8419_v45  ;;  %v8644_v33 = vmul.f32 %v10975_v22, %v8626_v12 }
 0x36b   : > { %v8648_v5 = vmul.f32 %v8626_v12, %v8613_v47  ;;  %v8666_v43 = vrot.slane %v8640_v63, 4  ;;  %v8577_v61 = vsel %vm701_vm6, %v8575_v1, %v8576_v10  ;;  %v8717_v17 = vrot.slane %v16638_v60, %v18903_v35 }
 0x36c   : > { %v8587_v19 = vsel %vm701_vm6, %v8576_v10, %v8586_v36  ;;  %v8812_v3 = vrot.slane %v16641_v30, %v18903_v35  ;;  %v8601_v46 = vadd.f32 %v8577_v61, %v8506_v0  ;;  %v8667_v28 = vrot.slane %v8644_v33, 4 }
 0x36d   : > { %v8605_v59 = vadd.f32 %v8587_v19, %v8510_v18  ;;  %v8677_v23 = vrot.slane %v8648_v5, 4  ;;  %v8731_v12 = vmul.f32 %v8717_v17, %v8700_v49  ;;  %v8735_v21 = vmul.f32 %v10975_v22, %v8717_v17  ;;  %v18926_v49 = vld [vmem:[#allocation10_spill] sm:$0xff] }
 0x36e   : > { %v8739_v39 = vmul.f32 %v8717_v17, %v8704_v9  ;;  %v8826_v54 = vmul.f32 %v8812_v3, %v8791_v14  ;;  %v8668_v57 = vsel %vm977_vm9, %v8666_v43, %v8667_v28  ;;  %v8830_v47 = vmul.f32 %v8812_v3, %v8795_v41  ;;  %v18927_v41 = vld [vmem:[#allocation58_spill] sm:$0xff] }
 0x36f   : > { %v8678_v55 = vsel %vm977_vm9, %v8667_v28, %v8677_v23  ;;  %v8834_v45 = vmul.f32 %v8812_v3, %v8799_v34  ;;  %v8692_v42 = vadd.f32 %v8668_v57, %v8601_v46  ;;  %v8757_v63 = vrot.slane %v8731_v12, 7  ;;  %v18928_v3 = vld [vmem:[#allocation16_spill] sm:$0xff]  ;;  %v18930_v23 = vld [vmem:[#allocation73_spill] sm:$0xff] }
 0x370   : > { %v8696_v1 = vadd.f32 %v8678_v55, %v8605_v59  ;;  %v8758_v13 = vrot.slane %v8735_v21, 7  ;;  %v8768_v10 = vrot.slane %v8739_v39, 7  ;;  %v8852_v36 = vrot.slane %v8826_v54, 2  ;;  %v18929_v59 = vld [vmem:[#allocation12_spill] sm:$0xff]  ;;  %v18933_v55 = vld [vmem:[#allocation35_spill] sm:$0xff] }
 0x371   : > { %v8853_v0 = vrot.slane %v8830_v47, 2  ;;  %v8863_v18 = vrot.slane %v8834_v45, 2  ;;  %v7472_v22 = vrot.slane %v16481_v40, %v18926_v49  ;;  %v7519_v5 = vrot.slane %v16483_v11, %v18926_v49  ;;  %v18932_v54 = vld [vmem:[#allocation80_spill] sm:$0xff] }
 0x372   : > { %v8759_v33 = vsel %vm3256_vm5, %v8757_v63, %v8758_v13  ;;  %v7610_v43 = vrot.slane %v16485_v6, %v18926_v49  ;;  %v8769_v9 = vsel %vm3256_vm5, %v8758_v13, %v8768_v10  ;;  %v18931_v6 = vld [vmem:[#allocation18_spill] sm:$0xff]  ;;  %v18934_v13 = vld [vmem:[#allocation65_spill] sm:$0xff] }
 0x373   : > { %v8783_v14 = vadd.f32 %v8759_v33, %v8692_v42  ;;  %v8854_v61 = vsel %vm793_vm7, %v8852_v36, %v8853_v0  ;;  %v8864_v19 = vsel %vm793_vm7, %v8853_v0, %v8863_v18  ;;  %v8787_v17 = vadd.f32 %v8769_v9, %v8696_v1  ;;  %v18935_v18 = vld [vmem:[#allocation67_spill] sm:$0xff] }
 0x374   : > { %v7489_v34 = vmul.f32 %v7472_v22, %v18927_v41  ;;  %v7493_v46 = vmul.f32 %v7472_v22, %v18928_v3  ;;  %v7536_v40 = vmul.f32 %v7519_v5, %v18929_v59  ;;  %v7540_v11 = vmul.f32 %v7519_v5, %v18928_v3  ;;  %v18936_v33 = vld [vmem:[#allocation47_spill] sm:$0xff] }
 0x375   : > { %v8878_v28 = vadd.f32 %v8854_v61, %v8783_v14  ;;  %v7544_v12 = vmul.f32 %v7519_v5, %v18930_v23  ;;  %v7627_v21 = vmul.f32 %v7610_v43, %v18931_v6  ;;  %v8882_v39 = vadd.f32 %v8864_v19, %v8787_v17  ;;  %v18937_v5 = vld [vmem:[#allocation9_spill] sm:$0xff] }
 0x376   : > { %v7497_v57 = vadd.f32 %v7489_v34, %v18932_v54  ;;  %v7501_v47 = vadd.f32 %v7493_v46, %v18933_v55  ;;  %v7560_v45 = vrot.slane %v7536_v40, 3  ;;  %v7561_v42 = vrot.slane %v7540_v11, 3  ;;  %v18938_v40 = vld [vmem:[#allocation77_spill] sm:$0xff] }
 0x377   : > { %v7572_v1 = vrot.slane %v7544_v12, 3  ;;  %v7631_v63 = vmul.f32 %v7610_v43, %v18928_v3  ;;  %v7635_v10 = vmul.f32 %v7610_v43, %v18934_v13  ;;  %v8886_v36 = vpack.c.bf16 %v8882_v39, %v8878_v28  ;;  %v18939_v28 = vld [vmem:[#allocation61_spill] sm:$0xff]  ;;  %v18940_v39 = vld [vmem:[#allocation54_spill] sm:$0xff] }
 0x378   : > { %v7651_v0 = vrot.slane %v7627_v21, 6  ;;  %v7722_v22 = vmul.f32 %v18936_v33, %v18935_v18  ;;  %v7726_v9 = vmul.f32 %v18936_v33, %v18937_v5  ;;  %v7562_v14 = vsel %vm885_vm8, %v7560_v45, %v7561_v42  ;;  %v18942_v45 = vld [vmem:[#allocation30_spill] sm:$0xff] }
 0x379   : > { %v7573_v61 = vsel %vm885_vm8, %v7561_v42, %v7572_v1  ;;  %v7652_v19 = vrot.slane %v7631_v63, 6  ;;  %v7663_v17 = vrot.slane %v7635_v10, 6  ;;  %9711 = vmatprep.mubr.bf16.mxu0 %v8886_v36  ;;  %9797 = vmatprep.mubr.bf16.mxu1 %v8886_v36  ;;  %v7588_v41 = vadd.f32 %v7562_v14, %v7497_v57  ;;  %v18943_v42 = vld [vmem:[#allocation83_spill] sm:$0xff]  ;;  %v18944_v36 = vld [vmem:[#allocation81_spill] sm:$0xff] }
 0x37a   : > { %v7592_v34 = vadd.f32 %v7573_v61, %v7501_v47  ;;  %v7746_v3 = vrot.slane %v7722_v22, 1  ;;  %v7747_v43 = vrot.slane %v7726_v9, 1  ;;  %v7813_v11 = vmul.f32 %v18939_v28, %v18938_v40  ;;  %v18945_v22 = vld [vmem:[#allocation11_spill] sm:$0xff]  ;;  %v18949_v40 = vld [vmem:[#allocation33_spill] sm:$0xff] }
 0x37b   : > { %v7653_v46 = vsel %vm498_vm3, %v7651_v0, %v7652_v19  ;;  %v7664_v59 = vsel %vm498_vm3, %v7652_v19, %v7663_v17  ;;  %v7817_v23 = vmul.f32 %v18939_v28, %v18937_v5  ;;  %v18941_v54 = vrot.slane %v18940_v39, 1 }
 0x37c   : > { %v7679_v12 = vadd.f32 %v7653_v46, %v7588_v41  ;;  %v7683_v6 = vadd.f32 %v7664_v59, %v7592_v34  ;;  %v7748_v21 = vsel %vm701_vm6, %v7746_v3, %v7747_v43  ;;  %v7837_v55 = vrot.slane %v7813_v11, 4  ;;  %v18947_v34 = vld [vmem:[#allocation85_spill] sm:$0xff] }
 0x37d   : > { %v7759_v57 = vsel %vm701_vm6, %v7747_v43, %v18941_v54  ;;  %v7838_v47 = vrot.slane %v7817_v23, 4  ;;  %v7904_v1 = vmul.f32 %v18943_v42, %v18942_v45  ;;  %v7908_v63 = vmul.f32 %v18943_v42, %v18937_v5  ;;  %v18948_v5 = vld [vmem:[#allocation69_spill] sm:$0xff]  ;;  %v10976_v54 = vld [vmem:[#allocation4] sm:$0xff] }
 0x37e   : > { %v7774_v13 = vadd.f32 %v7748_v21, %v7679_v12  ;;  %v7778_v10 = vadd.f32 %v7759_v57, %v7683_v6  ;;  %v7940_v0 = vrot.slane %v18944_v36, 7  ;;  %v7982_v18 = vrot.slane %v16596_v29, %v18926_v49  ;;  %v8331_v21 = vld [vmem:[#allocation4] sm:$0xf8]  ;;  %v8335_v45 = vld [vmem:[#allocation4 + $0x40] sm:$0x7] }
 0x37f   : > { %v7839_v33 = vsel %vm977_vm9, %v7837_v55, %v7838_v47  ;;  %v18946_v9 = vrot.slane %v18945_v22, 4  ;;  %v7928_v61 = vrot.slane %v7904_v1, 7  ;;  %v7929_v19 = vrot.slane %v7908_v63, 7  ;;  %v10977_v55 = vld [vmem:[#allocation4 + $0x20] sm:$0xff] }
 0x380   : > { %v7865_v17 = vadd.f32 %v7839_v33, %v7774_v13  ;;  %v7999_v3 = vmul.f32 %v7982_v18, %v18947_v34  ;;  %v8003_v43 = vmul.f32 %v7982_v18, %v18948_v5  ;;  %v8007_v29 = vmul.f32 %v7982_v18, %v18949_v40  ;;  %v8422_v1 = vld [vmem:[#allocation4] sm:$0xc0]  ;;  %v8426_v13 = vld [vmem:[#allocation4 + $0x40] sm:$0x3f] }
 0x381   : > { %v7850_v14 = vsel %vm977_vm9, %v7838_v47, %v18946_v9  ;;  %v7930_v46 = vsel %vm3256_vm5, %v7928_v61, %v7929_v19  ;;  %v7941_v59 = vsel %vm3256_vm5, %v7929_v19, %v7940_v0  ;;  %v8298_v28 = vrot.slane %v16598_v48, %v18926_v49  ;;  %v8513_v19 = vld [vmem:[#allocation4 + $0x20] sm:$0xfe] }
 0x382   : > { %v7869_v41 = vadd.f32 %v7850_v14, %v7778_v10  ;;  %v7956_v11 = vadd.f32 %v7930_v46, %v7865_v17  ;;  %v8023_v12 = vrot.slane %v7999_v3, 2  ;;  %v8024_v6 = vrot.slane %v8003_v43, 2  ;;  %v8521_v3 = vld [vmem:[#allocation4 + $0x60] sm:$0x1] }
 0x383   : > { %v8035_v39 = vrot.slane %v8007_v29, 2  ;;  %v8315_v57 = vmul.f32 %v10976_v54, %v8298_v28  ;;  %v8319_v47 = vmul.f32 %v10977_v55, %v8298_v28  ;;  %v8345_v42 = vrot.slane %v16613_v16, %v18926_v49  ;;  %v10978_v29 = vld [vmem:[#allocation4 + $0x40] sm:$0xff] }
 0x384   : > { %v7960_v23 = vadd.f32 %v7941_v59, %v7869_v41  ;;  %v8025_v63 = vsel %vm793_vm7, %v8023_v12, %v8024_v6  ;;  %v8436_v48 = vrot.slane %v16615_v58, %v18926_v49  ;;  %v8531_v10 = vrot.slane %v16624_v27, %v18926_v49 }
 0x385   : > { %v8622_v36 = vrot.slane %v16626_v20, %v18926_v49  ;;  %v8036_v0 = vsel %vm793_vm7, %v8024_v6, %v8035_v39  ;;  %v8051_v18 = vadd.f32 %v8025_v63, %v7956_v11  ;;  %v8362_v33 = vmul.f32 %v8345_v42, %v8331_v21  ;;  %v8608_v11 = vld [vmem:[#allocation4 + $0x20] sm:$0xf0]  ;;  %v8612_v39 = vld [vmem:[#allocation4 + $0x60] sm:$0xf] }
 0x386   : > { %v8366_v22 = vmul.f32 %v10977_v55, %v8345_v42  ;;  %v8055_v9 = vadd.f32 %v8036_v0, %v7960_v23  ;;  %v8370_v16 = vmul.f32 %v8345_v42, %v8335_v45  ;;  %v8453_v14 = vmul.f32 %v8436_v48, %v8422_v1 }
 0x387   : > { %v8457_v61 = vmul.f32 %v10977_v55, %v8436_v48  ;;  %v8323_v17 = vadd.f32 %v8315_v57, %v8051_v18  ;;  %v8386_v41 = vrot.slane %v8362_v33, 3  ;;  %v8461_v58 = vmul.f32 %v8436_v48, %v8426_v13  ;;  %v8699_v13 = vld [vmem:[#allocation4 + $0x20] sm:$0x80]  ;;  %v8703_v33 = vld [vmem:[#allocation4 + $0x60] sm:$0x7f] }
 0x388   : > { %v8387_v34 = vrot.slane %v8366_v22, 3  ;;  %v8327_v5 = vadd.f32 %v8319_v47, %v8055_v9  ;;  %v8398_v27 = vrot.slane %v8370_v16, 3  ;;  %v8477_v43 = vrot.slane %v8453_v14, 6 }
 0x389   : > { %v8478_v46 = vrot.slane %v8457_v61, 6  ;;  %v8489_v59 = vrot.slane %v8461_v58, 6  ;;  %v8548_v40 = vmul.f32 %v8531_v10, %v8513_v19  ;;  %v8552_v28 = vmul.f32 %v10978_v29, %v8531_v10  ;;  %v8790_v19 = vld [vmem:[#allocation4 + $0x40] sm:$0xfc] }
 0x38a   : > { %v8388_v20 = vsel %vm885_vm8, %v8386_v41, %v8387_v34  ;;  %v8399_v23 = vsel %vm885_vm8, %v8387_v34, %v8398_v27  ;;  %v8556_v21 = vmul.f32 %v8531_v10, %v8521_v3  ;;  %v8639_v1 = vmul.f32 %v8622_v36, %v8608_v11  ;;  %v6549_v10 = vpop.permute.xlu0 %6548  ;;  %v8794_v3 = vld [vmem:[#allocation4 + $0x60] sm:$0xff]  ;;  %v5859_v27 = vld [vmem:[#allocation4 + $0x50] sm:$0x7] }
 0x38b   : > { %v8414_v12 = vadd.f32 %v8388_v20, %v8323_v17  ;;  %v8479_v6 = vsel %vm498_vm3, %v8477_v43, %v8478_v46  ;;  %v8418_v54 = vadd.f32 %v8399_v23, %v8327_v5  ;;  %v8490_v57 = vsel %vm498_vm3, %v8478_v46, %v8489_v59  ;;  %v8798_v5 = vld [vmem:[#allocation4 + $0x80] sm:$0x3]  ;;  %v6551_v43 = vpop.permute.xlu1 %6550  ;;  %v16727_v20 = vld [vmem:[#allocation4 + $0x50] sm:$0x3f] }
 0x38c   : > { %v8572_v55 = vrot.slane %v8548_v40, 1  ;;  %v8573_v47 = vrot.slane %v8552_v28, 1  ;;  %v8584_v42 = vrot.slane %v8556_v21, 1  ;;  %v8643_v63 = vmul.f32 %v10978_v29, %v8622_v36  ;;  %v16729_v59 = vld [vmem:[#allocation4 + $0x50] sm:$0xff] }
 0x38d   : > { %v8505_v45 = vadd.f32 %v8479_v6, %v8414_v12  ;;  %v8509_v48 = vadd.f32 %v8490_v57, %v8418_v54  ;;  %v8647_v18 = vmul.f32 %v8622_v36, %v8612_v39  ;;  %v8713_v22 = vrot.slane %v16638_v60, %v18926_v49  ;;  %v16731_v40 = vld [vmem:[#allocation4 + $0x50] sm:$0xfc]  ;;  %v5860_v57 = vld [vmem:[#allocation4 + $0x58] sm:$0x7] }
 0x38e   : > { %v8574_v0 = vsel %vm701_vm6, %v8572_v55, %v8573_v47  ;;  %v8585_v9 = vsel %vm701_vm6, %v8573_v47, %v8584_v42  ;;  %v8663_v14 = vrot.slane %v8639_v1, 4  ;;  %v8664_v61 = vrot.slane %v8643_v63, 4  ;;  %v18950_v28 = vld [vmem:[#allocation66_spill] sm:$0xff]  ;;  %v16742_v42 = vld [vmem:[#allocation4 + $0x58] sm:$0xff] }
 0x38f   : > { %v8600_v16 = vadd.f32 %v8574_v0, %v8505_v45  ;;  %v8604_v17 = vadd.f32 %v8585_v9, %v8509_v48  ;;  %v8675_v41 = vrot.slane %v8647_v18, 4  ;;  %v8730_v34 = vmul.f32 %v8713_v22, %v8699_v13  ;;  %v16740_v45 = vld [vmem:[#allocation4 + $0x58] sm:$0x3f] }
 0x390   : > { %v8734_v58 = vmul.f32 %v10978_v29, %v8713_v22  ;;  %v8665_v36 = vsel %vm977_vm9, %v8663_v14, %v8664_v61  ;;  %v8738_v46 = vmul.f32 %v8713_v22, %v8703_v33  ;;  %v8808_v60 = vrot.slane %v16641_v30, %v18926_v49  ;;  %v16744_v1 = vld [vmem:[#allocation4 + $0x58] sm:$0xfc] }
 0x391   : > { %v16735_v11 = vsel %vm415_vm4, %v18950_v28, %v6549_v10  ;;  %v8676_v29 = vsel %vm977_vm9, %v8664_v61, %v8675_v41  ;;  %v8691_v23 = vadd.f32 %v8665_v36, %v8600_v16  ;;  %v8754_v12 = vrot.slane %v8730_v34, 7  ;;  %v10979_v14 = vld [vmem:[#allocation5 + $0x3] ss:$8 sm:$0xf] }
 0x392   : > { %v8755_v6 = vrot.slane %v8734_v58, 7  ;;  %6622 = vst [vmem:[#allocation4 + $0x50] sm:$0xff] %v16735_v11  ;;  %v8695_v21 = vadd.f32 %v8676_v29, %v8604_v17  ;;  %v8766_v39 = vrot.slane %v8738_v46, 7  ;;  %v8825_v30 = vmul.f32 %v8808_v60, %v8790_v19  ;;  %v10817_v29 = vld [vmem:[%s17894_s5 + $0x208] ss:$16 sps:$4 sm:$0xff]  }
 0x393   : > { %v8829_v54 = vmul.f32 %v8808_v60, %v8794_v3  ;;  %v8833_v47 = vmul.f32 %v8808_v60, %v8798_v5  ;;  %v16747_v63 = vsel %vm415_vm4, %v6549_v10, %v6551_v43  ;;  %v5668_v13 = vadd.f32 %v16471_v51, %v16382_v56  ;;  %v10980_v56 = vld [vmem:[#allocation5 + $0x22] ss:$8 sm:$0xf] }
 0x394   : > { %v8756_v55 = vsel %vm3256_vm5, %v8754_v12, %v8755_v6  ;;  %v8767_v48 = vsel %vm3256_vm5, %v8755_v6, %v8766_v39  ;;  %v8849_v18 = vrot.slane %v8825_v30, 2  ;;  %6623 = vst [vmem:[#allocation4 + $0x58] sm:$0xff] %v16747_v63  ;;  %v5669_v16 = vadd.f32 %v16476_v25, %v16384_v4 }
 0x395   : > { %v8782_v0 = vadd.f32 %v8756_v55, %v8691_v23  ;;  %v8850_v33 = vrot.slane %v8829_v54, 2  ;;  %v8786_v22 = vadd.f32 %v8767_v48, %v8695_v21  ;;  %v8861_v9 = vrot.slane %v8833_v47, 2  ;;  %v10981_v21 = vld [vmem:[#allocation5 + $0x41] ss:$8 sm:$0xf] }
 0x396   : > { %v5828_v61 = vrot.slane %v10979_v14, %v18794_v53  ;;  %v5832_v19 = vrot.slane %v10979_v14, %v18796_v15  ;;  %v5875_v51 = vrot.slane %v10980_v56, %v18794_v53  ;;  %v5879_v17 = vrot.slane %v10980_v56, %v18796_v15  ;;  %v10825_v54 = vld [vmem:[%s17894_s5 + $0x22c] ss:$16 sps:$4 sm:$0xff]  }
 0x397   : > { %v8851_v10 = vsel %vm793_vm7, %v8849_v18, %v8850_v33  ;;  %v8862_v41 = vsel %vm793_vm7, %v8850_v33, %v8861_v9  ;;  %v5966_v39 = vrot.slane %v10981_v21, %v18794_v53  ;;  %v5970_v30 = vrot.slane %v10981_v21, %v18796_v15  ;;  %v10820_v18 = vld [vmem:[%s17894_s5 + $0x220] ss:$16 sps:$4 sm:$0xff]   ;;  %v10823_v33 = vld [vmem:[%s17894_s5 + $0x228] ss:$16 sps:$4 sm:$0xff]   ;;  %v10831_v14 = vld [vmem:[%s17894_s5 + $0x24c] ss:$16 sps:$4 sm:$0xff]  }
 0x398   : > { %v8877_v34 = vadd.f32 %v8851_v10, %v8782_v0  ;;  %v5839_v58 = vmul.f32 %v5828_v61, %v16487_v24  ;;  %v5843_v3 = vmul.f32 %v5828_v61, %v16501_v32  ;;  %v8881_v4 = vadd.f32 %v8862_v41, %v8786_v22  ;;  %v10814_v24 = vld [vmem:[%s17894_s5 + $0x200] ss:$16 sps:$4 sm:$0xff]   ;;  %v16807_v41 = vpop.permute.xlu1 %6560 }
 0x399   : > { %v5840_v25 = vmul.f32 %v5832_v19, %v16489_v26  ;;  %v5844_v5 = vmul.f32 %v5832_v19, %v16503_v7  ;;  %v5886_v43 = vmul.f32 %v5875_v51, %v16491_v37  ;;  %v5887_v60 = vmul.f32 %v5879_v17, %v16493_v38  ;;  %v10822_v38 = vld [vmem:[%s17894_s5 + $0x224] ss:$16 sps:$4 sm:$0xff]  }
 0x39a   : > { %v5847_v36 = vadd.f32 %v5839_v58, %v5668_v13  ;;  %v5851_v46 = vadd.f32 %v5843_v3, %v16590_v50  ;;  %v5890_v28 = vmul.f32 %v5875_v51, %v16501_v32  ;;  %v8885_v26 = vpack.c.bf16 %v8881_v4, %v8877_v34 }
 0x39b   : > { %v5848_v23 = vadd.f32 %v5840_v25, %v5669_v16  ;;  %v5852_v12 = vadd.f32 %v5844_v5, %v16593_v62  ;;  %v5891_v37 = vmul.f32 %v5879_v17, %v16503_v7  ;;  %v5894_v50 = vmul.f32 %v5875_v51, %v5859_v27  ;;  %v16809_v25 = vpop.permute.xlu0 %6558  ;;  %v10826_v5 = vld [vmem:[%s17894_s5 + $0x240] ss:$16 sps:$4 sm:$0xff]  }
 0x39c   : > { %v5895_v6 = vmul.f32 %v5879_v17, %v5860_v57  ;;  %9712 = vmatmul.mubr.bf16.vlgmr.msra.gmra.mrb[0].mxu0 %v8885_v26  ;;  %9798 = vmatmul.mubr.bf16.vlgmr.msra.gmra.mrb[0].mxu1 %v8885_v26  ;;  %v5914_v62 = vrot.slane %v5886_v43, 3  ;;  %v5915_v55 = vrot.slane %v5890_v28, 3  ;;  %v5917_v47 = vrot.slane %v5887_v60, 3  ;;  %v10829_v60 = vld [vmem:[%s17894_s5 + $0x248] ss:$16 sps:$4 sm:$0xff]  }
 0x39d   : > { %v5918_v13 = vrot.slane %v5891_v37, 3  ;;  %v5924_v48 = vrot.slane %v5894_v50, 3  ;;  %v5977_v27 = vmul.f32 %v5966_v39, %v16505_v52  ;;  %v5978_v57 = vmul.f32 %v5970_v30, %v16507_v44  ;;  %9723 = vmatpush1.bf16.msra.mxu0 %v10814_v24  ;;  %9809 = vmatpush1.bf16.msra.mxu1 %v10817_v29  ;;  %v10828_v44 = vld [vmem:[%s17894_s5 + $0x244] ss:$16 sps:$4 sm:$0xff]   ;;  %v6045_v26 = vld [vmem:[#allocation4 + $0x70] sm:$0x1] }
 0x39e   : > { %v5926_v0 = vrot.slane %v5895_v6, 3  ;;  %v5916_v22 = vsel %vm885_vm8, %v5914_v62, %v5915_v55  ;;  %v5981_v16 = vmul.f32 %v5966_v39, %v16501_v32  ;;  %v5982_v52 = vmul.f32 %v5970_v30, %v16503_v7  ;;  %9724 = vmatprep.subr.bf16.mxu0 %v10822_v38  ;;  %9810 = vmatprep.subr.bf16.mxu1 %v10825_v54  ;;  %v10834_v28 = vld [vmem:[%s17894_s5 + $0x264] ss:$16 sps:$4 sm:$0xff]   ;;  %v10837_v50 = vld [vmem:[%s17894_s5 + $0x26c] ss:$16 sps:$4 sm:$0xff]  }
 0x39f   : > { %v5919_v9 = vsel %vm885_vm8, %v5917_v47, %v5918_v13  ;;  %v5925_v61 = vsel %vm885_vm8, %v5915_v55, %v5924_v48  ;;  %v5938_v19 = vadd.f32 %v5916_v22, %v5847_v36  ;;  %v5985_v7 = vmul.f32 %v5966_v39, %v16727_v20 }
 0x3a0   : > { %v5927_v10 = vsel %vm885_vm8, %v5918_v13, %v5926_v0  ;;  %v5939_v56 = vadd.f32 %v5919_v9, %v5848_v23  ;;  %v5942_v51 = vadd.f32 %v5925_v61, %v5851_v46  ;;  %v5986_v17 = vmul.f32 %v5970_v30, %v16740_v45  ;;  %v10982_v46 = vld [vmem:[#allocation5 + $0x60] ss:$8 sm:$0xf]  ;;  %v10840_v61 = vld [vmem:[%s17894_s5 + $0x284] ss:$16 sps:$4 sm:$0xff]  }
 0x3a1   : > { %v5943_v32 = vadd.f32 %v5927_v10, %v5852_v12  ;;  %v6005_v34 = vrot.slane %v5977_v27, 6  ;;  %v6006_v58 = vrot.slane %v5981_v16, 6  ;;  %v6008_v3 = vrot.slane %v5978_v57, 6  ;;  %9725 = vmatpush1.bf16.msra.mxu0 %v10820_v18  ;;  %9811 = vmatpush1.bf16.msra.mxu1 %v10823_v33  ;;  %v6046_v23 = vld [vmem:[#allocation4 + $0x78] sm:$0x1]  ;;  %v18951_v16 = vld [vmem:[#allocation34_spill] sm:$0xff] }
 0x3a2   : > { %v6009_v4 = vrot.slane %v5982_v52, 6  ;;  %v6015_v43 = vrot.slane %v5985_v7, 6  ;;  %v6017_v36 = vrot.slane %v5986_v17, 6  ;;  %v6061_v20 = vrot.slane %v10982_v46, %v18794_v53  ;;  %9726 = vmatprep.subr.bf16.mxu0 %v10828_v44  ;;  %9812 = vmatprep.subr.bf16.mxu1 %v10831_v14  ;;  %v10983_v12 = vld [vmem:[#allocation5 + $0x67] ss:$8 sm:$0xf]  ;;  %v16843_v44 = vpop.permute.xlu1 %6570  ;;  %v16845_v14 = vpop.permute.xlu0 %6568 }
 0x3a3   : > { %v6065_v45 = vrot.slane %v10982_v46, %v18796_v15  ;;  %v6007_v24 = vsel %vm498_vm3, %v6005_v34, %v6006_v58  ;;  %v6152_v37 = vrot.slane %v10983_v12, %v18794_v53  ;;  %v6156_v38 = vrot.slane %v10983_v12, %v18796_v15  ;;  %v10832_v13 = vld [vmem:[%s17894_s5 + $0x260] ss:$16 sps:$4 sm:$0xff]   ;;  %v6137_v33 = vld [vmem:[#allocation4 + $0x78] sm:$0xf]  ;;  %v10849_v12 = vld [vmem:[%s17894_s5 + $0x2ac] ss:$16 sps:$4 sm:$0xff]  }
 0x3a4   : > { %v6010_v29 = vsel %vm498_vm3, %v6008_v3, %v6009_v4  ;;  %v6016_v6 = vsel %vm498_vm3, %v6006_v58, %v6015_v43  ;;  %v6018_v21 = vsel %vm498_vm3, %v6009_v4, %v6017_v36  ;;  %v6029_v39 = vadd.f32 %v6007_v24, %v5938_v19  ;;  %v6136_v18 = vld [vmem:[#allocation4 + $0x70] sm:$0xf]  ;;  %v10841_v36 = vld [vmem:[%s17894_s5 + $0x288] ss:$16 sps:$4 sm:$0xff]  }
 0x3a5   : > { %v6030_v30 = vadd.f32 %v6010_v29, %v5939_v56  ;;  %v6033_v54 = vadd.f32 %v6016_v6, %v5942_v51  ;;  %v6034_v62 = vadd.f32 %v6018_v21, %v5943_v32  ;;  %v6072_v55 = vmul.f32 %v6061_v20, %v16518_v2  ;;  %9727 = vmatpush1.bf16.msra.mxu0 %v10826_v5  ;;  %v10835_v2 = vld [vmem:[%s17894_s5 + $0x268] ss:$16 sps:$4 sm:$0xff]   ;;  %v10838_v58 = vld [vmem:[%s17894_s5 + $0x280] ss:$16 sps:$4 sm:$0xff]  }
 0x3a6   : > { %v6073_v47 = vmul.f32 %v6065_v45, %v16520_v8  ;;  %v6076_v48 = vmul.f32 %v6061_v20, %v16729_v59  ;;  %v6077_v0 = vmul.f32 %v6065_v45, %v16742_v42  ;;  %v6080_v27 = vmul.f32 %v6061_v20, %v6045_v26  ;;  %9813 = vmatpush1.bf16.msra.mxu1 %v10829_v60  ;;  %v10984_v6 = vld [vmem:[#allocation5 + $0x86] ss:$8 sm:$0xf] }
 0x3a7   : > { %v6081_v57 = vmul.f32 %v6065_v45, %v6046_v23  ;;  %v6100_v22 = vrot.slane %v6072_v55, 1  ;;  %v6163_v9 = vmul.f32 %v6152_v37, %v16522_v31  ;;  %v6164_v52 = vmul.f32 %v6156_v38, %v18951_v16  ;;  %9728 = vmatprep.subr.bf16.mxu0 %v10834_v28  ;;  %9814 = vmatprep.subr.bf16.mxu1 %v10837_v50  ;;  %v10843_v31 = vld [vmem:[%s17894_s5 + $0x28c] ss:$16 sps:$4 sm:$0xff]   ;;  %v10846_v28 = vld [vmem:[%s17894_s5 + $0x2a4] ss:$16 sps:$4 sm:$0xff]  }
 0x3a8   : > { %v6103_v8 = vrot.slane %v6073_v47, 1  ;;  %v6101_v10 = vrot.slane %v6076_v48, 1  ;;  %v6104_v19 = vrot.slane %v6077_v0, 1  ;;  %v6110_v56 = vrot.slane %v6080_v27, 1  ;;  %v6227_v50 = vld [vmem:[#allocation4 + $0x70] sm:$0x7f] }
 0x3a9   : > { %v6112_v51 = vrot.slane %v6081_v57, 1  ;;  %v6167_v32 = vmul.f32 %v6152_v37, %v16729_v59  ;;  %v6168_v7 = vmul.f32 %v6156_v38, %v16742_v42  ;;  %v6171_v17 = vmul.f32 %v6152_v37, %v6136_v18  ;;  %9729 = vmatpush1.bf16.msra.mxu0 %v10832_v13  ;;  %v6228_v13 = vld [vmem:[#allocation4 + $0x78] sm:$0x7f]  ;;  %v10852_v18 = vld [vmem:[%s17894_s5 + $0x2c4] ss:$16 sps:$4 sm:$0xff]  }
 0x3aa   : > { %v6172_v34 = vmul.f32 %v6156_v38, %v6137_v33  ;;  %v6102_v3 = vsel %vm701_vm6, %v6100_v22, %v6101_v10  ;;  %v6105_v4 = vsel %vm701_vm6, %v6103_v8, %v6104_v19  ;;  %v6111_v5 = vsel %vm701_vm6, %v6101_v10, %v6110_v56  ;;  %9815 = vmatpush1.bf16.msra.mxu1 %v10835_v2  ;;  %v10985_v48 = vld [vmem:[#allocation5 + $0xa5] ss:$8 sm:$0xf]  ;;  %v10847_v57 = vld [vmem:[%s17894_s5 + $0x2a8] ss:$16 sps:$4 sm:$0xff]  }
 0x3ab   : > { %v6113_v43 = vsel %vm701_vm6, %v6104_v19, %v6112_v51  ;;  %v6124_v46 = vadd.f32 %v6102_v3, %v6029_v39  ;;  %v6125_v20 = vadd.f32 %v6105_v4, %v6030_v30  ;;  %v6128_v45 = vadd.f32 %v6111_v5, %v6033_v54  ;;  %9730 = vmatprep.subr.bf16.mxu0 %v10840_v61  ;;  %v16873_v30 = vpop.permute.xlu1 %7356  ;;  %v16875_v54 = vpop.permute.xlu0 %7354  ;;  %v18952_v61 = vld [vmem:[#allocation62_spill] sm:$0xff] }
 0x3ac   : > { %v6129_v60 = vadd.f32 %v6113_v43, %v6034_v62  ;;  %v6191_v24 = vrot.slane %v6163_v9, 4  ;;  %v6192_v29 = vrot.slane %v6167_v32, 4  ;;  %v6194_v26 = vrot.slane %v6164_v52, 4  ;;  %9816 = vmatprep.subr.bf16.mxu1 %v10843_v31  ;;  %v10844_v62 = vld [vmem:[%s17894_s5 + $0x2a0] ss:$16 sps:$4 sm:$0xff]  }
 0x3ad   : > { %v6195_v23 = vrot.slane %v6168_v7, 4  ;;  %v6201_v37 = vrot.slane %v6171_v17, 4  ;;  %v6203_v38 = vrot.slane %v6172_v34, 4  ;;  %v6243_v21 = vrot.slane %v10984_v6, %v18794_v53  ;;  %9731 = vmatpush1.bf16.msra.mxu0 %v10838_v58  ;;  %v10855_v9 = vld [vmem:[%s17894_s5 + $0x2cc] ss:$16 sps:$4 sm:$0xff]   ;;  %v18953_v19 = vld [vmem:[#allocation82_spill] sm:$0xff] }
 0x3ae   : > { %v6247_v39 = vrot.slane %v10984_v6, %v18796_v15  ;;  %v6193_v55 = vsel %vm977_vm9, %v6191_v24, %v6192_v29  ;;  %v16883_v0 = vrot.slane %v10985_v48, %v18794_v53  ;;  %v16886_v27 = vrot.slane %v10985_v48, %v18796_v15  ;;  %9817 = vmatpush1.bf16.msra.mxu1 %v10841_v36  ;;  %v6318_v17 = vld [vmem:[#allocation4 + $0x70] sm:$0xff]  ;;  %v6319_v34 = vld [vmem:[#allocation4 + $0x78] sm:$0xff] }
 0x3af   : > { %v6196_v47 = vsel %vm977_vm9, %v6194_v26, %v6195_v23  ;;  %v6202_v33 = vsel %vm977_vm9, %v6192_v29, %v6201_v37  ;;  %v6204_v2 = vsel %vm977_vm9, %v6195_v23, %v6203_v38  ;;  %v6215_v22 = vadd.f32 %v6193_v55, %v6124_v46  ;;  %9732 = vmatprep.subr.bf16.mxu0 %v10846_v28  ;;  %v10850_v58 = vld [vmem:[%s17894_s5 + $0x2c0] ss:$16 sps:$4 sm:$0xff]  }
 0x3b0   : > { %v6216_v8 = vadd.f32 %v6196_v47, %v6125_v20  ;;  %v6219_v16 = vadd.f32 %v6202_v33, %v6128_v45  ;;  %v6220_v52 = vadd.f32 %v6204_v2, %v6129_v60  ;;  %v6254_v10 = vmul.f32 %v6243_v21, %v18952_v61  ;;  %9818 = vmatprep.subr.bf16.mxu1 %v10849_v12  ;;  %v16916_v60 = vpop.permute.xlu1 %7366  ;;  %v6681_v55 = vld [vmem:[#allocation4 + $0x10] sm:$0xf8]  ;;  %v10859_v47 = vld [vmem:[%s17894_s5 + $0x2e8] ss:$16 sps:$4 sm:$0xff]   ;;  %v6773_v61 = vld [vmem:[#allocation4 + $0x18] sm:$0xc0] }
 0x3b1   : > { %v6255_v56 = vmul.f32 %v6247_v39, %v18953_v19  ;;  %v6258_v51 = vmul.f32 %v6243_v21, %v16729_v59  ;;  %v6259_v31 = vmul.f32 %v6247_v39, %v16742_v42  ;;  %v6262_v32 = vmul.f32 %v6243_v21, %v6227_v50  ;;  %9733 = vmatpush1.bf16.msra.mxu0 %v10844_v62  ;;  %v10853_v59 = vld [vmem:[%s17894_s5 + $0x2c8] ss:$16 sps:$4 sm:$0xff]   ;;  %v10858_v42 = vld [vmem:[%s17894_s5 + $0x2e4] ss:$16 sps:$4 sm:$0xff]   ;;  %v10856_v50 = vld [vmem:[%s17894_s5 + $0x2e0] ss:$16 sps:$4 sm:$0xff]  }
 0x3b2   : > { %v6263_v7 = vmul.f32 %v6247_v39, %v6228_v13  ;;  %v6282_v3 = vrot.slane %v6254_v10, 7  ;;  %v6349_v5 = vmul.f32 %v16883_v0, %v16731_v40  ;;  %v6350_v43 = vmul.f32 %v16886_v27, %v16744_v1  ;;  %9819 = vmatpush1.bf16.msra.mxu1 %v10847_v57  ;;  %9734 = vmatprep.subr.bf16.mxu0 %v10852_v18  ;;  %v16918_v40 = vpop.permute.xlu0 %7364  ;;  %v10861_v1 = vld [vmem:[%s17894_s5 + $0x2ec] ss:$16 sps:$4 sm:$0xff]   ;;  %v10988_v10 = vld [vmem:[#allocation5 + $0x42] ss:$8 sm:$0xf] }
 0x3b3   : > { %v6285_v4 = vrot.slane %v6255_v56, 7  ;;  %v6283_v36 = vrot.slane %v6258_v51, 7  ;;  %v6286_v46 = vrot.slane %v6259_v31, 7  ;;  %v6292_v20 = vrot.slane %v6262_v32, 7  ;;  %9820 = vmatprep.subr.bf16.mxu1 %v10855_v9  ;;  %v6682_v2 = vld [vmem:[#allocation4 + $0x18] sm:$0xf8] }
 0x3b4   : > { %v6294_v45 = vrot.slane %v6263_v7, 7  ;;  %v16924_v28 = vmul.f32 %v16883_v0, %v6318_v17  ;;  %v16927_v24 = vmul.f32 %v16886_v27, %v6319_v34  ;;  %v6377_v29 = vrot.slane %v6349_v5, 2  ;;  %v10986_v57 = vld [vmem:[#allocation5 + $0x4] ss:$8 sm:$0xf] }
 0x3b5   : > { %v6380_v26 = vrot.slane %v6350_v43, 2  ;;  %v6284_v23 = vsel %vm3256_vm5, %v6282_v3, %v6283_v36  ;;  %v6287_v12 = vsel %vm3256_vm5, %v6285_v4, %v6286_v46  ;;  %v6293_v37 = vsel %vm3256_vm5, %v6283_v36, %v6292_v20  ;;  %9735 = vmatpush1.bf16.msra.mxu0 %v10850_v58  ;;  %v10867_v51 = vld [vmem:[%s17894_s5 + $0x30c] ss:$16 sps:$4 sm:$0xff]   ;;  %v10989_v7 = vld [vmem:[#allocation4 + $0x10] sm:$0xff]  ;;  %v16977_v3 = vpop.permute.xlu1 %7376 }
 0x3b6   : > { %v6295_v38 = vsel %vm3256_vm5, %v6286_v46, %v6294_v45  ;;  %v6306_v6 = vadd.f32 %v6284_v23, %v6215_v22  ;;  %v6307_v21 = vadd.f32 %v6287_v12, %v6216_v8  ;;  %v16936_v39 = vadd.f32 %v6293_v37, %v6219_v16  ;;  %9821 = vmatpush1.bf16.msra.mxu1 %v10853_v59  ;;  %v10864_v22 = vld [vmem:[%s17894_s5 + $0x304] ss:$16 sps:$4 sm:$0xff]   ;;  %v10987_v8 = vld [vmem:[#allocation5 + $0x23] ss:$8 sm:$0xf]  ;;  %v16979_v4 = vpop.permute.xlu0 %7374 }
 0x3b7   : > { %v16938_v62 = vadd.f32 %v6295_v38, %v6220_v52  ;;  %v6378_v13 = vrot.slane %v16924_v28, 2  ;;  %v6381_v48 = vrot.slane %v16927_v24, 2  ;;  %v16946_v18 = vrot.slane %v10986_v57, %v18794_v53  ;;  %9736 = vmatprep.subr.bf16.mxu0 %v10858_v42  ;;  %9822 = vmatprep.subr.bf16.mxu1 %v10861_v1  ;;  %v6772_v52 = vld [vmem:[#allocation4 + $0x10] sm:$0xc0]  ;;  %v10990_v34 = vld [vmem:[#allocation4 + $0x18] sm:$0xff] }
 0x3b8   : > { %v16949_v33 = vrot.slane %v10986_v57, %v18796_v15  ;;  %v16955_v9 = vrot.slane %v10987_v8, %v18794_v53  ;;  %v16958_v16 = vrot.slane %v10987_v8, %v18796_v15  ;;  %v16961_v19 = vrot.slane %v10988_v10, %v18794_v53  ;;  %v10862_v5 = vld [vmem:[%s17894_s5 + $0x300] ss:$16 sps:$4 sm:$0xff]   ;;  %v10865_v46 = vld [vmem:[%s17894_s5 + $0x308] ss:$16 sps:$4 sm:$0xff]   ;;  %v10870_v20 = vld [vmem:[%s17894_s5 + $0x324] ss:$16 sps:$4 sm:$0xff]  }
 0x3b9   : > { %v16964_v56 = vrot.slane %v10988_v10, %v18796_v15  ;;  %v6379_v31 = vsel %vm793_vm7, %v6377_v29, %v6378_v13  ;;  %v6382_v32 = vsel %vm793_vm7, %v6380_v26, %v6381_v48  ;;  %v6665_v17 = vmul.f32 %v10989_v7, %v16946_v18  ;;  %9737 = vmatpush1.bf16.msra.mxu0 %v10856_v50  ;;  %v10991_v45 = vld [vmem:[#allocation4 + $0x30] sm:$0xff]  ;;  %v10992_v29 = vld [vmem:[#allocation4 + $0x38] sm:$0xff] }
 0x3ba   : > { %v6666_v58 = vmul.f32 %v10990_v34, %v16949_v33  ;;  %v6401_v43 = vadd.f32 %v6379_v31, %v6306_v6  ;;  %v6402_v59 = vadd.f32 %v6382_v32, %v6307_v21  ;;  %v6712_v42 = vmul.f32 %v16955_v9, %v6681_v55  ;;  %9823 = vmatpush1.bf16.msra.mxu1 %v10859_v47  ;;  %v10873_v37 = vld [vmem:[%s17894_s5 + $0x32c] ss:$16 sps:$4 sm:$0xff]   ;;  %v6322_v55 = vld [vmem:[#allocation4 + $0x90] sm:$0x3]  ;;  %v10871_v7 = vld [vmem:[%s17894_s5 + $0x328] ss:$16 sps:$4 sm:$0xff]  }
 0x3bb   : > { %v6713_v36 = vmul.f32 %v16958_v16, %v6682_v2  ;;  %v16993_v1 = vmul.f32 %v10991_v45, %v16955_v9  ;;  %v16996_v26 = vmul.f32 %v10992_v29, %v16958_v16  ;;  %v6803_v23 = vmul.f32 %v16961_v19, %v6772_v52  ;;  %9738 = vmatprep.subr.bf16.mxu0 %v10864_v22  ;;  %v6323_v22 = vld [vmem:[#allocation4 + $0x98] sm:$0x3]  ;;  %v10868_v52 = vld [vmem:[%s17894_s5 + $0x320] ss:$16 sps:$4 sm:$0xff]   ;;  %v17110_v28 = vld [vmem:[#allocation4 + $0x38] sm:$0x80] }
 0x3bc   : > { %v6804_v12 = vmul.f32 %v16964_v56, %v6773_v61  ;;  %v6673_v38 = vadd.f32 %v6665_v17, %v6401_v43  ;;  %v6674_v50 = vadd.f32 %v6666_v58, %v6402_v59  ;;  %v6740_v6 = vrot.slane %v6712_v42, 3  ;;  %9824 = vmatprep.subr.bf16.mxu1 %v10867_v51  ;;  %v18954_v51 = vld [vmem:[#allocation29_spill] sm:$0xff]  ;;  %v10876_v17 = vld [vmem:[%s17894_s5 + $0x344] ss:$16 sps:$4 sm:$0xff]   ;;  %v17042_v43 = vpop.permute.xlu0 %7384 }
 0x3bd   : > { %v6743_v21 = vrot.slane %v6713_v36, 3  ;;  %v6741_v47 = vrot.slane %v16993_v1, 3  ;;  %v6744_v57 = vrot.slane %v16996_v26, 3  ;;  %v17006_v2 = vmul.f32 %v10991_v45, %v16961_v19  ;;  %9739 = vmatpush1.bf16.msra.mxu0 %v10862_v5  ;;  %v17040_v5 = vpop.permute.xlu1 %7386  ;;  %v10879_v59 = vld [vmem:[%s17894_s5 + $0x34c] ss:$16 sps:$4 sm:$0xff]  }
 0x3be   : > { %v17009_v8 = vmul.f32 %v10992_v29, %v16964_v56  ;;  %v6831_v61 = vrot.slane %v6803_v23, 6  ;;  %v6834_v10 = vrot.slane %v6804_v12, 6  ;;  %v17017_v31 = vsel %vm415_vm4, %v18954_v51, %v16809_v25  ;;  %9825 = vmatpush1.bf16.msra.mxu1 %v10865_v46  ;;  %9740 = vmatprep.subr.bf16.mxu0 %v10870_v20  ;;  %v6777_v51 = vld [vmem:[#allocation4 + $0x58] sm:$0x3f] }
 0x3bf   : > { %v17022_v32 = vsel %vm415_vm4, %v16809_v25, %v16807_v41  ;;  %v6742_v34 = vsel %vm885_vm8, %v6740_v6, %v6741_v47  ;;  %v6745_v58 = vsel %vm885_vm8, %v6743_v21, %v6744_v57  ;;  %v6832_v41 = vrot.slane %v17006_v2, 6  ;;  %6626 = vst [vmem:[#allocation4 + $0x70] sm:$0xff] %v17017_v31  ;;  %9826 = vmatprep.subr.bf16.mxu1 %v10873_v37  ;;  %v10885_v24 = vld [vmem:[%s17894_s5 + $0x36c] ss:$16 sps:$4 sm:$0xff]   ;;  %v10894_v2 = vld [vmem:[%s17894_s5 + $0x3a4] ss:$16 sps:$4 sm:$0xff]  }
 0x3c0   : > { %v6835_v25 = vrot.slane %v17009_v8, 6  ;;  %6627 = vst [vmem:[#allocation4 + $0x78] sm:$0xff] %v17022_v32  ;;  %v6764_v42 = vadd.f32 %v6742_v34, %v6673_v38  ;;  %v6765_v36 = vadd.f32 %v6745_v58, %v6674_v50  ;;  %v6357_v46 = vmul.f32 %v16883_v0, %v6322_v55  ;;  %v10874_v38 = vld [vmem:[%s17894_s5 + $0x340] ss:$16 sps:$4 sm:$0xff]   ;;  %v10877_v0 = vld [vmem:[%s17894_s5 + $0x348] ss:$16 sps:$4 sm:$0xff]  }
 0x3c1   : > { %v6358_v20 = vmul.f32 %v16886_v27, %v6323_v22  ;;  %v6833_v23 = vsel %vm498_vm3, %v6831_v61, %v6832_v41  ;;  %v6669_v37 = vmul.f32 %v10991_v45, %v16946_v18  ;;  %v6670_v6 = vmul.f32 %v10992_v29, %v16949_v33  ;;  %9741 = vmatpush1.bf16.msra.mxu0 %v10868_v52  ;;  %v6685_v27 = vld [vmem:[#allocation4 + $0x50] sm:$0x7]  ;;  %v6864_v18 = vld [vmem:[#allocation4 + $0x38] sm:$0xfe]  ;;  %v17067_v45 = vld [vmem:[#allocation4 + $0x30] sm:$0xf0] }
 0x3c2   : > { %v6836_v12 = vsel %vm498_vm3, %v6834_v10, %v6835_v25  ;;  %v17063_v50 = vadd.f32 %v6833_v23, %v6764_v42  ;;  %v6387_v55 = vrot.slane %v6357_v46, 2  ;;  %v6863_v61 = vld [vmem:[#allocation4 + $0x30] sm:$0xfe]  ;;  %v17069_v33 = vld [vmem:[#allocation4 + $0x38] sm:$0xf0]  ;;  %9827 = vmatpush1.bf16.msra.mxu1 %v10871_v7  ;;  %9742 = vmatprep.subr.bf16.mxu0 %v10876_v17  ;;  %v18955_v34 = vld [vmem:[#allocation32_spill] sm:$0xff]  ;;  %v6591_v42 = vsel %vm415_vm4, %v16845_v14, %v16843_v44 }
 0x3c3   : > { %v17065_v21 = vadd.f32 %v6836_v12, %v6765_v36  ;;  %v6389_v22 = vrot.slane %v6358_v20, 2  ;;  %v10882_v29 = vld [vmem:[%s17894_s5 + $0x364] ss:$16 sps:$4 sm:$0xff]   ;;  %v6686_v52 = vld [vmem:[#allocation4 + $0x58] sm:$0x7]  ;;  %v6590_v58 = vsel %vm415_vm4, %v18955_v34, %v16845_v14  ;;  %v18956_v36 = vld [vmem:[#allocation49_spill] sm:$0xff]  ;;  %v17088_v17 = vsel %vm363_vm1, %v16875_v54, %v16873_v30  ;;  %9828 = vmatprep.subr.bf16.mxu1 %v10879_v59 }
 0x3c4   : > { %v6776_v10 = vld [vmem:[#allocation4 + $0x50] sm:$0x3f]  ;;  %v17083_v7 = vsel %vm363_vm1, %v18956_v36, %v16875_v54  ;;  %v6388_v46 = vsel %vm793_vm7, %v6378_v13, %v6387_v55  ;;  %6630 = vst [vmem:[#allocation4 + $0x90] sm:$0x3] %v6590_v58  ;;  %6631 = vst [vmem:[#allocation4 + $0x98] sm:$0x3] %v6591_v42  ;;  %v17106_v30 = vsel %vm363_vm1, %v16918_v40, %v16916_v60  ;;  %v17131_v55 = vpop.permute.xlu1 %7396 }
 0x3c5   : > { %v6390_v20 = vsel %vm793_vm7, %v6381_v48, %v6389_v22  ;;  %7440 = vst [vmem:[#allocation4 + $0x10] sm:$0xff] %v17083_v7  ;;  %7441 = vst [vmem:[#allocation4 + $0x18] sm:$0xff] %v17088_v17  ;;  %v18957_v44 = vld [vmem:[#allocation26_spill] sm:$0xff]  ;;  %v17117_v48 = vld [vmem:[#allocation4 + $0x58] sm:$0xfc]  ;;  %v6405_v59 = vadd.f32 %v6388_v46, %v16936_v39  ;;  %v17133_v22 = vpop.permute.xlu0 %7394  ;;  %9743 = vmatpush1.bf16.msra.mxu0 %v10874_v38  ;;  %v6812_v34 = vmul.f32 %v16964_v56, %v6777_v51 }
 0x3c6   : > { %v17101_v14 = vsel %vm363_vm1, %v18957_v44, %v16918_v40  ;;  %v17108_v54 = vld [vmem:[#allocation4 + $0x30] sm:$0x80]  ;;  %v6406_v23 = vadd.f32 %v6390_v20, %v16938_v62  ;;  %v18958_v12 = vld [vmem:[#allocation31_spill] sm:$0xff]  ;;  %v17127_v40 = vsel %vm363_vm1, %v16979_v4, %v16977_v3  ;;  %7445 = vst [vmem:[#allocation4 + $0x38] sm:$0xff] %v17106_v30  ;;  %v10880_v39 = vld [vmem:[%s17894_s5 + $0x360] ss:$16 sps:$4 sm:$0xff]   ;;  %v6720_v62 = vmul.f32 %v16955_v9, %v6685_v27 }
 0x3c7   : > { %v17115_v13 = vld [vmem:[#allocation4 + $0x50] sm:$0xfc]  ;;  %v7408_v60 = vsel %vm363_vm1, %v18958_v12, %v16979_v4  ;;  %7444 = vst [vmem:[#allocation4 + $0x30] sm:$0xff] %v17101_v14  ;;  %7449 = vst [vmem:[#allocation4 + $0x58] sm:$0xff] %v17127_v40  ;;  %v6721_v3 = vmul.f32 %v16958_v16, %v6686_v52  ;;  %v6811_v4 = vmul.f32 %v16961_v19, %v6776_v10  ;;  %9829 = vmatpush1.bf16.msra.mxu1 %v10877_v0  ;;  %v10883_v38 = vld [vmem:[%s17894_s5 + $0x368] ss:$16 sps:$4 sm:$0xff]  }
 0x3c8   : > { %7448 = vst [vmem:[#allocation4 + $0x50] sm:$0xff] %v7408_v60  ;;  %v6677_v58 = vadd.f32 %v6669_v37, %v6405_v59  ;;  %v6678_v42 = vadd.f32 %v6670_v6, %v6406_v23  ;;  %v6871_v36 = vld [vmem:[#allocation4 + $0x70] sm:$0x1]  ;;  %v10993_v46 = vld [vmem:[#allocation5 + $0x61] ss:$8 sm:$0xf]  ;;  %9744 = vmatprep.subr.bf16.mxu0 %v10882_v29  ;;  %9830 = vmatprep.subr.bf16.mxu1 %v10885_v24  ;;  %v17174_v26 = vpop.permute.xlu1 %8182 }
 0x3c9   : > { %v6887_v20 = vrot.slane %v10993_v46, %v18794_v53  ;;  %v6891_v44 = vrot.slane %v10993_v46, %v18796_v15  ;;  %v10888_v9 = vld [vmem:[%s17894_s5 + $0x384] ss:$16 sps:$4 sm:$0xff]   ;;  %v10891_v16 = vld [vmem:[%s17894_s5 + $0x38c] ss:$16 sps:$4 sm:$0xff]   ;;  %v6750_v19 = vrot.slane %v6720_v62, 3  ;;  %v6752_v56 = vrot.slane %v6721_v3, 3  ;;  %9745 = vmatpush1.bf16.msra.mxu0 %v10880_v39 }
 0x3ca   : > { %v6841_v0 = vrot.slane %v6811_v4, 6  ;;  %v6843_v37 = vrot.slane %v6812_v34, 6  ;;  %v6872_v6 = vld [vmem:[#allocation4 + $0x78] sm:$0x1]  ;;  %v10886_v51 = vld [vmem:[%s17894_s5 + $0x380] ss:$16 sps:$4 sm:$0xff]   ;;  %9746 = vmatprep.subr.bf16.mxu0 %v10888_v9 }
 0x3cb   : > { %v6898_v27 = vmul.f32 %v6887_v20, %v6863_v61  ;;  %v6899_v52 = vmul.f32 %v6891_v44, %v6864_v18  ;;  %v6902_v10 = vmul.f32 %v6887_v20, %v16735_v11  ;;  %v6903_v29 = vmul.f32 %v6891_v44, %v16747_v63  ;;  %9831 = vmatpush1.bf16.msra.mxu1 %v10883_v38  ;;  %v10889_v24 = vld [vmem:[%s17894_s5 + $0x388] ss:$16 sps:$4 sm:$0xff]   ;;  %v10897_v62 = vld [vmem:[%s17894_s5 + $0x3ac] ss:$16 sps:$4 sm:$0xff]  }
 0x3cc   : > { %v6751_v59 = vsel %vm885_vm8, %v6741_v47, %v6750_v19  ;;  %v6753_v23 = vsel %vm885_vm8, %v6744_v57, %v6752_v56  ;;  %v6842_v61 = vsel %vm498_vm3, %v6832_v41, %v6841_v0  ;;  %v6844_v18 = vsel %vm498_vm3, %v6835_v25, %v6843_v37  ;;  %v17176_v57 = vpop.permute.xlu0 %8180  ;;  %9832 = vmatprep.subr.bf16.mxu1 %v10891_v16  ;;  %v10994_v9 = vld [vmem:[#allocation5 + $0x80] ss:$8 sm:$0xf]  ;;  %v10900_v56 = vld [vmem:[%s17894_s5 + $0x3c4] ss:$16 sps:$4 sm:$0xff]  }
 0x3cd   : > { %v6768_v1 = vadd.f32 %v6751_v59, %v6677_v58  ;;  %v6769_v12 = vadd.f32 %v6753_v23, %v6678_v42  ;;  %v6906_v47 = vmul.f32 %v6887_v20, %v6871_v36  ;;  %v6907_v60 = vmul.f32 %v6891_v44, %v6872_v6  ;;  %9747 = vmatpush1.bf16.msra.mxu0 %v10886_v51  ;;  %v10892_v58 = vld [vmem:[%s17894_s5 + $0x3a0] ss:$16 sps:$4 sm:$0xff]   ;;  %v10895_v42 = vld [vmem:[%s17894_s5 + $0x3a8] ss:$16 sps:$4 sm:$0xff]  }
 0x3ce   : > { %v6926_v8 = vrot.slane %v6898_v27, 1  ;;  %v6927_v41 = vrot.slane %v6902_v10, 1  ;;  %v6929_v25 = vrot.slane %v6899_v52, 1  ;;  %v6930_v39 = vrot.slane %v6903_v29, 1  ;;  %v6962_v20 = vld [vmem:[#allocation4 + $0x70] sm:$0xf]  ;;  %9748 = vmatprep.subr.bf16.mxu0 %v10894_v2 }
 0x3cf   : > { %v6859_v3 = vadd.f32 %v6842_v61, %v6768_v1  ;;  %v6860_v4 = vadd.f32 %v6844_v18, %v6769_v12  ;;  %v6936_v34 = vrot.slane %v6906_v47, 1  ;;  %v6938_v38 = vrot.slane %v6907_v60, 1  ;;  %v6963_v44 = vld [vmem:[#allocation4 + $0x78] sm:$0xf]  ;;  %9833 = vmatpush1.bf16.msra.mxu1 %v10889_v24  ;;  %v10903_v52 = vld [vmem:[%s17894_s5 + $0x3cc] ss:$16 sps:$4 sm:$0xff]   ;;  %v17208_v24 = vpop.permute.xlu1 %8192 }
 0x3d0   : > { %v6928_v36 = vsel %vm701_vm6, %v6926_v8, %v6927_v41  ;;  %v6931_v46 = vsel %vm701_vm6, %v6929_v25, %v6930_v39  ;;  %v6978_v16 = vrot.slane %v10994_v9, %v18794_v53  ;;  %v6982_v19 = vrot.slane %v10994_v9, %v18796_v15  ;;  %9834 = vmatprep.subr.bf16.mxu1 %v10897_v62  ;;  %v10898_v1 = vld [vmem:[%s17894_s5 + $0x3c0] ss:$16 sps:$4 sm:$0xff]   ;;  %v10995_v47 = vld [vmem:[#allocation5 + $0x87] ss:$8 sm:$0xf] }
 0x3d1   : > { %v6937_v0 = vsel %vm701_vm6, %v6927_v41, %v6936_v34  ;;  %v6939_v37 = vsel %vm701_vm6, %v6930_v39, %v6938_v38  ;;  %v6950_v6 = vadd.f32 %v6928_v36, %v17063_v50  ;;  %v6951_v27 = vadd.f32 %v6931_v46, %v17065_v21  ;;  %v17210_v21 = vpop.permute.xlu0 %8190  ;;  %9749 = vmatpush1.bf16.msra.mxu0 %v10892_v58  ;;  %v10901_v2 = vld [vmem:[%s17894_s5 + $0x3c8] ss:$16 sps:$4 sm:$0xff]   ;;  %v10906_v8 = vld [vmem:[%s17894_s5 + $0x3e4] ss:$16 sps:$4 sm:$0xff]  }
 0x3d2   : > { %v6954_v10 = vadd.f32 %v6937_v0, %v6859_v3  ;;  %v6955_v29 = vadd.f32 %v6939_v37, %v6860_v4  ;;  %v6989_v51 = vmul.f32 %v6978_v16, %v17067_v45  ;;  %v6990_v59 = vmul.f32 %v6982_v19, %v17069_v33  ;;  %9750 = vmatprep.subr.bf16.mxu0 %v10900_v56  ;;  %v10909_v3 = vld [vmem:[%s17894_s5 + $0x3ec] ss:$16 sps:$4 sm:$0xff]   ;;  %v7053_v4 = vld [vmem:[#allocation4 + $0x70] sm:$0x7f] }
 0x3d3   : > { %v6993_v23 = vmul.f32 %v6978_v16, %v16735_v11  ;;  %v6994_v61 = vmul.f32 %v6982_v19, %v16747_v63  ;;  %v6997_v18 = vmul.f32 %v6978_v16, %v6962_v20  ;;  %v6998_v50 = vmul.f32 %v6982_v19, %v6963_v44  ;;  %9835 = vmatpush1.bf16.msra.mxu1 %v10895_v42  ;;  %v7054_v34 = vld [vmem:[#allocation4 + $0x78] sm:$0x7f]  ;;  %v10904_v16 = vld [vmem:[%s17894_s5 + $0x3e0] ss:$16 sps:$4 sm:$0xff]  }
 0x3d4   : > { %v7017_v12 = vrot.slane %v6989_v51, 4  ;;  %v7020_v45 = vrot.slane %v6990_v59, 4  ;;  %v7069_v33 = vrot.slane %v10995_v47, %v18794_v53  ;;  %v7073_v60 = vrot.slane %v10995_v47, %v18796_v15  ;;  %9836 = vmatprep.subr.bf16.mxu1 %v10903_v52  ;;  %v17240_v51 = vpop.permute.xlu1 %8202 }
 0x3d5   : > { %v7018_v41 = vrot.slane %v6993_v23, 4  ;;  %v7021_v25 = vrot.slane %v6994_v61, 4  ;;  %v7027_v39 = vrot.slane %v6997_v18, 4  ;;  %v7029_v62 = vrot.slane %v6998_v50, 4  ;;  %9751 = vmatpush1.bf16.msra.mxu0 %v10898_v1  ;;  %v17242_v59 = vpop.permute.xlu0 %8200  ;;  %v7148_v1 = vld [vmem:[#allocation4 + $0x90] sm:$0x3] }
 0x3d6   : > { %v7080_v38 = vmul.f32 %v7069_v33, %v17108_v54  ;;  %v7081_v58 = vmul.f32 %v7073_v60, %v17110_v28  ;;  %v7084_v42 = vmul.f32 %v7069_v33, %v16735_v11  ;;  %v7085_v36 = vmul.f32 %v7073_v60, %v16747_v63  ;;  %v10907_v11 = vld [vmem:[%s17894_s5 + $0x3e8] ss:$16 sps:$4 sm:$0xff]   ;;  %9752 = vmatprep.subr.bf16.mxu0 %v10906_v8 }
 0x3d7   : > { %v7019_v46 = vsel %vm977_vm9, %v7017_v12, %v7018_v41  ;;  %v7022_v20 = vsel %vm977_vm9, %v7020_v45, %v7021_v25  ;;  %v7028_v44 = vsel %vm977_vm9, %v7018_v41, %v7027_v39  ;;  %v7030_v9 = vsel %vm977_vm9, %v7021_v25, %v7029_v62  ;;  %9837 = vmatpush1.bf16.msra.mxu1 %v10901_v2  ;;  %v17247_v12 = vld [vmem:[#allocation5 + $0x5] ss:$8 sm:$0xf] }
 0x3d8   : > { %v7041_v54 = vadd.f32 %v7019_v46, %v6950_v6  ;;  %v7042_v19 = vadd.f32 %v7022_v20, %v6951_v27  ;;  %v7045_v28 = vadd.f32 %v7028_v44, %v6954_v10  ;;  %v7046_v56 = vadd.f32 %v7030_v9, %v6955_v29  ;;  %9838 = vmatprep.subr.bf16.mxu1 %v10909_v3  ;;  %v10996_v27 = vld [vmem:[#allocation5 + $0xa6] ss:$8 sm:$0xf] }
 0x3d9   : > { %v7088_v63 = vmul.f32 %v7069_v33, %v7053_v4  ;;  %v7089_v0 = vmul.f32 %v7073_v60, %v7054_v34  ;;  %v7108_v37 = vrot.slane %v7080_v38, 7  ;;  %v7109_v52 = vrot.slane %v7084_v42, 7  ;;  %9753 = vmatpush1.bf16.msra.mxu0 %v10904_v16  ;;  %v7149_v60 = vld [vmem:[#allocation4 + $0x98] sm:$0x3] }
 0x3da   : > { %v7111_v23 = vrot.slane %v7081_v58, 7  ;;  %v7112_v6 = vrot.slane %v7085_v36, 7  ;;  %v7164_v10 = vrot.slane %v10996_v27, %v18794_v53  ;;  %v7168_v29 = vrot.slane %v10996_v27, %v18796_v15  ;;  %v17292_v27 = vld [vmem:[#allocation4 + $0x38] sm:$0xfe] }
 0x3db   : > { %v7110_v61 = vsel %vm3256_vm5, %v7108_v37, %v7109_v52  ;;  %v7118_v18 = vrot.slane %v7088_v63, 7  ;;  %v7120_v50 = vrot.slane %v7089_v0, 7  ;;  %v7480_v45 = vrot.slane %v17247_v12, %v18794_v53  ;;  %9839 = vmatpush1.bf16.msra.mxu1 %v10907_v11  ;;  %v18960_v63 = vld [vmem:[#allocation20_spill] sm:$0xff]  ;;  %v17282_v37 = vld [vmem:[#allocation4 + $0x18] sm:$0xf8] }
 0x3dc   : > { %v7113_v47 = vsel %vm3256_vm5, %v7111_v23, %v7112_v6  ;;  %v7132_v33 = vadd.f32 %v7110_v61, %v7041_v54  ;;  %v7175_v2 = vmul.f32 %v7164_v10, %v17115_v13  ;;  %v7176_v8 = vmul.f32 %v7168_v29, %v17117_v48  ;;  %v17258_v13 = vpop.permute.xlu1 %8212  ;;  %v17260_v48 = vpop.permute.xlu0 %8210  ;;  %v17298_v61 = vld [vmem:[#allocation4 + $0x10] sm:$0xf8] }
 0x3dd   : > { %v7119_v41 = vsel %vm3256_vm5, %v7109_v52, %v7118_v18  ;;  %v7121_v25 = vsel %vm3256_vm5, %v7112_v6, %v7120_v50  ;;  %v7133_v39 = vadd.f32 %v7113_v47, %v7042_v19  ;;  %v7179_v62 = vmul.f32 %v7164_v10, %v17017_v31  ;;  %v17284_v52 = vld [vmem:[#allocation4 + $0x18] sm:$0xc0]  ;;  %v17300_v18 = vld [vmem:[#allocation4 + $0x50] sm:$0x7]  ;;  %v17302_v50 = vld [vmem:[#allocation4 + $0x10] sm:$0xc0] }
 0x3de   : > { %v7136_v3 = vadd.f32 %v7119_v41, %v7045_v28  ;;  %v7137_v4 = vadd.f32 %v7121_v25, %v7046_v56  ;;  %v7180_v34 = vmul.f32 %v7168_v29, %v17022_v32  ;;  %v7183_v38 = vmul.f32 %v7164_v10, %v7148_v1  ;;  %v18959_v32 = vld [vmem:[#allocation56_spill] sm:$0xff]  ;;  %v17294_v10 = vld [vmem:[#allocation4 + $0x38] sm:$0xf0]  ;;  %v18963_v41 = vld [vmem:[#allocation86_spill] sm:$0xff] }
 0x3df   : > { %v7184_v58 = vmul.f32 %v7168_v29, %v7149_v60  ;;  %v7203_v42 = vrot.slane %v7175_v2, 2  ;;  %v7204_v36 = vrot.slane %v7179_v62, 2  ;;  %v7206_v46 = vrot.slane %v7176_v8, 2  ;;  %v17296_v29 = vld [vmem:[#allocation4 + $0x38] sm:$0x80]  ;;  %v17322_v2 = vld [vmem:[#allocation4 + $0x50] sm:$0xff] }
 0x3e0   : > { %v7207_v20 = vrot.slane %v7180_v34, 2  ;;  %v7213_v44 = vrot.slane %v7183_v38, 2  ;;  %v7491_v9 = vmul.f32 %v7480_v45, %v17083_v7  ;;  %v7495_v16 = vmul.f32 %v7480_v45, %v17101_v14  ;;  %v17320_v60 = vld [vmem:[#allocation4 + $0x30] sm:$0xfe]  ;;  %v8223_v62 = vpop.permute.xlu1 %8222 }
 0x3e1   : > { %v7205_v31 = vsel %vm793_vm7, %v7203_v42, %v7204_v36  ;;  %v7215_v54 = vrot.slane %v7184_v58, 2  ;;  %v17268_v19 = vsel %vm363_vm1, %v18959_v32, %v17042_v43  ;;  %v17273_v28 = vsel %vm363_vm1, %v17042_v43, %v17040_v5  ;;  %v17344_v34 = vld [vmem:[#allocation4 + $0x30] sm:$0x80] }
 0x3e2   : > { %v7208_v56 = vsel %vm793_vm7, %v7206_v46, %v7207_v20  ;;  %v7214_v11 = vsel %vm793_vm7, %v7204_v36, %v7213_v44  ;;  %v7227_v7 = vadd.f32 %v7205_v31, %v7132_v33  ;;  %7452 = vst [vmem:[#allocation4 + $0x70] sm:$0xff] %v17268_v19  ;;  %7453 = vst [vmem:[#allocation4 + $0x78] sm:$0xff] %v17273_v28  ;;  %v17318_v33 = vld [vmem:[#allocation4 + $0x50] sm:$0x3f]  ;;  %v7603_v44 = vld [vmem:[#allocation4 + $0x58] sm:$0x3f] }
 0x3e3   : > { %v7416_v0 = vsel %vm363_vm1, %v18960_v63, %v17133_v22  ;;  %v7216_v5 = vsel %vm793_vm7, %v7207_v20, %v7215_v54  ;;  %v17287_v43 = vadd.f32 %v7208_v56, %v7133_v39  ;;  %v7231_v23 = vadd.f32 %v7214_v11, %v7136_v3  ;;  %v8221_v3 = vpop.permute.xlu0 %8220  ;;  %v17346_v38 = vld [vmem:[#allocation4 + $0x50] sm:$0xfc]  ;;  %v10999_v36 = vld [vmem:[#allocation5 + $0x81] ss:$8 sm:$0xf] }
 0x3e4   : > { %v7417_v6 = vsel %vm363_vm1, %v17133_v22, %v17131_v55  ;;  %7456 = vst [vmem:[#allocation4 + $0x90] sm:$0x3] %v7416_v0  ;;  %v17304_v1 = vadd.f32 %v7216_v5, %v7137_v4  ;;  %v17306_v45 = vadd.f32 %v7491_v9, %v7227_v7  ;;  %v18961_v55 = vld [vmem:[#allocation52_spill] sm:$0xff]  ;;  %v17316_v47 = vsel %vm2166_vm10, %v17176_v57, %v17174_v26  ;;  %v18965_v26 = vld [vmem:[#allocation78_spill] sm:$0xff]  ;;  %v7512_v20 = vld [vmem:[#allocation4 + $0x58] sm:$0x7] }
 0x3e5   : > { %7457 = vst [vmem:[#allocation4 + $0x98] sm:$0x3] %v7417_v6  ;;  %v17311_v22 = vsel %vm2166_vm10, %v18961_v55, %v17176_v57  ;;  %v17324_v8 = vadd.f32 %v7495_v16, %v7231_v23  ;;  %v17329_v25 = vsel %vm2166_vm10, %v18963_v41, %v17210_v21  ;;  %v17334_v39 = vsel %vm2166_vm10, %v17210_v21, %v17208_v24  ;;  %v17342_v4 = vld [vmem:[#allocation4 + $0x30] sm:$0xf0]  ;;  %v17363_v9 = vld [vmem:[#allocation4 + $0x58] sm:$0xfc] }
 0x3e6   : > { %18962 = vst [vmem:[#allocation51_spill] sm:$0xff] %v17311_v22  ;;  %18964 = vst [vmem:[#allocation57_spill] sm:$0xff] %v17329_v25  ;;  %v17339_v57 = vsel %vm2166_vm10, %v18965_v26, %v17242_v59  ;;  %v17352_v24 = vsel %vm2166_vm10, %v17242_v59, %v17240_v51  ;;  %v10998_v21 = vld [vmem:[#allocation5 + $0x62] ss:$8 sm:$0xf]  ;;  %v17361_v46 = vrot.slane %v10999_v36, %v18794_v53 }
 0x3e7   : > { %18966 = vst [vmem:[#allocation60_spill] sm:$0xff] %v17339_v57  ;;  %8267 = vst [vmem:[#allocation4 + $0x18] sm:$0xff] %v17316_v47  ;;  %v17355_v58 = vrot.slane %v10998_v21, %v18794_v53  ;;  %v17358_v42 = vrot.slane %v10998_v21, %v18796_v15  ;;  %v17369_v51 = vrot.slane %v10999_v36, %v18796_v15  ;;  %v11000_v59 = vld [vmem:[#allocation5 + $0xa0] ss:$8 sm:$0xf] }
 0x3e8   : > { %8266 = vst [vmem:[#allocation4 + $0x10] sm:$0xff] %v17311_v22  ;;  %8271 = vst [vmem:[#allocation4 + $0x38] sm:$0xff] %v17334_v39  ;;  %v17372_v16 = vrot.slane %v11000_v59, %v18794_v53  ;;  %v17375_v31 = vrot.slane %v11000_v59, %v18796_v15  ;;  %v17377_v54 = vld [vmem:[#allocation5 + $0xa7] ss:$8 sm:$0xf]  ;;  %v17392_v7 = vsel %vm2166_vm10, %v17260_v48, %v17258_v13 }
 0x3e9   : > { %8270 = vst [vmem:[#allocation4 + $0x30] sm:$0xff] %v17329_v25  ;;  %8274 = vst [vmem:[#allocation4 + $0x50] sm:$0xff] %v17339_v57  ;;  %v17381_v32 = vrot.slane %v17377_v54, %v18794_v53  ;;  %v18968_v56 = vld [vmem:[#allocation25_spill] sm:$0xff]  ;;  %v18970_v63 = vld [vmem:[#allocation63_spill] sm:$0xff]  ;;  %v8243_v5 = vsel %vm2166_vm10, %v8221_v3, %v8223_v62  ;;  %v7484_v26 = vrot.slane %v17247_v12, %v18796_v15 }
 0x3ea   : > { %8275 = vst [vmem:[#allocation4 + $0x58] sm:$0xff] %v17352_v24  ;;  %v17387_v11 = vsel %vm2166_vm10, %v18968_v56, %v17260_v48  ;;  %v8242_v0 = vsel %vm2166_vm10, %v18970_v63, %v8221_v3  ;;  %v7697_v23 = vld [vmem:[#allocation4 + $0x70] sm:$0x1]  ;;  %v7698_v6 = vld [vmem:[#allocation4 + $0x78] sm:$0x1]  ;;  %v7725_v63 = vmul.f32 %v17358_v42, %v17292_v27 }
 0x3eb   : > { %18967 = vst [vmem:[#allocation79_spill] sm:$0xff] %v17381_v32  ;;  %18969 = vst [vmem:[#allocation72_spill] sm:$0xff] %v17387_v11  ;;  %v7788_v55 = vld [vmem:[#allocation4 + $0x70] sm:$0xf]  ;;  %v17399_v41 = vmul.f32 %v17381_v32, %v17268_v19  ;;  %v17412_v3 = vmul.f32 %v17355_v58, %v7697_v23  ;;  %v7733_v36 = vmul.f32 %v17358_v42, %v7698_v6  ;;  %v7789_v19 = vld [vmem:[#allocation4 + $0x78] sm:$0xf] }
 0x3ec   : > { %v17403_v21 = vld [vmem:[#allocation5 + $0x24] ss:$8 sm:$0xf]  ;;  %v17407_v48 = vld [vmem:[#allocation5 + $0x43] ss:$8 sm:$0xf]  ;;  %v17416_v59 = vmul.f32 %v17361_v46, %v7788_v55  ;;  %v7824_v35 = vmul.f32 %v17369_v51, %v7789_v19  ;;  %v7496_v23 = vmul.f32 %v7484_v26, %v17106_v30 }
 0x3ed   : > { %18971 = vst [vmem:[#allocation74_spill] sm:$0xff] %v17399_v41  ;;  %v7531_v13 = vrot.slane %v17403_v21, %v18796_v15  ;;  %v7622_v62 = vrot.slane %v17407_v48, %v18796_v15  ;;  %v7879_v12 = vld [vmem:[#allocation4 + $0x70] sm:$0x7f]  ;;  %v7880_v56 = vld [vmem:[#allocation4 + $0x78] sm:$0x7f]  ;;  %v7764_v27 = vrot.slane %v7733_v36, 1 }
 0x3ee   : > { %v17422_v49 = vmul.f32 %v17372_v16, %v7879_v12  ;;  %v17425_v57 = vmul.f32 %v17375_v31, %v7880_v56  ;;  %8278 = vst [vmem:[#allocation4 + $0x70] sm:$0xff] %v17387_v11  ;;  %8279 = vst [vmem:[#allocation4 + $0x78] sm:$0xff] %v17392_v7  ;;  %v17430_v6 = vld [vmem:[#allocation4 + $0x90] sm:$0x3]  ;;  %v7975_v55 = vld [vmem:[#allocation4 + $0x98] sm:$0x3]  ;;  %v7492_v12 = vmul.f32 %v7484_v26, %v17088_v17 }
 0x3ef   : > { %18973 = vst [vmem:[#allocation75_spill] sm:$0xff] %v17430_v6  ;;  %8282 = vst [vmem:[#allocation4 + $0x90] sm:$0x3] %v8242_v0  ;;  %v7855_v56 = vrot.slane %v7824_v35, 4  ;;  %v7539_v11 = vmul.f32 %v7531_v13, %v17282_v37  ;;  %v7543_v6 = vmul.f32 %v7531_v13, %v17106_v30  ;;  %v7547_v32 = vmul.f32 %v7531_v13, %v7512_v20 }
 0x3f0   : > { %18972 = vst [vmem:[#allocation13_spill] sm:$0xff] %v17422_v49  ;;  %8283 = vst [vmem:[#allocation4 + $0x98] sm:$0x3] %v8243_v5  ;;  %v7500_v41 = vadd.f32 %v7492_v12, %v17287_v43  ;;  %v7630_v36 = vmul.f32 %v7622_v62, %v17284_v52  ;;  %v7504_v19 = vadd.f32 %v7496_v23, %v17304_v1  ;;  %v7755_v43 = vrot.slane %v7725_v63, 1 }
 0x3f1   : > { %v7569_v0 = vrot.slane %v7539_v11, 3  ;;  %v7634_v5 = vmul.f32 %v7622_v62, %v17106_v30  ;;  %v7638_v17 = vmul.f32 %v7622_v62, %v7603_v44  ;;  %v7570_v35 = vrot.slane %v7543_v6, 3 }
 0x3f2   : > { %v7578_v25 = vrot.slane %v7547_v32, 3  ;;  %v7660_v22 = vrot.slane %v7630_v36, 6  ;;  %v7729_v26 = vmul.f32 %v17358_v42, %v17127_v40  ;;  %v7816_v20 = vmul.f32 %v17369_v51, %v17294_v10 }
 0x3f3   : > { %v7661_v37 = vrot.slane %v7634_v5, 6  ;;  %v7669_v49 = vrot.slane %v7638_v17, 6  ;;  %v7571_v52 = vsel %vm885_vm8, %v7569_v0, %v7570_v35  ;;  %v7820_v30 = vmul.f32 %v17369_v51, %v17127_v40 }
 0x3f4   : > { %v7579_v1 = vsel %vm885_vm8, %v7570_v35, %v7578_v25  ;;  %v7756_v11 = vrot.slane %v7729_v26, 1  ;;  %v7591_v44 = vadd.f32 %v7571_v52, %v7500_v41  ;;  %v7846_v23 = vrot.slane %v7816_v20, 4  ;;  %v17466_v26 = vld [vmem:[#allocation5 + $0x6] ss:$8 sm:$0xf] }
 0x3f5   : > { %v7595_v32 = vadd.f32 %v7579_v1, %v7504_v19  ;;  %v7662_v13 = vsel %vm498_vm3, %v7660_v22, %v7661_v37  ;;  %v7670_v42 = vsel %vm498_vm3, %v7661_v37, %v7669_v49  ;;  %v7847_v10 = vrot.slane %v7820_v30, 4  ;;  %v17474_v30 = vld [vmem:[#allocation5 + $0x25] ss:$8 sm:$0xf] }
 0x3f6   : > { %v7757_v62 = vsel %vm701_vm6, %v7755_v43, %v7756_v11  ;;  %v7765_v63 = vsel %vm701_vm6, %v7756_v11, %v7764_v27  ;;  %v7682_v6 = vadd.f32 %v7662_v13, %v7591_v44  ;;  %v7907_v25 = vmul.f32 %v17375_v31, %v17296_v29  ;;  %v8338_v11 = vld [vmem:[#allocation4 + $0x58] sm:$0x7] }
 0x3f7   : > { %v7686_v12 = vadd.f32 %v7670_v42, %v7595_v32  ;;  %v7911_v51 = vmul.f32 %v17375_v31, %v17127_v40  ;;  %v7848_v41 = vsel %vm977_vm9, %v7846_v23, %v7847_v10  ;;  %v7856_v22 = vsel %vm977_vm9, %v7847_v10, %v7855_v56  ;;  %v8425_v32 = vld [vmem:[#allocation4 + $0x18] sm:$0xc0]  ;;  %v8429_v13 = vld [vmem:[#allocation4 + $0x58] sm:$0x3f] }
 0x3f8   : > { %v7946_v49 = vrot.slane %v17425_v57, 7  ;;  %v7994_v19 = vrot.slane %v17377_v54, %v18796_v15  ;;  %v7777_v27 = vadd.f32 %v7757_v62, %v7682_v6  ;;  %v7937_v0 = vrot.slane %v7907_v25, 7  ;;  %v17484_v23 = vld [vmem:[#allocation5 + $0x63] ss:$8 sm:$0xf] }
 0x3f9   : > { %v7781_v36 = vadd.f32 %v7765_v63, %v7686_v12  ;;  %v7938_v5 = vrot.slane %v7911_v51, 7  ;;  %v8310_v40 = vrot.slane %v17466_v26, %v18796_v15  ;;  %v8357_v44 = vrot.slane %v17474_v30, %v18796_v15  ;;  %v17480_v63 = vld [vmem:[#allocation5 + $0x44] ss:$8 sm:$0xf] }
 0x3fa   : > { %v8002_v17 = vmul.f32 %v7994_v19, %v17363_v9  ;;  %v8006_v29 = vmul.f32 %v7994_v19, %v17273_v28  ;;  %v8010_v35 = vmul.f32 %v7994_v19, %v7975_v55  ;;  %v7868_v31 = vadd.f32 %v7848_v41, %v7777_v27  ;;  %v8334_v9 = vld [vmem:[#allocation4 + $0x18] sm:$0xf8] }
 0x3fb   : > { %v7872_v56 = vadd.f32 %v7856_v22, %v7781_v36  ;;  %v7939_v57 = vsel %vm3256_vm5, %v7937_v0, %v7938_v5  ;;  %v7947_v54 = vsel %vm3256_vm5, %v7938_v5, %v7946_v49  ;;  %v8318_v52 = vmul.f32 %v8310_v40, %v17316_v47  ;;  %v8516_v27 = vld [vmem:[#allocation4 + $0x38] sm:$0xfe]  ;;  %v8524_v36 = vld [vmem:[#allocation4 + $0x78] sm:$0x1] }
 0x3fc   : > { %v8032_v37 = vrot.slane %v8002_v17, 2  ;;  %v8033_v43 = vrot.slane %v8006_v29, 2  ;;  %v8041_v20 = vrot.slane %v8010_v35, 2  ;;  %v7959_v1 = vadd.f32 %v7939_v57, %v7868_v31 }
 0x3fd   : > { %v7963_v28 = vadd.f32 %v7947_v54, %v7872_v56  ;;  %v8322_v55 = vmul.f32 %v8310_v40, %v17334_v39  ;;  %v8448_v47 = vrot.slane %v17480_v63, %v18796_v15  ;;  %v8543_v10 = vrot.slane %v17484_v23, %v18796_v15 }
 0x3fe   : > { %v8034_v42 = vsel %vm793_vm7, %v8032_v37, %v8033_v43  ;;  %v8042_v62 = vsel %vm793_vm7, %v8033_v43, %v8041_v20  ;;  %v8365_v25 = vmul.f32 %v8357_v44, %v8334_v9  ;;  %v8369_v51 = vmul.f32 %v8357_v44, %v17334_v39 }
 0x3ff   : > { %v8054_v6 = vadd.f32 %v8034_v42, %v7959_v1  ;;  %v8058_v12 = vadd.f32 %v8042_v62, %v7963_v28  ;;  %v8373_v41 = vmul.f32 %v8357_v44, %v8338_v11  ;;  %v8456_v22 = vmul.f32 %v8448_v47, %v8425_v32  ;;  %v8611_v1 = vld [vmem:[#allocation4 + $0x38] sm:$0xf0]  ;;  %v9875_v28 = vld [vmem:[%s17896_s7 + $0x80] sm:$0xff]  ;;  %v8615_v42 = vld [vmem:[#allocation4 + $0x78] sm:$0xf] }
 0x400   : > { %v8460_v49 = vmul.f32 %v8448_v47, %v17334_v39  ;;  %v8464_v19 = vmul.f32 %v8448_v47, %v8429_v13  ;;  %v8395_v17 = vrot.slane %v8365_v25, 3  ;;  %v8396_v29 = vrot.slane %v8369_v51, 3  ;;  %v17501_v47 = vld [vmem:[#allocation5 + $0x82] ss:$8 sm:$0xf] }
 0x401   : > { %v8326_v0 = vadd.f32 %v8318_v52, %v8054_v6  ;;  %v8330_v5 = vadd.f32 %v8322_v55, %v8058_v12  ;;  %v8404_v35 = vrot.slane %v8373_v41, 3  ;;  %v8486_v40 = vrot.slane %v8456_v22, 6  ;;  %v9876_v55 = vld [vmem:[%s17896_s7 + $0x88] sm:$0xff]  ;;  %v8702_v6 = vld [vmem:[#allocation4 + $0x38] sm:$0x80] }
 0x402   : > { %v8487_v31 = vrot.slane %v8460_v49, 6  ;;  %v8495_v56 = vrot.slane %v8464_v19, 6  ;;  %v8397_v57 = vsel %vm885_vm8, %v8395_v17, %v8396_v29  ;;  %v8551_v54 = vmul.f32 %v8543_v10, %v8516_v27  ;;  %v8706_v12 = vld [vmem:[#allocation4 + $0x78] sm:$0x7f] }
 0x403   : > { %v8555_v37 = vmul.f32 %v8543_v10, %v17352_v24  ;;  %v8559_v43 = vmul.f32 %v8543_v10, %v8524_v36  ;;  %v8405_v20 = vsel %vm885_vm8, %v8396_v29, %v8404_v35  ;;  %v8417_v39 = vadd.f32 %v8397_v57, %v8326_v0  ;;  %v17505_v25 = vld [vmem:[#allocation5 + $0xa1] ss:$8 sm:$0xf]  ;;  %v17509_v41 = vld [vmem:[#allocation5 + $0xc0] ss:$8 sm:$0xf] }
 0x404   : > { %v8488_v9 = vsel %vm498_vm3, %v8486_v40, %v8487_v31  ;;  %v8496_v52 = vsel %vm498_vm3, %v8487_v31, %v8495_v56  ;;  %v8421_v11 = vadd.f32 %v8405_v20, %v8330_v5  ;;  %v8581_v44 = vrot.slane %v8551_v54, 1  ;;  %v8793_v36 = vld [vmem:[#allocation4 + $0x58] sm:$0xfc]  ;;  %v8801_v54 = vld [vmem:[#allocation4 + $0x98] sm:$0x3] }
 0x405   : > { %v8582_v32 = vrot.slane %v8555_v37, 1  ;;  %v8590_v13 = vrot.slane %v8559_v43, 1  ;;  %v8508_v62 = vadd.f32 %v8488_v9, %v8417_v39  ;;  %v8634_v10 = vrot.slane %v17501_v47, %v18796_v15 }
 0x406   : > { %v8725_v51 = vrot.slane %v17505_v25, %v18796_v15  ;;  %v8820_v22 = vrot.slane %v17509_v41, %v18796_v15  ;;  %v8512_v49 = vadd.f32 %v8496_v52, %v8421_v11  ;;  %v10613_v0 = vpack.c.bf16 %v9876_v55, %v9875_v28 }
 0x407   : > { %v8583_v19 = vsel %vm701_vm6, %v8581_v44, %v8582_v32  ;;  %v8591_v27 = vsel %vm701_vm6, %v8582_v32, %v8590_v13  ;;  %v8642_v17 = vmul.f32 %v8634_v10, %v8611_v1  ;;  %v8646_v29 = vmul.f32 %v8634_v10, %v17352_v24  ;;  %v9907_v1 = vld [vmem:[%s17896_s7 + $0x180] sm:$0xff] }
 0x408   : > { %v8603_v5 = vadd.f32 %v8583_v19, %v8508_v62  ;;  %v8650_v35 = vmul.f32 %v8634_v10, %v8615_v42  ;;  %v8607_v40 = vadd.f32 %v8591_v27, %v8512_v49  ;;  %v8733_v31 = vmul.f32 %v8725_v51, %v8702_v6  ;;  %10614 = vmatprep.subr.bf16.mxu0 %v10613_v0 }
 0x409   : > { %v8737_v56 = vmul.f32 %v8725_v51, %v17352_v24  ;;  %v8741_v57 = vmul.f32 %v8725_v51, %v8706_v12  ;;  %v8672_v37 = vrot.slane %v8642_v17, 4  ;;  %v8673_v43 = vrot.slane %v8646_v29, 4  ;;  %v9908_v24 = vld [vmem:[%s17896_s7 + $0x188] sm:$0xff] }
 0x40a   : > { %v8681_v20 = vrot.slane %v8650_v35, 4  ;;  %v8828_v39 = vmul.f32 %v8820_v22, %v8793_v36  ;;  %v8763_v9 = vrot.slane %v8733_v31, 7  ;;  %v8832_v28 = vmul.f32 %v8820_v22, %v17392_v7 }
 0x40b   : > { %v8764_v52 = vrot.slane %v8737_v56, 7  ;;  %v8772_v11 = vrot.slane %v8741_v57, 7  ;;  %v8674_v55 = vsel %vm977_vm9, %v8672_v37, %v8673_v43  ;;  %v8836_v32 = vmul.f32 %v8820_v22, %v8801_v54 }
 0x40c   : > { %v8682_v44 = vsel %vm977_vm9, %v8673_v43, %v8681_v20  ;;  %v8858_v13 = vrot.slane %v8828_v39, 2  ;;  %v8694_v42 = vadd.f32 %v8674_v55, %v8603_v5  ;;  %v8859_v6 = vrot.slane %v8832_v28, 2 }
 0x40d   : > { %v8698_v62 = vadd.f32 %v8682_v44, %v8607_v40  ;;  %v8765_v10 = vsel %vm3256_vm5, %v8763_v9, %v8764_v52  ;;  %v8773_v7 = vsel %vm3256_vm5, %v8764_v52, %v8772_v11  ;;  %v8867_v12 = vrot.slane %v8836_v32, 2 }
 0x40e   : > { %v10645_v51 = vpack.c.bf16 %v9908_v24, %v9907_v1  ;;  %v7527_v49 = vrot.slane %v17403_v21, %v18794_v53  ;;  %v8785_v19 = vadd.f32 %v8765_v10, %v8694_v42  ;;  %v7618_v36 = vrot.slane %v17407_v48, %v18794_v53  ;;  %v18975_v10 = vld [vmem:[#allocation79_spill] sm:$0xff] }
 0x40f   : > { %v8789_v27 = vadd.f32 %v8773_v7, %v8698_v62  ;;  %v7724_v22 = vmul.f32 %v17355_v58, %v17320_v60  ;;  %v8860_v0 = vsel %vm793_vm7, %v8858_v13, %v8859_v6  ;;  %v8868_v5 = vsel %vm793_vm7, %v8859_v6, %v8867_v12  ;;  %v18976_v7 = vld [vmem:[#allocation75_spill] sm:$0xff] }
 0x410   : > { %10646 = vmatprep.subr.bf16.mxu1 %v10645_v51  ;;  %v7538_v17 = vmul.f32 %v7527_v49, %v17298_v61  ;;  %v7542_v29 = vmul.f32 %v7527_v49, %v17101_v14  ;;  %v8880_v35 = vadd.f32 %v8860_v0, %v8785_v19  ;;  %v7546_v21 = vmul.f32 %v7527_v49, %v17300_v18  ;;  %v18978_v0 = vld [vmem:[#allocation51_spill] sm:$0xff] }
 0x411   : > { %v8884_v40 = vadd.f32 %v8868_v5, %v8789_v27  ;;  %v7629_v31 = vmul.f32 %v7618_v36, %v17302_v50  ;;  %v7633_v57 = vmul.f32 %v7618_v36, %v17101_v14  ;;  %v7637_v60 = vmul.f32 %v7618_v36, %v17318_v33 }
 0x412   : > { %v7566_v56 = vrot.slane %v7538_v17, 3  ;;  %v7567_v48 = vrot.slane %v7542_v29, 3  ;;  %v7576_v37 = vrot.slane %v7546_v21, 3  ;;  %v7728_v61 = vmul.f32 %v17355_v58, %v17322_v2  ;;  %v18979_v17 = vld [vmem:[#allocation57_spill] sm:$0xff] }
 0x413   : > { %v8888_v54 = vpack.c.bf16 %v8884_v40, %v8880_v35  ;;  %v7657_v43 = vrot.slane %v7629_v31, 6  ;;  %v7658_v39 = vrot.slane %v7633_v57, 6  ;;  %v7667_v9 = vrot.slane %v7637_v60, 6  ;;  %v8337_v35 = vld [vmem:[#allocation4 + $0x50] sm:$0x7] }
 0x414   : > { %v7568_v20 = vsel %vm885_vm8, %v7566_v56, %v7567_v48  ;;  %v7752_v52 = vrot.slane %v7724_v22, 1  ;;  %v7577_v18 = vsel %vm885_vm8, %v7567_v48, %v7576_v37  ;;  %v7753_v14 = vrot.slane %v7728_v61, 1  ;;  %v8333_v22 = vld [vmem:[#allocation4 + $0x10] sm:$0xf8] }
 0x415   : > { %9754 = vmatprep.mubr.bf16.mxu0 %v8888_v54  ;;  %9840 = vmatprep.mubr.bf16.mxu1 %v8888_v54  ;;  %v7590_v50 = vadd.f32 %v7568_v20, %v17306_v45  ;;  %v7815_v33 = vmul.f32 %v17361_v46, %v17342_v4  ;;  %v7594_v11 = vadd.f32 %v7577_v18, %v17324_v8  ;;  %v18974_v44 = vrot.slane %v17412_v3, 1  ;;  %v18982_v56 = vld [vmem:[#allocation74_spill] sm:$0xff] }
 0x416   : > { %v7659_v28 = vsel %vm498_vm3, %v7657_v43, %v7658_v39  ;;  %v7668_v58 = vsel %vm498_vm3, %v7658_v39, %v7667_v9  ;;  %v7819_v1 = vmul.f32 %v17361_v46, %v17322_v2  ;;  %v7754_v55 = vsel %vm701_vm6, %v7752_v52, %v7753_v14  ;;  %v8428_v39 = vld [vmem:[#allocation4 + $0x50] sm:$0x3f] }
 0x417   : > { %v7681_v24 = vadd.f32 %v7659_v28, %v7590_v50  ;;  %v7763_v45 = vsel %vm701_vm6, %v7753_v14, %v18974_v44  ;;  %v7843_v32 = vrot.slane %v7815_v33, 4  ;;  %v7685_v13 = vadd.f32 %v7668_v58, %v7594_v11  ;;  %v8515_v18 = vld [vmem:[#allocation4 + $0x30] sm:$0xfe] }
 0x418   : > { %v7844_v42 = vrot.slane %v7819_v1, 4  ;;  %v7906_v8 = vmul.f32 %v17372_v16, %v17344_v34  ;;  %v7910_v4 = vmul.f32 %v17372_v16, %v17322_v2  ;;  %v8001_v46 = vmul.f32 %v18975_v10, %v17346_v38 }
 0x419   : > { %v7776_v62 = vadd.f32 %v7754_v55, %v7681_v24  ;;  %v8009_v6 = vmul.f32 %v18975_v10, %v18976_v7  ;;  %v8306_v3 = vrot.slane %v17466_v26, %v18794_v53  ;;  %v7780_v12 = vadd.f32 %v7763_v45, %v7685_v13  ;;  %v8523_v45 = vld [vmem:[#allocation4 + $0x70] sm:$0x1]  ;;  %v18985_v7 = vld [vmem:[#allocation60_spill] sm:$0xff] }
 0x41a   : > { %v7845_v51 = vsel %vm977_vm9, %v7843_v32, %v7844_v42  ;;  %v18977_v49 = vrot.slane %v17416_v59, 4  ;;  %v7934_v19 = vrot.slane %v7906_v8, 7  ;;  %v7935_v2 = vrot.slane %v7910_v4, 7  ;;  %v18980_v59 = vld [vmem:[#allocation13_spill] sm:$0xff]  ;;  %v8610_v8 = vld [vmem:[#allocation4 + $0x30] sm:$0xf0] }
 0x41b   : > { %v7867_v27 = vadd.f32 %v7845_v51, %v7776_v62  ;;  %v8029_v16 = vrot.slane %v8001_v46, 2  ;;  %v8039_v36 = vrot.slane %v8009_v6, 2  ;;  %v8317_v5 = vmul.f32 %v8306_v3, %v18978_v0 }
 0x41c   : > { %v7854_v34 = vsel %vm977_vm9, %v7844_v42, %v18977_v49  ;;  %v8321_v29 = vmul.f32 %v8306_v3, %v18979_v17  ;;  %v8353_v26 = vrot.slane %v17474_v30, %v18794_v53  ;;  %v7936_v40 = vsel %vm3256_vm5, %v7934_v19, %v7935_v2  ;;  %v8424_v30 = vld [vmem:[#allocation4 + $0x10] sm:$0xc0] }
 0x41d   : > { %v7871_v38 = vadd.f32 %v7854_v34, %v7780_v12  ;;  %v18981_v21 = vrot.slane %v18980_v59, 7  ;;  %v18983_v48 = vrot.slane %v18982_v56, 2  ;;  %v7958_v37 = vadd.f32 %v7936_v40, %v7867_v27  ;;  %v8614_v12 = vld [vmem:[#allocation4 + $0x70] sm:$0xf] }
 0x41e   : > { %v8364_v61 = vmul.f32 %v8353_v26, %v8333_v22  ;;  %v8368_v20 = vmul.f32 %v8353_v26, %v18979_v17  ;;  %v8372_v9 = vmul.f32 %v8353_v26, %v8337_v35  ;;  %v8444_v52 = vrot.slane %v17480_v63, %v18794_v53  ;;  %v8701_v22 = vld [vmem:[#allocation4 + $0x30] sm:$0x80]  ;;  %v8800_v59 = vld [vmem:[#allocation4 + $0x90] sm:$0x3] }
 0x41f   : > { %v7945_v31 = vsel %vm3256_vm5, %v7935_v2, %v18981_v21  ;;  %v8031_v57 = vsel %vm793_vm7, %v8029_v16, %v18983_v48  ;;  %v18984_v60 = vmov %v18983_v48  ;;  %v8539_v50 = vrot.slane %v17484_v23, %v18794_v53  ;;  %v8792_v35 = vld [vmem:[#allocation4 + $0x50] sm:$0xfc] }
 0x420   : > { %v8040_v54 = vsel %vm793_vm7, %v18984_v60, %v8039_v36  ;;  %v7962_v43 = vadd.f32 %v7945_v31, %v7871_v38  ;;  %v8630_v14 = vrot.slane %v17501_v47, %v18794_v53  ;;  %v8053_v33 = vadd.f32 %v8031_v57, %v7958_v37 }
 0x421   : > { %v8392_v28 = vrot.slane %v8364_v61, 3  ;;  %v8393_v58 = vrot.slane %v8368_v20, 3  ;;  %v8402_v1 = vrot.slane %v8372_v9, 3  ;;  %v8455_v24 = vmul.f32 %v8444_v52, %v8424_v30  ;;  %v18986_v20 = vld [vmem:[#allocation72_spill] sm:$0xff] }
 0x422   : > { %v8057_v11 = vadd.f32 %v8040_v54, %v7962_v43  ;;  %v8459_v55 = vmul.f32 %v8444_v52, %v18979_v17  ;;  %v8463_v44 = vmul.f32 %v8444_v52, %v8428_v39  ;;  %v8325_v32 = vadd.f32 %v8317_v5, %v8053_v33  ;;  %v8705_v17 = vld [vmem:[#allocation4 + $0x70] sm:$0x7f] }
 0x423   : > { %v8394_v63 = vsel %vm885_vm8, %v8392_v28, %v8393_v58  ;;  %v8550_v42 = vmul.f32 %v8539_v50, %v8515_v18  ;;  %v8403_v23 = vsel %vm885_vm8, %v8393_v58, %v8402_v1  ;;  %v8483_v4 = vrot.slane %v8455_v24, 6  ;;  %v9859_v24 = vld [vmem:[%s17896_s7] sm:$0xff] }
 0x424   : > { %v8329_v13 = vadd.f32 %v8321_v29, %v8057_v11  ;;  %v8484_v47 = vrot.slane %v8459_v55, 6  ;;  %v8493_v62 = vrot.slane %v8463_v44, 6  ;;  %v8416_v10 = vadd.f32 %v8394_v63, %v8325_v32  ;;  %v9860_v55 = vld [vmem:[%s17896_s7 + $0x8] sm:$0xff]  ;;  %v9891_v32 = vld [vmem:[%s17896_s7 + $0x100] sm:$0xff]  ;;  %v9877_v63 = vld [vmem:[%s17896_s7 + $0x90] sm:$0xff] }
 0x425   : > { %v8554_v6 = vmul.f32 %v8539_v50, %v18985_v7  ;;  %v8558_v3 = vmul.f32 %v8539_v50, %v8523_v45  ;;  %v8578_v34 = vrot.slane %v8550_v42, 1  ;;  %v8641_v19 = vmul.f32 %v8630_v14, %v8610_v8 }
 0x426   : > { %v8420_v46 = vadd.f32 %v8403_v23, %v8329_v13  ;;  %v8485_v51 = vsel %vm498_vm3, %v8483_v4, %v8484_v47  ;;  %v8494_v49 = vsel %vm498_vm3, %v8484_v47, %v8493_v62  ;;  %v8645_v38 = vmul.f32 %v8630_v14, %v18985_v7  ;;  %v9892_v13 = vld [vmem:[%s17896_s7 + $0x108] sm:$0xff]  ;;  %v9878_v23 = vld [vmem:[%s17896_s7 + $0x98] sm:$0xff]  ;;  %v9909_v4 = vld [vmem:[%s17896_s7 + $0x190] sm:$0xff] }
 0x427   : > { %v8507_v27 = vadd.f32 %v8485_v51, %v8416_v10  ;;  %v8579_v16 = vrot.slane %v8554_v6, 1  ;;  %v8588_v36 = vrot.slane %v8558_v3, 1  ;;  %v8649_v0 = vmul.f32 %v8630_v14, %v8614_v12  ;;  %v9910_v47 = vld [vmem:[%s17896_s7 + $0x198] sm:$0xff] }
 0x428   : > { %v8511_v2 = vadd.f32 %v8494_v49, %v8420_v46  ;;  %v8669_v5 = vrot.slane %v8641_v19, 4  ;;  %v8721_v29 = vrot.slane %v17505_v25, %v18794_v53  ;;  %v8816_v21 = vrot.slane %v17509_v41, %v18794_v53  ;;  %v9862_v6 = vld [vmem:[%s17896_s7 + $0x18] sm:$0xff]  ;;  %v9893_v49 = vld [vmem:[%s17896_s7 + $0x110] sm:$0xff]  ;;  %v9879_v19 = vld [vmem:[%s17896_s7 + $0xa0] sm:$0xff] }
 0x429   : > { %v8580_v26 = vsel %vm701_vm6, %v8578_v34, %v8579_v16  ;;  %v8589_v40 = vsel %vm701_vm6, %v8579_v16, %v8588_v36  ;;  %v8670_v48 = vrot.slane %v8645_v38, 4  ;;  %v8679_v57 = vrot.slane %v8649_v0, 4  ;;  %v9894_v34 = vld [vmem:[%s17896_s7 + $0x118] sm:$0xff]  ;;  %v9912_v16 = vld [vmem:[%s17896_s7 + $0x1a8] sm:$0xff] }
 0x42a   : > { %v8602_v31 = vadd.f32 %v8580_v26, %v8507_v27  ;;  %v8606_v56 = vadd.f32 %v8589_v40, %v8511_v2  ;;  %v8732_v60 = vmul.f32 %v8721_v29, %v8701_v22  ;;  %v8736_v54 = vmul.f32 %v8721_v29, %v18985_v7  ;;  %v9861_v7 = vld [vmem:[%s17896_s7 + $0x10] sm:$0xff]  ;;  %v9880_v27 = vld [vmem:[%s17896_s7 + $0xa8] sm:$0xff]  ;;  %v9911_v2 = vld [vmem:[%s17896_s7 + $0x1a0] sm:$0xff] }
 0x42b   : > { %v8740_v37 = vmul.f32 %v8721_v29, %v8705_v17  ;;  %v8827_v43 = vmul.f32 %v8816_v21, %v8792_v35  ;;  %v8671_v25 = vsel %vm977_vm9, %v8669_v5, %v8670_v48  ;;  %v8680_v61 = vsel %vm977_vm9, %v8670_v48, %v8679_v57  ;;  %v17663_v36 = vld [vmem:[%s11203_s11 + $0x8] sm:$0xff]  ;;  %v17666_v22 = vld [vmem:[%s11203_s11 + $0x18] sm:$0xff]  ;;  %v9863_v5 = vld [vmem:[%s17896_s7 + $0x20] sm:$0xff] }
 0x42c   : > { %v8831_v30 = vmul.f32 %v8816_v21, %v18986_v20  ;;  %v8835_v39 = vmul.f32 %v8816_v21, %v8800_v59  ;;  %v8693_v9 = vadd.f32 %v8671_v25, %v8602_v31  ;;  %v8697_v52 = vadd.f32 %v8680_v61, %v8606_v56  ;;  %v9864_v17 = vld [vmem:[%s17896_s7 + $0x28] sm:$0xff]  ;;  %v9895_v26 = vld [vmem:[%s17896_s7 + $0x120] sm:$0xff]  ;;  %v9881_v59 = vld [vmem:[%s17896_s7 + $0xb0] sm:$0xff] }
 0x42d   : > { %v8760_v18 = vrot.slane %v8732_v60, 7  ;;  %v8761_v41 = vrot.slane %v8736_v54, 7  ;;  %v8770_v50 = vrot.slane %v8740_v37, 7  ;;  %v8855_v14 = vrot.slane %v8827_v43, 2  ;;  %v9896_v40 = vld [vmem:[%s17896_s7 + $0x128] sm:$0xff]  ;;  %v9882_v21 = vld [vmem:[%s17896_s7 + $0xb8] sm:$0xff] }
 0x42e   : > { %v8865_v33 = vrot.slane %v8835_v39, 2  ;;  %v8856_v28 = vrot.slane %v8831_v30, 2  ;;  %v10615_v10 = vpack.c.bf16 %v9860_v55, %v9859_v24  ;;  %v10647_v46 = vpack.c.bf16 %v9892_v13, %v9891_v32  ;;  %v9913_v31 = vld [vmem:[%s17896_s7 + $0x1b0] sm:$0xff]  ;;  %v9914_v56 = vld [vmem:[%s17896_s7 + $0x1b8] sm:$0xff]  ;;  %v9883_v20 = vld [vmem:[%s17896_s7 + $0xc0] sm:$0xff] }
 0x42f   : > { %v8762_v11 = vsel %vm3256_vm5, %v8760_v18, %v8761_v41  ;;  %v8771_v58 = vsel %vm3256_vm5, %v8761_v41, %v8770_v50  ;;  %v10617_v12 = vpack.c.bf16 %v9878_v23, %v9877_v63  ;;  %v10649_v51 = vpack.c.bf16 %v9910_v47, %v9909_v4  ;;  %v9865_v60 = vld [vmem:[%s17896_s7 + $0x30] sm:$0xff]  ;;  %v9866_v54 = vld [vmem:[%s17896_s7 + $0x38] sm:$0xff]  ;;  %v9884_v30 = vld [vmem:[%s17896_s7 + $0xc8] sm:$0xff] }
 0x430   : > { %v8784_v1 = vadd.f32 %v8762_v11, %v8693_v9  ;;  %v8788_v44 = vadd.f32 %v8771_v58, %v8697_v52  ;;  %v8857_v45 = vsel %vm793_vm7, %v8855_v14, %v8856_v28  ;;  %v8866_v42 = vsel %vm793_vm7, %v8856_v28, %v8865_v33  ;;  %v9897_v25 = vld [vmem:[%s17896_s7 + $0x130] sm:$0xff]  ;;  %v9898_v61 = vld [vmem:[%s17896_s7 + $0x138] sm:$0xff]  ;;  %v9915_v39 = vld [vmem:[%s17896_s7 + $0x1c0] sm:$0xff] }
 0x431   : > { %v10619_v38 = vpack.c.bf16 %v9862_v6, %v9861_v7  ;;  %v10651_v0 = vpack.c.bf16 %v9894_v34, %v9893_v49  ;;  %v10621_v29 = vpack.c.bf16 %v9880_v27, %v9879_v19  ;;  %v10653_v35 = vpack.c.bf16 %v9912_v16, %v9911_v2  ;;  %v9916_v9 = vld [vmem:[%s17896_s7 + $0x1c8] sm:$0xff]  ;;  %v9867_v41 = vld [vmem:[%s17896_s7 + $0x40] sm:$0xff]  ;;  %v9885_v58 = vld [vmem:[%s17896_s7 + $0xd0] sm:$0xff] }
 0x432   : > { %v8879_v8 = vadd.f32 %v8857_v45, %v8784_v1  ;;  %v8883_v62 = vadd.f32 %v8866_v42, %v8788_v44  ;;  %v10623_v48 = vpack.c.bf16 %v9864_v17, %v9863_v5  ;;  %v10655_v57 = vpack.c.bf16 %v9896_v40, %v9895_v26  ;;  %v9868_v50 = vld [vmem:[%s17896_s7 + $0x48] sm:$0xff]  ;;  %v9899_v11 = vld [vmem:[%s17896_s7 + $0x140] sm:$0xff]  ;;  %v9886_v1 = vld [vmem:[%s17896_s7 + $0xd8] sm:$0xff] }
 0x433   : > { %v10625_v37 = vpack.c.bf16 %v9882_v21, %v9881_v59  ;;  %v10657_v43 = vpack.c.bf16 %v9914_v56, %v9913_v31  ;;  %v10627_v52 = vpack.c.bf16 %v9866_v54, %v9865_v60  ;;  %v10659_v18 = vpack.c.bf16 %v9898_v61, %v9897_v25  ;;  %v9900_v28 = vld [vmem:[%s17896_s7 + $0x148] sm:$0xff]  ;;  %v9917_v24 = vld [vmem:[%s17896_s7 + $0x1d0] sm:$0xff]  ;;  %v9918_v55 = vld [vmem:[%s17896_s7 + $0x1d8] sm:$0xff] }
 0x434   : > { %v8887_v3 = vpack.c.bf16 %v8883_v62, %v8879_v8  ;;  %v10629_v14 = vpack.c.bf16 %v9884_v30, %v9883_v20  ;;  %v10661_v33 = vpack.c.bf16 %v9916_v9, %v9915_v39  ;;  %v10631_v44 = vpack.c.bf16 %v9868_v50, %v9867_v41  ;;  %v9869_v32 = vld [vmem:[%s17896_s7 + $0x50] sm:$0xff]  ;;  %v9870_v13 = vld [vmem:[%s17896_s7 + $0x58] sm:$0xff]  ;;  %v9887_v4 = vld [vmem:[%s17896_s7 + $0xe0] sm:$0xff] }
 0x435   : > { %v10663_v45 = vpack.c.bf16 %v9900_v28, %v9899_v11  ;;  %v10633_v63 = vpack.c.bf16 %v9886_v1, %v9885_v58  ;;  %v10665_v42 = vpack.c.bf16 %v9918_v55, %v9917_v24  ;;  %v9901_v8 = vld [vmem:[%s17896_s7 + $0x150] sm:$0xff]  ;;  %v9902_v23 = vld [vmem:[%s17896_s7 + $0x158] sm:$0xff]  ;;  %v9888_v47 = vld [vmem:[%s17896_s7 + $0xe8] sm:$0xff] }
 0x436   : > { %9755 = vmatmul.mubr.bf16.vlgmr.msra.gmra.mrb[0].mxu0 %v8887_v3  ;;  %9841 = vmatmul.mubr.bf16.vlgmr.msra.gmra.mrb[0].mxu1 %v8887_v3  ;;  %v9919_v62 = vld [vmem:[%s17896_s7 + $0x1e0] sm:$0xff]  ;;  %v10667_v7 = vpack.c.bf16 %v9902_v23, %v9901_v8  ;;  %v9872_v3 = vld [vmem:[%s17896_s7 + $0x68] sm:$0xff]  ;;  %v9889_v19 = vld [vmem:[%s17896_s7 + $0xf0] sm:$0xff] }
 0x437   : > { %10616 = vmatpush3.bf16.msra.mxu0 %v10615_v10  ;;  %10648 = vmatpush3.bf16.msra.mxu1 %v10647_v46  ;;  %v9920_v10 = vld [vmem:[%s17896_s7 + $0x1e8] sm:$0xff]  ;;  %v10635_v46 = vpack.c.bf16 %v9870_v13, %v9869_v32  ;;  %v9871_v6 = vld [vmem:[%s17896_s7 + $0x60] sm:$0xff]  ;;  %v9890_v27 = vld [vmem:[%s17896_s7 + $0xf8] sm:$0xff] }
 0x438   : > { %10618 = vmatprep.subr.bf16.mxu0 %v10617_v12  ;;  %10650 = vmatprep.subr.bf16.mxu1 %v10649_v51  ;;  %v10637_v12 = vpack.c.bf16 %v9888_v47, %v9887_v4  ;;  %v10669_v51 = vpack.c.bf16 %v9920_v10, %v9919_v62  ;;  %v9903_v49 = vld [vmem:[%s17896_s7 + $0x160] sm:$0xff]  ;;  %v9904_v34 = vld [vmem:[%s17896_s7 + $0x168] sm:$0xff]  ;;  %v9921_v2 = vld [vmem:[%s17896_s7 + $0x1f0] sm:$0xff]  ;;  %v10641_v17 = vpack.c.bf16 %v9890_v27, %v9889_v19 }
 0x439   : > { %9987 = vmatprep.mubr.f32.mxu0 %v17663_v36  ;;  %10062 = vmatprep.mubr.f32.mxu1 %v17666_v22  ;;  %v9922_v16 = vld [vmem:[%s17896_s7 + $0x1f8] sm:$0xff]  ;;  %v9873_v5 = vld [vmem:[%s17896_s7 + $0x70] sm:$0xff]  ;;  %v17803_v31 = vld [vmem:[%s11203_s11] sm:$0xff] }
 0x43a   : > { %v9905_v26 = vld [vmem:[%s17896_s7 + $0x170] sm:$0xff]  ;;  %v9906_v40 = vld [vmem:[%s17896_s7 + $0x178] sm:$0xff]  ;;  %v17819_v60 = vld [vmem:[%s11203_s11 + $0x20] sm:$0xff] }
 0x43b   : > { %10620 = vmatpush3.bf16.msra.mxu0 %v10619_v38  ;;  %10652 = vmatpush3.bf16.msra.mxu1 %v10651_v0  ;;  %v10639_v38 = vpack.c.bf16 %v9872_v3, %v9871_v6  ;;  %v10671_v0 = vpack.c.bf16 %v9904_v34, %v9903_v49  ;;  %v10675_v21 = vpack.c.bf16 %v9906_v40, %v9905_v26  ;;  %v17806_v56 = vld [vmem:[%s11203_s11 + $0x10] sm:$0xff]  ;;  %v10087_v25 = vld [vmem:[%s17897_s8 + $0x18] sm:$0xff]  ;;  %v10084_v61 = vld [vmem:[%s17897_s8] sm:$0xff] }
 0x43c   : > { %10622 = vmatprep.subr.bf16.mxu0 %v10621_v29  ;;  %10654 = vmatprep.subr.bf16.mxu1 %v10653_v35  ;;  %v10673_v29 = vpack.c.bf16 %v9922_v16, %v9921_v2  ;;  %v9874_v35 = vld [vmem:[%s17896_s7 + $0x78] sm:$0xff]  ;;  %v17822_v54 = vld [vmem:[%s11203_s11 + $0x30] sm:$0xff] }
 0x43d   : > { %v10643_v59 = vpack.c.bf16 %v9874_v35, %v9873_v5  ;;  %v10086_v20 = vld [vmem:[%s17897_s8 + $0x10] sm:$0xff] }
 0x43f   : > { %10624 = vmatpush3.bf16.msra.mxu0 %v10623_v48  ;;  %10656 = vmatpush3.bf16.msra.mxu1 %v10655_v57  ;;  %v17809_v48 = vld [vmem:[%s11203_s11 + $0x28] sm:$0xff]  ;;  %v17812_v57 = vld [vmem:[%s11203_s11 + $0x38] sm:$0xff] }
 0x440   : > { %10626 = vmatprep.subr.bf16.mxu0 %v10625_v37  ;;  %10658 = vmatprep.subr.bf16.mxu1 %v10657_v43  ;;  %v11011_v37 = vld [vmem:[#allocation3 + $0x50] sm:$0xff]  ;;  %v10085_v43 = vld [vmem:[%s17897_s8 + $0x8] sm:$0xff] }
 0x443   : > { %10628 = vmatpush3.bf16.msra.mxu0 %v10627_v52  ;;  %10660 = vmatpush3.bf16.msra.mxu1 %v10659_v18 }
 0x444   : > { %10630 = vmatprep.subr.bf16.mxu0 %v10629_v14  ;;  %10662 = vmatprep.subr.bf16.mxu1 %v10661_v33 }
 0x447   : > { %10632 = vmatpush3.bf16.msra.mxu0 %v10631_v44  ;;  %10664 = vmatpush3.bf16.msra.mxu1 %v10663_v45 }
 0x448   : > { %10634 = vmatprep.subr.bf16.mxu0 %v10633_v63  ;;  %10666 = vmatprep.subr.bf16.mxu1 %v10665_v42 }
 0x44b   : > { %10636 = vmatpush3.bf16.msra.mxu0 %v10635_v46  ;;  %10668 = vmatpush3.bf16.msra.mxu1 %v10667_v7 }
 0x44c   : > { %10638 = vmatprep.subr.bf16.mxu0 %v10637_v12  ;;  %10670 = vmatprep.subr.bf16.mxu1 %v10669_v51 }
 0x44f   : > { %10640 = vmatpush3.bf16.msra.mxu0 %v10639_v38  ;;  %10672 = vmatpush3.bf16.msra.mxu1 %v10671_v0 }
 0x450   : > { %10642 = vmatprep.subr.bf16.mxu0 %v10641_v17  ;;  %10674 = vmatprep.subr.bf16.mxu1 %v10673_v29 }
 0x453   : > { %10644 = vmatpush3.bf16.msra.mxu0 %v10643_v59  ;;  %10676 = vmatpush3.bf16.msra.mxu1 %v10675_v21  ;;  %v9017_v21 = vld [vmem:[%s17895_s6] sm:$0xf] }
 0x454   : > { %10091 = vmatprep.subr.mxu0 %v10085_v43  ;;  %10162 = vmatprep.subr.mxu1 %v10087_v25  ;;  %v9030_v25 = vrot.slane %v9017_v21, %v18794_v53 }
 0x456   : > { %9988 = vmatmul.mubr.f32.vlgmr.msra.gmra.mrb[4].mxu0 %v17803_v31  ;;  %10063 = vmatmul.mubr.f32.vlgmr.msra.gmra.mrb[4].mxu1 %v17806_v56 }
 0x457   : > { %9992 = vmatprep.mubr.f32.mxu0 %v17809_v48  ;;  %10067 = vmatprep.mubr.f32.mxu1 %v17812_v57 }
 0x458   : > { %10092 = vmatpush1.msra.mxu0 %v10084_v61  ;;  %10163 = vmatpush1.msra.mxu1 %v10086_v20  ;;  %v18988_v61 = vld [vmem:[#allocation8_spill] sm:$0xff] }
 0x459   : > { %v9026_v20 = vrot.slane %v9017_v21, %v18988_v61 }
 0x45a   : > { %9993 = vmatmul.mubr.f32.gmra.mrb[6].mxu0 %v17819_v60  ;;  %10068 = vmatmul.mubr.f32.gmra.mrb[6].mxu1 %v17822_v54 }
 0x45b   : > { %10155 = vmatprep.mubr.f32.mxu0 %v11011_v37  ;;  %10226 = vmatprep.mubr.f32.mxu1 %v11011_v37  ;;  %v18987_v37 = vld [vmem:[#allocation10_spill] sm:$0xff] }
 0x45c   : > { %v9022_v43 = vrot.slane %v9017_v21, %v18987_v37 }
 0x509   : > { %v17838_v30 = vpop.f32.mrb[0].mxu0  ;;  %v17840_v39 = vpop.f32.mrb[0].mxu1 }
 0x50a   : > { %v17842_v9 = vpop.f32.mrb[1].mxu0  ;;  %v17844_v52 = vpop.f32.mrb[1].mxu1 }
 0x50b   : > { %v17846_v18 = vpop.f32.mrb[2].mxu0  ;;  %v17848_v41 = vpop.f32.mrb[2].mxu1 }
 0x50c   : > { %v17850_v50 = vpop.f32.mrb[3].mxu0  ;;  %v17852_v14 = vpop.f32.mrb[3].mxu1 }
 0x529   : > { %v10569_v33 = vpop.f32.mrb[4].mxu0  ;;  %v10607_v11 = vpop.f32.mrb[4].mxu1 }
 0x52a   : > { %v10570_v28 = vpop.f32.mrb[5].mxu0  ;;  %v10608_v58 = vpop.f32.mrb[5].mxu1 }
 0x52b   : > { %v10571_v1 = vadd.f32 %v10570_v28, %v10569_v33  ;;  %v10609_v24 = vadd.f32 %v10608_v58, %v10607_v11  ;;  %v9034_v33 = vrot.slane %v9017_v21, %v18796_v15  ;;  %v10677_v58 = vadd.f32 %v17838_v30, %v9022_v43 }
 0x52d   : > { %v10065_v55 = vadd.f32 %v10609_v24, %v10571_v1  ;;  %v10572_v44 = vpop.f32.mrb[6].mxu0  ;;  %v10610_v45 = vpop.f32.mrb[6].mxu1  ;;  %v10681_v1 = vadd.f32 %v17840_v39, %v9030_v25  ;;  %v10679_v24 = vadd.f32 %v17846_v18, %v9022_v43  ;;  %v10682_v53 = vadd.f32 %v17844_v52, %v9034_v33 }
 0x52e   : > { %v10573_v32 = vpop.f32.mrb[7].mxu0  ;;  %v10611_v13 = vpop.f32.mrb[7].mxu1  ;;  %v10684_v18 = vadd.f32 %v17852_v14, %v9034_v33 }
 0x52f   : > { %v10574_v63 = vadd.f32 %v10573_v32, %v10572_v44  ;;  %v10612_v42 = vadd.f32 %v10611_v13, %v10610_v45  ;;  %v10074_v23 = vsel %vm10073_vm11, %v10065_v55, 0.0  ;;  %v10678_v45 = vadd.f32 %v17842_v9, %v9026_v20 }
 0x530   : > { %v10683_v32 = vadd.f32 %v17848_v41, %v9030_v25 }
 0x531   : > { %v10070_v8 = vadd.f32 %v10612_v42, %v10574_v63  ;;  %v10680_v63 = vadd.f32 %v17850_v50, %v9026_v20 }
 0x533   : > { %v10075_v4 = vsel %vm10073_vm11, %v10070_v8, 0.0 }
 0x534   : > { %v10076_v47 = vadd.f32 %v10075_v4, %v10074_v23 }
 0x536   : > { %v10077_v62 = vrot.slane %v10076_v47, 4 }
 0x538   : > { %v10078_v10 = vadd.f32 %v10077_v62, %v10076_v47 }
 0x53a   : > { %v10079_v46 = vrot.slane %v10078_v10, 2 }
 0x53c   : > { %v10080_v7 = vadd.f32 %v10079_v46, %v10078_v10 }
 0x53e   : > { %v10081_v6 = vrot.slane %v10080_v7, 1 }
 0x540   : > { %v10082_v3 = vadd.f32 %v10081_v6, %v10080_v7 }
 0x542   : > { %v10083_v12 = vmax.f32 %v10082_v3, 0.0 }
 0x544   : > { %10527 = vmatmul.mubr.msk.f32.vlgmr.msra.gmra.mrb[8].mxu0 %vm10073_vm11, %v10083_v12  ;;  %10528 = vmatmul.mubr.msk.f32.vlgmr.msra.gmra.mrb[8].mxu1 %vm10073_vm11, %v10083_v12 }
 0x617   : > { %v10157_v51 = vpop.f32.mrb[8].mxu0  ;;  %v10228_v49 = vpop.f32.mrb[8].mxu1 }
 0x618   : > { %v10529_v34 = vmul.f32 -1.442695, %v10157_v51  ;;  %v10531_v19 = vmul.f32 -1.442695, %v10228_v49  ;;  %v10159_v27 = vpop.f32.mrb[9].mxu0  ;;  %v10230_v2 = vpop.f32.mrb[9].mxu1 }
 0x619   : > { %v10530_v16 = vmul.f32 -1.442695, %v10159_v27  ;;  %v10532_v38 = vmul.f32 -1.442695, %v10230_v2 }
 0x61a   : > { %10910 = vpow2.f32 %v10529_v34 }
 0x61b   : > { %10912 = vpow2.f32 %v10531_v19 }
 0x61c   : > { %10914 = vpow2.f32 %v10530_v16 }
 0x61d   : > { %10916 = vpow2.f32 %v10532_v38 }
 0x624   : > { %v10911_v0 = vpop.eup %10910 }
 0x625   : > { %v10913_v5 = vpop.eup %10912  ;;  %v10245_v17 = vadd.f32 1.0, %v10911_v0 }
 0x626   : > { %v10915_v29 = vpop.eup %10914  ;;  %v10247_v35 = vadd.f32 1.0, %v10913_v5 }
 0x627   : > { %v10917_v26 = vpop.eup %10916  ;;  %10918 = vrcp.f32 %v10245_v17  ;;  %v10246_v40 = vadd.f32 1.0, %v10915_v29 }
 0x628   : > { %10920 = vrcp.f32 %v10247_v35  ;;  %v10248_v59 = vadd.f32 1.0, %v10917_v26 }
 0x629   : > { %10922 = vrcp.f32 %v10246_v40 }
 0x62a   : > { %10924 = vrcp.f32 %v10248_v59 }
 0x631   : > { %v10919_v11 = vpop.eup %10918 }
 0x632   : > { %v10921_v28 = vpop.eup %10920  ;;  %v10260_v55 = vrot.slane %v10919_v11, %v18987_v37 }
 0x633   : > { %v10923_v44 = vpop.eup %10922  ;;  %v10268_v15 = vrot.slane %v10921_v28, %v18987_v37 }
 0x634   : > { %v10925_v13 = vpop.eup %10924  ;;  %v10273_v42 = vmul.f32 %v10677_v58, %v10260_v55  ;;  %v10277_v30 = vmul.f32 %v10679_v24, %v10260_v55  ;;  %v10264_v39 = vrot.slane %v10923_v44, %v18987_v37 }
 0x635   : > { %v10275_v9 = vmul.f32 %v10681_v1, %v10268_v15  ;;  %v10279_v52 = vmul.f32 %v10683_v32, %v10268_v15  ;;  %v10272_v41 = vrot.slane %v10925_v13, %v18987_v37 }
 0x636   : > { %v10281_v8 = vmul.f32 %v10273_v42, %v17803_v31  ;;  %v10285_v23 = vmul.f32 %v10277_v30, %v17819_v60  ;;  %v10274_v50 = vmul.f32 %v10678_v45, %v10264_v39  ;;  %v10278_v4 = vmul.f32 %v10680_v63, %v10264_v39 }
 0x637   : > { %v10283_v47 = vmul.f32 %v10275_v9, %v17806_v56  ;;  %v10287_v62 = vmul.f32 %v10279_v52, %v17822_v54  ;;  %v10276_v14 = vmul.f32 %v10682_v53, %v10272_v41  ;;  %v10280_v10 = vmul.f32 %v10684_v18, %v10272_v41 }
 0x638   : > { %10289 = vst [vmem:[%s347_s21] sm:$0xff] %v10281_v8  ;;  %10293 = vst [vmem:[%s347_s21 + $0x20] sm:$0xff] %v10285_v23  ;;  %v10282_v46 = vmul.f32 %v10274_v50, %v17663_v36  ;;  %v10286_v7 = vmul.f32 %v10278_v4, %v17809_v48 }
 0x639   : > { %10291 = vst [vmem:[%s347_s21 + $0x10] sm:$0xff] %v10283_v47  ;;  %10295 = vst [vmem:[%s347_s21 + $0x30] sm:$0xff] %v10287_v62  ;;  %v10284_v31 = vmul.f32 %v10276_v14, %v17666_v22  ;;  %v10288_v60 = vmul.f32 %v10280_v10, %v17812_v57 }
 0x63a   : > { %10290 = vst [vmem:[%s347_s21 + $0x8] sm:$0xff] %v10282_v46  ;;  %10294 = vst [vmem:[%s347_s21 + $0x28] sm:$0xff] %v10286_v7 }
 0x63b   : > { %10292 = vst [vmem:[%s347_s21 + $0x18] sm:$0xff] %v10284_v31  ;;  %10296 = vst [vmem:[%s347_s21 + $0x38] sm:$0xff] %v10288_v60 }
 0x63c PF: > { %s20_s30 = sadd.s32 1, %s11050_s30  }
 0x63d   : > { %p17_p3 = scmp.ge.s32.totalorder %s20_s30, 4  }
 0x63f   :  { %19 = sbr.rel (!%p17_p3) target bundleno = 1 (0x1), region = 163 }
 0x646   :  { %10318 = vsyncpa [#allocation6], 1 }
 0x647   :  { %10320 = vsyncpa [#allocation6 + $0x1], 1 }

</bundles_post_ra>
